<compile_context>
chip_gen: v5e
topology: v5e:2x2
jax: 0.10.0
libtpu: 0.0.40
codegen_flags: <defaults>
</compile_context>

<pallas_src>
import math

import jax
import jax.numpy as jnp
from jax.experimental import pallas as pl
from jax.experimental.pallas import tpu as pltpu


_TM_MAX = 1024                        # per-layer M-tile cap
_VMEM_BUDGET = 28 * 1024 * 1024       # conservative kernel working-set target
_VMEM_LIMIT = 48 * 1024 * 1024        # scoped VMEM limit (safe on v5e/v6e/v7x)


def _round_up(x, m):
    return ((x + m - 1) // m) * m


# ----------------------------------------------------------------------------
# Pallas kernel: full-K conv-GEMM (bf16 -> f32 acc) + bias + GDN epilogue
# ----------------------------------------------------------------------------
def _conv_gdn_kernel(p_ref, w_ref, b_ref, gt_ref, beta_ref, o_ref):
    # conv GEMM: bf16 x bf16 -> f32 on the MXU, full K resident in VMEM.
    y = jnp.dot(p_ref[...], w_ref[...], preferred_element_type=jnp.float32)
    y = y + b_ref[...]
    # GDN:  norm = beta + (y^2) @ gamma^T   (bf16 operands, f32 accumulation)
    norm = jnp.dot((y * y).astype(jnp.bfloat16), gt_ref[...],
                   preferred_element_type=jnp.float32)
    norm = norm + beta_ref[...]
    o_ref[...] = y * jax.lax.rsqrt(norm)


def conv_gdn_pallas(patches, w_flat, bias, gamma, beta):
    """patches: (M, K) bf16, w_flat: (K, Cout) f32, bias/beta: (Cout,), gamma: (Cout, Cout)."""
    M, K = patches.shape
    Cout = w_flat.shape[1]

    Kp = _round_up(K, 128)
    Coutp = _round_up(Cout, 128)

    # ---- choose TM from a VMEM budget; prefer >= 2 M tiles for megacore ----
    # Weights / gamma^T have a constant block index so they are DMA'd once;
    # we still budget two buffers for them (no pl.Buffered(1) for robustness).
    fixed = (2 * Kp * Coutp * 2          # weights (bf16)
             + 2 * Coutp * Coutp * 2     # gamma^T (bf16)
             + 4 * 2 * Coutp * 4)        # bias + beta (f32)
    per_row = (2 * Kp * 2                # patch tile (bf16, double-buffered)
               + 2 * Coutp * 4           # output tile (f32, double-buffered)
               + 4 * Coutp * 4)          # in-kernel f32 intermediates (slack)
    tm_budget = (_VMEM_BUDGET - fixed) // per_row
    tm_budget = max(8, min(_TM_MAX, (tm_budget // 8) * 8))

    m8 = _round_up(M, 8)
    nm = -(-m8 // tm_budget)
    if m8 >= 16:
        nm = max(nm, 2)                  # let both TensorCores get work (v7x)
    TM = _round_up(-(-m8 // nm), 8)      # minimal tail padding for this nm
    nm = -(-m8 // TM)
    Mp = nm * TM

    # ---- pad / cast operands once.  Zero rows/cols are exact no-ops in the
    # GEMMs; padded GDN lanes get gamma = 0 and beta = 1 so rsqrt stays finite
    # (their outputs are 0 and sliced off below). ----
    p = jnp.pad(patches, ((0, Mp - M), (0, Kp - K)))
    w = jnp.pad(w_flat.astype(jnp.bfloat16), ((0, Kp - K), (0, Coutp - Cout)))
    b = jnp.pad(bias.astype(jnp.float32), (0, Coutp - Cout)).reshape(1, Coutp)
    gt = jnp.pad(gamma.T.astype(jnp.bfloat16),
                 ((0, Coutp - Cout), (0, Coutp - Cout)))
    be = jnp.pad(beta.astype(jnp.float32), (0, Coutp - Cout),
                 constant_values=1.0).reshape(1, Coutp)

    flops = 2 * Mp * Kp * Coutp + 2 * Mp * Coutp * Coutp
    bytes_accessed = (Mp * Kp * 2            # patches (bf16)
                      + Kp * Coutp * 2       # weights, DMA'd once (bf16)
                      + Mp * Coutp * 4       # output (f32)
                      + Coutp * Coutp * 2 + 2 * Coutp * 4)

    out = pl.pallas_call(
        _conv_gdn_kernel,
        out_shape=jax.ShapeDtypeStruct((Mp, Coutp), jnp.float32),
        grid_spec=pltpu.PrefetchScalarGridSpec(
            num_scalar_prefetch=0,
            grid=(nm,),
            in_specs=[
                pl.BlockSpec((TM, Kp), lambda i: (i, 0)),        # patches
                pl.BlockSpec((Kp, Coutp), lambda i: (0, 0)),     # weights (const idx)
                pl.BlockSpec((1, Coutp), lambda i: (0, 0)),      # bias
                pl.BlockSpec((Coutp, Coutp), lambda i: (0, 0)),  # gamma^T
                pl.BlockSpec((1, Coutp), lambda i: (0, 0)),      # beta
            ],
            out_specs=pl.BlockSpec((TM, Coutp), lambda i: (i, 0)),
        ),
        compiler_params=pltpu.CompilerParams(
            dimension_semantics=("parallel",),
            vmem_limit_bytes=_VMEM_LIMIT,
        ),
        cost_estimate=pl.CostEstimate(
            flops=int(flops),
            transcendentals=int(Mp * Coutp),
            bytes_accessed=int(bytes_accessed),
        ),
    )(p, w, b, gt, be)
    return out[:M, :Cout]


# ----------------------------------------------------------------------------
# JAX-side glue: bf16 im2col patch extraction + layer wrapper
# ----------------------------------------------------------------------------
def im2col_nhwc(x, k, stride, pad):
    N, H, W, C = x.shape
    Ho = (H + 2 * pad - k) // stride + 1
    Wo = (W + 2 * pad - k) // stride + 1
    xp = jnp.pad(x, ((0, 0), (pad, pad), (pad, pad), (0, 0)))
    cols = []
    for di in range(k):
        for dj in range(k):
            sl = jax.lax.slice(
                xp,
                (0, di, dj, 0),
                (N, di + stride * (Ho - 1) + 1, dj + stride * (Wo - 1) + 1, C),
                (1, stride, stride, 1),
            )
            cols.append(sl)                       # (N, Ho, Wo, C)
    patches = jnp.stack(cols, axis=3)             # (N, Ho, Wo, k*k, C)
    return patches.reshape(N * Ho * Wo, k * k * C), (N, Ho, Wo)


def conv_gdn_layer(x_nhwc, layer, k, stride, pad):
    w, b, gamma, beta = layer
    Cout = w.shape[0]
    # Cast to bf16 before im2col: halves the materialized-patch HBM traffic
    # and matches the MXU operand precision inside the kernel.
    patches, (N, Ho, Wo) = im2col_nhwc(x_nhwc.astype(jnp.bfloat16), k, stride, pad)
    # torch weight (Cout, Cin, kh, kw) -> (kh*kw*Cin, Cout), matching patch order
    w_flat = jnp.transpose(w, (2, 3, 1, 0)).reshape(-1, Cout)
    y = conv_gdn_pallas(patches, w_flat, b, gamma, beta)
    return y.reshape(N, Ho, Wo, Cout)


def analysis_net_forward(x_nchw, params):
    x = jnp.transpose(x_nchw, (0, 2, 3, 1))       # NCHW -> NHWC
    x = conv_gdn_layer(x, params["layer1"], k=9, stride=4, pad=4)
    x = conv_gdn_layer(x, params["layer2"], k=5, stride=2, pad=2)
    x = conv_gdn_layer(x, params["layer3"], k=5, stride=2, pad=2)
    return jnp.transpose(x, (0, 3, 1, 2))         # NHWC -> NCHW


# ----------------------------------------------------------------------------
# Deterministic parameter init (mirrors the torch __init__ shapes / schemes)
# ----------------------------------------------------------------------------
def _xavier_normal(key, shape, gain):
    cout, cin, kh, kw = shape
    fan_in, fan_out = cin * kh * kw, cout * kh * kw
    std = gain * math.sqrt(2.0 / (fan_in + fan_out))
    return std * jax.random.normal(key, shape, dtype=jnp.float32)


def _gdn_params(ch):
    gamma = 0.1 * jnp.eye(ch, dtype=jnp.float32)
    beta = jnp.ones((ch,), dtype=jnp.float32)
    return gamma, beta


def init_analysis_net(key, out_channel_N=192):
    k1, k2, k3 = jax.random.split(key, 3)
    gain1 = math.sqrt(2 * (3 + out_channel_N) / 6)
    w1 = _xavier_normal(k1, (256, 3, 9, 9), gain1)
    b1 = jnp.full((256,), 0.01, dtype=jnp.float32)
    g1, be1 = _gdn_params(256)
    w2 = _xavier_normal(k2, (out_channel_N, 256, 5, 5), math.sqrt(2))
    b2 = jnp.full((out_channel_N,), 0.01, dtype=jnp.float32)
    g2, be2 = _gdn_params(out_channel_N)
    w3 = _xavier_normal(k3, (out_channel_N, out_channel_N, 5, 5), math.sqrt(2))
    b3 = jnp.full((out_channel_N,), 0.01, dtype=jnp.float32)
    g3, be3 = _gdn_params(out_channel_N)
    return {
        "layer1": (w1, b1, g1, be1),
        "layer2": (w2, b2, g2, be2),
        "layer3": (w3, b3, g3, be3),
    }


# ----------------------------------------------------------------------------
# Pure-JAX reference (NCHW, lax.conv).  `matmul_dtype=bfloat16` mirrors the
# kernel's MXU operand precision (f32 accumulation) for a tight check.
# ----------------------------------------------------------------------------
def _ref_layer(x, layer, stride, pad, matmul_dtype):
    w, b, gamma, beta = layer
    y = jax.lax.conv_general_dilated(
        x.astype(matmul_dtype), w.astype(matmul_dtype),
        (stride, stride), [(pad, pad), (pad, pad)],
        dimension_numbers=("NCHW", "OIHW", "NCHW"),
        preferred_element_type=jnp.float32)
    y = y + b[None, :, None, None]
    norm = jax.lax.conv_general_dilated(
        (y * y).astype(matmul_dtype),
        gamma[:, :, None, None].astype(matmul_dtype),
        (1, 1), [(0, 0), (0, 0)],
        dimension_numbers=("NCHW", "OIHW", "NCHW"),
        preferred_element_type=jnp.float32)
    norm = norm + beta[None, :, None, None]
    return y * jax.lax.rsqrt(norm)


def reference_forward(x, params, matmul_dtype=jnp.float32):
    x = _ref_layer(x, params["layer1"], 4, 4, matmul_dtype)
    x = _ref_layer(x, params["layer2"], 2, 2, matmul_dtype)
    x = _ref_layer(x, params["layer3"], 2, 2, matmul_dtype)
    return x


# ----------------------------------------------------------------------------
if __name__ == "__main__":
    out_channel_N = 192
    key = jax.random.PRNGKey(0)
    kx, kp = jax.random.split(key)

    x = jax.random.normal(kx, (2, 3, 16, 16), dtype=jnp.float32)  # NCHW input
    params = init_analysis_net(kp, out_channel_N=out_channel_N)

    fwd = jax.jit(analysis_net_forward)
    out = jax.block_until_ready(fwd(x, params))

    assert out.shape == (2, out_channel_N, 1, 1), out.shape
    assert bool(jnp.all(jnp.isfinite(out)))

    # Check against a reference built with the same bf16 matmul-operand
    # precision (both accumulate in f32), so only ordering noise remains.
    ref = jax.block_until_ready(
        reference_forward(x, params, matmul_dtype=jnp.bfloat16))
    assert bool(jnp.allclose(out, ref, atol=2e-2, rtol=2e-2)), (
        float(jnp.max(jnp.abs(out - ref))))

    print("KERNEL_OK")
</pallas_src>

<mosaic_0001>
module attributes {stable_mosaic.version = 11 : i64} {
  func.func @_conv_gdn_kernel(%arg0: i32, %arg1: memref<16x256xbf16, #tpu.memory_space<vmem>>, %arg2: memref<256x256xbf16, #tpu.memory_space<vmem>>, %arg3: memref<1x256xf32, #tpu.memory_space<vmem>>, %arg4: memref<256x256xbf16, #tpu.memory_space<vmem>>, %arg5: memref<1x256xf32, #tpu.memory_space<vmem>>, %arg6: memref<16x256xf32, #tpu.memory_space<vmem>>) attributes {dimension_semantics = [#tpu.dimension_semantics<parallel>], iteration_bounds = array<i64: 2>, scalar_prefetch = 0 : i64, scratch_operands = 0 : i64, tpu.core_type = #tpu.core_type<tc>, window_params = [{transform_indices = @transform_0, window_bounds = array<i64: 16, 256>}, {pipeline_mode = #tpu.pipeline_mode<synchronous>, transform_indices = @transform_1, window_bounds = array<i64: 256, 256>}, {pipeline_mode = #tpu.pipeline_mode<synchronous>, transform_indices = @transform_2, window_bounds = array<i64: 1, 256>}, {pipeline_mode = #tpu.pipeline_mode<synchronous>, transform_indices = @transform_3, window_bounds = array<i64: 256, 256>}, {pipeline_mode = #tpu.pipeline_mode<synchronous>, transform_indices = @transform_4, window_bounds = array<i64: 1, 256>}, {transform_indices = @transform_5, window_bounds = array<i64: 16, 256>}]} {
    %c0 = arith.constant 0 : index
    %c0_0 = arith.constant 0 : index
    %0 = vector.load %arg1[%c0, %c0_0] : memref<16x256xbf16, #tpu.memory_space<vmem>>, vector<16x256xbf16>
    %c0_1 = arith.constant 0 : index
    %c0_2 = arith.constant 0 : index
    %1 = vector.load %arg2[%c0_1, %c0_2] : memref<256x256xbf16, #tpu.memory_space<vmem>>, vector<256x256xbf16>
    %cst = arith.constant dense<0.000000e+00> : vector<16x256xf32>
    %2 = tpu.matmul %0, %1, %cst {dimension_numbers = #tpu.dot_dimension_numbers<[1], [0], [0], [1], [0, 0, 1, 1], [], []>} : vector<16x256xbf16>, vector<256x256xbf16>, vector<16x256xf32> -> vector<16x256xf32>
    %c0_3 = arith.constant 0 : index
    %c0_4 = arith.constant 0 : index
    %3 = vector.load %arg3[%c0_3, %c0_4] : memref<1x256xf32, #tpu.memory_space<vmem>>, vector<1x256xf32>
    %4 = vector.broadcast %3 : vector<1x256xf32> to vector<16x256xf32>
    %5 = arith.addf %2, %4 : vector<16x256xf32>
    %6 = arith.mulf %5, %5 : vector<16x256xf32>
    %7 = arith.truncf %6 : vector<16x256xf32> to vector<16x256xbf16>
    %c0_5 = arith.constant 0 : index
    %c0_6 = arith.constant 0 : index
    %8 = vector.load %arg4[%c0_5, %c0_6] : memref<256x256xbf16, #tpu.memory_space<vmem>>, vector<256x256xbf16>
    %cst_7 = arith.constant dense<0.000000e+00> : vector<16x256xf32>
    %9 = tpu.matmul %7, %8, %cst_7 {dimension_numbers = #tpu.dot_dimension_numbers<[1], [0], [0], [1], [0, 0, 1, 1], [], []>} : vector<16x256xbf16>, vector<256x256xbf16>, vector<16x256xf32> -> vector<16x256xf32>
    %c0_8 = arith.constant 0 : index
    %c0_9 = arith.constant 0 : index
    %10 = vector.load %arg5[%c0_8, %c0_9] : memref<1x256xf32, #tpu.memory_space<vmem>>, vector<1x256xf32>
    %11 = vector.broadcast %10 : vector<1x256xf32> to vector<16x256xf32>
    %12 = arith.addf %9, %11 : vector<16x256xf32>
    %13 = math.rsqrt %12 : vector<16x256xf32>
    %14 = arith.mulf %5, %13 : vector<16x256xf32>
    %c0_10 = arith.constant 0 : index
    %c0_11 = arith.constant 0 : index
    %15 = vector.load %arg6[%c0_10, %c0_11] : memref<16x256xf32, #tpu.memory_space<vmem>>, vector<16x256xf32>
    tpu.vector_store %arg6[%c0_10, %c0_11], %14 {strides = array<i32>} : memref<16x256xf32, #tpu.memory_space<vmem>>, vector<16x256xf32>,
    return
  }
  func.func @transform_0(%arg0: i32) -> (i32, i32) {
    %c0_i32 = arith.constant 0 : i32
    %c0_i32_0 = arith.constant 0 : i32
    return %arg0, %c0_i32 : i32, i32
  }
  func.func @transform_1(%arg0: i32) -> (i32, i32) {
    %c0_i32 = arith.constant 0 : i32
    %c0_i32_0 = arith.constant 0 : i32
    %c0_i32_1 = arith.constant 0 : i32
    return %c0_i32, %c0_i32_0 : i32, i32
  }
  func.func @transform_2(%arg0: i32) -> (i32, i32) {
    %c0_i32 = arith.constant 0 : i32
    %c0_i32_0 = arith.constant 0 : i32
    %c0_i32_1 = arith.constant 0 : i32
    return %c0_i32, %c0_i32_0 : i32, i32
  }
  func.func @transform_3(%arg0: i32) -> (i32, i32) {
    %c0_i32 = arith.constant 0 : i32
    %c0_i32_0 = arith.constant 0 : i32
    %c0_i32_1 = arith.constant 0 : i32
    return %c0_i32, %c0_i32_0 : i32, i32
  }
  func.func @transform_4(%arg0: i32) -> (i32, i32) {
    %c0_i32 = arith.constant 0 : i32
    %c0_i32_0 = arith.constant 0 : i32
    %c0_i32_1 = arith.constant 0 : i32
    return %c0_i32, %c0_i32_0 : i32, i32
  }
  func.func @transform_5(%arg0: i32) -> (i32, i32) {
    %c0_i32 = arith.constant 0 : i32
    %c0_i32_0 = arith.constant 0 : i32
    return %arg0, %c0_i32 : i32, i32
  }
}

module attributes {stable_mosaic.version = 11 : i64} {
  func.func @_conv_gdn_kernel(%arg0: i32, %arg1: memref<8x6400xbf16, #tpu.memory_space<vmem>>, %arg2: memref<6400x256xbf16, #tpu.memory_space<vmem>>, %arg3: memref<1x256xf32, #tpu.memory_space<vmem>>, %arg4: memref<256x256xbf16, #tpu.memory_space<vmem>>, %arg5: memref<1x256xf32, #tpu.memory_space<vmem>>, %arg6: memref<8x256xf32, #tpu.memory_space<vmem>>) attributes {dimension_semantics = [#tpu.dimension_semantics<parallel>], iteration_bounds = array<i64: 1>, scalar_prefetch = 0 : i64, scratch_operands = 0 : i64, tpu.core_type = #tpu.core_type<tc>, window_params = [{transform_indices = @transform_0, window_bounds = array<i64: 8, 6400>}, {pipeline_mode = #tpu.pipeline_mode<synchronous>, transform_indices = @transform_1, window_bounds = array<i64: 6400, 256>}, {pipeline_mode = #tpu.pipeline_mode<synchronous>, transform_indices = @transform_2, window_bounds = array<i64: 1, 256>}, {pipeline_mode = #tpu.pipeline_mode<synchronous>, transform_indices = @transform_3, window_bounds = array<i64: 256, 256>}, {pipeline_mode = #tpu.pipeline_mode<synchronous>, transform_indices = @transform_4, window_bounds = array<i64: 1, 256>}, {transform_indices = @transform_5, window_bounds = array<i64: 8, 256>}]} {
    %c0 = arith.constant 0 : index
    %c0_0 = arith.constant 0 : index
    %0 = vector.load %arg1[%c0, %c0_0] : memref<8x6400xbf16, #tpu.memory_space<vmem>>, vector<8x6400xbf16>
    %c0_1 = arith.constant 0 : index
    %c0_2 = arith.constant 0 : index
    %1 = vector.load %arg2[%c0_1, %c0_2] : memref<6400x256xbf16, #tpu.memory_space<vmem>>, vector<6400x256xbf16>
    %cst = arith.constant dense<0.000000e+00> : vector<8x256xf32>
    %2 = tpu.matmul %0, %1, %cst {dimension_numbers = #tpu.dot_dimension_numbers<[1], [0], [0], [1], [0, 0, 1, 1], [], []>} : vector<8x6400xbf16>, vector<6400x256xbf16>, vector<8x256xf32> -> vector<8x256xf32>
    %c0_3 = arith.constant 0 : index
    %c0_4 = arith.constant 0 : index
    %3 = vector.load %arg3[%c0_3, %c0_4] : memref<1x256xf32, #tpu.memory_space<vmem>>, vector<1x256xf32>
    %4 = vector.broadcast %3 : vector<1x256xf32> to vector<8x256xf32>
    %5 = arith.addf %2, %4 : vector<8x256xf32>
    %6 = arith.mulf %5, %5 : vector<8x256xf32>
    %7 = arith.truncf %6 : vector<8x256xf32> to vector<8x256xbf16>
    %c0_5 = arith.constant 0 : index
    %c0_6 = arith.constant 0 : index
    %8 = vector.load %arg4[%c0_5, %c0_6] : memref<256x256xbf16, #tpu.memory_space<vmem>>, vector<256x256xbf16>
    %cst_7 = arith.constant dense<0.000000e+00> : vector<8x256xf32>
    %9 = tpu.matmul %7, %8, %cst_7 {dimension_numbers = #tpu.dot_dimension_numbers<[1], [0], [0], [1], [0, 0, 1, 1], [], []>} : vector<8x256xbf16>, vector<256x256xbf16>, vector<8x256xf32> -> vector<8x256xf32>
    %c0_8 = arith.constant 0 : index
    %c0_9 = arith.constant 0 : index
    %10 = vector.load %arg5[%c0_8, %c0_9] : memref<1x256xf32, #tpu.memory_space<vmem>>, vector<1x256xf32>
    %11 = vector.broadcast %10 : vector<1x256xf32> to vector<8x256xf32>
    %12 = arith.addf %9, %11 : vector<8x256xf32>
    %13 = math.rsqrt %12 : vector<8x256xf32>
    %14 = arith.mulf %5, %13 : vector<8x256xf32>
    %c0_10 = arith.constant 0 : index
    %c0_11 = arith.constant 0 : index
    %15 = vector.load %arg6[%c0_10, %c0_11] : memref<8x256xf32, #tpu.memory_space<vmem>>, vector<8x256xf32>
    tpu.vector_store %arg6[%c0_10, %c0_11], %14 {strides = array<i32>} : memref<8x256xf32, #tpu.memory_space<vmem>>, vector<8x256xf32>,
    return
  }
  func.func @transform_0(%arg0: i32) -> (i32, i32) {
    %c0_i32 = arith.constant 0 : i32
    %c0_i32_0 = arith.constant 0 : i32
    return %arg0, %c0_i32 : i32, i32
  }
  func.func @transform_1(%arg0: i32) -> (i32, i32) {
    %c0_i32 = arith.constant 0 : i32
    %c0_i32_0 = arith.constant 0 : i32
    %c0_i32_1 = arith.constant 0 : i32
    return %c0_i32, %c0_i32_0 : i32, i32
  }
  func.func @transform_2(%arg0: i32) -> (i32, i32) {
    %c0_i32 = arith.constant 0 : i32
    %c0_i32_0 = arith.constant 0 : i32
    %c0_i32_1 = arith.constant 0 : i32
    return %c0_i32, %c0_i32_0 : i32, i32
  }
  func.func @transform_3(%arg0: i32) -> (i32, i32) {
    %c0_i32 = arith.constant 0 : i32
    %c0_i32_0 = arith.constant 0 : i32
    %c0_i32_1 = arith.constant 0 : i32
    return %c0_i32, %c0_i32_0 : i32, i32
  }
  func.func @transform_4(%arg0: i32) -> (i32, i32) {
    %c0_i32 = arith.constant 0 : i32
    %c0_i32_0 = arith.constant 0 : i32
    %c0_i32_1 = arith.constant 0 : i32
    return %c0_i32, %c0_i32_0 : i32, i32
  }
  func.func @transform_5(%arg0: i32) -> (i32, i32) {
    %c0_i32 = arith.constant 0 : i32
    %c0_i32_0 = arith.constant 0 : i32
    return %arg0, %c0_i32 : i32, i32
  }
}

module attributes {stable_mosaic.version = 11 : i64} {
  func.func @_conv_gdn_kernel(%arg0: i32, %arg1: memref<8x4864xbf16, #tpu.memory_space<vmem>>, %arg2: memref<4864x256xbf16, #tpu.memory_space<vmem>>, %arg3: memref<1x256xf32, #tpu.memory_space<vmem>>, %arg4: memref<256x256xbf16, #tpu.memory_space<vmem>>, %arg5: memref<1x256xf32, #tpu.memory_space<vmem>>, %arg6: memref<8x256xf32, #tpu.memory_space<vmem>>) attributes {dimension_semantics = [#tpu.dimension_semantics<parallel>], iteration_bounds = array<i64: 1>, scalar_prefetch = 0 : i64, scratch_operands = 0 : i64, tpu.core_type = #tpu.core_type<tc>, window_params = [{transform_indices = @transform_0, window_bounds = array<i64: 8, 4864>}, {pipeline_mode = #tpu.pipeline_mode<synchronous>, transform_indices = @transform_1, window_bounds = array<i64: 4864, 256>}, {pipeline_mode = #tpu.pipeline_mode<synchronous>, transform_indices = @transform_2, window_bounds = array<i64: 1, 256>}, {pipeline_mode = #tpu.pipeline_mode<synchronous>, transform_indices = @transform_3, window_bounds = array<i64: 256, 256>}, {pipeline_mode = #tpu.pipeline_mode<synchronous>, transform_indices = @transform_4, window_bounds = array<i64: 1, 256>}, {transform_indices = @transform_5, window_bounds = array<i64: 8, 256>}]} {
    %c0 = arith.constant 0 : index
    %c0_0 = arith.constant 0 : index
    %0 = vector.load %arg1[%c0, %c0_0] : memref<8x4864xbf16, #tpu.memory_space<vmem>>, vector<8x4864xbf16>
    %c0_1 = arith.constant 0 : index
    %c0_2 = arith.constant 0 : index
    %1 = vector.load %arg2[%c0_1, %c0_2] : memref<4864x256xbf16, #tpu.memory_space<vmem>>, vector<4864x256xbf16>
    %cst = arith.constant dense<0.000000e+00> : vector<8x256xf32>
    %2 = tpu.matmul %0, %1, %cst {dimension_numbers = #tpu.dot_dimension_numbers<[1], [0], [0], [1], [0, 0, 1, 1], [], []>} : vector<8x4864xbf16>, vector<4864x256xbf16>, vector<8x256xf32> -> vector<8x256xf32>
    %c0_3 = arith.constant 0 : index
    %c0_4 = arith.constant 0 : index
    %3 = vector.load %arg3[%c0_3, %c0_4] : memref<1x256xf32, #tpu.memory_space<vmem>>, vector<1x256xf32>
    %4 = vector.broadcast %3 : vector<1x256xf32> to vector<8x256xf32>
    %5 = arith.addf %2, %4 : vector<8x256xf32>
    %6 = arith.mulf %5, %5 : vector<8x256xf32>
    %7 = arith.truncf %6 : vector<8x256xf32> to vector<8x256xbf16>
    %c0_5 = arith.constant 0 : index
    %c0_6 = arith.constant 0 : index
    %8 = vector.load %arg4[%c0_5, %c0_6] : memref<256x256xbf16, #tpu.memory_space<vmem>>, vector<256x256xbf16>
    %cst_7 = arith.constant dense<0.000000e+00> : vector<8x256xf32>
    %9 = tpu.matmul %7, %8, %cst_7 {dimension_numbers = #tpu.dot_dimension_numbers<[1], [0], [0], [1], [0, 0, 1, 1], [], []>} : vector<8x256xbf16>, vector<256x256xbf16>, vector<8x256xf32> -> vector<8x256xf32>
    %c0_8 = arith.constant 0 : index
    %c0_9 = arith.constant 0 : index
    %10 = vector.load %arg5[%c0_8, %c0_9] : memref<1x256xf32, #tpu.memory_space<vmem>>, vector<1x256xf32>
    %11 = vector.broadcast %10 : vector<1x256xf32> to vector<8x256xf32>
    %12 = arith.addf %9, %11 : vector<8x256xf32>
    %13 = math.rsqrt %12 : vector<8x256xf32>
    %14 = arith.mulf %5, %13 : vector<8x256xf32>
    %c0_10 = arith.constant 0 : index
    %c0_11 = arith.constant 0 : index
    %15 = vector.load %arg6[%c0_10, %c0_11] : memref<8x256xf32, #tpu.memory_space<vmem>>, vector<8x256xf32>
    tpu.vector_store %arg6[%c0_10, %c0_11], %14 {strides = array<i32>} : memref<8x256xf32, #tpu.memory_space<vmem>>, vector<8x256xf32>,
    return
  }
  func.func @transform_0(%arg0: i32) -> (i32, i32) {
    %c0_i32 = arith.constant 0 : i32
    %c0_i32_0 = arith.constant 0 : i32
    return %arg0, %c0_i32 : i32, i32
  }
  func.func @transform_1(%arg0: i32) -> (i32, i32) {
    %c0_i32 = arith.constant 0 : i32
    %c0_i32_0 = arith.constant 0 : i32
    %c0_i32_1 = arith.constant 0 : i32
    return %c0_i32, %c0_i32_0 : i32, i32
  }
  func.func @transform_2(%arg0: i32) -> (i32, i32) {
    %c0_i32 = arith.constant 0 : i32
    %c0_i32_0 = arith.constant 0 : i32
    %c0_i32_1 = arith.constant 0 : i32
    return %c0_i32, %c0_i32_0 : i32, i32
  }
  func.func @transform_3(%arg0: i32) -> (i32, i32) {
    %c0_i32 = arith.constant 0 : i32
    %c0_i32_0 = arith.constant 0 : i32
    %c0_i32_1 = arith.constant 0 : i32
    return %c0_i32, %c0_i32_0 : i32, i32
  }
  func.func @transform_4(%arg0: i32) -> (i32, i32) {
    %c0_i32 = arith.constant 0 : i32
    %c0_i32_0 = arith.constant 0 : i32
    %c0_i32_1 = arith.constant 0 : i32
    return %c0_i32, %c0_i32_0 : i32, i32
  }
  func.func @transform_5(%arg0: i32) -> (i32, i32) {
    %c0_i32 = arith.constant 0 : i32
    %c0_i32_0 = arith.constant 0 : i32
    return %arg0, %c0_i32 : i32, i32
  }
}

</mosaic_0001>

<bundles_post_ra>
// kernel: analysis_net_forward.3
= control target key start
LH: loop header
LB: loop body
LE: loop exit
PB: predicated region body
PF: predicated region fallthrough
CT: control target
= control target key end

     0   :  { %s1264_s18 = smov 0   ;;  %s1698_s0 = inlined_call_operand.vmem [shape: bf16[32,256], index: 0, kind: input, shape index: {}]   ;;  %s1699_s1 = inlined_call_operand.vmem [shape: bf16[256,256], index: 1, kind: input, shape index: {}]   ;;  %s1700_s2 = inlined_call_operand.vmem [shape: f32[1,256], index: 2, kind: input, shape index: {}]   ;;  %s1701_s3 = inlined_call_operand.vmem [shape: bf16[256,256], index: 3, kind: input, shape index: {}]   ;;  %s1702_s4 = inlined_call_operand.vmem [shape: f32[1,256], index: 4, kind: input, shape index: {}]   ;;  %s1703_s5 = inlined_call_operand.vmem [shape: f32[32,256], index: 5, kind: output, shape index: {}]  }
   0x1 LB: > { %s865_s19 = sadd.s32 4294967295, %s1232_s18   ;;  %p869_p0 = scmp.ge.s32.totalorder %s1232_s18, 1  ;;  %s1232_s18 = sphi %s1264_s18, %s15_s18  }
   0x2   : > { %p189_p1 = scmp.lt.s32.totalorder %s1232_s18, 3 }
   0x4   : > { %p190_p2 = pnand %p869_p0, %p189_p1 }
   0x5   : > { %s870_s11 = sshll.u32 (!%p190_p2), %s865_s19, 1 }
   0x6   : > { %193 = sbr.rel (%p190_p2) target bundleno = 359 (0x167), region = 40  ;;  %p220_p3 = scmp.lt.s32.totalorder (!%p190_p2), %s870_s11, 3 }
   0xb   : > { %v942_v0 = vld [vmem:[%s1699_s1 + $0x70] sm:$0xf]  ;;  %v1161_v1 = vld [vmem:[%s1699_s1 + $0x74] sm:$0xf0]  ;;  %v1160_v5 = vld [vmem:[%s1699_s1 + $0x74] sm:$0xf] }
   0xc   : > { %v1006_v2 = vld [vmem:[%s1699_s1 + $0xf0] sm:$0xf]  ;;  %v943_v3 = vor.u32 %v1161_v1, %v942_v0  ;;  %v1177_v4 = vld [vmem:[%s1699_s1 + $0xf4] sm:$0xf0]  ;;  %v944_v6 = vld [vmem:[%s1699_s1 + $0x78] sm:$0xf0] }
   0xd   : > { %v1007_v7 = vor.u32 %v1177_v4, %v1006_v2  ;;  %v947_v8 = vor.u32 %v1160_v5, %v944_v6  ;;  %v1176_v9 = vld [vmem:[%s1699_s1 + $0xf4] sm:$0xf]  ;;  %v1008_v10 = vld [vmem:[%s1699_s1 + $0xf8] sm:$0xf0]  ;;  %v934_v11 = vld [vmem:[%s1699_s1 + $0x60] sm:$0xf] }
   0xe   : > { %443 = vmatpush.bf16.msra.mxu0 %v943_v3  ;;  %v1011_v12 = vor.u32 %v1176_v9, %v1008_v10  ;;  %v1159_v13 = vld [vmem:[%s1699_s1 + $0x64] sm:$0xf0]  ;;  %v998_v14 = vld [vmem:[%s1699_s1 + $0xe0] sm:$0xf]  ;;  %v1158_v18 = vld [vmem:[%s1699_s1 + $0x64] sm:$0xf] }
   0xf   : > { %v1175_v15 = vld [vmem:[%s1699_s1 + $0xe4] sm:$0xf0]  ;;  %457 = vmatpush.bf16.msra.mxu1 %v1007_v7  ;;  %471 = vmatpush.bf16.msra.mxu2 %v947_v8  ;;  %v935_v16 = vor.u32 %v1159_v13, %v934_v11  ;;  %v936_v19 = vld [vmem:[%s1699_s1 + $0x68] sm:$0xf0]  ;;  %v1174_v20 = vld [vmem:[%s1699_s1 + $0xe4] sm:$0xf] }
  0x10   : > { %v999_v17 = vor.u32 %v1175_v15, %v998_v14  ;;  %485 = vmatpush.bf16.msra.mxu3 %v1011_v12  ;;  %v939_v21 = vor.u32 %v1158_v18, %v936_v19  ;;  %v1000_v22 = vld [vmem:[%s1699_s1 + $0xe8] sm:$0xf0]  ;;  %v926_v23 = vld [vmem:[%s1699_s1 + $0x50] sm:$0xf]  ;;  %v1157_v24 = vld [vmem:[%s1699_s1 + $0x54] sm:$0xf0] }
  0x11   : > { %v1003_v25 = vor.u32 %v1174_v20, %v1000_v22  ;;  %v990_v26 = vld [vmem:[%s1699_s1 + $0xd0] sm:$0xf]  ;;  %v1173_v27 = vld [vmem:[%s1699_s1 + $0xd4] sm:$0xf0]  ;;  %v1156_v28 = vld [vmem:[%s1699_s1 + $0x54] sm:$0xf]  ;;  %v927_v29 = vor.u32 %v1157_v24, %v926_v23 }
  0x12   : > { %444 = vmatpush.bf16.msra.mxu0 %v935_v16  ;;  %v928_v30 = vld [vmem:[%s1699_s1 + $0x58] sm:$0xf0]  ;;  %v1172_v31 = vld [vmem:[%s1699_s1 + $0xd4] sm:$0xf]  ;;  %v991_v33 = vor.u32 %v1173_v27, %v990_v26  ;;  %v918_v35 = vld [vmem:[%s1699_s1 + $0x40] sm:$0xf] }
  0x13   : > { %v992_v32 = vld [vmem:[%s1699_s1 + $0xd8] sm:$0xf0]  ;;  %458 = vmatpush.bf16.msra.mxu1 %v999_v17  ;;  %472 = vmatpush.bf16.msra.mxu2 %v939_v21  ;;  %v931_v34 = vor.u32 %v1156_v28, %v928_v30  ;;  %v1155_v36 = vld [vmem:[%s1699_s1 + $0x44] sm:$0xf0]  ;;  %v982_v37 = vld [vmem:[%s1699_s1 + $0xc0] sm:$0xf] }
  0x14   : > { %486 = vmatpush.bf16.msra.mxu3 %v1003_v25  ;;  %v995_v38 = vor.u32 %v1172_v31, %v992_v32  ;;  %v1171_v39 = vld [vmem:[%s1699_s1 + $0xc4] sm:$0xf0]  ;;  %v1154_v40 = vld [vmem:[%s1699_s1 + $0x44] sm:$0xf]  ;;  %v920_v41 = vld [vmem:[%s1699_s1 + $0x48] sm:$0xf0]  ;;  %v919_v44 = vor.u32 %v1155_v36, %v918_v35 }
  0x15   : > { %v1170_v42 = vld [vmem:[%s1699_s1 + $0xc4] sm:$0xf]  ;;  %v984_v43 = vld [vmem:[%s1699_s1 + $0xc8] sm:$0xf0]  ;;  %v983_v45 = vor.u32 %v1171_v39, %v982_v37  ;;  %v923_v46 = vor.u32 %v1154_v40, %v920_v41  ;;  %v910_v47 = vld [vmem:[%s1699_s1 + $0x30] sm:$0xf] }
  0x16   : > { %445 = vmatpush.bf16.msra.mxu0 %v927_v29  ;;  %v1153_v48 = vld [vmem:[%s1699_s1 + $0x34] sm:$0xf0]  ;;  %v974_v49 = vld [vmem:[%s1699_s1 + $0xb0] sm:$0xf]  ;;  %v987_v50 = vor.u32 %v1170_v42, %v984_v43  ;;  %v1152_v52 = vld [vmem:[%s1699_s1 + $0x34] sm:$0xf] }
  0x17   : > { %459 = vmatpush.bf16.msra.mxu1 %v991_v33  ;;  %473 = vmatpush.bf16.msra.mxu2 %v931_v34  ;;  %v1169_v51 = vld [vmem:[%s1699_s1 + $0xb4] sm:$0xf0]  ;;  %v912_v53 = vld [vmem:[%s1699_s1 + $0x38] sm:$0xf0]  ;;  %v1168_v54 = vld [vmem:[%s1699_s1 + $0xb4] sm:$0xf]  ;;  %v911_v56 = vor.u32 %v1153_v48, %v910_v47 }
  0x18   : > { %487 = vmatpush.bf16.msra.mxu3 %v995_v38  ;;  %v976_v55 = vld [vmem:[%s1699_s1 + $0xb8] sm:$0xf0]  ;;  %v975_v57 = vor.u32 %v1169_v51, %v974_v49  ;;  %v915_v58 = vor.u32 %v1152_v52, %v912_v53  ;;  %v902_v59 = vld [vmem:[%s1699_s1 + $0x20] sm:$0xf]  ;;  %v1151_v60 = vld [vmem:[%s1699_s1 + $0x24] sm:$0xf0] }
  0x19   : > { %v966_v61 = vld [vmem:[%s1699_s1 + $0xa0] sm:$0xf]  ;;  %v979_v62 = vor.u32 %v1168_v54, %v976_v55  ;;  %v1167_v63 = vld [vmem:[%s1699_s1 + $0xa4] sm:$0xf0]  ;;  %v1150_v0 = vld [vmem:[%s1699_s1 + $0x24] sm:$0xf]  ;;  %v903_v4 = vor.u32 %v1151_v60, %v902_v59 }
  0x1a   : > { %446 = vmatpush.bf16.msra.mxu0 %v919_v44  ;;  %v904_v1 = vld [vmem:[%s1699_s1 + $0x28] sm:$0xf0]  ;;  %v1166_v2 = vld [vmem:[%s1699_s1 + $0xa4] sm:$0xf]  ;;  %v894_v5 = vld [vmem:[%s1699_s1 + $0x10] sm:$0xf]  ;;  %v967_v6 = vor.u32 %v1167_v63, %v966_v61 }
  0x1b   : > { %460 = vmatpush.bf16.msra.mxu1 %v983_v45  ;;  %474 = vmatpush.bf16.msra.mxu2 %v923_v46  ;;  %v968_v3 = vld [vmem:[%s1699_s1 + $0xa8] sm:$0xf0]  ;;  %v907_v7 = vor.u32 %v1150_v0, %v904_v1  ;;  %v1149_v8 = vld [vmem:[%s1699_s1 + $0x14] sm:$0xf0]  ;;  %v958_v9 = vld [vmem:[%s1699_s1 + $0x90] sm:$0xf] }
  0x1c   : > { %488 = vmatpush.bf16.msra.mxu3 %v987_v50  ;;  %v1165_v10 = vld [vmem:[%s1699_s1 + $0x94] sm:$0xf0]  ;;  %v971_v11 = vor.u32 %v1166_v2, %v968_v3  ;;  %v1148_v12 = vld [vmem:[%s1699_s1 + $0x14] sm:$0xf]  ;;  %v896_v13 = vld [vmem:[%s1699_s1 + $0x18] sm:$0xf0]  ;;  %v895_v16 = vor.u32 %v1149_v8, %v894_v5 }
  0x1d   : > { %v1164_v14 = vld [vmem:[%s1699_s1 + $0x94] sm:$0xf]  ;;  %v960_v15 = vld [vmem:[%s1699_s1 + $0x98] sm:$0xf0]  ;;  %v886_v17 = vld [vmem:[%s1699_s1] sm:$0xf]  ;;  %v959_v20 = vor.u32 %v1165_v10, %v958_v9  ;;  %v899_v21 = vor.u32 %v1148_v12, %v896_v13 }
  0x1e   : > { %447 = vmatpush.bf16.msra.mxu0 %v911_v56  ;;  %v1147_v18 = vld [vmem:[%s1699_s1 + $0x4] sm:$0xf0]  ;;  %v950_v19 = vld [vmem:[%s1699_s1 + $0x80] sm:$0xf]  ;;  %v1146_v23 = vld [vmem:[%s1699_s1 + $0x4] sm:$0xf]  ;;  %v963_v24 = vor.u32 %v1164_v14, %v960_v15 }
  0x1f   : > { %461 = vmatpush.bf16.msra.mxu1 %v975_v57  ;;  %475 = vmatpush.bf16.msra.mxu2 %v915_v58  ;;  %v1163_v22 = vld [vmem:[%s1699_s1 + $0x84] sm:$0xf0]  ;;  %s1705_s11 = smov (!%p220_p3, %s870_s11), 3  ;;  %v888_v25 = vld [vmem:[%s1699_s1 + $0x8] sm:$0xf0]  ;;  %v887_v30 = vor.u32 %v1147_v18, %v886_v17 }
  0x20   : > { %489 = vmatpush.bf16.msra.mxu3 %v979_v62  ;;  %v1162_v26 = vld [vmem:[%s1699_s1 + $0x84] sm:$0xf]  ;;  %v952_v27 = vld [vmem:[%s1699_s1 + $0x88] sm:$0xf0]  ;;  %s1142_s8 = sshll.u32 %s1705_s11, 3  ;;  %v951_v33 = vor.u32 %v1163_v22, %v950_v19  ;;  %v891_v34 = vor.u32 %v1146_v23, %v888_v25  ;;  %s1143_s6 = sshll.u32 %s1705_s11, 4 }
  0x21   : > { %v1070_v28 = vld [vmem:[%s1701_s3 + $0x70] sm:$0xf]  ;;  %v1193_v29 = vld [vmem:[%s1701_s3 + $0x74] sm:$0xf0]  ;;  %s224_s16 = scalar_lea.vmem %s1698_s0, %s1142_s8  ;;  %v1192_v31 = vld [vmem:[%s1701_s3 + $0x74] sm:$0xf]  ;;  %v955_v39 = vor.u32 %v1162_v26, %v952_v27  ;;  %s1686_s9 = scalar_lea.vmem %s1703_s5, %s1143_s6 }
  0x22   : > { %448 = vmatpush.bf16.msra.mxu0 %v903_v4  ;;  %v1072_v32 = vld [vmem:[%s1701_s3 + $0x78] sm:$0xf0]  ;;  %v878_v35 = vld [vmem:[%s224_s16] sm:$0xf]  ;;  %v1145_v36 = vld [vmem:[%s224_s16 + $0x4] sm:$0xf0]  ;;  %v1071_v41 = vor.u32 %v1193_v29, %v1070_v28 }
  0x23   : > { %462 = vmatpush.bf16.msra.mxu1 %v967_v6  ;;  %476 = vmatpush.bf16.msra.mxu2 %v907_v7  ;;  %v1144_v37 = vld [vmem:[%s224_s16 + $0x4] sm:$0xf]  ;;  %v1062_v38 = vld [vmem:[%s1701_s3 + $0x60] sm:$0xf]  ;;  %v880_v40 = vld [vmem:[%s224_s16 + $0x8] sm:$0xf0]  ;;  %v879_v44 = vor.u32 %v1145_v36, %v878_v35  ;;  %v1075_v45 = vor.u32 %v1192_v31, %v1072_v32 }
  0x24   : > { %490 = vmatpush.bf16.msra.mxu3 %v971_v11  ;;  %v1134_v42 = vld [vmem:[%s1701_s3 + $0xf0] sm:$0xf]  ;;  %v1209_v43 = vld [vmem:[%s1701_s3 + $0xf4] sm:$0xf0]  ;;  %v1191_v46 = vld [vmem:[%s1701_s3 + $0x64] sm:$0xf0]  ;;  %v883_v49 = vor.u32 %v1144_v37, %v880_v40 }
  0x25   : > { %v1208_v47 = vld [vmem:[%s1701_s3 + $0xf4] sm:$0xf]  ;;  %v1136_v48 = vld [vmem:[%s1701_s3 + $0xf8] sm:$0xf0]  ;;  %v1190_v50 = vld [vmem:[%s1701_s3 + $0x64] sm:$0xf]  ;;  %v1135_v52 = vor.u32 %v1209_v43, %v1134_v42  ;;  %v1063_v53 = vor.u32 %v1191_v46, %v1062_v38 }
  0x26   : > { %449 = vmatpush.bf16.msra.mxu0 %v895_v16  ;;  %v1064_v51 = vld [vmem:[%s1701_s3 + $0x68] sm:$0xf0]  ;;  %v1139_v54 = vor.u32 %v1208_v47, %v1136_v48  ;;  %v1054_v55 = vld [vmem:[%s1701_s3 + $0x50] sm:$0xf]  ;;  %v1126_v56 = vld [vmem:[%s1701_s3 + $0xe0] sm:$0xf] }
  0x27   : > { %463 = vmatpush.bf16.msra.mxu1 %v959_v20  ;;  %477 = vmatpush.bf16.msra.mxu2 %v899_v21  ;;  %v1207_v57 = vld [vmem:[%s1701_s3 + $0xe4] sm:$0xf0]  ;;  %v1067_v58 = vor.u32 %v1190_v50, %v1064_v51  ;;  %v1189_v59 = vld [vmem:[%s1701_s3 + $0x54] sm:$0xf0]  ;;  %v1206_v60 = vld [vmem:[%s1701_s3 + $0xe4] sm:$0xf] }
  0x28   : > { %491 = vmatpush.bf16.msra.mxu3 %v963_v24  ;;  %v1128_v61 = vld [vmem:[%s1701_s3 + $0xe8] sm:$0xf0]  ;;  %v1188_v62 = vld [vmem:[%s1701_s3 + $0x54] sm:$0xf]  ;;  %v1056_v63 = vld [vmem:[%s1701_s3 + $0x58] sm:$0xf0]  ;;  %v1127_v0 = vor.u32 %v1207_v57, %v1126_v56  ;;  %v1055_v1 = vor.u32 %v1189_v59, %v1054_v55 }
  0x29   : > { %v1131_v2 = vor.u32 %v1206_v60, %v1128_v61  ;;  %v1059_v3 = vor.u32 %v1188_v62, %v1056_v63  ;;  %v1046_v4 = vld [vmem:[%s1701_s3 + $0x40] sm:$0xf]  ;;  %v1187_v5 = vld [vmem:[%s1701_s3 + $0x44] sm:$0xf0]  ;;  %v1186_v6 = vld [vmem:[%s1701_s3 + $0x44] sm:$0xf] }
  0x2a   : > { %450 = vmatpush.bf16.msra.mxu0 %v887_v30  ;;  %v1048_v7 = vld [vmem:[%s1701_s3 + $0x48] sm:$0xf0]  ;;  %v1047_v8 = vor.u32 %v1187_v5, %v1046_v4  ;;  %v1118_v10 = vld [vmem:[%s1701_s3 + $0xd0] sm:$0xf]  ;;  %v1205_v11 = vld [vmem:[%s1701_s3 + $0xd4] sm:$0xf0] }
  0x2b   : > { %464 = vmatpush.bf16.msra.mxu1 %v951_v33  ;;  %478 = vmatpush.bf16.msra.mxu2 %v891_v34  ;;  %v1051_v9 = vor.u32 %v1186_v6, %v1048_v7  ;;  %v1204_v12 = vld [vmem:[%s1701_s3 + $0xd4] sm:$0xf]  ;;  %v1119_v13 = vor.u32 %v1205_v11, %v1118_v10  ;;  %v1120_v14 = vld [vmem:[%s1701_s3 + $0xd8] sm:$0xf0]  ;;  %v1038_v16 = vld [vmem:[%s1701_s3 + $0x30] sm:$0xf] }
  0x2c   : > { %492 = vmatpush.bf16.msra.mxu3 %v955_v39  ;;  %v1123_v15 = vor.u32 %v1204_v12, %v1120_v14  ;;  %v1185_v17 = vld [vmem:[%s1701_s3 + $0x34] sm:$0xf0]  ;;  %v1184_v18 = vld [vmem:[%s1701_s3 + $0x34] sm:$0xf]  ;;  %v1040_v20 = vld [vmem:[%s1701_s3 + $0x38] sm:$0xf0] }
  0x2d   : > { %451 = vmatmul.bf16.vlgmr.msra.gmra.mxu0 %v879_v44  ;;  %v1039_v19 = vor.u32 %v1185_v17, %v1038_v16  ;;  %v1043_v21 = vor.u32 %v1184_v18, %v1040_v20  ;;  %v1110_v22 = vld [vmem:[%s1701_s3 + $0xc0] sm:$0xf]  ;;  %v1203_v23 = vld [vmem:[%s1701_s3 + $0xc4] sm:$0xf0]  ;;  %v1202_v24 = vld [vmem:[%s1701_s3 + $0xc4] sm:$0xf] }
  0x2e   : > { %703 = vmatpush.bf16.msrb.mxu0 %v1071_v41  ;;  %465 = vmatmul.bf16.vlgmr.msra.gmra.mxu1 %v883_v49  ;;  %v1111_v25 = vor.u32 %v1203_v23, %v1110_v22  ;;  %v1112_v26 = vld [vmem:[%s1701_s3 + $0xc8] sm:$0xf0]  ;;  %v1030_v28 = vld [vmem:[%s1701_s3 + $0x20] sm:$0xf]  ;;  %v1183_v29 = vld [vmem:[%s1701_s3 + $0x24] sm:$0xf0] }
  0x2f   : > { %731 = vmatpush.bf16.msrb.mxu2 %v1075_v45  ;;  %493 = vmatmul.bf16.vlgmr.msra.gmra.mxu3 %v883_v49  ;;  %v1115_v27 = vor.u32 %v1202_v24, %v1112_v26  ;;  %v1031_v30 = vor.u32 %v1183_v29, %v1030_v28  ;;  %v1182_v31 = vld [vmem:[%s1701_s3 + $0x24] sm:$0xf]  ;;  %v1032_v32 = vld [vmem:[%s1701_s3 + $0x28] sm:$0xf0]  ;;  %v1102_v34 = vld [vmem:[%s1701_s3 + $0xb0] sm:$0xf] }
  0x30   : > { %479 = vmatmul.bf16.vlgmr.msra.gmra.mxu2 %v879_v44  ;;  %717 = vmatpush.bf16.msrb.mxu1 %v1135_v52  ;;  %v1035_v33 = vor.u32 %v1182_v31, %v1032_v32  ;;  %v1201_v35 = vld [vmem:[%s1701_s3 + $0xb4] sm:$0xf0]  ;;  %v1200_v36 = vld [vmem:[%s1701_s3 + $0xb4] sm:$0xf]  ;;  %v1104_v38 = vld [vmem:[%s1701_s3 + $0xb8] sm:$0xf0] }
  0x31   : > { %745 = vmatpush.bf16.msrb.mxu3 %v1139_v54  ;;  %v1103_v37 = vor.u32 %v1201_v35, %v1102_v34  ;;  %v1107_v39 = vor.u32 %v1200_v36, %v1104_v38  ;;  %v1022_v40 = vld [vmem:[%s1701_s3 + $0x10] sm:$0xf]  ;;  %v1181_v41 = vld [vmem:[%s1701_s3 + $0x14] sm:$0xf0]  ;;  %v1180_v42 = vld [vmem:[%s1701_s3 + $0x14] sm:$0xf] }
  0x32   : > { %704 = vmatpush.bf16.msrb.mxu0 %v1063_v53  ;;  %v1023_v43 = vor.u32 %v1181_v41, %v1022_v40  ;;  %v1024_v44 = vld [vmem:[%s1701_s3 + $0x18] sm:$0xf0]  ;;  %v1094_v46 = vld [vmem:[%s1701_s3 + $0xa0] sm:$0xf]  ;;  %v1199_v47 = vld [vmem:[%s1701_s3 + $0xa4] sm:$0xf0] }
  0x33   : > { %732 = vmatpush.bf16.msrb.mxu2 %v1067_v58  ;;  %v1027_v45 = vor.u32 %v1180_v42, %v1024_v44  ;;  %v1198_v48 = vld [vmem:[%s1701_s3 + $0xa4] sm:$0xf]  ;;  %v1095_v49 = vor.u32 %v1199_v47, %v1094_v46  ;;  %v1096_v50 = vld [vmem:[%s1701_s3 + $0xa8] sm:$0xf0]  ;;  %v1014_v52 = vld [vmem:[%s1701_s3] sm:$0xf] }
  0x34   : > { %718 = vmatpush.bf16.msrb.mxu1 %v1127_v0  ;;  %v1099_v51 = vor.u32 %v1198_v48, %v1096_v50  ;;  %v1179_v53 = vld [vmem:[%s1701_s3 + $0x4] sm:$0xf0]  ;;  %v1178_v54 = vld [vmem:[%s1701_s3 + $0x4] sm:$0xf]  ;;  %v1016_v56 = vld [vmem:[%s1701_s3 + $0x8] sm:$0xf0] }
  0x35   : > { %746 = vmatpush.bf16.msrb.mxu3 %v1131_v2  ;;  %v1015_v55 = vor.u32 %v1179_v53, %v1014_v52  ;;  %v1019_v57 = vor.u32 %v1178_v54, %v1016_v56  ;;  %v1086_v58 = vld [vmem:[%s1701_s3 + $0x90] sm:$0xf]  ;;  %v1197_v59 = vld [vmem:[%s1701_s3 + $0x94] sm:$0xf0]  ;;  %v1196_v60 = vld [vmem:[%s1701_s3 + $0x94] sm:$0xf] }
  0x36   : > { %705 = vmatpush.bf16.msrb.mxu0 %v1055_v1  ;;  %v1087_v61 = vor.u32 %v1197_v59, %v1086_v58  ;;  %v1088_v62 = vld [vmem:[%s1701_s3 + $0x98] sm:$0xf0]  ;;  %v1078_v0 = vld [vmem:[%s1701_s3 + $0x80] sm:$0xf]  ;;  %v1195_v1 = vld [vmem:[%s1701_s3 + $0x84] sm:$0xf0] }
  0x37   : > { %733 = vmatpush.bf16.msrb.mxu2 %v1059_v3  ;;  %v1091_v63 = vor.u32 %v1196_v60, %v1088_v62  ;;  %v1194_v2 = vld [vmem:[%s1701_s3 + $0x84] sm:$0xf]  ;;  %v1079_v3 = vor.u32 %v1195_v1, %v1078_v0  ;;  %v1080_v4 = vld [vmem:[%s1701_s3 + $0x88] sm:$0xf0]  ;;  %v267_v6 = vld [vmem:[%s1700_s2] sm:$0x3] }
  0x38   : > { %719 = vmatpush.bf16.msrb.mxu1 %v1119_v13  ;;  %v1083_v5 = vor.u32 %v1194_v2, %v1080_v4  ;;  %v270_v12 = vperm.slane %v267_v6, 1  ;;  %v537_v31 = vld [vmem:[%s1702_s4] sm:$0x3] }
  0x39   : > { %747 = vmatpush.bf16.msrb.mxu3 %v1123_v15  ;;  %v540_v38 = vperm.slane %v537_v31, 1 }
  0x3a   : > { %706 = vmatpush.bf16.msrb.mxu0 %v1047_v8  ;;  %v269_v8 = vperm.slane %v267_v6, 0 }
  0x3b   : > { %734 = vmatpush.bf16.msrb.mxu2 %v1051_v9 }
  0x3c   : > { %720 = vmatpush.bf16.msrb.mxu1 %v1111_v25 }
  0x3d   : > { %748 = vmatpush.bf16.msrb.mxu3 %v1115_v27 }
  0x3e   : > { %707 = vmatpush.bf16.msrb.mxu0 %v1039_v19 }
  0x3f   : > { %735 = vmatpush.bf16.msrb.mxu2 %v1043_v21 }
  0x40   : > { %721 = vmatpush.bf16.msrb.mxu1 %v1103_v37 }
  0x41   : > { %749 = vmatpush.bf16.msrb.mxu3 %v1107_v39 }
  0x42   : > { %708 = vmatpush.bf16.msrb.mxu0 %v1031_v30 }
  0x43   : > { %736 = vmatpush.bf16.msrb.mxu2 %v1035_v33  ;;  %v539_v33 = vperm.slane %v537_v31, 0 }
  0x44   : > { %722 = vmatpush.bf16.msrb.mxu1 %v1095_v49 }
  0x45   : > { %750 = vmatpush.bf16.msrb.mxu3 %v1099_v51 }
  0x46   : > { %709 = vmatpush.bf16.msrb.mxu0 %v1023_v43 }
  0x47   : > { %737 = vmatpush.bf16.msrb.mxu2 %v1027_v45 }
  0x48   : > { %723 = vmatpush.bf16.msrb.mxu1 %v1087_v61 }
  0x49   : > { %751 = vmatpush.bf16.msrb.mxu3 %v1091_v63 }
  0x4a   : > { %710 = vmatpush.bf16.msrb.mxu0 %v1015_v55 }
  0x4b   : > { %738 = vmatpush.bf16.msrb.mxu2 %v1019_v57 }
  0x4c   : > { %724 = vmatpush.bf16.msrb.mxu1 %v1079_v3 }
  0x4d   : > { %752 = vmatpush.bf16.msrb.mxu3 %v1083_v5 }
  0xaa   : > { %v452_v7 = vpop.f32.mrf.mxu0 }
  0xab   : > { %v466_v9 = vpop.f32.mrf.mxu1  ;;  %v453_v10 = vadd.f32 %v452_v7, %v269_v8 }
  0xad   : > { %v467_v15 = vadd.f32 %v466_v9, %v453_v10 }
  0xaf   : > { %v499_v20 = vmul.f32 %v467_v15, %v467_v15 }
  0xb2   : > { %v494_v13 = vpop.f32.mrf.mxu3  ;;  %v454_v14 = vpop.f32.mrf.mxu0 }
  0xb3   : > { %v480_v11 = vpop.f32.mrf.mxu2  ;;  %v455_v16 = vadd.f32 %v454_v14, %v269_v8  ;;  %v468_v17 = vpop.f32.mrf.mxu1 }
  0xb4   : > { %v481_v19 = vadd.f32 %v480_v11, %v270_v12 }
  0xb5   : > { %v1667_v18 = vadd.f32 %v468_v17, %v455_v16 }
  0xb6   : > { %v1671_v24 = vadd.f32 %v494_v13, %v481_v19 }
  0xb7   : > { %v501_v21 = vmul.f32 %v1667_v18, %v1667_v18 }
  0xb8   : > { %v500_v28 = vmul.f32 %v1671_v24, %v1671_v24 }
  0xb9   : > { %v503_v23 = vpack.c.bf16 %v501_v21, %v499_v20 }
  0xba   : > { %v496_v26 = vpop.f32.mrf.mxu3 }
  0xbb   : > { %v482_v22 = vpop.f32.mrf.mxu2  ;;  %711 = vmatmul.bf16.vlgmr.msrb.gmra.mxu0 %v503_v23  ;;  %739 = vmatmul.bf16.vlgmr.msrb.gmra.mxu2 %v503_v23 }
  0xbc   : > { %v483_v25 = vadd.f32 %v482_v22, %v270_v12 }
  0xbe   : > { %v1673_v27 = vadd.f32 %v496_v26, %v483_v25 }
  0xc0   : > { %v502_v29 = vmul.f32 %v1673_v27, %v1673_v27 }
  0xc2   : > { %v504_v30 = vpack.c.bf16 %v502_v29, %v500_v28 }
  0xc4   : > { %725 = vmatmul.bf16.vlgmr.msrb.gmra.mxu1 %v504_v30  ;;  %753 = vmatmul.bf16.vlgmr.msrb.gmra.mxu3 %v504_v30 }
 0x138   : > { %v712_v32 = vpop.f32.mrf.mxu0 }
 0x139   : > { %v713_v34 = vadd.f32 %v712_v32, %v539_v33 }
 0x13e   : > { %v740_v36 = vpop.f32.mrf.mxu2 }
 0x13f   : > { %v741_v40 = vadd.f32 %v740_v36, %v540_v38 }
 0x140   : > { %v714_v39 = vpop.f32.mrf.mxu0 }
 0x141   : > { %v726_v35 = vpop.f32.mrf.mxu1  ;;  %v715_v42 = vadd.f32 %v714_v39, %v539_v33 }
 0x142   : > { %v727_v37 = vadd.f32 %v726_v35, %v713_v34 }
 0x144   : > { %1218 = vrsqrt.f32 %v727_v37  ;;  %vm765_vm1 = vweird.f32 %v727_v37 }
 0x146   : > { %v742_v48 = vpop.f32.mrf.mxu2 }
 0x147   : > { %v754_v41 = vpop.f32.mrf.mxu3  ;;  %v743_v50 = vadd.f32 %v742_v48, %v540_v38 }
 0x148   : > { %v755_v43 = vadd.f32 %v754_v41, %v741_v40 }
 0x149   : > { %v728_v44 = vpop.f32.mrf.mxu1 }
 0x14a   : > { %v1219_v45 = vpop.eup %1218  ;;  %1220 = vrsqrt.f32 %v755_v43  ;;  %v729_v46 = vadd.f32 %v728_v44, %v715_v42  ;;  %vm775_vm4 = vweird.f32 %v755_v43 }
 0x14b   : > { %v760_v47 = vmul.f32 %v1219_v45, %v727_v37  ;;  %vm766_vm0 = vweird.f32 %v1219_v45 }
 0x14c   : > { %1222 = vrsqrt.f32 %v729_v46  ;;  %vm767_vm2 = vmor %vm765_vm1, %vm766_vm0  ;;  %vm785_vm7 = vweird.f32 %v729_v46 }
 0x14d   : > { %v761_v49 = vmul.f32 %v1219_v45, %v760_v47 }
 0x14f   : > { %v762_v51 = vmul.f32 0.5, %v761_v49  ;;  %v756_v52 = vpop.f32.mrf.mxu3 }
 0x150   : > { %v1221_v53 = vpop.eup %1220  ;;  %v757_v54 = vadd.f32 %v756_v52, %v743_v50 }
 0x151   : > { %v763_v55 = vsub.f32 1.5, %v762_v51  ;;  %v770_v56 = vmul.f32 %v1221_v53, %v755_v43  ;;  %vm776_vm3 = vweird.f32 %v1221_v53 }
 0x152   : > { %v1223_v57 = vpop.eup %1222  ;;  %1224 = vrsqrt.f32 %v757_v54  ;;  %vm777_vm6 = vmor %vm775_vm4, %vm776_vm3  ;;  %vm795_vm10 = vweird.f32 %v757_v54 }
 0x153   : > { %v764_v58 = vmul.f32 %v1219_v45, %v763_v55  ;;  %v771_v59 = vmul.f32 %v1221_v53, %v770_v56  ;;  %v780_v60 = vmul.f32 %v1223_v57, %v729_v46  ;;  %vm786_vm5 = vweird.f32 %v1223_v57 }
 0x154   : > { %vm787_vm8 = vmor %vm785_vm7, %vm786_vm5 }
 0x155   : > { %v768_v61 = vsel %vm767_vm2, %v1219_v45, %v764_v58  ;;  %v772_v62 = vmul.f32 0.5, %v771_v59  ;;  %v781_v63 = vmul.f32 %v1223_v57, %v780_v60 }
 0x156   : > { %v799_v0 = vmul.f32 %v768_v61, %v467_v15 }
 0x157   : > { %v773_v1 = vsub.f32 1.5, %v772_v62  ;;  %v782_v2 = vmul.f32 0.5, %v781_v63 }
 0x158   : > { %v1225_v3 = vpop.eup %1224  ;;  %803 = vst [vmem:[%s1686_s9] sm:$0xff] %v799_v0 }
 0x159   : > { %v774_v4 = vmul.f32 %v1221_v53, %v773_v1  ;;  %v783_v5 = vsub.f32 1.5, %v782_v2  ;;  %v790_v6 = vmul.f32 %v1225_v3, %v757_v54  ;;  %vm796_vm9 = vweird.f32 %v1225_v3 }
 0x15a   : > { %vm797_vm11 = vmor %vm795_vm10, %vm796_vm9 }
 0x15b   : > { %v778_v7 = vsel %vm777_vm6, %v1221_v53, %v774_v4  ;;  %v784_v8 = vmul.f32 %v1223_v57, %v783_v5  ;;  %v791_v9 = vmul.f32 %v1225_v3, %v790_v6 }
 0x15c   : > { %v800_v10 = vmul.f32 %v778_v7, %v1671_v24 }
 0x15d   : > { %v788_v11 = vsel %vm787_vm8, %v1223_v57, %v784_v8  ;;  %v792_v12 = vmul.f32 0.5, %v791_v9 }
 0x15e   : > { %804 = vst [vmem:[%s1686_s9 + $0x8] sm:$0xff] %v800_v10  ;;  %v801_v13 = vmul.f32 %v788_v11, %v1667_v18 }
 0x15f   : > { %v793_v14 = vsub.f32 1.5, %v792_v12 }
 0x160   : > { %805 = vst [vmem:[%s1686_s9 + $0x10] sm:$0xff] %v801_v13 }
 0x161   : > { %v794_v15 = vmul.f32 %v1225_v3, %v793_v14 }
 0x163   : > { %v798_v16 = vsel %vm797_vm11, %v1225_v3, %v794_v15 }
 0x164   : > { %v802_v17 = vmul.f32 %v798_v16, %v1673_v27 }
 0x166   : > { %806 = vst [vmem:[%s1686_s9 + $0x18] sm:$0xff] %v802_v17 }
 0x167 PF: > { %s15_s18 = sadd.s32 1, %s1232_s18  }
 0x168   : > { %p12_p4 = scmp.ge.s32.totalorder %s15_s18, 4  }
 0x16a   :  { %14 = sbr.rel (!%p12_p4) target bundleno = 1 (0x1), region = 70 }

// kernel: analysis_net_forward.4
= control target key start
LH: loop header
LB: loop body
LE: loop exit
PB: predicated region body
PF: predicated region fallthrough
CT: control target
= control target key end

     0   :  { %s16165_s1 = inlined_call_operand.vmem [shape: bf16[6400,256], index: 1, kind: input, shape index: {}]   ;;  %s16166_s0 = inlined_call_operand.vmem [shape: bf16[8,6400], index: 0, kind: input, shape index: {}]   ;;  %s16167_s2 = inlined_call_operand.vmem [shape: f32[1,256], index: 2, kind: input, shape index: {}]   ;;  %s16168_s3 = inlined_call_operand.vmem [shape: bf16[256,256], index: 3, kind: input, shape index: {}]   ;;  %s16169_s4 = inlined_call_operand.vmem [shape: f32[1,256], index: 4, kind: input, shape index: {}]   ;;  %s16170_s5 = inlined_call_operand.vmem [shape: f32[8,256], index: 5, kind: output, shape index: {}]  }
   0x1   :  { %v6666_v0 = vld [vmem:[%s16165_s1 + $0x70] sm:$0xf]  ;;  %v9951_v1 = vld [vmem:[%s16165_s1 + $0x74] sm:$0xf0]  ;;  %v6658_v11 = vld [vmem:[%s16165_s1 + $0x60] sm:$0xf] }
   0x2   :  { %v6730_v2 = vld [vmem:[%s16165_s1 + $0xf0] sm:$0xf]  ;;  %v6667_v3 = vor.u32 %v9951_v1, %v6666_v0  ;;  %v9967_v4 = vld [vmem:[%s16165_s1 + $0xf4] sm:$0xf0]  ;;  %v9949_v13 = vld [vmem:[%s16165_s1 + $0x64] sm:$0xf0] }
   0x3   :  { %v6794_v5 = vld [vmem:[%s16165_s1 + $0x170] sm:$0xf]  ;;  %v9983_v6 = vld [vmem:[%s16165_s1 + $0x174] sm:$0xf0]  ;;  %v6731_v7 = vor.u32 %v9967_v4, %v6730_v2  ;;  %v6722_v14 = vld [vmem:[%s16165_s1 + $0xe0] sm:$0xf]  ;;  %v6659_v16 = vor.u32 %v9949_v13, %v6658_v11 }
   0x4   :  { %v6795_v8 = vor.u32 %v9983_v6, %v6794_v5  ;;  %v6858_v9 = vld [vmem:[%s16165_s1 + $0x1f0] sm:$0xf]  ;;  %v9999_v10 = vld [vmem:[%s16165_s1 + $0x1f4] sm:$0xf0]  ;;  %5026 = vmatpush.bf16.msra.mxu0 %v6667_v3  ;;  %v9965_v15 = vld [vmem:[%s16165_s1 + $0xe4] sm:$0xf0] }
   0x5   :  { %v6859_v12 = vor.u32 %v9999_v10, %v6858_v9  ;;  %5039 = vmatpush.bf16.msra.mxu1 %v6731_v7  ;;  %v6723_v17 = vor.u32 %v9965_v15, %v6722_v14  ;;  %v6786_v18 = vld [vmem:[%s16165_s1 + $0x160] sm:$0xf]  ;;  %v9981_v19 = vld [vmem:[%s16165_s1 + $0x164] sm:$0xf0]  ;;  %v6650_v23 = vld [vmem:[%s16165_s1 + $0x50] sm:$0xf] }
   0x6   :  { %5052 = vmatpush.bf16.msra.mxu2 %v6795_v8  ;;  %v6850_v20 = vld [vmem:[%s16165_s1 + $0x1e0] sm:$0xf]  ;;  %v6787_v21 = vor.u32 %v9981_v19, %v6786_v18  ;;  %v9997_v22 = vld [vmem:[%s16165_s1 + $0x1e4] sm:$0xf0]  ;;  %v9947_v24 = vld [vmem:[%s16165_s1 + $0x54] sm:$0xf0] }
   0x7   :  { %5065 = vmatpush.bf16.msra.mxu3 %v6859_v12  ;;  %v6851_v25 = vor.u32 %v9997_v22, %v6850_v20  ;;  %v6714_v26 = vld [vmem:[%s16165_s1 + $0xd0] sm:$0xf]  ;;  %v9963_v27 = vld [vmem:[%s16165_s1 + $0xd4] sm:$0xf0]  ;;  %v6651_v29 = vor.u32 %v9947_v24, %v6650_v23  ;;  %v6642_v35 = vld [vmem:[%s16165_s1 + $0x40] sm:$0xf] }
   0x8   :  { %v6778_v28 = vld [vmem:[%s16165_s1 + $0x150] sm:$0xf]  ;;  %5027 = vmatpush.bf16.msra.mxu0 %v6659_v16  ;;  %v9979_v30 = vld [vmem:[%s16165_s1 + $0x154] sm:$0xf0]  ;;  %v6715_v33 = vor.u32 %v9963_v27, %v6714_v26  ;;  %v9945_v36 = vld [vmem:[%s16165_s1 + $0x44] sm:$0xf0] }
   0x9   :  { %v6842_v31 = vld [vmem:[%s16165_s1 + $0x1d0] sm:$0xf]  ;;  %v9995_v32 = vld [vmem:[%s16165_s1 + $0x1d4] sm:$0xf0]  ;;  %5040 = vmatpush.bf16.msra.mxu1 %v6723_v17  ;;  %v6779_v34 = vor.u32 %v9979_v30, %v6778_v28  ;;  %v6706_v37 = vld [vmem:[%s16165_s1 + $0xc0] sm:$0xf]  ;;  %v6643_v44 = vor.u32 %v9945_v36, %v6642_v35 }
   0xa   :  { %5053 = vmatpush.bf16.msra.mxu2 %v6787_v21  ;;  %v6843_v38 = vor.u32 %v9995_v32, %v6842_v31  ;;  %v9961_v39 = vld [vmem:[%s16165_s1 + $0xc4] sm:$0xf0]  ;;  %v6770_v40 = vld [vmem:[%s16165_s1 + $0x140] sm:$0xf]  ;;  %v6634_v47 = vld [vmem:[%s16165_s1 + $0x30] sm:$0xf] }
   0xb   :  { %5066 = vmatpush.bf16.msra.mxu3 %v6851_v25  ;;  %v9977_v41 = vld [vmem:[%s16165_s1 + $0x144] sm:$0xf0]  ;;  %v6834_v42 = vld [vmem:[%s16165_s1 + $0x1c0] sm:$0xf]  ;;  %v6707_v45 = vor.u32 %v9961_v39, %v6706_v37  ;;  %v9943_v48 = vld [vmem:[%s16165_s1 + $0x34] sm:$0xf0] }
   0xc   :  { %v9993_v43 = vld [vmem:[%s16165_s1 + $0x1c4] sm:$0xf0]  ;;  %5028 = vmatpush.bf16.msra.mxu0 %v6651_v29  ;;  %v6771_v46 = vor.u32 %v9977_v41, %v6770_v40  ;;  %v6698_v49 = vld [vmem:[%s16165_s1 + $0xb0] sm:$0xf]  ;;  %v9959_v51 = vld [vmem:[%s16165_s1 + $0xb4] sm:$0xf0]  ;;  %v6635_v56 = vor.u32 %v9943_v48, %v6634_v47 }
   0xd   :  { %5041 = vmatpush.bf16.msra.mxu1 %v6715_v33  ;;  %v6835_v50 = vor.u32 %v9993_v43, %v6834_v42  ;;  %v6762_v52 = vld [vmem:[%s16165_s1 + $0x130] sm:$0xf]  ;;  %v9975_v53 = vld [vmem:[%s16165_s1 + $0x134] sm:$0xf0]  ;;  %v6699_v57 = vor.u32 %v9959_v51, %v6698_v49  ;;  %v6626_v59 = vld [vmem:[%s16165_s1 + $0x20] sm:$0xf] }
   0xe   :  { %5054 = vmatpush.bf16.msra.mxu2 %v6779_v34  ;;  %v6826_v54 = vld [vmem:[%s16165_s1 + $0x1b0] sm:$0xf]  ;;  %v9991_v55 = vld [vmem:[%s16165_s1 + $0x1b4] sm:$0xf0]  ;;  %v6763_v58 = vor.u32 %v9975_v53, %v6762_v52  ;;  %v9941_v60 = vld [vmem:[%s16165_s1 + $0x24] sm:$0xf0] }
   0xf   :  { %5067 = vmatpush.bf16.msra.mxu3 %v6843_v38  ;;  %v6690_v61 = vld [vmem:[%s16165_s1 + $0xa0] sm:$0xf]  ;;  %v6827_v62 = vor.u32 %v9991_v55, %v6826_v54  ;;  %v9957_v63 = vld [vmem:[%s16165_s1 + $0xa4] sm:$0xf0]  ;;  %v6627_v4 = vor.u32 %v9941_v60, %v6626_v59  ;;  %v6618_v7 = vld [vmem:[%s16165_s1 + $0x10] sm:$0xf] }
  0x10   :  { %5029 = vmatpush.bf16.msra.mxu0 %v6643_v44  ;;  %v6754_v0 = vld [vmem:[%s16165_s1 + $0x120] sm:$0xf]  ;;  %v9973_v1 = vld [vmem:[%s16165_s1 + $0x124] sm:$0xf0]  ;;  %v6691_v5 = vor.u32 %v9957_v63, %v6690_v61  ;;  %v9939_v8 = vld [vmem:[%s16165_s1 + $0x14] sm:$0xf0] }
  0x11   :  { %5042 = vmatpush.bf16.msra.mxu1 %v6707_v45  ;;  %v6818_v2 = vld [vmem:[%s16165_s1 + $0x1a0] sm:$0xf]  ;;  %v9989_v3 = vld [vmem:[%s16165_s1 + $0x1a4] sm:$0xf0]  ;;  %v6755_v6 = vor.u32 %v9973_v1, %v6754_v0  ;;  %v6682_v9 = vld [vmem:[%s16165_s1 + $0x90] sm:$0xf]  ;;  %v6619_v16 = vor.u32 %v9939_v8, %v6618_v7 }
  0x12   :  { %5055 = vmatpush.bf16.msra.mxu2 %v6771_v46  ;;  %v6819_v10 = vor.u32 %v9989_v3, %v6818_v2  ;;  %v9955_v11 = vld [vmem:[%s16165_s1 + $0x94] sm:$0xf0]  ;;  %v6746_v12 = vld [vmem:[%s16165_s1 + $0x110] sm:$0xf]  ;;  %v6610_v17 = vld [vmem:[%s16165_s1] sm:$0xf] }
  0x13   :  { %5068 = vmatpush.bf16.msra.mxu3 %v6835_v50  ;;  %v9971_v13 = vld [vmem:[%s16165_s1 + $0x114] sm:$0xf0]  ;;  %v6810_v14 = vld [vmem:[%s16165_s1 + $0x190] sm:$0xf]  ;;  %v9937_v18 = vld [vmem:[%s16165_s1 + $0x4] sm:$0xf0]  ;;  %v6683_v19 = vor.u32 %v9955_v11, %v6682_v9 }
  0x14   :  { %5030 = vmatpush.bf16.msra.mxu0 %v6635_v56  ;;  %v9987_v15 = vld [vmem:[%s16165_s1 + $0x194] sm:$0xf0]  ;;  %v6747_v20 = vor.u32 %v9971_v13, %v6746_v12  ;;  %v6674_v21 = vld [vmem:[%s16165_s1 + $0x80] sm:$0xf]  ;;  %v9953_v22 = vld [vmem:[%s16165_s1 + $0x84] sm:$0xf0]  ;;  %v6611_v31 = vor.u32 %v9937_v18, %v6610_v17 }
  0x15   :  { %5043 = vmatpush.bf16.msra.mxu1 %v6699_v57  ;;  %v6738_v23 = vld [vmem:[%s16165_s1 + $0x100] sm:$0xf]  ;;  %v6811_v24 = vor.u32 %v9987_v15, %v6810_v14  ;;  %v9969_v25 = vld [vmem:[%s16165_s1 + $0x104] sm:$0xf0]  ;;  %v6922_v28 = vld [vmem:[%s16165_s1 + $0x270] sm:$0xf]  ;;  %v6675_v35 = vor.u32 %v9953_v22, %v6674_v21 }
  0x16   :  { %5056 = vmatpush.bf16.msra.mxu2 %v6763_v58  ;;  %v6802_v26 = vld [vmem:[%s16165_s1 + $0x180] sm:$0xf]  ;;  %v9985_v27 = vld [vmem:[%s16165_s1 + $0x184] sm:$0xf0]  ;;  %v10015_v29 = vld [vmem:[%s16165_s1 + $0x274] sm:$0xf0]  ;;  %v6739_v36 = vor.u32 %v9969_v25, %v6738_v23 }
  0x17   :  { %5069 = vmatpush.bf16.msra.mxu3 %v6827_v62  ;;  %v6986_v30 = vld [vmem:[%s16165_s1 + $0x2f0] sm:$0xf]  ;;  %v10031_v32 = vld [vmem:[%s16165_s1 + $0x2f4] sm:$0xf0]  ;;  %v6803_v39 = vor.u32 %v9985_v27, %v6802_v26  ;;  %v6923_v40 = vor.u32 %v10015_v29, %v6922_v28  ;;  %v6914_v43 = vld [vmem:[%s16165_s1 + $0x260] sm:$0xf] }
  0x18   :  { %5031 = vmatpush.bf16.msra.mxu0 %v6627_v4  ;;  %v7050_v33 = vld [vmem:[%s16165_s1 + $0x370] sm:$0xf]  ;;  %v10047_v34 = vld [vmem:[%s16165_s1 + $0x374] sm:$0xf0]  ;;  %v6987_v41 = vor.u32 %v10031_v32, %v6986_v30  ;;  %v10013_v44 = vld [vmem:[%s16165_s1 + $0x264] sm:$0xf0] }
  0x19   :  { %5044 = vmatpush.bf16.msra.mxu1 %v6691_v5  ;;  %v7114_v37 = vld [vmem:[%s16165_s1 + $0x3f0] sm:$0xf]  ;;  %v10063_v38 = vld [vmem:[%s16165_s1 + $0x3f4] sm:$0xf0]  ;;  %v7051_v42 = vor.u32 %v10047_v34, %v7050_v33  ;;  %v6978_v45 = vld [vmem:[%s16165_s1 + $0x2e0] sm:$0xf]  ;;  %v6915_v52 = vor.u32 %v10013_v44, %v6914_v43 }
  0x1a   :  { %5057 = vmatpush.bf16.msra.mxu2 %v6755_v6  ;;  %v7115_v46 = vor.u32 %v10063_v38, %v7114_v37  ;;  %v10029_v47 = vld [vmem:[%s16165_s1 + $0x2e4] sm:$0xf0]  ;;  %v7042_v48 = vld [vmem:[%s16165_s1 + $0x360] sm:$0xf]  ;;  %v6906_v53 = vld [vmem:[%s16165_s1 + $0x250] sm:$0xf] }
  0x1b   :  { %5070 = vmatpush.bf16.msra.mxu3 %v6819_v10  ;;  %v10045_v49 = vld [vmem:[%s16165_s1 + $0x364] sm:$0xf0]  ;;  %v7106_v50 = vld [vmem:[%s16165_s1 + $0x3e0] sm:$0xf]  ;;  %v6979_v54 = vor.u32 %v10029_v47, %v6978_v45  ;;  %v10011_v56 = vld [vmem:[%s16165_s1 + $0x254] sm:$0xf0] }
  0x1c   :  { %5032 = vmatpush.bf16.msra.mxu0 %v6619_v16  ;;  %v10061_v51 = vld [vmem:[%s16165_s1 + $0x3e4] sm:$0xf0]  ;;  %v7043_v55 = vor.u32 %v10045_v49, %v7042_v48  ;;  %v6970_v57 = vld [vmem:[%s16165_s1 + $0x2d0] sm:$0xf]  ;;  %v10027_v58 = vld [vmem:[%s16165_s1 + $0x2d4] sm:$0xf0]  ;;  %v6907_v0 = vor.u32 %v10011_v56, %v6906_v53 }
  0x1d   :  { %5045 = vmatpush.bf16.msra.mxu1 %v6683_v19  ;;  %v7107_v59 = vor.u32 %v10061_v51, %v7106_v50  ;;  %v7034_v60 = vld [vmem:[%s16165_s1 + $0x350] sm:$0xf]  ;;  %v10043_v61 = vld [vmem:[%s16165_s1 + $0x354] sm:$0xf0]  ;;  %v6971_v1 = vor.u32 %v10027_v58, %v6970_v57  ;;  %v21_v2 = vld [vmem:[%s16166_s0 + $0x8] sm:$0xff] }
  0x1e   :  { %5058 = vmatpush.bf16.msra.mxu2 %v6747_v20  ;;  %v7098_v62 = vld [vmem:[%s16165_s1 + $0x3d0] sm:$0xf]  ;;  %v10059_v63 = vld [vmem:[%s16165_s1 + $0x3d4] sm:$0xf0]  ;;  %v20_v3 = vld [vmem:[%s16166_s0] sm:$0xff]  ;;  %v7035_v4 = vor.u32 %v10043_v61, %v7034_v60  ;;  %v878_v8 = vunpack.c.l.b16 %v21_v2  ;;  %v879_v10 = vunpack.c.h.b16 %v21_v2 }
  0x1f   :  { %5071 = vmatpush.bf16.msra.mxu3 %v6811_v24  ;;  %v6898_v5 = vld [vmem:[%s16165_s1 + $0x240] sm:$0xf]  ;;  %v10009_v6 = vld [vmem:[%s16165_s1 + $0x244] sm:$0xf0]  ;;  %v876_v9 = vunpack.c.l.b16 %v20_v3  ;;  %v7099_v11 = vor.u32 %v10059_v63, %v7098_v62  ;;  %v877_v15 = vunpack.c.h.b16 %v20_v3  ;;  %v6890_v25 = vld [vmem:[%s16165_s1 + $0x230] sm:$0xf] }
  0x20   :  { %5033 = vmatpush.bf16.msra.mxu0 %v6611_v31  ;;  %v6962_v7 = vld [vmem:[%s16165_s1 + $0x2c0] sm:$0xf]  ;;  %v10025_v12 = vld [vmem:[%s16165_s1 + $0x2c4] sm:$0xf0]  ;;  %v11097_v18 = vpack.c.b16 %v878_v8, %v878_v8  ;;  %v11101_v20 = vpack.c.b16 %v879_v10, %v879_v10  ;;  %v6899_v21 = vor.u32 %v10009_v6, %v6898_v5  ;;  %v10007_v26 = vld [vmem:[%s16165_s1 + $0x234] sm:$0xf0] }
  0x21   :  { %5046 = vmatpush.bf16.msra.mxu1 %v6675_v35  ;;  %v7026_v13 = vld [vmem:[%s16165_s1 + $0x340] sm:$0xf]  ;;  %v10041_v14 = vld [vmem:[%s16165_s1 + $0x344] sm:$0xf0]  ;;  %v11099_v19 = vpack.c.b16 %v876_v9, %v876_v9  ;;  %v11103_v22 = vpack.c.b16 %v877_v15, %v877_v15  ;;  %v6963_v23 = vor.u32 %v10025_v12, %v6962_v7  ;;  %v6954_v27 = vld [vmem:[%s16165_s1 + $0x2b0] sm:$0xf]  ;;  %v6891_v34 = vor.u32 %v10007_v26, %v6890_v25 }
  0x22   :  { %5059 = vmatpush.bf16.msra.mxu2 %v6739_v36  ;;  %v7090_v16 = vld [vmem:[%s16165_s1 + $0x3c0] sm:$0xf]  ;;  %v10057_v17 = vld [vmem:[%s16165_s1 + $0x3c4] sm:$0xf0]  ;;  %v7027_v24 = vor.u32 %v10041_v14, %v7026_v13  ;;  %v10023_v29 = vld [vmem:[%s16165_s1 + $0x2b4] sm:$0xf0] }
  0x23   :  { %5072 = vmatpush.bf16.msra.mxu3 %v6803_v39  ;;  %v7091_v28 = vor.u32 %v10057_v17, %v7090_v16  ;;  %v7018_v30 = vld [vmem:[%s16165_s1 + $0x330] sm:$0xf]  ;;  %v10039_v31 = vld [vmem:[%s16165_s1 + $0x334] sm:$0xf0]  ;;  %5034 = vmatmul.bf16.vlgmr.msra.gmra.mxu0 %v11099_v19  ;;  %v6955_v35 = vor.u32 %v10023_v29, %v6954_v27  ;;  %v6882_v37 = vld [vmem:[%s16165_s1 + $0x220] sm:$0xf] }
  0x24   :  { %5078 = vmatpush.bf16.msrb.mxu0 %v6923_v40  ;;  %v7082_v32 = vld [vmem:[%s16165_s1 + $0x3b0] sm:$0xf]  ;;  %v10055_v33 = vld [vmem:[%s16165_s1 + $0x3b4] sm:$0xf0]  ;;  %5047 = vmatmul.bf16.vlgmr.msra.gmra.mxu1 %v11103_v22  ;;  %v7019_v36 = vor.u32 %v10039_v31, %v7018_v30  ;;  %v10005_v38 = vld [vmem:[%s16165_s1 + $0x224] sm:$0xf0] }
  0x25   :  { %5091 = vmatpush.bf16.msrb.mxu1 %v6987_v41  ;;  %5060 = vmatmul.bf16.vlgmr.msra.gmra.mxu2 %v11097_v18  ;;  %v6946_v39 = vld [vmem:[%s16165_s1 + $0x2a0] sm:$0xf]  ;;  %v7083_v40 = vor.u32 %v10055_v33, %v7082_v32  ;;  %v10021_v41 = vld [vmem:[%s16165_s1 + $0x2a4] sm:$0xf0]  ;;  %v6874_v49 = vld [vmem:[%s16165_s1 + $0x210] sm:$0xf] }
  0x26   :  { %5104 = vmatpush.bf16.msrb.mxu2 %v7051_v42  ;;  %5073 = vmatmul.bf16.vlgmr.msra.gmra.mxu3 %v11101_v20  ;;  %v7010_v42 = vld [vmem:[%s16165_s1 + $0x320] sm:$0xf]  ;;  %v10037_v43 = vld [vmem:[%s16165_s1 + $0x324] sm:$0xf0]  ;;  %v6947_v47 = vor.u32 %v10021_v41, %v6946_v39  ;;  %v10003_v50 = vld [vmem:[%s16165_s1 + $0x214] sm:$0xf0] }
  0x27   :  { %5117 = vmatpush.bf16.msrb.mxu3 %v7115_v46  ;;  %v7074_v44 = vld [vmem:[%s16165_s1 + $0x3a0] sm:$0xf]  ;;  %v10053_v45 = vld [vmem:[%s16165_s1 + $0x3a4] sm:$0xf0]  ;;  %v6883_v46 = vor.u32 %v10005_v38, %v6882_v37  ;;  %v7011_v48 = vor.u32 %v10037_v43, %v7010_v42  ;;  %v6938_v51 = vld [vmem:[%s16165_s1 + $0x290] sm:$0xf] }
  0x28   :  { %5079 = vmatpush.bf16.msrb.mxu0 %v6915_v52  ;;  %v7075_v52 = vor.u32 %v10053_v45, %v7074_v44  ;;  %v10019_v53 = vld [vmem:[%s16165_s1 + $0x294] sm:$0xf0]  ;;  %v7066_v56 = vld [vmem:[%s16165_s1 + $0x390] sm:$0xf]  ;;  %v6866_v58 = vld [vmem:[%s16165_s1 + $0x200] sm:$0xf] }
  0x29   :  { %5092 = vmatpush.bf16.msrb.mxu1 %v6979_v54  ;;  %v7002_v54 = vld [vmem:[%s16165_s1 + $0x310] sm:$0xf]  ;;  %v10051_v57 = vld [vmem:[%s16165_s1 + $0x394] sm:$0xf0]  ;;  %v10001_v60 = vld [vmem:[%s16165_s1 + $0x204] sm:$0xf0]  ;;  %v6939_v63 = vor.u32 %v10019_v53, %v6938_v51 }
  0x2a   :  { %5105 = vmatpush.bf16.msrb.mxu2 %v7043_v55  ;;  %v10035_v55 = vld [vmem:[%s16165_s1 + $0x314] sm:$0xf0]  ;;  %v6930_v61 = vld [vmem:[%s16165_s1 + $0x280] sm:$0xf]  ;;  %v10017_v62 = vld [vmem:[%s16165_s1 + $0x284] sm:$0xf0] }
  0x2b   :  { %5118 = vmatpush.bf16.msrb.mxu3 %v7107_v59  ;;  %v6875_v59 = vor.u32 %v10003_v50, %v6874_v49  ;;  %v10033_v2 = vld [vmem:[%s16165_s1 + $0x304] sm:$0xf0]  ;;  %v23_v3 = vld [vmem:[%s16166_s0 + $0x18] sm:$0xff]  ;;  %v7058_v5 = vld [vmem:[%s16165_s1 + $0x380] sm:$0xf]  ;;  %v6931_v16 = vor.u32 %v10017_v62, %v6930_v61 }
  0x2c   :  { %5080 = vmatpush.bf16.msrb.mxu0 %v6907_v0  ;;  %v7003_v0 = vor.u32 %v10035_v55, %v7002_v54  ;;  %v10049_v6 = vld [vmem:[%s16165_s1 + $0x384] sm:$0xf0]  ;;  %v22_v7 = vld [vmem:[%s16166_s0 + $0x10] sm:$0xff]  ;;  %v10079_v9 = vld [vmem:[%s16165_s1 + $0x474] sm:$0xf0]  ;;  %v882_v15 = vunpack.c.l.b16 %v23_v3  ;;  %v883_v25 = vunpack.c.h.b16 %v23_v3 }
  0x2d   :  { %5093 = vmatpush.bf16.msrb.mxu1 %v6971_v1  ;;  %v6994_v1 = vld [vmem:[%s16165_s1 + $0x300] sm:$0xf]  ;;  %v7178_v8 = vld [vmem:[%s16165_s1 + $0x470] sm:$0xf]  ;;  %v10095_v12 = vld [vmem:[%s16165_s1 + $0x4f4] sm:$0xf0]  ;;  %v7059_v26 = vor.u32 %v10049_v6, %v7058_v5 }
  0x2e   :  { %5106 = vmatpush.bf16.msrb.mxu2 %v7035_v4  ;;  %v7067_v4 = vor.u32 %v10051_v57, %v7066_v56  ;;  %v7242_v10 = vld [vmem:[%s16165_s1 + $0x4f0] sm:$0xf]  ;;  %v10111_v14 = vld [vmem:[%s16165_s1 + $0x574] sm:$0xf0]  ;;  %v6995_v17 = vor.u32 %v10033_v2, %v6994_v1  ;;  %v7179_v27 = vor.u32 %v10079_v9, %v7178_v8  ;;  %v7170_v31 = vld [vmem:[%s16165_s1 + $0x460] sm:$0xf]  ;;  %v11253_v38 = vpack.c.b16 %v882_v15, %v882_v15 }
  0x2f   :  { %5119 = vmatpush.bf16.msrb.mxu3 %v7099_v11  ;;  %v6867_v11 = vor.u32 %v10001_v60, %v6866_v58  ;;  %v7306_v13 = vld [vmem:[%s16165_s1 + $0x570] sm:$0xf]  ;;  %v7243_v29 = vor.u32 %v10095_v12, %v7242_v10  ;;  %v10077_v32 = vld [vmem:[%s16165_s1 + $0x464] sm:$0xf0]  ;;  %v7234_v33 = vld [vmem:[%s16165_s1 + $0x4e0] sm:$0xf]  ;;  %v11263_v42 = vpack.c.b16 %v883_v25, %v883_v25 }
  0x30   :  { %5081 = vmatpush.bf16.msrb.mxu0 %v6899_v21  ;;  %v7370_v21 = vld [vmem:[%s16165_s1 + $0x5f0] sm:$0xf]  ;;  %v7307_v30 = vor.u32 %v10111_v14, %v7306_v13  ;;  %v10109_v37 = vld [vmem:[%s16165_s1 + $0x564] sm:$0xf0]  ;;  %v7362_v39 = vld [vmem:[%s16165_s1 + $0x5e0] sm:$0xf]  ;;  %v7171_v43 = vor.u32 %v10077_v32, %v7170_v31 }
  0x31   :  { %5094 = vmatpush.bf16.msrb.mxu1 %v6963_v23  ;;  %v10127_v23 = vld [vmem:[%s16165_s1 + $0x5f4] sm:$0xf0]  ;;  %v7226_v49 = vld [vmem:[%s16165_s1 + $0x4d0] sm:$0xf]  ;;  %v10073_v60 = vld [vmem:[%s16165_s1 + $0x444] sm:$0xf0] }
  0x32   :  { %5107 = vmatpush.bf16.msrb.mxu2 %v7027_v24  ;;  %v880_v24 = vunpack.c.l.b16 %v22_v7  ;;  %v10091_v51 = vld [vmem:[%s16165_s1 + $0x4d4] sm:$0xf0]  ;;  %v7354_v54 = vld [vmem:[%s16165_s1 + $0x5d0] sm:$0xf]  ;;  %v7218_v61 = vld [vmem:[%s16165_s1 + $0x4c0] sm:$0xf] }
  0x33   :  { %5120 = vmatpush.bf16.msrb.mxu3 %v7091_v28  ;;  %v881_v28 = vunpack.c.h.b16 %v22_v7  ;;  %v10107_v53 = vld [vmem:[%s16165_s1 + $0x554] sm:$0xf0]  ;;  %v7227_v57 = vor.u32 %v10091_v51, %v7226_v49  ;;  %v10105_v1 = vld [vmem:[%s16165_s1 + $0x544] sm:$0xf0]  ;;  %v7346_v2 = vld [vmem:[%s16165_s1 + $0x5c0] sm:$0xf] }
  0x34   :  { %5082 = vmatpush.bf16.msrb.mxu0 %v6891_v34  ;;  %v7371_v34 = vor.u32 %v10127_v23, %v7370_v21  ;;  %v11261_v41 = vpack.c.b16 %v880_v24, %v880_v24  ;;  %v10123_v55 = vld [vmem:[%s16165_s1 + $0x5d4] sm:$0xf0]  ;;  %v10121_v3 = vld [vmem:[%s16165_s1 + $0x5c4] sm:$0xf0]  ;;  %v7146_v7 = vld [vmem:[%s16165_s1 + $0x430] sm:$0xf] }
  0x35   :  { %5095 = vmatpush.bf16.msrb.mxu1 %v6955_v35  ;;  %v10093_v35 = vld [vmem:[%s16165_s1 + $0x4e4] sm:$0xf0]  ;;  %v11265_v44 = vpack.c.b16 %v881_v28, %v881_v28  ;;  %v7355_v62 = vor.u32 %v10123_v55, %v7354_v54  ;;  %v10071_v8 = vld [vmem:[%s16165_s1 + $0x434] sm:$0xf0]  ;;  %v7210_v9 = vld [vmem:[%s16165_s1 + $0x4b0] sm:$0xf]  ;;  %v7347_v10 = vor.u32 %v10121_v3, %v7346_v2 }
  0x36   :  { %5108 = vmatpush.bf16.msrb.mxu2 %v7019_v36  ;;  %v7298_v36 = vld [vmem:[%s16165_s1 + $0x560] sm:$0xf]  ;;  %v7235_v45 = vor.u32 %v10093_v35, %v7234_v33  ;;  %v7274_v12 = vld [vmem:[%s16165_s1 + $0x530] sm:$0xf]  ;;  %v10103_v13 = vld [vmem:[%s16165_s1 + $0x534] sm:$0xf0] }
  0x37   :  { %5121 = vmatpush.bf16.msrb.mxu3 %v7083_v40  ;;  %v10125_v40 = vld [vmem:[%s16165_s1 + $0x5e4] sm:$0xf0]  ;;  %v7338_v14 = vld [vmem:[%s16165_s1 + $0x5b0] sm:$0xf]  ;;  %v10119_v15 = vld [vmem:[%s16165_s1 + $0x5b4] sm:$0xf0]  ;;  %v7275_v21 = vor.u32 %v10103_v13, %v7274_v12 }
  0x38   :  { %5083 = vmatpush.bf16.msrb.mxu0 %v6883_v46  ;;  %v7299_v46 = vor.u32 %v10109_v37, %v7298_v36  ;;  %v7363_v50 = vor.u32 %v10125_v40, %v7362_v39  ;;  %v7138_v23 = vld [vmem:[%s16165_s1 + $0x420] sm:$0xf]  ;;  %v10069_v24 = vld [vmem:[%s16165_s1 + $0x424] sm:$0xf0]  ;;  %v7130_v35 = vld [vmem:[%s16165_s1 + $0x410] sm:$0xf] }
  0x39   :  { %5096 = vmatpush.bf16.msrb.mxu1 %v6947_v47  ;;  %v7162_v47 = vld [vmem:[%s16165_s1 + $0x450] sm:$0xf]  ;;  %v7202_v25 = vld [vmem:[%s16165_s1 + $0x4a0] sm:$0xf]  ;;  %v10117_v31 = vld [vmem:[%s16165_s1 + $0x5a4] sm:$0xf0]  ;;  %v7139_v32 = vor.u32 %v10069_v24, %v7138_v23 }
  0x3a   :  { %5109 = vmatpush.bf16.msrb.mxu2 %v7011_v48  ;;  %v10075_v48 = vld [vmem:[%s16165_s1 + $0x454] sm:$0xf0]  ;;  %v7266_v28 = vld [vmem:[%s16165_s1 + $0x520] sm:$0xf]  ;;  %v7194_v37 = vld [vmem:[%s16165_s1 + $0x490] sm:$0xf] }
  0x3b   :  { %5122 = vmatpush.bf16.msrb.mxu3 %v7075_v52  ;;  %v7290_v52 = vld [vmem:[%s16165_s1 + $0x550] sm:$0xf]  ;;  %v7163_v56 = vor.u32 %v10075_v48, %v7162_v47  ;;  %v10067_v36 = vld [vmem:[%s16165_s1 + $0x414] sm:$0xf0]  ;;  %v7122_v48 = vld [vmem:[%s16165_s1 + $0x400] sm:$0xf] }
  0x3c   :  { %5084 = vmatpush.bf16.msrb.mxu0 %v6875_v59  ;;  %v7291_v58 = vor.u32 %v10107_v53, %v7290_v52  ;;  %v7154_v59 = vld [vmem:[%s16165_s1 + $0x440] sm:$0xf]  ;;  %v10083_v40 = vld [vmem:[%s16165_s1 + $0x494] sm:$0xf0]  ;;  %v7131_v49 = vor.u32 %v10067_v36, %v7130_v35  ;;  %v10081_v52 = vld [vmem:[%s16165_s1 + $0x484] sm:$0xf0] }
  0x3d   :  { %5097 = vmatpush.bf16.msrb.mxu1 %v6939_v63  ;;  %v10089_v63 = vld [vmem:[%s16165_s1 + $0x4c4] sm:$0xf0]  ;;  %v10115_v47 = vld [vmem:[%s16165_s1 + $0x594] sm:$0xf0]  ;;  %v7186_v51 = vld [vmem:[%s16165_s1 + $0x480] sm:$0xf]  ;;  %v7195_v53 = vor.u32 %v10083_v40, %v7194_v37 }
  0x3e   :  { %5110 = vmatpush.bf16.msrb.mxu2 %v7003_v0  ;;  %v7282_v0 = vld [vmem:[%s16165_s1 + $0x540] sm:$0xf]  ;;  %v7219_v5 = vor.u32 %v10089_v63, %v7218_v61  ;;  %v25_v61 = vld [vmem:[%s16166_s0 + $0x28] sm:$0xff]  ;;  %v10143_v63 = vld [vmem:[%s16165_s1 + $0x674] sm:$0xf0] }
  0x3f   :  { %5123 = vmatpush.bf16.msrb.mxu3 %v7067_v4  ;;  %v7155_v4 = vor.u32 %v10073_v60, %v7154_v59  ;;  %v7283_v6 = vor.u32 %v10105_v1, %v7282_v0  ;;  %v7250_v55 = vld [vmem:[%s16165_s1 + $0x500] sm:$0xf]  ;;  %v10113_v60 = vld [vmem:[%s16165_s1 + $0x584] sm:$0xf0]  ;;  %v7498_v0 = vld [vmem:[%s16165_s1 + $0x6f0] sm:$0xf] }
  0x40   :  { %5085 = vmatpush.bf16.msrb.mxu0 %v6867_v11  ;;  %v10087_v11 = vld [vmem:[%s16165_s1 + $0x4b4] sm:$0xf0]  ;;  %v7314_v59 = vld [vmem:[%s16165_s1 + $0x580] sm:$0xf]  ;;  %v7562_v3 = vld [vmem:[%s16165_s1 + $0x770] sm:$0xf] }
  0x41   :  { %5098 = vmatpush.bf16.msrb.mxu1 %v6931_v16  ;;  %v7147_v16 = vor.u32 %v10071_v8, %v7146_v7  ;;  %v10159_v2 = vld [vmem:[%s16165_s1 + $0x6f4] sm:$0xf0]  ;;  %v7626_v8 = vld [vmem:[%s16165_s1 + $0x7f0] sm:$0xf]  ;;  %v7315_v12 = vor.u32 %v10113_v60, %v7314_v59  ;;  %v7490_v23 = vld [vmem:[%s16165_s1 + $0x6e0] sm:$0xf] }
  0x42   :  { %5111 = vmatpush.bf16.msrb.mxu2 %v6995_v17  ;;  %v7211_v17 = vor.u32 %v10087_v11, %v7210_v9  ;;  %v10191_v9 = vld [vmem:[%s16165_s1 + $0x7f4] sm:$0xf0]  ;;  %v7418_v37 = vld [vmem:[%s16165_s1 + $0x650] sm:$0xf]  ;;  %v10169_v59 = vld [vmem:[%s16165_s1 + $0x744] sm:$0xf0] }
  0x43   :  { %5124 = vmatpush.bf16.msrb.mxu3 %v7059_v26  ;;  %5086 = vmatmul.bf16.vlgmr.msrb.gmra.mxu0 %v11261_v41  ;;  %v7339_v26 = vor.u32 %v10119_v15, %v7338_v14  ;;  %v887_v14 = vunpack.c.h.b16 %v25_v61  ;;  %v7499_v15 = vor.u32 %v10159_v2, %v7498_v0  ;;  %v7627_v24 = vor.u32 %v10191_v9, %v7626_v8  ;;  %v7482_v40 = vld [vmem:[%s16165_s1 + $0x6d0] sm:$0xf]  ;;  %v7602_v60 = vld [vmem:[%s16165_s1 + $0x7c0] sm:$0xf]  ;;  %v10135_v2 = vld [vmem:[%s16165_s1 + $0x634] sm:$0xf0] }
  0x44   :  { %5130 = vmatpush.bf16.msra.mxu0 %v7179_v27  ;;  %5099 = vmatmul.bf16.vlgmr.msrb.gmra.mxu1 %v11265_v44  ;;  %v10085_v27 = vld [vmem:[%s16165_s1 + $0x4a4] sm:$0xf0]  ;;  %v7594_v8 = vld [vmem:[%s16165_s1 + $0x7b0] sm:$0xf]  ;;  %v10183_v9 = vld [vmem:[%s16165_s1 + $0x7b4] sm:$0xf0] }
  0x45   :  { %5143 = vmatpush.bf16.msra.mxu1 %v7243_v29  ;;  %5112 = vmatmul.bf16.vlgmr.msrb.gmra.mxu2 %v11253_v38  ;;  %v10101_v29 = vld [vmem:[%s16165_s1 + $0x524] sm:$0xf0]  ;;  %v7203_v33 = vor.u32 %v10085_v27, %v7202_v25  ;;  %v7554_v27 = vld [vmem:[%s16165_s1 + $0x760] sm:$0xf] }
  0x46   :  { %5156 = vmatpush.bf16.msra.mxu2 %v7307_v30  ;;  %5125 = vmatmul.bf16.vlgmr.msrb.gmra.mxu3 %v11263_v42  ;;  %v7330_v30 = vld [vmem:[%s16165_s1 + $0x5a0] sm:$0xf] }
  0x47   :  { %5169 = vmatpush.bf16.msra.mxu3 %v7371_v34  ;;  %v7267_v34 = vor.u32 %v10101_v29, %v7266_v28  ;;  %v7331_v39 = vor.u32 %v10117_v31, %v7330_v30  ;;  %v10173_v28 = vld [vmem:[%s16165_s1 + $0x764] sm:$0xf0]  ;;  %v7618_v31 = vld [vmem:[%s16165_s1 + $0x7e0] sm:$0xf] }
  0x48   :  { %5131 = vmatpush.bf16.msra.mxu0 %v7171_v43  ;;  %v7258_v43 = vld [vmem:[%s16165_s1 + $0x510] sm:$0xf]  ;;  %v7555_v36 = vor.u32 %v10173_v28, %v7554_v27 }
  0x49   :  { %5144 = vmatpush.bf16.msra.mxu1 %v7235_v45  ;;  %v10099_v45 = vld [vmem:[%s16165_s1 + $0x514] sm:$0xf0] }
  0x4a   :  { %5157 = vmatpush.bf16.msra.mxu2 %v7299_v46  ;;  %v7322_v46 = vld [vmem:[%s16165_s1 + $0x590] sm:$0xf]  ;;  %v7259_v54 = vor.u32 %v10099_v45, %v7258_v43  ;;  %v10155_v45 = vld [vmem:[%s16165_s1 + $0x6d4] sm:$0xf0] }
  0x4b   :  { %5170 = vmatpush.bf16.msra.mxu3 %v7363_v50  ;;  %v10065_v50 = vld [vmem:[%s16165_s1 + $0x404] sm:$0xf0] }
  0x4c   :  { %5132 = vmatpush.bf16.msra.mxu0 %v7163_v56  ;;  %v10097_v56 = vld [vmem:[%s16165_s1 + $0x504] sm:$0xf0]  ;;  %v7123_v1 = vor.u32 %v10065_v50, %v7122_v48  ;;  %v7610_v48 = vld [vmem:[%s16165_s1 + $0x7d0] sm:$0xf] }
  0x4d   :  { %5145 = vmatpush.bf16.msra.mxu1 %v7227_v57  ;;  %v24_v57 = vld [vmem:[%s16166_s0 + $0x20] sm:$0xff]  ;;  %v7251_v7 = vor.u32 %v10097_v56, %v7250_v55 }
  0x4e   :  { %5158 = vmatpush.bf16.msra.mxu2 %v7291_v58  ;;  %v7323_v58 = vor.u32 %v10115_v47, %v7322_v46  ;;  %v885_v11 = vunpack.c.h.b16 %v24_v57  ;;  %v7546_v46 = vld [vmem:[%s16165_s1 + $0x750] sm:$0xf]  ;;  %v10171_v47 = vld [vmem:[%s16165_s1 + $0x754] sm:$0xf0]  ;;  %v7474_v55 = vld [vmem:[%s16165_s1 + $0x6c0] sm:$0xf] }
  0x4f   :  { %5171 = vmatpush.bf16.msra.mxu3 %v7355_v62  ;;  %v7434_v62 = vld [vmem:[%s16165_s1 + $0x670] sm:$0xf] }
  0x50   :  { %5133 = vmatpush.bf16.msra.mxu0 %v7155_v4  ;;  %v10175_v4 = vld [vmem:[%s16165_s1 + $0x774] sm:$0xf0]  ;;  %v7435_v13 = vor.u32 %v10143_v63, %v7434_v62  ;;  %v11467_v30 = vpack.c.b16 %v885_v11, %v885_v11 }
  0x51   :  { %5146 = vmatpush.bf16.msra.mxu1 %v7219_v5  ;;  %v884_v5 = vunpack.c.l.b16 %v24_v57  ;;  %v10153_v57 = vld [vmem:[%s16165_s1 + $0x6c4] sm:$0xf0] }
  0x52   :  { %5159 = vmatpush.bf16.msra.mxu2 %v7283_v6  ;;  %v7187_v6 = vor.u32 %v10081_v52, %v7186_v51  ;;  %v7483_v51 = vor.u32 %v10155_v45, %v7482_v40  ;;  %v7547_v52 = vor.u32 %v10171_v47, %v7546_v46  ;;  %v7475_v63 = vor.u32 %v10153_v57, %v7474_v55  ;;  %v10163_v40 = vld [vmem:[%s16165_s1 + $0x714] sm:$0xf0]  ;;  %v7378_v46 = vld [vmem:[%s16165_s1 + $0x600] sm:$0xf]  ;;  %v26_v55 = vld [vmem:[%s16166_s0 + $0x30] sm:$0xff] }
  0x53   :  { %5172 = vmatpush.bf16.msra.mxu3 %v7347_v10  ;;  %v886_v10 = vunpack.c.l.b16 %v25_v61  ;;  %v11454_v25 = vpack.c.b16 %v884_v5, %v884_v5  ;;  %v10185_v61 = vld [vmem:[%s16165_s1 + $0x7c4] sm:$0xf0]  ;;  %v10151_v5 = vld [vmem:[%s16165_s1 + $0x6b4] sm:$0xf0]  ;;  %v7570_v57 = vld [vmem:[%s16165_s1 + $0x780] sm:$0xf] }
  0x54   :  { %5134 = vmatpush.bf16.msra.mxu0 %v7147_v16  ;;  %v7563_v16 = vor.u32 %v10175_v4, %v7562_v3  ;;  %v7466_v3 = vld [vmem:[%s16165_s1 + $0x6b0] sm:$0xf]  ;;  %v7603_v4 = vor.u32 %v10185_v61, %v7602_v60  ;;  %v10179_v45 = vld [vmem:[%s16165_s1 + $0x794] sm:$0xf0] }
  0x55   :  { %5147 = vmatpush.bf16.msra.mxu1 %v7211_v17  ;;  %v7426_v17 = vld [vmem:[%s16165_s1 + $0x660] sm:$0xf]  ;;  %v11465_v29 = vpack.c.b16 %v886_v10, %v886_v10  ;;  %v7467_v11 = vor.u32 %v10151_v5, %v7466_v3  ;;  %v7690_v60 = vld [vmem:[%s16165_s1 + $0x870] sm:$0xf]  ;;  %v10207_v61 = vld [vmem:[%s16165_s1 + $0x874] sm:$0xf0]  ;;  %v888_v3 = vunpack.c.l.b16 %v26_v55 }
  0x56   :  { %5160 = vmatpush.bf16.msra.mxu2 %v7275_v21  ;;  %v10141_v21 = vld [vmem:[%s16165_s1 + $0x664] sm:$0xf0] }
  0x57   :  { %5173 = vmatpush.bf16.msra.mxu3 %v7339_v26  ;;  %v10157_v26 = vld [vmem:[%s16165_s1 + $0x6e4] sm:$0xf0] }
  0x58   :  { %5135 = vmatpush.bf16.msra.mxu0 %v7139_v32  ;;  %v10189_v32 = vld [vmem:[%s16165_s1 + $0x7e4] sm:$0xf0]  ;;  %v7491_v35 = vor.u32 %v10157_v26, %v7490_v23 }
  0x59   :  { %5148 = vmatpush.bf16.msra.mxu1 %v7203_v33  ;;  %v11475_v33 = vpack.c.b16 %v887_v14, %v887_v14  ;;  %v7619_v43 = vor.u32 %v10189_v32, %v7618_v31  ;;  %v10133_v14 = vld [vmem:[%s16165_s1 + $0x624] sm:$0xf0]  ;;  %v7386_v32 = vld [vmem:[%s16165_s1 + $0x610] sm:$0xf] }
  0x5a   :  { %5161 = vmatpush.bf16.msra.mxu2 %v7267_v34  ;;  %v7427_v34 = vor.u32 %v10141_v21, %v7426_v17  ;;  %v10149_v17 = vld [vmem:[%s16165_s1 + $0x6a4] sm:$0xf0]  ;;  %v7522_v21 = vld [vmem:[%s16165_s1 + $0x720] sm:$0xf] }
  0x5b   :  { %5174 = vmatpush.bf16.msra.mxu3 %v7331_v39  ;;  %v10139_v39 = vld [vmem:[%s16165_s1 + $0x654] sm:$0xf0]  ;;  %v10165_v23 = vld [vmem:[%s16165_s1 + $0x724] sm:$0xf0] }
  0x5c   :  { %5136 = vmatpush.bf16.msra.mxu0 %v7131_v49  ;;  %v10187_v49 = vld [vmem:[%s16165_s1 + $0x7d4] sm:$0xf0]  ;;  %v7419_v50 = vor.u32 %v10139_v39, %v7418_v37  ;;  %v10181_v26 = vld [vmem:[%s16165_s1 + $0x7a4] sm:$0xf0]  ;;  %v7523_v31 = vor.u32 %v10165_v23, %v7522_v21  ;;  %v7514_v39 = vld [vmem:[%s16165_s1 + $0x710] sm:$0xf]  ;;  %v11664_v23 = vpack.c.b16 %v888_v3, %v888_v3 }
  0x5d   :  { %5149 = vmatpush.bf16.msra.mxu1 %v7195_v53  ;;  %v7410_v53 = vld [vmem:[%s16165_s1 + $0x640] sm:$0xf]  ;;  %v7611_v56 = vor.u32 %v10187_v49, %v7610_v48  ;;  %v10147_v37 = vld [vmem:[%s16165_s1 + $0x694] sm:$0xf0]  ;;  %v10129_v48 = vld [vmem:[%s16165_s1 + $0x604] sm:$0xf0] }
  0x5e   :  { %5162 = vmatpush.bf16.msra.mxu2 %v7259_v54  ;;  %v10137_v54 = vld [vmem:[%s16165_s1 + $0x644] sm:$0xf0]  ;;  %v7442_v49 = vld [vmem:[%s16165_s1 + $0x680] sm:$0xf]  ;;  %v7658_v3 = vld [vmem:[%s16165_s1 + $0x830] sm:$0xf] }
  0x5f   :  { %5175 = vmatpush.bf16.msra.mxu3 %v7323_v58  ;;  %v7538_v58 = vld [vmem:[%s16165_s1 + $0x740] sm:$0xf]  ;;  %v7411_v62 = vor.u32 %v10137_v54, %v7410_v53  ;;  %v10161_v54 = vld [vmem:[%s16165_s1 + $0x704] sm:$0xf0] }
  0x60   :  { %5137 = vmatpush.bf16.msra.mxu0 %v7123_v1  ;;  %v7539_v0 = vor.u32 %v10169_v59, %v7538_v58  ;;  %v7402_v1 = vld [vmem:[%s16165_s1 + $0x630] sm:$0xf]  ;;  %v7506_v53 = vld [vmem:[%s16165_s1 + $0x700] sm:$0xf]  ;;  %v10177_v58 = vld [vmem:[%s16165_s1 + $0x784] sm:$0xf0] }
  0x61   :  { %5150 = vmatpush.bf16.msra.mxu1 %v7187_v6  ;;  %v7530_v6 = vld [vmem:[%s16165_s1 + $0x730] sm:$0xf]  ;;  %v7403_v10 = vor.u32 %v10135_v2, %v7402_v1  ;;  %v27_v59 = vld [vmem:[%s16166_s0 + $0x38] sm:$0xff]  ;;  %v7507_v5 = vor.u32 %v10161_v54, %v7506_v53 }
  0x62   :  { %5163 = vmatpush.bf16.msra.mxu2 %v7251_v7  ;;  %v10167_v7 = vld [vmem:[%s16165_s1 + $0x734] sm:$0xf0]  ;;  %v7818_v1 = vld [vmem:[%s16165_s1 + $0x970] sm:$0xf] }
  0x63   :  { %5176 = vmatpush.bf16.msra.mxu3 %v7315_v12  ;;  %5138 = vmatmul.bf16.vlgmr.msra.gmra.mxu0 %v11454_v25  ;;  %v7531_v12 = vor.u32 %v10167_v7, %v7530_v6  ;;  %v10239_v2 = vld [vmem:[%s16165_s1 + $0x974] sm:$0xf0]  ;;  %v7882_v6 = vld [vmem:[%s16165_s1 + $0x9f0] sm:$0xf] }
  0x64   :  { %5182 = vmatpush.bf16.msrb.mxu0 %v7435_v13  ;;  %5151 = vmatmul.bf16.vlgmr.msra.gmra.mxu1 %v11467_v30  ;;  %v7394_v13 = vld [vmem:[%s16165_s1 + $0x620] sm:$0xf]  ;;  %v10255_v7 = vld [vmem:[%s16165_s1 + $0x9f4] sm:$0xf0] }
  0x65   :  { %5195 = vmatpush.bf16.msrb.mxu1 %v7499_v15  ;;  %5164 = vmatmul.bf16.vlgmr.msra.gmra.mxu2 %v11465_v29  ;;  %v7458_v15 = vld [vmem:[%s16165_s1 + $0x6a0] sm:$0xf]  ;;  %v7395_v27 = vor.u32 %v10133_v14, %v7394_v13  ;;  %v7819_v14 = vor.u32 %v10239_v2, %v7818_v1  ;;  %v7883_v21 = vor.u32 %v10255_v7, %v7882_v6  ;;  %v10215_v7 = vld [vmem:[%s16165_s1 + $0x8b4] sm:$0xf0] }
  0x66   :  { %5208 = vmatpush.bf16.msrb.mxu2 %v7563_v16  ;;  %5177 = vmatmul.bf16.vlgmr.msra.gmra.mxu3 %v11475_v33  ;;  %v7595_v16 = vor.u32 %v10183_v9, %v7594_v8  ;;  %v7459_v28 = vor.u32 %v10149_v17, %v7458_v15  ;;  %v890_v8 = vunpack.c.l.b16 %v27_v59  ;;  %v889_v9 = vunpack.c.h.b16 %v26_v55  ;;  %v7682_v15 = vld [vmem:[%s16165_s1 + $0x860] sm:$0xf] }
  0x67   :  { %5221 = vmatpush.bf16.msrb.mxu3 %v7627_v24  ;;  %v7586_v24 = vld [vmem:[%s16165_s1 + $0x7a0] sm:$0xf] }
  0x68   :  { %5183 = vmatpush.bf16.msrb.mxu0 %v7427_v34  ;;  %v10131_v34 = vld [vmem:[%s16165_s1 + $0x614] sm:$0xf0]  ;;  %v7746_v17 = vld [vmem:[%s16165_s1 + $0x8e0] sm:$0xf] }
  0x69   :  { %5196 = vmatpush.bf16.msrb.mxu1 %v7491_v35  ;;  %v7450_v35 = vld [vmem:[%s16165_s1 + $0x690] sm:$0xf]  ;;  %v7387_v47 = vor.u32 %v10131_v34, %v7386_v32  ;;  %v7874_v32 = vld [vmem:[%s16165_s1 + $0x9e0] sm:$0xf]  ;;  %v10253_v34 = vld [vmem:[%s16165_s1 + $0x9e4] sm:$0xf0] }
  0x6a   :  { %5209 = vmatpush.bf16.msrb.mxu2 %v7555_v36  ;;  %v7587_v36 = vor.u32 %v10181_v26, %v7586_v24  ;;  %v10221_v24 = vld [vmem:[%s16165_s1 + $0x8e4] sm:$0xf0]  ;;  %v7810_v26 = vld [vmem:[%s16165_s1 + $0x960] sm:$0xf] }
  0x6b   :  { %5222 = vmatpush.bf16.msrb.mxu3 %v7619_v43  ;;  %v7578_v43 = vld [vmem:[%s16165_s1 + $0x790] sm:$0xf]  ;;  %v7666_v55 = vld [vmem:[%s16165_s1 + $0x840] sm:$0xf] }
  0x6c   :  { %5184 = vmatpush.bf16.msrb.mxu0 %v7419_v50  ;;  %v10145_v50 = vld [vmem:[%s16165_s1 + $0x684] sm:$0xf0] }
  0x6d   :  { %5197 = vmatpush.bf16.msrb.mxu1 %v7483_v51  ;;  %v7451_v51 = vor.u32 %v10147_v37, %v7450_v35  ;;  %v7747_v37 = vor.u32 %v10221_v24, %v7746_v17  ;;  %v7714_v17 = vld [vmem:[%s16165_s1 + $0x8a0] sm:$0xf]  ;;  %v10213_v24 = vld [vmem:[%s16165_s1 + $0x8a4] sm:$0xf0] }
  0x6e   :  { %5210 = vmatpush.bf16.msrb.mxu2 %v7547_v52  ;;  %v7515_v52 = vor.u32 %v10163_v40, %v7514_v39  ;;  %v7674_v40 = vld [vmem:[%s16165_s1 + $0x850] sm:$0xf] }
  0x6f   :  { %5223 = vmatpush.bf16.msrb.mxu3 %v7611_v56  ;;  %v7579_v56 = vor.u32 %v10179_v45, %v7578_v43  ;;  %v10203_v43 = vld [vmem:[%s16165_s1 + $0x854] sm:$0xf0]  ;;  %v7738_v45 = vld [vmem:[%s16165_s1 + $0x8d0] sm:$0xf] }
  0x70   :  { %5185 = vmatpush.bf16.msrb.mxu0 %v7411_v62  ;;  %v7754_v62 = vld [vmem:[%s16165_s1 + $0x8f0] sm:$0xf] }
  0x71   :  { %5198 = vmatpush.bf16.msrb.mxu1 %v7475_v63  ;;  %v7379_v63 = vor.u32 %v10129_v48, %v7378_v46  ;;  %v7875_v46 = vor.u32 %v10253_v34, %v7874_v32  ;;  %v7802_v48 = vld [vmem:[%s16165_s1 + $0x950] sm:$0xf]  ;;  %v7842_v32 = vld [vmem:[%s16165_s1 + $0x9a0] sm:$0xf]  ;;  %v10245_v34 = vld [vmem:[%s16165_s1 + $0x9a4] sm:$0xf0] }
  0x72   :  { %5211 = vmatpush.bf16.msrb.mxu2 %v7539_v0  ;;  %v10223_v0 = vld [vmem:[%s16165_s1 + $0x8f4] sm:$0xf0] }
  0x73   :  { %5224 = vmatpush.bf16.msrb.mxu3 %v7603_v4  ;;  %v7443_v4 = vor.u32 %v10145_v50, %v7442_v49  ;;  %v7755_v13 = vor.u32 %v10223_v0, %v7754_v62  ;;  %v10235_v49 = vld [vmem:[%s16165_s1 + $0x954] sm:$0xf0]  ;;  %v7866_v50 = vld [vmem:[%s16165_s1 + $0x9d0] sm:$0xf]  ;;  %v7858_v62 = vld [vmem:[%s16165_s1 + $0x9c0] sm:$0xf] }
  0x74   :  { %5186 = vmatpush.bf16.msrb.mxu0 %v7403_v10  ;;  %v7571_v10 = vor.u32 %v10177_v58, %v7570_v57  ;;  %v7803_v54 = vor.u32 %v10235_v49, %v7802_v48  ;;  %v7730_v57 = vld [vmem:[%s16165_s1 + $0x8c0] sm:$0xf]  ;;  %v7770_v48 = vld [vmem:[%s16165_s1 + $0x910] sm:$0xf]  ;;  %v10227_v49 = vld [vmem:[%s16165_s1 + $0x914] sm:$0xf0] }
  0x75   :  { %5199 = vmatpush.bf16.msrb.mxu1 %v7467_v11  ;;  %v7691_v11 = vor.u32 %v10207_v61, %v7690_v60  ;;  %v7794_v60 = vld [vmem:[%s16165_s1 + $0x940] sm:$0xf]  ;;  %v10233_v61 = vld [vmem:[%s16165_s1 + $0x944] sm:$0xf0] }
  0x76   :  { %5212 = vmatpush.bf16.msrb.mxu2 %v7531_v12  ;;  %v891_v12 = vunpack.c.h.b16 %v27_v59  ;;  %v10217_v59 = vld [vmem:[%s16165_s1 + $0x8c4] sm:$0xf0]  ;;  %v7795_v2 = vor.u32 %v10233_v61, %v7794_v60  ;;  %v28_v61 = vld [vmem:[%s16166_s0 + $0x40] sm:$0xff] }
  0x77   :  { %5225 = vmatpush.bf16.msrb.mxu3 %v7595_v16  ;;  %v10205_v16 = vld [vmem:[%s16165_s1 + $0x864] sm:$0xf0]  ;;  %v7731_v1 = vor.u32 %v10217_v59, %v7730_v57  ;;  %v7762_v59 = vld [vmem:[%s16165_s1 + $0x900] sm:$0xf] }
  0x78   :  { %5187 = vmatpush.bf16.msrb.mxu0 %v7395_v27  ;;  %v10237_v27 = vld [vmem:[%s16165_s1 + $0x964] sm:$0xf0]  ;;  %v11685_v35 = vpack.c.b16 %v891_v12, %v891_v12 }
  0x79   :  { %5200 = vmatpush.bf16.msrb.mxu1 %v7459_v28  ;;  %v11675_v28 = vpack.c.b16 %v890_v8, %v890_v8  ;;  %v7811_v39 = vor.u32 %v10237_v27, %v7810_v26  ;;  %v7786_v8 = vld [vmem:[%s16165_s1 + $0x930] sm:$0xf]  ;;  %v7778_v26 = vld [vmem:[%s16165_s1 + $0x920] sm:$0xf]  ;;  %v10229_v27 = vld [vmem:[%s16165_s1 + $0x924] sm:$0xf0] }
  0x7a   :  { %5213 = vmatpush.bf16.msrb.mxu2 %v7523_v31  ;;  %v11677_v31 = vpack.c.b16 %v889_v9, %v889_v9  ;;  %v10231_v9 = vld [vmem:[%s16165_s1 + $0x934] sm:$0xf0]  ;;  %v10225_v60 = vld [vmem:[%s16165_s1 + $0x904] sm:$0xf0] }
  0x7b   :  { %5226 = vmatpush.bf16.msrb.mxu3 %v7587_v36  ;;  %v7683_v36 = vor.u32 %v10205_v16, %v7682_v15  ;;  %v7650_v15 = vld [vmem:[%s16165_s1 + $0x820] sm:$0xf]  ;;  %v10197_v16 = vld [vmem:[%s16165_s1 + $0x824] sm:$0xf0] }
  0x7c   :  { %5188 = vmatpush.bf16.msrb.mxu0 %v7387_v47  ;;  %v10219_v47 = vld [vmem:[%s16165_s1 + $0x8d4] sm:$0xf0] }
  0x7d   :  { %5201 = vmatpush.bf16.msrb.mxu1 %v7451_v51  ;;  %v10251_v51 = vld [vmem:[%s16165_s1 + $0x9d4] sm:$0xf0]  ;;  %v7739_v53 = vor.u32 %v10219_v47, %v7738_v45  ;;  %v7706_v45 = vld [vmem:[%s16165_s1 + $0x890] sm:$0xf] }
  0x7e   :  { %5214 = vmatpush.bf16.msrb.mxu2 %v7515_v52  ;;  %v7675_v52 = vor.u32 %v10203_v43, %v7674_v40  ;;  %v7867_v58 = vor.u32 %v10251_v51, %v7866_v50  ;;  %v7642_v40 = vld [vmem:[%s16165_s1 + $0x810] sm:$0xf]  ;;  %v10195_v43 = vld [vmem:[%s16165_s1 + $0x814] sm:$0xf0] }
  0x7f   :  { %5227 = vmatpush.bf16.msrb.mxu3 %v7579_v56  ;;  %v10201_v56 = vld [vmem:[%s16165_s1 + $0x844] sm:$0xf0]  ;;  %v10211_v47 = vld [vmem:[%s16165_s1 + $0x894] sm:$0xf0]  ;;  %v7834_v50 = vld [vmem:[%s16165_s1 + $0x990] sm:$0xf] }
  0x80   :  { %5189 = vmatpush.bf16.msrb.mxu0 %v7379_v63  ;;  %v10249_v63 = vld [vmem:[%s16165_s1 + $0x9c4] sm:$0xf0]  ;;  %v7667_v0 = vor.u32 %v10201_v56, %v7666_v55  ;;  %v10243_v51 = vld [vmem:[%s16165_s1 + $0x994] sm:$0xf0]  ;;  %v7698_v55 = vld [vmem:[%s16165_s1 + $0x880] sm:$0xf]  ;;  %v7707_v57 = vor.u32 %v10211_v47, %v7706_v45 }
  0x81   :  { %5202 = vmatpush.bf16.msrb.mxu1 %v7443_v4  ;;  %v10199_v4 = vld [vmem:[%s16165_s1 + $0x834] sm:$0xf0]  ;;  %v7859_v6 = vor.u32 %v10249_v63, %v7858_v62  ;;  %v10209_v56 = vld [vmem:[%s16165_s1 + $0x884] sm:$0xf0]  ;;  %v7835_v62 = vor.u32 %v10243_v51, %v7834_v50  ;;  %v7826_v63 = vld [vmem:[%s16165_s1 + $0x980] sm:$0xf] }
  0x82   :  { %5215 = vmatpush.bf16.msrb.mxu2 %v7507_v5  ;;  %v7722_v5 = vld [vmem:[%s16165_s1 + $0x8b0] sm:$0xf]  ;;  %v7659_v12 = vor.u32 %v10199_v4, %v7658_v3  ;;  %v10271_v3 = vld [vmem:[%s16165_s1 + $0xa74] sm:$0xf0]  ;;  %v8130_v47 = vld [vmem:[%s16165_s1 + $0xbe0] sm:$0xf] }
  0x83   :  { %5228 = vmatpush.bf16.msrb.mxu3 %v7571_v10  ;;  %5190 = vmatmul.bf16.vlgmr.msrb.gmra.mxu0 %v11664_v23  ;;  %v7850_v10 = vld [vmem:[%s16165_s1 + $0x9b0] sm:$0xf] }
  0x84   :  { %5234 = vmatpush.bf16.msra.mxu0 %v7691_v11  ;;  %5203 = vmatmul.bf16.vlgmr.msrb.gmra.mxu1 %v11677_v31  ;;  %v10247_v11 = vld [vmem:[%s16165_s1 + $0x9b4] sm:$0xf0]  ;;  %v8010_v4 = vld [vmem:[%s16165_s1 + $0xaf0] sm:$0xf] }
  0x85   :  { %5247 = vmatpush.bf16.msra.mxu1 %v7755_v13  ;;  %5216 = vmatmul.bf16.vlgmr.msrb.gmra.mxu2 %v11675_v28  ;;  %v7723_v13 = vor.u32 %v10215_v7, %v7722_v5  ;;  %v8074_v7 = vld [vmem:[%s16165_s1 + $0xb70] sm:$0xf] }
  0x86   :  { %5260 = vmatpush.bf16.msra.mxu2 %v7819_v14  ;;  %5229 = vmatmul.bf16.vlgmr.msrb.gmra.mxu3 %v11685_v35  ;;  %v7787_v14 = vor.u32 %v10231_v9, %v7786_v8  ;;  %v10303_v8 = vld [vmem:[%s16165_s1 + $0xb74] sm:$0xf0]  ;;  %v892_v9 = vunpack.c.l.b16 %v28_v61 }
  0x87   :  { %5273 = vmatpush.bf16.msra.mxu3 %v7883_v21  ;;  %v7851_v21 = vor.u32 %v10247_v11, %v7850_v10  ;;  %v7699_v10 = vor.u32 %v10209_v56, %v7698_v55  ;;  %v7763_v11 = vor.u32 %v10225_v60, %v7762_v59  ;;  %v7994_v55 = vld [vmem:[%s16165_s1 + $0xad0] sm:$0xf]  ;;  %v10299_v59 = vld [vmem:[%s16165_s1 + $0xb54] sm:$0xf0] }
  0x88   :  { %5235 = vmatpush.bf16.msra.mxu0 %v7683_v36  ;;  %v7651_v36 = vor.u32 %v10197_v16, %v7650_v15  ;;  %v893_v15 = vunpack.c.h.b16 %v28_v61  ;;  %v8122_v60 = vld [vmem:[%s16165_s1 + $0xbd0] sm:$0xf]  ;;  %v10315_v61 = vld [vmem:[%s16165_s1 + $0xbd4] sm:$0xf0] }
  0x89   :  { %5248 = vmatpush.bf16.msra.mxu1 %v7747_v37  ;;  %v7715_v37 = vor.u32 %v10213_v24, %v7714_v17 }
  0x8a   :  { %5261 = vmatpush.bf16.msra.mxu2 %v7811_v39  ;;  %v7779_v39 = vor.u32 %v10229_v27, %v7778_v26  ;;  %v8075_v26 = vor.u32 %v10303_v8, %v8074_v7  ;;  %v7938_v27 = vld [vmem:[%s16165_s1 + $0xa60] sm:$0xf]  ;;  %v10297_v7 = vld [vmem:[%s16165_s1 + $0xb44] sm:$0xf0] }
  0x8b   :  { %5274 = vmatpush.bf16.msra.mxu3 %v7875_v46  ;;  %v7843_v46 = vor.u32 %v10245_v34, %v7842_v32  ;;  %v10269_v32 = vld [vmem:[%s16165_s1 + $0xa64] sm:$0xf0]  ;;  %v8002_v34 = vld [vmem:[%s16165_s1 + $0xae0] sm:$0xf] }
  0x8c   :  { %5236 = vmatpush.bf16.msra.mxu0 %v7675_v52  ;;  %v7634_v52 = vld [vmem:[%s16165_s1 + $0x800] sm:$0xf]  ;;  %v7939_v50 = vor.u32 %v10269_v32, %v7938_v27  ;;  %v8106_v27 = vld [vmem:[%s16165_s1 + $0xbb0] sm:$0xf]  ;;  %v10311_v32 = vld [vmem:[%s16165_s1 + $0xbb4] sm:$0xf0] }
  0x8d   :  { %5249 = vmatpush.bf16.msra.mxu1 %v7739_v53  ;;  %v7643_v53 = vor.u32 %v10195_v43, %v7642_v40  ;;  %v8066_v40 = vld [vmem:[%s16165_s1 + $0xb60] sm:$0xf]  ;;  %v10301_v43 = vld [vmem:[%s16165_s1 + $0xb64] sm:$0xf0] }
  0x8e   :  { %5262 = vmatpush.bf16.msra.mxu2 %v7803_v54  ;;  %v10193_v54 = vld [vmem:[%s16165_s1 + $0x804] sm:$0xf0]  ;;  %v8114_v8 = vld [vmem:[%s16165_s1 + $0xbc0] sm:$0xf] }
  0x8f   :  { %5275 = vmatpush.bf16.msra.mxu3 %v7867_v58  ;;  %v7771_v58 = vor.u32 %v10227_v49, %v7770_v48  ;;  %v7635_v5 = vor.u32 %v10193_v54, %v7634_v52  ;;  %v10317_v48 = vld [vmem:[%s16165_s1 + $0xbe4] sm:$0xf0]  ;;  %v8067_v52 = vor.u32 %v10301_v43, %v8066_v40  ;;  %v10267_v54 = vld [vmem:[%s16165_s1 + $0xa54] sm:$0xf0] }
  0x90   :  { %5237 = vmatpush.bf16.msra.mxu0 %v7667_v0  ;;  %v10241_v0 = vld [vmem:[%s16165_s1 + $0x984] sm:$0xf0]  ;;  %v8131_v56 = vor.u32 %v10317_v48, %v8130_v47  ;;  %v7970_v47 = vld [vmem:[%s16165_s1 + $0xaa0] sm:$0xf] }
  0x91   :  { %5250 = vmatpush.bf16.msra.mxu1 %v7731_v1  ;;  %v29_v1 = vld [vmem:[%s16166_s0 + $0x48] sm:$0xff]  ;;  %v7827_v16 = vor.u32 %v10241_v0, %v7826_v63 }
  0x92   :  { %5263 = vmatpush.bf16.msra.mxu2 %v7795_v2  ;;  %v7946_v2 = vld [vmem:[%s16165_s1 + $0xa70] sm:$0xf]  ;;  %v10261_v43 = vld [vmem:[%s16165_s1 + $0xa24] sm:$0xf0] }
  0x93   :  { %5276 = vmatpush.bf16.msra.mxu3 %v7859_v6  ;;  %v10287_v6 = vld [vmem:[%s16165_s1 + $0xaf4] sm:$0xf0]  ;;  %v7947_v17 = vor.u32 %v10271_v3, %v7946_v2  ;;  %v10265_v2 = vld [vmem:[%s16165_s1 + $0xa44] sm:$0xf0]  ;;  %v7986_v3 = vld [vmem:[%s16165_s1 + $0xac0] sm:$0xf] }
  0x94   :  { %5238 = vmatpush.bf16.msra.mxu0 %v7659_v12  ;;  %v8138_v12 = vld [vmem:[%s16165_s1 + $0xbf0] sm:$0xf]  ;;  %v8011_v24 = vor.u32 %v10287_v6, %v8010_v4  ;;  %v8123_v4 = vor.u32 %v10315_v61, %v8122_v60  ;;  %v8050_v6 = vld [vmem:[%s16165_s1 + $0xb40] sm:$0xf]  ;;  %v10259_v61 = vld [vmem:[%s16165_s1 + $0xa14] sm:$0xf0] }
  0x95   :  { %5251 = vmatpush.bf16.msra.mxu1 %v7723_v13  ;;  %v10319_v13 = vld [vmem:[%s16165_s1 + $0xbf4] sm:$0xf0]  ;;  %v7898_v60 = vld [vmem:[%s16165_s1 + $0xa10] sm:$0xf] }
  0x96   :  { %5264 = vmatpush.bf16.msra.mxu2 %v7787_v14  ;;  %v894_v14 = vunpack.c.l.b16 %v29_v1 }
  0x97   :  { %5277 = vmatpush.bf16.msra.mxu3 %v7851_v21  ;;  %v895_v21 = vunpack.c.h.b16 %v29_v1  ;;  %v7922_v1 = vld [vmem:[%s16165_s1 + $0xa40] sm:$0xf] }
  0x98   :  { %5239 = vmatpush.bf16.msra.mxu0 %v7651_v36  ;;  %v8139_v36 = vor.u32 %v10319_v13, %v8138_v12  ;;  %v11885_v45 = vpack.c.b16 %v894_v14, %v894_v14  ;;  %v8051_v13 = vor.u32 %v10297_v7, %v8050_v6  ;;  %v10263_v14 = vld [vmem:[%s16165_s1 + $0xa34] sm:$0xf0]  ;;  %v7890_v7 = vld [vmem:[%s16165_s1 + $0xa00] sm:$0xf] }
  0x99   :  { %5252 = vmatpush.bf16.msra.mxu1 %v7715_v37  ;;  %v11874_v37 = vpack.c.b16 %v892_v9, %v892_v9  ;;  %v11895_v49 = vpack.c.b16 %v895_v21, %v895_v21  ;;  %v10313_v9 = vld [vmem:[%s16165_s1 + $0xbc4] sm:$0xf0]  ;;  %v8042_v21 = vld [vmem:[%s16165_s1 + $0xb30] sm:$0xf]  ;;  %v10307_v6 = vld [vmem:[%s16165_s1 + $0xb94] sm:$0xf0] }
  0x9a   :  { %5265 = vmatpush.bf16.msra.mxu2 %v7779_v39  ;;  %v10285_v39 = vld [vmem:[%s16165_s1 + $0xae4] sm:$0xf0] }
  0x9b   :  { %5278 = vmatpush.bf16.msra.mxu3 %v7843_v46  ;;  %v11887_v46 = vpack.c.b16 %v893_v15, %v893_v15  ;;  %v8003_v51 = vor.u32 %v10285_v39, %v8002_v34  ;;  %v7978_v15 = vld [vmem:[%s16165_s1 + $0xab0] sm:$0xf] }
  0x9c   :  { %5240 = vmatpush.bf16.msra.mxu0 %v7643_v53  ;;  %v7930_v53 = vld [vmem:[%s16165_s1 + $0xa50] sm:$0xf] }
  0x9d   :  { %5253 = vmatpush.bf16.msra.mxu1 %v7707_v57  ;;  %v10283_v57 = vld [vmem:[%s16165_s1 + $0xad4] sm:$0xf0] }
  0x9e   :  { %5266 = vmatpush.bf16.msra.mxu2 %v7771_v58  ;;  %v8058_v58 = vld [vmem:[%s16165_s1 + $0xb50] sm:$0xf]  ;;  %v7995_v63 = vor.u32 %v10283_v57, %v7994_v55  ;;  %v10309_v55 = vld [vmem:[%s16165_s1 + $0xba4] sm:$0xf0] }
  0x9f   :  { %5279 = vmatpush.bf16.msra.mxu3 %v7835_v62  ;;  %v7931_v62 = vor.u32 %v10267_v54, %v7930_v53  ;;  %v8059_v0 = vor.u32 %v10299_v59, %v8058_v58  ;;  %v10293_v53 = vld [vmem:[%s16165_s1 + $0xb24] sm:$0xf0]  ;;  %v8098_v54 = vld [vmem:[%s16165_s1 + $0xba0] sm:$0xf] }
  0xa0   :  { %5241 = vmatpush.bf16.msra.mxu0 %v7635_v5  ;;  %v10281_v5 = vld [vmem:[%s16165_s1 + $0xac4] sm:$0xf0]  ;;  %v5035_v57 = vpop.f32.mrf.mxu0 }
  0xa1   :  { %5254 = vmatpush.bf16.msra.mxu1 %v7699_v10  ;;  %v7923_v10 = vor.u32 %v10265_v2, %v7922_v1  ;;  %v7987_v12 = vor.u32 %v10281_v5, %v7986_v3  ;;  %v8099_v1 = vor.u32 %v10309_v55, %v8098_v54  ;;  %v10275_v2 = vld [vmem:[%s16165_s1 + $0xa94] sm:$0xf0]  ;;  %v8026_v3 = vld [vmem:[%s16165_s1 + $0xb10] sm:$0xf] }
  0xa2   :  { %5267 = vmatpush.bf16.msra.mxu2 %v7763_v11  ;;  %v7914_v11 = vld [vmem:[%s16165_s1 + $0xa30] sm:$0xf] }
  0xa3   :  { %5280 = vmatpush.bf16.msra.mxu3 %v7827_v16  ;;  %5242 = vmatmul.bf16.vlgmr.msra.gmra.mxu0 %v11874_v37  ;;  %v10279_v16 = vld [vmem:[%s16165_s1 + $0xab4] sm:$0xf0]  ;;  %v7915_v34 = vor.u32 %v10263_v14, %v7914_v11  ;;  %v8090_v5 = vld [vmem:[%s16165_s1 + $0xb90] sm:$0xf]  ;;  %v7954_v11 = vld [vmem:[%s16165_s1 + $0xa80] sm:$0xf] }
  0xa4   :  { %5286 = vmatpush.bf16.msrb.mxu0 %v7947_v17  ;;  %5255 = vmatmul.bf16.vlgmr.msra.gmra.mxu1 %v11887_v46  ;;  %v8115_v17 = vor.u32 %v10313_v9, %v8114_v8  ;;  %v7979_v39 = vor.u32 %v10279_v16, %v7978_v15  ;;  %v7899_v9 = vor.u32 %v10259_v61, %v7898_v60  ;;  %v8018_v15 = vld [vmem:[%s16165_s1 + $0xb00] sm:$0xf]  ;;  %v10289_v16 = vld [vmem:[%s16165_s1 + $0xb04] sm:$0xf0] }
  0xa5   :  { %5299 = vmatpush.bf16.msrb.mxu1 %v8011_v24  ;;  %5268 = vmatmul.bf16.vlgmr.msra.gmra.mxu2 %v11885_v45  ;;  %v10295_v24 = vld [vmem:[%s16165_s1 + $0xb34] sm:$0xf0] }
  0xa6   :  { %5312 = vmatpush.bf16.msrb.mxu2 %v8075_v26  ;;  %5281 = vmatmul.bf16.vlgmr.msra.gmra.mxu3 %v11895_v49  ;;  %v845_v26 = vld [vmem:[%s16167_s2] sm:$0x3]  ;;  %v8043_v40 = vor.u32 %v10295_v24, %v8042_v21  ;;  %v8091_v24 = vor.u32 %v10307_v6, %v8090_v5 }
  0xa7   :  { %5325 = vmatpush.bf16.msrb.mxu3 %v8139_v36  ;;  %v7906_v36 = vld [vmem:[%s16165_s1 + $0xa20] sm:$0xf]  ;;  %v847_v48 = vperm.slane %v845_v26, 0 }
  0xa8   :  { %5287 = vmatpush.bf16.msrb.mxu0 %v7939_v50  ;;  %v8107_v50 = vor.u32 %v10311_v32, %v8106_v27  ;;  %v5061_v21 = vpop.f32.mrf.mxu2  ;;  %v8082_v26 = vld [vmem:[%s16165_s1 + $0xb80] sm:$0xf]  ;;  %v10305_v27 = vld [vmem:[%s16165_s1 + $0xb84] sm:$0xf0]  ;;  %v31_v32 = vld [vmem:[%s16166_s0 + $0x58] sm:$0xff]  ;;  %v5037_v54 = vpop.f32.mrf.mxu0 }
  0xa9   :  { %5300 = vmatpush.bf16.msrb.mxu1 %v8003_v51  ;;  %v10277_v51 = vld [vmem:[%s16165_s1 + $0xaa4] sm:$0xf0]  ;;  %v8258_v5 = vld [vmem:[%s16165_s1 + $0xce0] sm:$0xf] }
  0xaa   :  { %5313 = vmatpush.bf16.msrb.mxu2 %v8067_v52  ;;  %v8034_v52 = vld [vmem:[%s16165_s1 + $0xb20] sm:$0xf]  ;;  %v7971_v58 = vor.u32 %v10277_v51, %v7970_v47  ;;  %v10367_v51 = vld [vmem:[%s16165_s1 + $0xd74] sm:$0xf0] }
  0xab   :  { %5326 = vmatpush.bf16.msrb.mxu3 %v8131_v56  ;;  %v7907_v56 = vor.u32 %v10261_v43, %v7906_v36  ;;  %v8035_v59 = vor.u32 %v10293_v53, %v8034_v52  ;;  %v5074_v36 = vpop.f32.mrf.mxu3  ;;  %v8266_v43 = vld [vmem:[%s16165_s1 + $0xcf0] sm:$0xf]  ;;  %v8178_v54 = vld [vmem:[%s16165_s1 + $0xc40] sm:$0xf] }
  0xac   :  { %5288 = vmatpush.bf16.msrb.mxu0 %v7931_v62  ;;  %v7962_v62 = vld [vmem:[%s16165_s1 + $0xa90] sm:$0xf] }
  0xad   :  { %5301 = vmatpush.bf16.msrb.mxu1 %v7995_v63  ;;  %v5036_v63 = vadd.f32 %v5035_v57, %v847_v48  ;;  %v10351_v48 = vld [vmem:[%s16165_s1 + $0xcf4] sm:$0xf0]  ;;  %v8394_v57 = vld [vmem:[%s16165_s1 + $0xdf0] sm:$0xf] }
  0xae   :  { %5314 = vmatpush.bf16.msrb.mxu2 %v8059_v0  ;;  %v5048_v0 = vpop.f32.mrf.mxu1 }
  0xaf   :  { %5327 = vmatpush.bf16.msrb.mxu3 %v8123_v4  ;;  %v10291_v4 = vld [vmem:[%s16165_s1 + $0xb14] sm:$0xf0]  ;;  %v5049_v8 = vadd.f32 %v5048_v0, %v5036_v63  ;;  %v899_v0 = vunpack.c.h.b16 %v31_v32 }
  0xb0   :  { %5289 = vmatpush.bf16.msrb.mxu0 %v7923_v10  ;;  %v10257_v10 = vld [vmem:[%s16165_s1 + $0xa04] sm:$0xf0]  ;;  %v8027_v14 = vor.u32 %v10291_v4, %v8026_v3  ;;  %v8194_v3 = vld [vmem:[%s16165_s1 + $0xc60] sm:$0xf] }
  0xb1   :  { %5302 = vmatpush.bf16.msrb.mxu1 %v7987_v12  ;;  %v10273_v12 = vld [vmem:[%s16165_s1 + $0xa84] sm:$0xf0]  ;;  %v7891_v47 = vor.u32 %v10257_v10, %v7890_v7 }
  0xb2   :  { %5315 = vmatpush.bf16.msrb.mxu2 %v8051_v13  ;;  %v7963_v13 = vor.u32 %v10275_v2, %v7962_v62  ;;  %v7955_v55 = vor.u32 %v10273_v12, %v7954_v11  ;;  %v8083_v62 = vor.u32 %v10305_v27, %v8082_v26  ;;  %v10333_v4 = vld [vmem:[%s16165_s1 + $0xc64] sm:$0xf0]  ;;  %v8186_v27 = vld [vmem:[%s16165_s1 + $0xc50] sm:$0xf] }
  0xb3   :  { %5328 = vmatpush.bf16.msrb.mxu3 %v8115_v17  ;;  %v30_v17 = vld [vmem:[%s16166_s0 + $0x50] sm:$0xff]  ;;  %v10365_v10 = vld [vmem:[%s16165_s1 + $0xd64] sm:$0xf0] }
  0xb4   :  { %5290 = vmatpush.bf16.msrb.mxu0 %v7915_v34  ;;  %v5062_v34 = vadd.f32 %v5061_v21, %v5049_v8  ;;  %v896_v52 = vunpack.c.l.b16 %v30_v17  ;;  %v897_v60 = vunpack.c.h.b16 %v30_v17  ;;  %v10349_v8 = vld [vmem:[%s16165_s1 + $0xce4] sm:$0xf0]  ;;  %v8195_v17 = vor.u32 %v10333_v4, %v8194_v3  ;;  %v5076_v21 = vpop.f32.mrf.mxu3  ;;  %v8170_v3 = vld [vmem:[%s16165_s1 + $0xc30] sm:$0xf]  ;;  %v10327_v4 = vld [vmem:[%s16165_s1 + $0xc34] sm:$0xf0] }
  0xb5   :  { %5303 = vmatpush.bf16.msrb.mxu1 %v7979_v39  ;;  %v8202_v39 = vld [vmem:[%s16165_s1 + $0xc70] sm:$0xf]  ;;  %v8171_v21 = vor.u32 %v10327_v4, %v8170_v3  ;;  %v10371_v4 = vld [vmem:[%s16165_s1 + $0xd94] sm:$0xf0] }
  0xb6   :  { %5316 = vmatpush.bf16.msrb.mxu2 %v8043_v40  ;;  %v10335_v40 = vld [vmem:[%s16165_s1 + $0xc74] sm:$0xf0]  ;;  %v12072_v53 = vadd.f32 %v5074_v36, %v5062_v34  ;;  %v5050_v61 = vpop.f32.mrf.mxu1  ;;  %v12089_v7 = vpack.c.b16 %v896_v52, %v896_v52  ;;  %v12102_v12 = vpack.c.b16 %v897_v60, %v897_v60  ;;  %v8250_v34 = vld [vmem:[%s16165_s1 + $0xcd0] sm:$0xf]  ;;  %v10361_v60 = vld [vmem:[%s16165_s1 + $0xd44] sm:$0xf0] }
  0xb7   :  { %5329 = vmatpush.bf16.msrb.mxu3 %v8107_v50  ;;  %v8330_v50 = vld [vmem:[%s16165_s1 + $0xd70] sm:$0xf]  ;;  %v8203_v63 = vor.u32 %v10335_v40, %v8202_v39  ;;  %v10347_v39 = vld [vmem:[%s16165_s1 + $0xcd4] sm:$0xf0]  ;;  %v8370_v61 = vld [vmem:[%s16165_s1 + $0xdc0] sm:$0xf] }
  0xb8   :  { %5291 = vmatpush.bf16.msrb.mxu0 %v7907_v56  ;;  %v8019_v56 = vor.u32 %v10289_v16, %v8018_v15  ;;  %v8331_v2 = vor.u32 %v10367_v51, %v8330_v50  ;;  %v5063_v15 = vpop.f32.mrf.mxu2  ;;  %v12110_v16 = vpack.c.b16 %v899_v0, %v899_v0  ;;  %v8314_v40 = vld [vmem:[%s16165_s1 + $0xd50] sm:$0xf]  ;;  %v8251_v51 = vor.u32 %v10347_v39, %v8250_v34  ;;  %v8226_v34 = vld [vmem:[%s16165_s1 + $0xca0] sm:$0xf] }
  0xb9   :  { %5304 = vmatpush.bf16.msrb.mxu1 %v7971_v58  ;;  %v10383_v58 = vld [vmem:[%s16165_s1 + $0xdf4] sm:$0xf0]  ;;  %v8362_v15 = vld [vmem:[%s16165_s1 + $0xdb0] sm:$0xf] }
  0xba   :  { %5317 = vmatpush.bf16.msrb.mxu2 %v8035_v59  ;;  %v898_v59 = vunpack.c.l.b16 %v31_v32  ;;  %v8395_v6 = vor.u32 %v10383_v58, %v8394_v57  ;;  %v10331_v32 = vld [vmem:[%s16165_s1 + $0xc54] sm:$0xf0]  ;;  %v10345_v58 = vld [vmem:[%s16165_s1 + $0xcc4] sm:$0xf0]  ;;  %v8346_v3 = vld [vmem:[%s16165_s1 + $0xd90] sm:$0xf] }
  0xbb   :  { %5330 = vmatpush.bf16.msrb.mxu3 %v8099_v1  ;;  %v8267_v1 = vor.u32 %v10351_v48, %v8266_v43  ;;  %v10363_v43 = vld [vmem:[%s16165_s1 + $0xd54] sm:$0xf0]  ;;  %v8187_v50 = vor.u32 %v10331_v32, %v8186_v27  ;;  %v8162_v27 = vld [vmem:[%s16165_s1 + $0xc20] sm:$0xf]  ;;  %v10325_v32 = vld [vmem:[%s16165_s1 + $0xc24] sm:$0xf0] }
  0xbc   :  { %5292 = vmatpush.bf16.msrb.mxu0 %v7899_v9  ;;  %v8322_v9 = vld [vmem:[%s16165_s1 + $0xd60] sm:$0xf]  ;;  %v12100_v11 = vpack.c.b16 %v898_v59, %v898_v59  ;;  %v10379_v48 = vld [vmem:[%s16165_s1 + $0xdd4] sm:$0xf0]  ;;  %v8315_v52 = vor.u32 %v10363_v43, %v8314_v40  ;;  %v10341_v40 = vld [vmem:[%s16165_s1 + $0xca4] sm:$0xf0] }
  0xbd   :  { %5305 = vmatpush.bf16.msrb.mxu1 %v7963_v13  ;;  %v8386_v13 = vld [vmem:[%s16165_s1 + $0xde0] sm:$0xf]  ;;  %v8323_v26 = vor.u32 %v10365_v10, %v8322_v9  ;;  %v10343_v10 = vld [vmem:[%s16165_s1 + $0xcb4] sm:$0xf0] }
  0xbe   :  { %5318 = vmatpush.bf16.msrb.mxu2 %v8027_v14  ;;  %v10381_v14 = vld [vmem:[%s16165_s1 + $0xde4] sm:$0xf0]  ;;  %v8306_v59 = vld [vmem:[%s16165_s1 + $0xd40] sm:$0xf] }
  0xbf   :  { %5331 = vmatpush.bf16.msrb.mxu3 %v8091_v24  ;;  %v8259_v24 = vor.u32 %v10349_v8, %v8258_v5  ;;  %v8387_v36 = vor.u32 %v10381_v14, %v8386_v13  ;;  %v8234_v5 = vld [vmem:[%s16165_s1 + $0xcb0] sm:$0xf]  ;;  %v10359_v14 = vld [vmem:[%s16165_s1 + $0xd34] sm:$0xf0]  ;;  %v8290_v43 = vld [vmem:[%s16165_s1 + $0xd20] sm:$0xf] }
  0xc0   :  { %5293 = vmatpush.bf16.msrb.mxu0 %v7891_v47  ;;  %v8378_v47 = vld [vmem:[%s16165_s1 + $0xdd0] sm:$0xf]  ;;  %v5087_v0 = vpop.f32.mrf.mxu0 }
  0xc1   :  { %5306 = vmatpush.bf16.msrb.mxu1 %v7955_v55  ;;  %v10329_v55 = vld [vmem:[%s16165_s1 + $0xc44] sm:$0xf0]  ;;  %v8379_v57 = vor.u32 %v10379_v48, %v8378_v47  ;;  %v5100_v8 = vpop.f32.mrf.mxu1  ;;  %v8298_v13 = vld [vmem:[%s16165_s1 + $0xd30] sm:$0xf] }
  0xc2   :  { %5319 = vmatpush.bf16.msrb.mxu2 %v8019_v56  ;;  %v8242_v56 = vld [vmem:[%s16165_s1 + $0xcc0] sm:$0xf]  ;;  %v10357_v47 = vld [vmem:[%s16165_s1 + $0xd24] sm:$0xf0] }
  0xc3   :  { %5332 = vmatpush.bf16.msrb.mxu3 %v8083_v62  ;;  %5294 = vmatmul.bf16.vlgmr.msrb.gmra.mxu0 %v12089_v7  ;;  %v10377_v62 = vld [vmem:[%s16165_s1 + $0xdc4] sm:$0xf0] }
  0xc4   :  { %5338 = vmatpush.bf16.msra.mxu0 %v8203_v63  ;;  %5307 = vmatmul.bf16.vlgmr.msrb.gmra.mxu1 %v12102_v12  ;;  %v8179_v63 = vor.u32 %v10329_v55, %v8178_v54  ;;  %v8371_v9 = vor.u32 %v10377_v62, %v8370_v61  ;;  %v8163_v54 = vor.u32 %v10325_v32, %v8162_v27  ;;  %v8218_v61 = vld [vmem:[%s16165_s1 + $0xc90] sm:$0xf]  ;;  %v10369_v27 = vld [vmem:[%s16165_s1 + $0xd84] sm:$0xf0] }
  0xc5   :  { %5351 = vmatpush.bf16.msra.mxu1 %v8267_v1  ;;  %5320 = vmatmul.bf16.vlgmr.msrb.gmra.mxu2 %v12100_v11  ;;  %v8243_v1 = vor.u32 %v10345_v58, %v8242_v56  ;;  %v8291_v58 = vor.u32 %v10357_v47, %v8290_v43  ;;  %v33_v32 = vld [vmem:[%s16166_s0 + $0x68] sm:$0xff]  ;;  %v10415_v47 = vld [vmem:[%s16165_s1 + $0xef4] sm:$0xf0] }
  0xc6   :  { %5364 = vmatpush.bf16.msra.mxu2 %v8331_v2  ;;  %5333 = vmatmul.bf16.vlgmr.msrb.gmra.mxu3 %v12110_v16  ;;  %v8307_v2 = vor.u32 %v10361_v60, %v8306_v59  ;;  %v8154_v59 = vld [vmem:[%s16165_s1 + $0xc10] sm:$0xf]  ;;  %v10323_v60 = vld [vmem:[%s16165_s1 + $0xc14] sm:$0xf0] }
  0xc7   :  { %5377 = vmatpush.bf16.msra.mxu3 %v8395_v6  ;;  %v5088_v6 = vadd.f32 %v5087_v0, %v12072_v53  ;;  %v10375_v53 = vld [vmem:[%s16165_s1 + $0xdb4] sm:$0xf0] }
  0xc8   :  { %5339 = vmatpush.bf16.msra.mxu0 %v8195_v17  ;;  %v8363_v39 = vor.u32 %v10375_v53, %v8362_v15  ;;  %v5089_v56 = vpop.f32.mrf.mxu0  ;;  %v10339_v0 = vld [vmem:[%s16165_s1 + $0xc94] sm:$0xf0]  ;;  %v8274_v15 = vld [vmem:[%s16165_s1 + $0xd00] sm:$0xf]  ;;  %v10353_v53 = vld [vmem:[%s16165_s1 + $0xd04] sm:$0xf0] }
  0xc9   :  { %5352 = vmatpush.bf16.msra.mxu1 %v8259_v24  ;;  %v5101_v17 = vadd.f32 %v5100_v8, %v5088_v6  ;;  %v8235_v24 = vor.u32 %v10343_v10, %v8234_v5  ;;  %v5102_v62 = vpop.f32.mrf.mxu1  ;;  %v8146_v5 = vld [vmem:[%s16165_s1 + $0xc00] sm:$0xf]  ;;  %v8155_v6 = vor.u32 %v10323_v60, %v8154_v59  ;;  %v10321_v8 = vld [vmem:[%s16165_s1 + $0xc04] sm:$0xf0]  ;;  %v8650_v56 = vld [vmem:[%s16165_s1 + $0xff0] sm:$0xf] }
  0xca   :  { %5365 = vmatpush.bf16.msra.mxu2 %v8323_v26  ;;  %v8299_v26 = vor.u32 %v10359_v14, %v8298_v13  ;;  %v10337_v10 = vld [vmem:[%s16165_s1 + $0xc84] sm:$0xf0]  ;;  %v8219_v13 = vor.u32 %v10339_v0, %v8218_v61  ;;  %v8147_v43 = vor.u32 %v10321_v8, %v8146_v5  ;;  %v903_v62 = vunpack.c.h.b16 %v33_v32  ;;  %v8578_v8 = vld [vmem:[%s16165_s1 + $0xf60] sm:$0xf] }
  0xcb   :  { %5378 = vmatpush.bf16.msra.mxu3 %v8387_v36  ;;  %v5113_v36 = vpop.f32.mrf.mxu2 }
  0xcc   :  { %5340 = vmatpush.bf16.msra.mxu0 %v8187_v50  ;;  %v5114_v48 = vadd.f32 %v5113_v36, %v5101_v17  ;;  %v5126_v50 = vpop.f32.mrf.mxu3  ;;  %v32_v17 = vld [vmem:[%s16166_s0 + $0x60] sm:$0xff]  ;;  %v8458_v36 = vld [vmem:[%s16165_s1 + $0xe70] sm:$0xf] }
  0xcd   :  { %5353 = vmatpush.bf16.msra.mxu1 %v8251_v51  ;;  %v8354_v51 = vld [vmem:[%s16165_s1 + $0xda0] sm:$0xf]  ;;  %v901_v59 = vunpack.c.h.b16 %v32_v17 }
  0xce   :  { %5366 = vmatpush.bf16.msra.mxu2 %v8315_v52  ;;  %v10373_v52 = vld [vmem:[%s16165_s1 + $0xda4] sm:$0xf0]  ;;  %v12213_v55 = vadd.f32 %v5126_v50, %v5114_v48  ;;  %v8586_v48 = vld [vmem:[%s16165_s1 + $0xf70] sm:$0xf]  ;;  %v10431_v50 = vld [vmem:[%s16165_s1 + $0xf74] sm:$0xf0] }
  0xcf   :  { %5379 = vmatpush.bf16.msra.mxu3 %v8379_v57  ;;  %v8227_v57 = vor.u32 %v10341_v40, %v8226_v34  ;;  %v8522_v40 = vld [vmem:[%s16165_s1 + $0xef0] sm:$0xf]  ;;  %v8587_v0 = vor.u32 %v10431_v50, %v8586_v48 }
  0xd0   :  { %5341 = vmatpush.bf16.msra.mxu0 %v8179_v63  ;;  %v8355_v63 = vor.u32 %v10373_v52, %v8354_v51  ;;  %v900_v51 = vunpack.c.l.b16 %v32_v17 }
  0xd1   :  { %5354 = vmatpush.bf16.msra.mxu1 %v8243_v1  ;;  %v8282_v1 = vld [vmem:[%s16165_s1 + $0xd10] sm:$0xf] }
  0xd2   :  { %5367 = vmatpush.bf16.msra.mxu2 %v8307_v2  ;;  %v10355_v2 = vld [vmem:[%s16165_s1 + $0xd14] sm:$0xf0]  ;;  %v12302_v5 = vpack.c.b16 %v900_v51, %v900_v51 }
  0xd3   :  { %5380 = vmatpush.bf16.msra.mxu3 %v8371_v9  ;;  %v8210_v9 = vld [vmem:[%s16165_s1 + $0xc80] sm:$0xf]  ;;  %v8283_v14 = vor.u32 %v10355_v2, %v8282_v1  ;;  %v10397_v2 = vld [vmem:[%s16165_s1 + $0xe64] sm:$0xf0] }
  0xd4   :  { %5342 = vmatpush.bf16.msra.mxu0 %v8171_v21  ;;  %v5115_v21 = vpop.f32.mrf.mxu2  ;;  %v5128_v34 = vpop.f32.mrf.mxu3  ;;  %v8211_v52 = vor.u32 %v10337_v10, %v8210_v9  ;;  %v8450_v1 = vld [vmem:[%s16165_s1 + $0xe60] sm:$0xf]  ;;  %v10429_v9 = vld [vmem:[%s16165_s1 + $0xf64] sm:$0xf0] }
  0xd5   :  { %5355 = vmatpush.bf16.msra.mxu1 %v8235_v24  ;;  %v8347_v24 = vor.u32 %v10371_v4, %v8346_v3  ;;  %v8514_v3 = vld [vmem:[%s16165_s1 + $0xee0] sm:$0xf]  ;;  %v8451_v17 = vor.u32 %v10397_v2, %v8450_v1 }
  0xd6   :  { %5368 = vmatpush.bf16.msra.mxu2 %v8299_v26  ;;  %v8338_v26 = vld [vmem:[%s16165_s1 + $0xd80] sm:$0xf] }
  0xd7   :  { %5381 = vmatpush.bf16.msra.mxu3 %v8363_v39  ;;  %v10399_v39 = vld [vmem:[%s16165_s1 + $0xe74] sm:$0xf0]  ;;  %v8339_v60 = vor.u32 %v10369_v27, %v8338_v26  ;;  %v8442_v26 = vld [vmem:[%s16165_s1 + $0xe50] sm:$0xf] }
  0xd8   :  { %5343 = vmatpush.bf16.msra.mxu0 %v8163_v54  ;;  %v8275_v54 = vor.u32 %v10353_v53, %v8274_v15  ;;  %v8459_v61 = vor.u32 %v10399_v39, %v8458_v36  ;;  %v10445_v15 = vld [vmem:[%s16165_s1 + $0xfe4] sm:$0xf0]  ;;  %v12323_v53 = vpack.c.b16 %v903_v62, %v903_v62  ;;  %v10395_v27 = vld [vmem:[%s16165_s1 + $0xe54] sm:$0xf0]  ;;  %v8570_v39 = vld [vmem:[%s16165_s1 + $0xf50] sm:$0xf] }
  0xd9   :  { %5356 = vmatpush.bf16.msra.mxu1 %v8227_v57  ;;  %v10447_v57 = vld [vmem:[%s16165_s1 + $0xff4] sm:$0xf0]  ;;  %v8443_v48 = vor.u32 %v10395_v27, %v8442_v26  ;;  %v8626_v62 = vld [vmem:[%s16165_s1 + $0xfc0] sm:$0xf] }
  0xda   :  { %5369 = vmatpush.bf16.msra.mxu2 %v8291_v58  ;;  %v902_v58 = vunpack.c.l.b16 %v33_v32  ;;  %v8651_v4 = vor.u32 %v10447_v57, %v8650_v56  ;;  %v8506_v32 = vld [vmem:[%s16165_s1 + $0xed0] sm:$0xf]  ;;  %v10411_v36 = vld [vmem:[%s16165_s1 + $0xed4] sm:$0xf0]  ;;  %v8498_v56 = vld [vmem:[%s16165_s1 + $0xec0] sm:$0xf] }
  0xdb   :  { %5382 = vmatpush.bf16.msra.mxu3 %v8355_v63  ;;  %v8523_v63 = vor.u32 %v10415_v47, %v8522_v40  ;;  %v10427_v40 = vld [vmem:[%s16165_s1 + $0xf54] sm:$0xf0]  ;;  %v8507_v50 = vor.u32 %v10411_v36, %v8506_v32  ;;  %v8418_v36 = vld [vmem:[%s16165_s1 + $0xe20] sm:$0xf] }
  0xdc   :  { %5344 = vmatpush.bf16.msra.mxu0 %v8155_v6  ;;  %v10413_v6 = vld [vmem:[%s16165_s1 + $0xee4] sm:$0xf0]  ;;  %v12313_v10 = vpack.c.b16 %v902_v58, %v902_v58  ;;  %v10443_v47 = vld [vmem:[%s16165_s1 + $0xfd4] sm:$0xf0]  ;;  %v8571_v51 = vor.u32 %v10427_v40, %v8570_v39  ;;  %v8482_v40 = vld [vmem:[%s16165_s1 + $0xea0] sm:$0xf] }
  0xdd   :  { %5357 = vmatpush.bf16.msra.mxu1 %v8219_v13  ;;  %v12315_v13 = vpack.c.b16 %v901_v59, %v901_v59  ;;  %v8515_v21 = vor.u32 %v10413_v6, %v8514_v3  ;;  %v10409_v58 = vld [vmem:[%s16165_s1 + $0xec4] sm:$0xf0]  ;;  %v8562_v59 = vld [vmem:[%s16165_s1 + $0xf40] sm:$0xf]  ;;  %v8426_v6 = vld [vmem:[%s16165_s1 + $0xe30] sm:$0xf] }
  0xde   :  { %5370 = vmatpush.bf16.msra.mxu2 %v8283_v14  ;;  %v8642_v14 = vld [vmem:[%s16165_s1 + $0xfe0] sm:$0xf]  ;;  %v8499_v3 = vor.u32 %v10409_v58, %v8498_v56  ;;  %v10439_v26 = vld [vmem:[%s16165_s1 + $0xfb4] sm:$0xf0]  ;;  %v10389_v39 = vld [vmem:[%s16165_s1 + $0xe24] sm:$0xf0] }
  0xdf   :  { %5383 = vmatpush.bf16.msra.mxu3 %v8347_v24  ;;  %v8579_v24 = vor.u32 %v10429_v9, %v8578_v8  ;;  %v8643_v34 = vor.u32 %v10445_v15, %v8642_v14  ;;  %v10391_v8 = vld [vmem:[%s16165_s1 + $0xe34] sm:$0xf0]  ;;  %v8490_v9 = vld [vmem:[%s16165_s1 + $0xeb0] sm:$0xf]  ;;  %v8610_v56 = vld [vmem:[%s16165_s1 + $0xfa0] sm:$0xf] }
  0xe0   :  { %5345 = vmatpush.bf16.msra.mxu0 %v8147_v43  ;;  %v8634_v43 = vld [vmem:[%s16165_s1 + $0xfd0] sm:$0xf]  ;;  %v10407_v15 = vld [vmem:[%s16165_s1 + $0xeb4] sm:$0xf0]  ;;  %v8427_v27 = vor.u32 %v10391_v8, %v8426_v6 }
  0xe1   :  { %5358 = vmatpush.bf16.msra.mxu1 %v8211_v52  ;;  %v8434_v52 = vld [vmem:[%s16165_s1 + $0xe40] sm:$0xf]  ;;  %v8635_v57 = vor.u32 %v10443_v47, %v8634_v43  ;;  %v5152_v2 = vpop.f32.mrf.mxu1  ;;  %v8491_v32 = vor.u32 %v10407_v15, %v8490_v9  ;;  %v8538_v6 = vld [vmem:[%s16165_s1 + $0xf10] sm:$0xf]  ;;  %v10419_v8 = vld [vmem:[%s16165_s1 + $0xf14] sm:$0xf0] }
  0xe2   :  { %5371 = vmatpush.bf16.msra.mxu2 %v8275_v54  ;;  %v10393_v54 = vld [vmem:[%s16165_s1 + $0xe44] sm:$0xf0]  ;;  %v8602_v9 = vld [vmem:[%s16165_s1 + $0xf90] sm:$0xf] }
  0xe3   :  { %5384 = vmatpush.bf16.msra.mxu3 %v8339_v60  ;;  %5346 = vmatmul.bf16.vlgmr.msra.gmra.mxu0 %v12302_v5  ;;  %v10425_v60 = vld [vmem:[%s16165_s1 + $0xf44] sm:$0xf0]  ;;  %v8435_v1 = vor.u32 %v10393_v54, %v8434_v52 }
  0xe4   :  { %5390 = vmatpush.bf16.msrb.mxu0 %v8459_v61  ;;  %5359 = vmatmul.bf16.vlgmr.msra.gmra.mxu1 %v12315_v13  ;;  %v5139_v61 = vpop.f32.mrf.mxu0 }
  0xe5   :  { %5403 = vmatpush.bf16.msrb.mxu1 %v8523_v63  ;;  %5372 = vmatmul.bf16.vlgmr.msra.gmra.mxu2 %v12313_v10  ;;  %v10441_v63 = vld [vmem:[%s16165_s1 + $0xfc4] sm:$0xf0] }
  0xe6   :  { %5416 = vmatpush.bf16.msrb.mxu2 %v8587_v0  ;;  %5385 = vmatmul.bf16.vlgmr.msra.gmra.mxu3 %v12323_v53  ;;  %v5140_v0 = vadd.f32 %v5139_v61, %v12213_v55  ;;  %v8627_v55 = vor.u32 %v10441_v63, %v8626_v62 }
  0xe7   :  { %5429 = vmatpush.bf16.msrb.mxu3 %v8651_v4  ;;  %v8563_v4 = vor.u32 %v10425_v60, %v8562_v59  ;;  %v8419_v59 = vor.u32 %v10389_v39, %v8418_v36  ;;  %v34_v36 = vld [vmem:[%s16166_s0 + $0x70] sm:$0xff] }
  0xe8   :  { %5391 = vmatpush.bf16.msrb.mxu0 %v8451_v17  ;;  %v5153_v14 = vadd.f32 %v5152_v2, %v5140_v0  ;;  %v8554_v17 = vld [vmem:[%s16165_s1 + $0xf30] sm:$0xf]  ;;  %v5165_v47 = vpop.f32.mrf.mxu2 }
  0xe9   :  { %5404 = vmatpush.bf16.msrb.mxu1 %v8515_v21  ;;  %v10423_v21 = vld [vmem:[%s16165_s1 + $0xf34] sm:$0xf0]  ;;  %v5178_v54 = vpop.f32.mrf.mxu3  ;;  %v5154_v60 = vpop.f32.mrf.mxu1  ;;  %v8410_v0 = vld [vmem:[%s16165_s1 + $0xe10] sm:$0xf] }
  0xea   :  { %5417 = vmatpush.bf16.msrb.mxu2 %v8579_v24  ;;  %v8618_v24 = vld [vmem:[%s16165_s1 + $0xfb0] sm:$0xf]  ;;  %v5166_v52 = vadd.f32 %v5165_v47, %v5153_v14  ;;  %v8402_v14 = vld [vmem:[%s16165_s1 + $0xe00] sm:$0xf]  ;;  %v35_v47 = vld [vmem:[%s16166_s0 + $0x78] sm:$0xff]  ;;  %v904_v60 = vunpack.c.l.b16 %v34_v36 }
  0xeb   :  { %5430 = vmatpush.bf16.msrb.mxu3 %v8643_v34  ;;  %v8555_v34 = vor.u32 %v10423_v21, %v8554_v17  ;;  %v8619_v43 = vor.u32 %v10439_v26, %v8618_v24  ;;  %v8474_v2 = vld [vmem:[%s16165_s1 + $0xe90] sm:$0xf]  ;;  %v10385_v17 = vld [vmem:[%s16165_s1 + $0xe04] sm:$0xf0]  ;;  %v8466_v21 = vld [vmem:[%s16165_s1 + $0xe80] sm:$0xf] }
  0xec   :  { %5392 = vmatpush.bf16.msrb.mxu0 %v8443_v48  ;;  %v10405_v48 = vld [vmem:[%s16165_s1 + $0xea4] sm:$0xf0]  ;;  %v5141_v58 = vpop.f32.mrf.mxu0  ;;  %v12426_v61 = vadd.f32 %v5178_v54, %v5166_v52  ;;  %v8778_v52 = vld [vmem:[%s16165_s1 + $0x10f0] sm:$0xf] }
  0xed   :  { %5405 = vmatpush.bf16.msrb.mxu1 %v8507_v50  ;;  %v8546_v50 = vld [vmem:[%s16165_s1 + $0xf20] sm:$0xf]  ;;  %v8483_v62 = vor.u32 %v10405_v48, %v8482_v40  ;;  %v10401_v24 = vld [vmem:[%s16165_s1 + $0xe84] sm:$0xf0]  ;;  %v8842_v58 = vld [vmem:[%s16165_s1 + $0x1170] sm:$0xf] }
  0xee   :  { %5418 = vmatpush.bf16.msrb.mxu2 %v8571_v51  ;;  %v10421_v51 = vld [vmem:[%s16165_s1 + $0xf24] sm:$0xf0]  ;;  %v8594_v40 = vld [vmem:[%s16165_s1 + $0xf80] sm:$0xf] }
  0xef   :  { %5431 = vmatpush.bf16.msrb.mxu3 %v8635_v57  ;;  %v10437_v57 = vld [vmem:[%s16165_s1 + $0xfa4] sm:$0xf0]  ;;  %v8547_v63 = vor.u32 %v10421_v51, %v8546_v50  ;;  %v8714_v50 = vld [vmem:[%s16165_s1 + $0x1070] sm:$0xf]  ;;  %v10463_v51 = vld [vmem:[%s16165_s1 + $0x1074] sm:$0xf0] }
  0xf0   :  { %5393 = vmatpush.bf16.msrb.mxu0 %v8435_v1  ;;  %v10387_v1 = vld [vmem:[%s16165_s1 + $0xe14] sm:$0xf0]  ;;  %v5167_v48 = vpop.f32.mrf.mxu2 }
  0xf1   :  { %5406 = vmatpush.bf16.msrb.mxu1 %v8499_v3  ;;  %v8611_v3 = vor.u32 %v10437_v57, %v8610_v56  ;;  %v8411_v15 = vor.u32 %v10387_v1, %v8410_v0  ;;  %v5180_v54 = vpop.f32.mrf.mxu3  ;;  %v8403_v56 = vor.u32 %v10385_v17, %v8402_v14  ;;  %v10479_v57 = vld [vmem:[%s16165_s1 + $0x10f4] sm:$0xf0]  ;;  %v8906_v0 = vld [vmem:[%s16165_s1 + $0x11f0] sm:$0xf]  ;;  %v8706_v14 = vld [vmem:[%s16165_s1 + $0x1060] sm:$0xf] }
  0xf2   :  { %5419 = vmatpush.bf16.msrb.mxu2 %v8563_v4  ;;  %v10403_v4 = vld [vmem:[%s16165_s1 + $0xe94] sm:$0xf0]  ;;  %v8770_v17 = vld [vmem:[%s16165_s1 + $0x10e0] sm:$0xf]  ;;  %v8762_v54 = vld [vmem:[%s16165_s1 + $0x10d0] sm:$0xf] }
  0xf3   :  { %5432 = vmatpush.bf16.msrb.mxu3 %v8627_v55  ;;  %v10435_v55 = vld [vmem:[%s16165_s1 + $0xf94] sm:$0xf0]  ;;  %v8475_v26 = vor.u32 %v10403_v4, %v8474_v2  ;;  %v906_v2 = vunpack.c.l.b16 %v35_v47 }
  0xf4   :  { %5394 = vmatpush.bf16.msrb.mxu0 %v8427_v27  ;;  %v8539_v27 = vor.u32 %v10419_v8, %v8538_v6  ;;  %v8603_v39 = vor.u32 %v10435_v55, %v8602_v9  ;;  %v10511_v1 = vld [vmem:[%s16165_s1 + $0x11f4] sm:$0xf0]  ;;  %v8715_v6 = vor.u32 %v10463_v51, %v8714_v50  ;;  %v907_v8 = vunpack.c.h.b16 %v35_v47  ;;  %v8698_v51 = vld [vmem:[%s16165_s1 + $0x1050] sm:$0xf] }
  0xf5   :  { %5407 = vmatpush.bf16.msrb.mxu1 %v8491_v32  ;;  %v8530_v32 = vld [vmem:[%s16165_s1 + $0xf00] sm:$0xf]  ;;  %v8779_v9 = vor.u32 %v10479_v57, %v8778_v52  ;;  %v10459_v52 = vld [vmem:[%s16165_s1 + $0x1054] sm:$0xf0] }
  0xf6   :  { %5420 = vmatpush.bf16.msrb.mxu2 %v8555_v34  ;;  %v10417_v34 = vld [vmem:[%s16165_s1 + $0xf04] sm:$0xf0]  ;;  %v10475_v57 = vld [vmem:[%s16165_s1 + $0x10d4] sm:$0xf0] }
  0xf7   :  { %5433 = vmatpush.bf16.msrb.mxu3 %v8619_v43  ;;  %v10433_v43 = vld [vmem:[%s16165_s1 + $0xf84] sm:$0xf0] }
  0xf8   :  { %5395 = vmatpush.bf16.msrb.mxu0 %v8419_v59  ;;  %v10495_v59 = vld [vmem:[%s16165_s1 + $0x1174] sm:$0xf0]  ;;  %v8595_v4 = vor.u32 %v10433_v43, %v8594_v40  ;;  %v10509_v40 = vld [vmem:[%s16165_s1 + $0x11e4] sm:$0xf0]  ;;  %v12536_v43 = vpack.c.b16 %v907_v8, %v907_v8 }
  0xf9   :  { %5408 = vmatpush.bf16.msrb.mxu1 %v8483_v62  ;;  %v8467_v62 = vor.u32 %v10401_v24, %v8466_v21  ;;  %v8843_v55 = vor.u32 %v10495_v59, %v8842_v58  ;;  %v8907_v21 = vor.u32 %v10511_v1, %v8906_v0  ;;  %v12515_v24 = vpack.c.b16 %v904_v60, %v904_v60  ;;  %v8826_v58 = vld [vmem:[%s16165_s1 + $0x1150] sm:$0xf]  ;;  %v10491_v59 = vld [vmem:[%s16165_s1 + $0x1154] sm:$0xf0]  ;;  %v10473_v8 = vld [vmem:[%s16165_s1 + $0x10c4] sm:$0xf0] }
  0xfa   :  { %5421 = vmatpush.bf16.msrb.mxu2 %v8547_v63  ;;  %v8531_v63 = vor.u32 %v10417_v34, %v8530_v32  ;;  %v10493_v32 = vld [vmem:[%s16165_s1 + $0x1164] sm:$0xf0]  ;;  %v12526_v34 = vpack.c.b16 %v906_v2, %v906_v2  ;;  %v8890_v60 = vld [vmem:[%s16165_s1 + $0x11d0] sm:$0xf]  ;;  %v8763_v0 = vor.u32 %v10475_v57, %v8762_v54  ;;  %v8827_v1 = vor.u32 %v10491_v59, %v8826_v58  ;;  %v8690_v2 = vld [vmem:[%s16165_s1 + $0x1040] sm:$0xf] }
  0xfb   :  { %5434 = vmatpush.bf16.msrb.mxu3 %v8611_v3  ;;  %v905_v3 = vunpack.c.h.b16 %v34_v36  ;;  %v10487_v54 = vld [vmem:[%s16165_s1 + $0x1134] sm:$0xf0] }
  0xfc   :  { %5396 = vmatpush.bf16.msrb.mxu0 %v8411_v15  ;;  %v10461_v15 = vld [vmem:[%s16165_s1 + $0x1064] sm:$0xf0]  ;;  %v10503_v57 = vld [vmem:[%s16165_s1 + $0x11b4] sm:$0xf0] }
  0xfd   :  { %5409 = vmatpush.bf16.msrb.mxu1 %v8475_v26  ;;  %v10477_v26 = vld [vmem:[%s16165_s1 + $0x10e4] sm:$0xf0]  ;;  %v12528_v36 = vpack.c.b16 %v905_v3, %v905_v3  ;;  %v8707_v47 = vor.u32 %v10461_v15, %v8706_v14  ;;  %v8882_v15 = vld [vmem:[%s16165_s1 + $0x11c0] sm:$0xf] }
  0xfe   :  { %5422 = vmatpush.bf16.msrb.mxu2 %v8539_v27  ;;  %v8834_v27 = vld [vmem:[%s16165_s1 + $0x1160] sm:$0xf]  ;;  %v8771_v48 = vor.u32 %v10477_v26, %v8770_v17  ;;  %v10457_v3 = vld [vmem:[%s16165_s1 + $0x1044] sm:$0xf0] }
  0xff   :  { %5435 = vmatpush.bf16.msrb.mxu3 %v8603_v39  ;;  %v8898_v39 = vld [vmem:[%s16165_s1 + $0x11e0] sm:$0xf]  ;;  %v8835_v50 = vor.u32 %v10493_v32, %v8834_v27  ;;  %v10505_v17 = vld [vmem:[%s16165_s1 + $0x11c4] sm:$0xf0]  ;;  %v8691_v26 = vor.u32 %v10457_v3, %v8690_v2 }
 0x100   :  { %5397 = vmatpush.bf16.msrb.mxu0 %v8403_v56  ;;  %v8899_v56 = vor.u32 %v10509_v40, %v8898_v39  ;;  %v5191_v14 = vpop.f32.mrf.mxu0  ;;  %v8682_v40 = vld [vmem:[%s16165_s1 + $0x1030] sm:$0xf]  ;;  %v10469_v3 = vld [vmem:[%s16165_s1 + $0x10a4] sm:$0xf0] }
 0x101   :  { %5410 = vmatpush.bf16.msrb.mxu1 %v8467_v62  ;;  %v10507_v62 = vld [vmem:[%s16165_s1 + $0x11d4] sm:$0xf0]  ;;  %v5204_v27 = vpop.f32.mrf.mxu1 }
 0x102   :  { %5423 = vmatpush.bf16.msrb.mxu2 %v8531_v63  ;;  %v8699_v63 = vor.u32 %v10459_v52, %v8698_v51  ;;  %v10471_v51 = vld [vmem:[%s16165_s1 + $0x10b4] sm:$0xf0]  ;;  %v8810_v52 = vld [vmem:[%s16165_s1 + $0x1130] sm:$0xf] }
 0x103   :  { %5436 = vmatpush.bf16.msrb.mxu3 %v8595_v4  ;;  %5398 = vmatmul.bf16.vlgmr.msrb.gmra.mxu0 %v12515_v24  ;;  %v8754_v4 = vld [vmem:[%s16165_s1 + $0x10c0] sm:$0xf] }
 0x104   :  { %5442 = vmatpush.bf16.msra.mxu0 %v8715_v6  ;;  %5411 = vmatmul.bf16.vlgmr.msrb.gmra.mxu1 %v12528_v36  ;;  %v8891_v6 = vor.u32 %v10507_v62, %v8890_v60  ;;  %v8755_v32 = vor.u32 %v10473_v8, %v8754_v4  ;;  %v8811_v60 = vor.u32 %v10487_v54, %v8810_v52  ;;  %v8674_v62 = vld [vmem:[%s16165_s1 + $0x1020] sm:$0xf]  ;;  %v8858_v52 = vld [vmem:[%s16165_s1 + $0x1190] sm:$0xf]  ;;  %v10499_v54 = vld [vmem:[%s16165_s1 + $0x1194] sm:$0xf0] }
 0x105   :  { %5455 = vmatpush.bf16.msra.mxu1 %v8779_v9  ;;  %5424 = vmatmul.bf16.vlgmr.msrb.gmra.mxu2 %v12526_v34  ;;  %v8818_v9 = vld [vmem:[%s16165_s1 + $0x1140] sm:$0xf] }
 0x106   :  { %5468 = vmatpush.bf16.msra.mxu2 %v8843_v55  ;;  %5437 = vmatmul.bf16.vlgmr.msrb.gmra.mxu3 %v12536_v43  ;;  %v10489_v55 = vld [vmem:[%s16165_s1 + $0x1144] sm:$0xf0]  ;;  %v8802_v4 = vld [vmem:[%s16165_s1 + $0x1120] sm:$0xf] }
 0x107   :  { %5481 = vmatpush.bf16.msra.mxu3 %v8907_v21  ;;  %v5192_v21 = vadd.f32 %v5191_v14, %v12426_v61  ;;  %v8819_v39 = vor.u32 %v10489_v55, %v8818_v9  ;;  %v8883_v61 = vor.u32 %v10505_v17, %v8882_v15  ;;  %v8866_v55 = vld [vmem:[%s16165_s1 + $0x11a0] sm:$0xf]  ;;  %v10501_v14 = vld [vmem:[%s16165_s1 + $0x11a4] sm:$0xf0] }
 0x108   :  { %5443 = vmatpush.bf16.msra.mxu0 %v8707_v47  ;;  %v10455_v47 = vld [vmem:[%s16165_s1 + $0x1034] sm:$0xf0]  ;;  %v5217_v2 = vpop.f32.mrf.mxu2  ;;  %v5193_v15 = vpop.f32.mrf.mxu0 }
 0x109   :  { %5456 = vmatpush.bf16.msra.mxu1 %v8771_v48  ;;  %v8746_v48 = vld [vmem:[%s16165_s1 + $0x10b0] sm:$0xf]  ;;  %v8683_v58 = vor.u32 %v10455_v47, %v8682_v40  ;;  %v5230_v9 = vpop.f32.mrf.mxu3  ;;  %v10451_v40 = vld [vmem:[%s16165_s1 + $0x1014] sm:$0xf0] }
 0x10a   :  { %5469 = vmatpush.bf16.msra.mxu2 %v8835_v50  ;;  %v5205_v50 = vadd.f32 %v5204_v27, %v5192_v21  ;;  %v8747_v59 = vor.u32 %v10471_v51, %v8746_v48  ;;  %v5206_v21 = vpop.f32.mrf.mxu1  ;;  %v8730_v47 = vld [vmem:[%s16165_s1 + $0x1090] sm:$0xf]  ;;  %v8867_v48 = vor.u32 %v10501_v14, %v8866_v55  ;;  %v10483_v51 = vld [vmem:[%s16165_s1 + $0x1114] sm:$0xf0] }
 0x10b   :  { %5482 = vmatpush.bf16.msra.mxu3 %v8899_v56  ;;  %v8874_v56 = vld [vmem:[%s16165_s1 + $0x11b0] sm:$0xf]  ;;  %v10527_v14 = vld [vmem:[%s16165_s1 + $0x1274] sm:$0xf0] }
 0x10c   :  { %5444 = vmatpush.bf16.msra.mxu0 %v8699_v63  ;;  %v10453_v63 = vld [vmem:[%s16165_s1 + $0x1024] sm:$0xf0]  ;;  %v5218_v8 = vadd.f32 %v5217_v2, %v5205_v50  ;;  %v8794_v50 = vld [vmem:[%s16165_s1 + $0x1110] sm:$0xf]  ;;  %v36_v2 = vld [vmem:[%s16166_s0 + $0x80] sm:$0xff] }
 0x10d   :  { %5457 = vmatpush.bf16.msra.mxu1 %v8763_v0  ;;  %v8738_v0 = vld [vmem:[%s16165_s1 + $0x10a0] sm:$0xf]  ;;  %v8675_v17 = vor.u32 %v10453_v63, %v8674_v62  ;;  %v8795_v63 = vor.u32 %v10483_v51, %v8794_v50  ;;  %v8970_v55 = vld [vmem:[%s16165_s1 + $0x1270] sm:$0xf]  ;;  %v10575_v50 = vld [vmem:[%s16165_s1 + $0x13f4] sm:$0xf0] }
 0x10e   :  { %5470 = vmatpush.bf16.msra.mxu2 %v8827_v1  ;;  %v8875_v1 = vor.u32 %v10503_v57, %v8874_v56  ;;  %v8739_v27 = vor.u32 %v10469_v3, %v8738_v0  ;;  %v8658_v56 = vld [vmem:[%s16165_s1 + $0x1000] sm:$0xf]  ;;  %v8859_v3 = vor.u32 %v10499_v54, %v8858_v52  ;;  %v9034_v15 = vld [vmem:[%s16165_s1 + $0x12f0] sm:$0xf]  ;;  %v909_v52 = vunpack.c.h.b16 %v36_v2 }
 0x10f   :  { %5483 = vmatpush.bf16.msra.mxu3 %v8891_v6  ;;  %v10485_v6 = vld [vmem:[%s16165_s1 + $0x1124] sm:$0xf0]  ;;  %v8786_v0 = vld [vmem:[%s16165_s1 + $0x1100] sm:$0xf] }
 0x110   :  { %5445 = vmatpush.bf16.msra.mxu0 %v8691_v26  ;;  %v12639_v26 = vadd.f32 %v5230_v9, %v5218_v8  ;;  %v37_v8 = vld [vmem:[%s16166_s0 + $0x88] sm:$0xff]  ;;  %v5219_v9 = vpop.f32.mrf.mxu2 }
 0x111   :  { %5458 = vmatpush.bf16.msra.mxu1 %v8755_v32  ;;  %v8803_v32 = vor.u32 %v10485_v6, %v8802_v4  ;;  %v8850_v4 = vld [vmem:[%s16165_s1 + $0x1180] sm:$0xf]  ;;  %v10497_v6 = vld [vmem:[%s16165_s1 + $0x1184] sm:$0xf0]  ;;  %v910_v51 = vunpack.c.l.b16 %v37_v8 }
 0x112   :  { %5471 = vmatpush.bf16.msra.mxu2 %v8819_v39  ;;  %v8666_v39 = vld [vmem:[%s16165_s1 + $0x1010] sm:$0xf]  ;;  %v8851_v54 = vor.u32 %v10497_v6, %v8850_v4  ;;  %v12741_v6 = vpack.c.b16 %v909_v52, %v909_v52 }
 0x113   :  { %5484 = vmatpush.bf16.msra.mxu3 %v8883_v61  ;;  %v10467_v61 = vld [vmem:[%s16165_s1 + $0x1094] sm:$0xf0]  ;;  %v8667_v57 = vor.u32 %v10451_v40, %v8666_v39  ;;  %v908_v40 = vunpack.c.l.b16 %v36_v2  ;;  %v9090_v2 = vld [vmem:[%s16165_s1 + $0x1360] sm:$0xf]  ;;  %v12739_v4 = vpack.c.b16 %v910_v51, %v910_v51 }
 0x114   :  { %5446 = vmatpush.bf16.msra.mxu0 %v8683_v58  ;;  %v10449_v58 = vld [vmem:[%s16165_s1 + $0x1004] sm:$0xf0]  ;;  %v8731_v62 = vor.u32 %v10467_v61, %v8730_v47  ;;  %v10559_v39 = vld [vmem:[%s16165_s1 + $0x1374] sm:$0xf0]  ;;  %v9162_v61 = vld [vmem:[%s16165_s1 + $0x13f0] sm:$0xf] }
 0x115   :  { %5459 = vmatpush.bf16.msra.mxu1 %v8747_v59  ;;  %v8722_v59 = vld [vmem:[%s16165_s1 + $0x1080] sm:$0xf]  ;;  %v8659_v21 = vor.u32 %v10449_v58, %v8658_v56  ;;  %v8971_v56 = vor.u32 %v10527_v14, %v8970_v55  ;;  %16183 = vst [vmem:[#allocation2_spill] sm:$0xff] %v12739_v4  ;;  %v10573_v55 = vld [vmem:[%s16165_s1 + $0x13e4] sm:$0xf0] }
 0x116   :  { %5472 = vmatpush.bf16.msra.mxu2 %v8811_v60  ;;  %v10465_v60 = vld [vmem:[%s16165_s1 + $0x1084] sm:$0xf0]  ;;  %16184 = vst [vmem:[#allocation3_spill] sm:$0xff] %v12741_v6  ;;  %v10571_v51 = vld [vmem:[%s16165_s1 + $0x13d4] sm:$0xf0] }
 0x117   :  { %5485 = vmatpush.bf16.msra.mxu3 %v8875_v1  ;;  %v10481_v1 = vld [vmem:[%s16165_s1 + $0x1104] sm:$0xf0]  ;;  %v8723_v47 = vor.u32 %v10465_v60, %v8722_v59  ;;  %v8962_v59 = vld [vmem:[%s16165_s1 + $0x1260] sm:$0xf] }
 0x118   :  { %5447 = vmatpush.bf16.msra.mxu0 %v8675_v17  ;;  %v5232_v17 = vpop.f32.mrf.mxu3  ;;  %v10525_v60 = vld [vmem:[%s16165_s1 + $0x1264] sm:$0xf0] }
 0x119   :  { %5460 = vmatpush.bf16.msra.mxu1 %v8739_v27  ;;  %v10543_v27 = vld [vmem:[%s16165_s1 + $0x12f4] sm:$0xf0] }
 0x11a   :  { %5473 = vmatpush.bf16.msra.mxu2 %v8803_v32  ;;  %v9098_v32 = vld [vmem:[%s16165_s1 + $0x1370] sm:$0xf]  ;;  %v9035_v58 = vor.u32 %v10543_v27, %v9034_v15  ;;  %v8963_v15 = vor.u32 %v10525_v60, %v8962_v59  ;;  %v10537_v60 = vld [vmem:[%s16165_s1 + $0x12c4] sm:$0xf0] }
 0x11b   :  { %5486 = vmatpush.bf16.msra.mxu3 %v8867_v48  ;;  %v8787_v48 = vor.u32 %v10481_v1, %v8786_v0  ;;  %v9099_v9 = vor.u32 %v10559_v39, %v9098_v32  ;;  %v12728_v0 = vpack.c.b16 %v908_v40, %v908_v40  ;;  %v10541_v1 = vld [vmem:[%s16165_s1 + $0x12e4] sm:$0xf0]  ;;  %v8954_v27 = vld [vmem:[%s16165_s1 + $0x1250] sm:$0xf]  ;;  %v10523_v32 = vld [vmem:[%s16165_s1 + $0x1254] sm:$0xf0] }
 0x11c   :  { %5448 = vmatpush.bf16.msra.mxu0 %v8667_v57  ;;  %v911_v57 = vunpack.c.h.b16 %v37_v8  ;;  %v9154_v8 = vld [vmem:[%s16165_s1 + $0x13e0] sm:$0xf]  ;;  %v9018_v39 = vld [vmem:[%s16165_s1 + $0x12d0] sm:$0xf]  ;;  %v8955_v52 = vor.u32 %v10523_v32, %v8954_v27  ;;  %v10519_v32 = vld [vmem:[%s16165_s1 + $0x1234] sm:$0xf0] }
 0x11d   :  { %5461 = vmatpush.bf16.msra.mxu1 %v8731_v62  ;;  %v9026_v62 = vld [vmem:[%s16165_s1 + $0x12e0] sm:$0xf]  ;;  %v9155_v40 = vor.u32 %v10573_v55, %v9154_v8  ;;  %v8938_v27 = vld [vmem:[%s16165_s1 + $0x1230] sm:$0xf] }
 0x11e   :  { %5474 = vmatpush.bf16.msra.mxu2 %v8795_v63  ;;  %v9163_v63 = vor.u32 %v10575_v50, %v9162_v61  ;;  %v12749_v14 = vpack.c.b16 %v911_v57, %v911_v57  ;;  %v9027_v17 = vor.u32 %v10541_v1, %v9026_v62  ;;  %v10555_v61 = vld [vmem:[%s16165_s1 + $0x1354] sm:$0xf0]  ;;  %v9146_v50 = vld [vmem:[%s16165_s1 + $0x13d0] sm:$0xf]  ;;  %v8946_v57 = vld [vmem:[%s16165_s1 + $0x1240] sm:$0xf] }
 0x11f   :  { %5487 = vmatpush.bf16.msra.mxu3 %v8859_v3  ;;  %v10557_v3 = vld [vmem:[%s16165_s1 + $0x1364] sm:$0xf0]  ;;  %v9147_v59 = vor.u32 %v10571_v51, %v9146_v50  ;;  %v9074_v62 = vld [vmem:[%s16165_s1 + $0x1340] sm:$0xf]  ;;  %v9130_v50 = vld [vmem:[%s16165_s1 + $0x13b0] sm:$0xf] }
 0x120   :  { %5449 = vmatpush.bf16.msra.mxu0 %v8659_v21  ;;  %16185 = vst [vmem:[#allocation4_spill] sm:$0xff] %v12749_v14  ;;  %v9091_v21 = vor.u32 %v10557_v3, %v9090_v2  ;;  %v5243_v1 = vpop.f32.mrf.mxu0  ;;  %v9138_v2 = vld [vmem:[%s16165_s1 + $0x13c0] sm:$0xf]  ;;  %v10569_v3 = vld [vmem:[%s16165_s1 + $0x13c4] sm:$0xf0] }
 0x121   :  { %5462 = vmatpush.bf16.msra.mxu1 %v8723_v47  ;;  %v10539_v47 = vld [vmem:[%s16165_s1 + $0x12d4] sm:$0xf0]  ;;  %v5244_v8 = vadd.f32 %v5243_v1, %v12639_v26  ;;  %v9139_v26 = vor.u32 %v10569_v3, %v9138_v2  ;;  %v10549_v1 = vld [vmem:[%s16165_s1 + $0x1324] sm:$0xf0] }
 0x122   :  { %5475 = vmatpush.bf16.msra.mxu2 %v8787_v48  ;;  %v9082_v48 = vld [vmem:[%s16165_s1 + $0x1350] sm:$0xf]  ;;  %v10567_v51 = vld [vmem:[%s16165_s1 + $0x13b4] sm:$0xf0] }
 0x123   :  { %5488 = vmatpush.bf16.msra.mxu3 %v8851_v54  ;;  %5450 = vmatmul.bf16.vlgmr.msra.gmra.mxu0 %v12728_v0  ;;  %v9019_v54 = vor.u32 %v10539_v47, %v9018_v39  ;;  %v9002_v39 = vld [vmem:[%s16165_s1 + $0x12b0] sm:$0xf]  ;;  %v10535_v47 = vld [vmem:[%s16165_s1 + $0x12b4] sm:$0xf0] }
 0x124   :  { %5494 = vmatpush.bf16.msrb.mxu0 %v8971_v56  ;;  %5463 = vmatmul.bf16.vlgmr.msra.gmra.mxu1 %v12741_v6  ;;  %v9083_v56 = vor.u32 %v10555_v61, %v9082_v48  ;;  %v9066_v48 = vld [vmem:[%s16165_s1 + $0x1330] sm:$0xf]  ;;  %v10551_v61 = vld [vmem:[%s16165_s1 + $0x1334] sm:$0xf0] }
 0x125   :  { %5507 = vmatpush.bf16.msrb.mxu1 %v9035_v58  ;;  %5476 = vmatmul.bf16.vlgmr.msra.gmra.mxu2 %v12739_v4  ;;  %v10521_v58 = vld [vmem:[%s16165_s1 + $0x1244] sm:$0xf0] }
 0x126   :  { %5520 = vmatpush.bf16.msrb.mxu2 %v9099_v9  ;;  %5489 = vmatmul.bf16.vlgmr.msra.gmra.mxu3 %v12749_v14  ;;  %v9010_v9 = vld [vmem:[%s16165_s1 + $0x12c0] sm:$0xf]  ;;  %v8947_v55 = vor.u32 %v10521_v58, %v8946_v57  ;;  %v10517_v58 = vld [vmem:[%s16165_s1 + $0x1224] sm:$0xf0] }
 0x127   :  { %5533 = vmatpush.bf16.msrb.mxu3 %v9163_v63  ;;  %v10553_v63 = vld [vmem:[%s16165_s1 + $0x1344] sm:$0xf0]  ;;  %v8930_v57 = vld [vmem:[%s16165_s1 + $0x1220] sm:$0xf] }
 0x128   :  { %5495 = vmatpush.bf16.msrb.mxu0 %v8963_v15  ;;  %v5256_v15 = vpop.f32.mrf.mxu1 }
 0x129   :  { %5508 = vmatpush.bf16.msrb.mxu1 %v9027_v17  ;;  %v9011_v17 = vor.u32 %v10537_v60, %v9010_v9  ;;  %v8994_v9 = vld [vmem:[%s16165_s1 + $0x12a0] sm:$0xf]  ;;  %v5269_v60 = vpop.f32.mrf.mxu2  ;;  %v5282_v3 = vpop.f32.mrf.mxu3 }
 0x12a   :  { %5521 = vmatpush.bf16.msrb.mxu2 %v9091_v21  ;;  %v9075_v21 = vor.u32 %v10553_v63, %v9074_v62  ;;  %v10533_v62 = vld [vmem:[%s16165_s1 + $0x12a4] sm:$0xf0]  ;;  %v9058_v63 = vld [vmem:[%s16165_s1 + $0x1320] sm:$0xf] }
 0x12b   :  { %5534 = vmatpush.bf16.msrb.mxu3 %v9155_v40  ;;  %v5257_v40 = vadd.f32 %v5256_v15, %v5244_v8  ;;  %v9122_v8 = vld [vmem:[%s16165_s1 + $0x13a0] sm:$0xf]  ;;  %v5245_v15 = vpop.f32.mrf.mxu0 }
 0x12c   :  { %5496 = vmatpush.bf16.msrb.mxu0 %v8955_v52  ;;  %v8939_v52 = vor.u32 %v10519_v32, %v8938_v27  ;;  %v8995_v32 = vor.u32 %v10533_v62, %v8994_v9  ;;  %v8978_v9 = vld [vmem:[%s16165_s1 + $0x1280] sm:$0xf]  ;;  %v39_v15 = vld [vmem:[%s16166_s0 + $0x98] sm:$0xff] }
 0x12d   :  { %5509 = vmatpush.bf16.msrb.mxu1 %v9019_v54  ;;  %v9003_v54 = vor.u32 %v10535_v47, %v9002_v39  ;;  %v5270_v2 = vadd.f32 %v5269_v60, %v5257_v40  ;;  %v9059_v39 = vor.u32 %v10549_v1, %v9058_v63  ;;  %v10515_v40 = vld [vmem:[%s16165_s1 + $0x1214] sm:$0xf0]  ;;  %v8986_v47 = vld [vmem:[%s16165_s1 + $0x1290] sm:$0xf]  ;;  %v9042_v63 = vld [vmem:[%s16165_s1 + $0x1300] sm:$0xf]  ;;  %v915_v14 = vunpack.c.h.b16 %v39_v15 }
 0x12e   :  { %5522 = vmatpush.bf16.msrb.mxu2 %v9083_v56  ;;  %v9067_v56 = vor.u32 %v10551_v61, %v9066_v48  ;;  %v10531_v61 = vld [vmem:[%s16165_s1 + $0x1294] sm:$0xf0]  ;;  %v10545_v1 = vld [vmem:[%s16165_s1 + $0x1304] sm:$0xf0] }
 0x12f   :  { %5535 = vmatpush.bf16.msrb.mxu3 %v9147_v59  ;;  %v9131_v59 = vor.u32 %v10567_v51, %v9130_v50  ;;  %v12852_v27 = vadd.f32 %v5282_v3, %v5270_v2  ;;  %v9050_v50 = vld [vmem:[%s16165_s1 + $0x1310] sm:$0xf]  ;;  %v10547_v51 = vld [vmem:[%s16165_s1 + $0x1314] sm:$0xf0]  ;;  %v8987_v60 = vor.u32 %v10531_v61, %v8986_v47 }
 0x130   :  { %5497 = vmatpush.bf16.msrb.mxu0 %v8947_v55  ;;  %v10565_v55 = vld [vmem:[%s16165_s1 + $0x13a4] sm:$0xf0]  ;;  %v9051_v62 = vor.u32 %v10547_v51, %v9050_v50  ;;  %v38_v2 = vld [vmem:[%s16166_s0 + $0x90] sm:$0xff]  ;;  %v10607_v47 = vld [vmem:[%s16165_s1 + $0x14f4] sm:$0xf0] }
 0x131   :  { %5510 = vmatpush.bf16.msrb.mxu1 %v9011_v17  ;;  %v8931_v17 = vor.u32 %v10517_v58, %v8930_v57  ;;  %v9123_v48 = vor.u32 %v10565_v55, %v9122_v8  ;;  %v10513_v58 = vld [vmem:[%s16165_s1 + $0x1204] sm:$0xf0]  ;;  %v9106_v8 = vld [vmem:[%s16165_s1 + $0x1380] sm:$0xf]  ;;  %v10623_v61 = vld [vmem:[%s16165_s1 + $0x1574] sm:$0xf0]  ;;  %v912_v50 = vunpack.c.l.b16 %v38_v2 }
 0x132   :  { %5523 = vmatpush.bf16.msrb.mxu2 %v9075_v21  ;;  %v5258_v21 = vpop.f32.mrf.mxu1  ;;  %v10561_v55 = vld [vmem:[%s16165_s1 + $0x1384] sm:$0xf0] }
 0x133   :  { %5536 = vmatpush.bf16.msrb.mxu3 %v9139_v26  ;;  %v8922_v26 = vld [vmem:[%s16165_s1 + $0x1210] sm:$0xf] }
 0x134   :  { %5498 = vmatpush.bf16.msrb.mxu0 %v8939_v52  ;;  %v9114_v52 = vld [vmem:[%s16165_s1 + $0x1390] sm:$0xf]  ;;  %v8923_v57 = vor.u32 %v10515_v40, %v8922_v26  ;;  %v5284_v26 = vpop.f32.mrf.mxu3 }
 0x135   :  { %5511 = vmatpush.bf16.msrb.mxu1 %v9003_v54  ;;  %v10563_v54 = vld [vmem:[%s16165_s1 + $0x1394] sm:$0xf0]  ;;  %v9226_v21 = vld [vmem:[%s16165_s1 + $0x1470] sm:$0xf] }
 0x136   :  { %5524 = vmatpush.bf16.msrb.mxu2 %v9067_v56  ;;  %v8914_v56 = vld [vmem:[%s16165_s1 + $0x1200] sm:$0xf]  ;;  %v9115_v3 = vor.u32 %v10563_v54, %v9114_v52  ;;  %v9043_v52 = vor.u32 %v10545_v1, %v9042_v63  ;;  %v9418_v54 = vld [vmem:[%s16165_s1 + $0x15f0] sm:$0xf]  ;;  %v12941_v63 = vpack.c.b16 %v912_v50, %v912_v50  ;;  %v10605_v1 = vld [vmem:[%s16165_s1 + $0x14e4] sm:$0xf0] }
 0x137   :  { %5537 = vmatpush.bf16.msrb.mxu3 %v9131_v59  ;;  %v10529_v59 = vld [vmem:[%s16165_s1 + $0x1284] sm:$0xf0]  ;;  %v8915_v40 = vor.u32 %v10513_v58, %v8914_v56  ;;  %v10639_v56 = vld [vmem:[%s16165_s1 + $0x15f4] sm:$0xf0]  ;;  %v913_v58 = vunpack.c.h.b16 %v38_v2  ;;  %v9346_v2 = vld [vmem:[%s16165_s1 + $0x1560] sm:$0xf] }
 0x138   :  { %5499 = vmatpush.bf16.msrb.mxu0 %v8931_v17  ;;  %v5271_v17 = vpop.f32.mrf.mxu2  ;;  %v8979_v51 = vor.u32 %v10529_v59, %v8978_v9  ;;  %v9218_v9 = vld [vmem:[%s16165_s1 + $0x1460] sm:$0xf]  ;;  %v10589_v59 = vld [vmem:[%s16165_s1 + $0x1464] sm:$0xf0]  ;;  %16186 = vst [vmem:[#allocation5_spill] sm:$0xff] %v12941_v63 }
 0x139   :  { %5512 = vmatpush.bf16.msrb.mxu1 %v8995_v32  ;;  %v10591_v32 = vld [vmem:[%s16165_s1 + $0x1474] sm:$0xf0]  ;;  %v9107_v17 = vor.u32 %v10561_v55, %v9106_v8  ;;  %v12954_v55 = vpack.c.b16 %v913_v58, %v913_v58  ;;  %v9274_v50 = vld [vmem:[%s16165_s1 + $0x14d0] sm:$0xf] }
 0x13a   :  { %5525 = vmatpush.bf16.msrb.mxu2 %v9059_v39  ;;  %v9290_v39 = vld [vmem:[%s16165_s1 + $0x14f0] sm:$0xf]  ;;  %v9227_v26 = vor.u32 %v10591_v32, %v9226_v21  ;;  %v10637_v21 = vld [vmem:[%s16165_s1 + $0x15e4] sm:$0xf0]  ;;  %v12962_v32 = vpack.c.b16 %v915_v14, %v915_v14 }
 0x13b   :  { %5538 = vmatpush.bf16.msrb.mxu3 %v9123_v48  ;;  %v9354_v48 = vld [vmem:[%s16165_s1 + $0x1570] sm:$0xf]  ;;  %v9291_v4 = vor.u32 %v10607_v47, %v9290_v39  ;;  %16188 = vst [vmem:[#allocation7_spill] sm:$0xff] %v12954_v55  ;;  %v9219_v39 = vor.u32 %v10589_v59, %v9218_v9  ;;  %v9266_v9 = vld [vmem:[%s16165_s1 + $0x14c0] sm:$0xf] }
 0x13c   :  { %5500 = vmatpush.bf16.msrb.mxu0 %v8923_v57  ;;  %v914_v57 = vunpack.c.l.b16 %v39_v15  ;;  %v9355_v6 = vor.u32 %v10623_v61, %v9354_v48  ;;  %v9410_v15 = vld [vmem:[%s16165_s1 + $0x15e0] sm:$0xf]  ;;  %16189 = vst [vmem:[#allocation8_spill] sm:$0xff] %v12962_v32  ;;  %v9210_v48 = vld [vmem:[%s16165_s1 + $0x1450] sm:$0xf] }
 0x13d   :  { %5513 = vmatpush.bf16.msrb.mxu1 %v8987_v60  ;;  %v9282_v60 = vld [vmem:[%s16165_s1 + $0x14e0] sm:$0xf]  ;;  %v10587_v61 = vld [vmem:[%s16165_s1 + $0x1454] sm:$0xf0]  ;;  %v9411_v14 = vor.u32 %v10637_v21, %v9410_v15  ;;  %v10633_v15 = vld [vmem:[%s16165_s1 + $0x15c4] sm:$0xf0] }
 0x13e   :  { %5526 = vmatpush.bf16.msrb.mxu2 %v9051_v62  ;;  %v9419_v62 = vor.u32 %v10639_v56, %v9418_v54  ;;  %v12952_v8 = vpack.c.b16 %v914_v57, %v914_v57  ;;  %v10635_v54 = vld [vmem:[%s16165_s1 + $0x15d4] sm:$0xf0]  ;;  %v9211_v56 = vor.u32 %v10587_v61, %v9210_v48  ;;  %v9194_v61 = vld [vmem:[%s16165_s1 + $0x1430] sm:$0xf] }
 0x13f   :  { %5539 = vmatpush.bf16.msrb.mxu3 %v9115_v3  ;;  %v10621_v3 = vld [vmem:[%s16165_s1 + $0x1564] sm:$0xf0] }
 0x140   :  { %5501 = vmatpush.bf16.msrb.mxu0 %v8915_v40  ;;  %16187 = vst [vmem:[#allocation6_spill] sm:$0xff] %v12952_v8  ;;  %v9283_v40 = vor.u32 %v10605_v1, %v9282_v60  ;;  %v9347_v47 = vor.u32 %v10621_v3, %v9346_v2  ;;  %v10601_v60 = vld [vmem:[%s16165_s1 + $0x14c4] sm:$0xf0]  ;;  %v5295_v2 = vpop.f32.mrf.mxu0  ;;  %v9394_v3 = vld [vmem:[%s16165_s1 + $0x15c0] sm:$0xf] }
 0x141   :  { %5514 = vmatpush.bf16.msrb.mxu1 %v8979_v51  ;;  %v10619_v51 = vld [vmem:[%s16165_s1 + $0x1554] sm:$0xf0]  ;;  %v10617_v1 = vld [vmem:[%s16165_s1 + $0x1544] sm:$0xf0]  ;;  %v5296_v21 = vadd.f32 %v5295_v2, %v12852_v27  ;;  %v9395_v27 = vor.u32 %v10633_v15, %v9394_v3  ;;  %v9314_v2 = vld [vmem:[%s16165_s1 + $0x1520] sm:$0xf] }
 0x142   :  { %5527 = vmatpush.bf16.msrb.mxu2 %v9043_v52  ;;  %v9402_v52 = vld [vmem:[%s16165_s1 + $0x15d0] sm:$0xf]  ;;  %v10613_v3 = vld [vmem:[%s16165_s1 + $0x1524] sm:$0xf0] }
 0x143   :  { %5540 = vmatpush.bf16.msrb.mxu3 %v9107_v17  ;;  %5502 = vmatmul.bf16.vlgmr.msrb.gmra.mxu0 %v12941_v63  ;;  %v9202_v17 = vld [vmem:[%s16165_s1 + $0x1440] sm:$0xf]  ;;  %v9403_v59 = vor.u32 %v10635_v54, %v9402_v52  ;;  %v10615_v52 = vld [vmem:[%s16165_s1 + $0x1534] sm:$0xf0]  ;;  %v9386_v54 = vld [vmem:[%s16165_s1 + $0x15b0] sm:$0xf] }
 0x144   :  { %5546 = vmatpush.bf16.msra.mxu0 %v9227_v26  ;;  %5515 = vmatmul.bf16.vlgmr.msrb.gmra.mxu1 %v12954_v55  ;;  %v10585_v26 = vld [vmem:[%s16165_s1 + $0x1444] sm:$0xf0] }
 0x145   :  { %5559 = vmatpush.bf16.msra.mxu1 %v9291_v4  ;;  %v10603_v4 = vld [vmem:[%s16165_s1 + $0x14d4] sm:$0xf0]  ;;  %5528 = vmatmul.bf16.vlgmr.msrb.gmra.mxu2 %v12952_v8 }
 0x146   :  { %5572 = vmatpush.bf16.msra.mxu2 %v9355_v6  ;;  %v9338_v6 = vld [vmem:[%s16165_s1 + $0x1550] sm:$0xf]  ;;  %5541 = vmatmul.bf16.vlgmr.msrb.gmra.mxu3 %v12962_v32  ;;  %v9275_v57 = vor.u32 %v10603_v4, %v9274_v50  ;;  %v10583_v50 = vld [vmem:[%s16165_s1 + $0x1434] sm:$0xf0] }
 0x147   :  { %5585 = vmatpush.bf16.msra.mxu3 %v9419_v62  ;;  %v9339_v58 = vor.u32 %v10619_v51, %v9338_v6  ;;  %v9330_v62 = vld [vmem:[%s16165_s1 + $0x1540] sm:$0xf]  ;;  %v10599_v6 = vld [vmem:[%s16165_s1 + $0x14b4] sm:$0xf0]  ;;  %v9322_v51 = vld [vmem:[%s16165_s1 + $0x1530] sm:$0xf] }
 0x148   :  { %5547 = vmatpush.bf16.msra.mxu0 %v9219_v39  ;;  %v9203_v39 = vor.u32 %v10585_v26, %v9202_v17  ;;  %v9331_v48 = vor.u32 %v10617_v1, %v9330_v62  ;;  %v9323_v17 = vor.u32 %v10615_v52, %v9322_v51  ;;  %v9186_v26 = vld [vmem:[%s16165_s1 + $0x1420] sm:$0xf]  ;;  %v5321_v62 = vpop.f32.mrf.mxu2  ;;  %v10597_v1 = vld [vmem:[%s16165_s1 + $0x14a4] sm:$0xf0]  ;;  %v9242_v51 = vld [vmem:[%s16165_s1 + $0x1490] sm:$0xf] }
 0x149   :  { %5560 = vmatpush.bf16.msra.mxu1 %v9283_v40  ;;  %v5308_v40 = vpop.f32.mrf.mxu1 }
 0x14a   :  { %5573 = vmatpush.bf16.msra.mxu2 %v9347_v47  ;;  %v9267_v47 = vor.u32 %v10601_v60, %v9266_v9  ;;  %v5309_v4 = vadd.f32 %v5308_v40, %v5296_v21  ;;  %v10581_v9 = vld [vmem:[%s16165_s1 + $0x1424] sm:$0xf0]  ;;  %v5334_v21 = vpop.f32.mrf.mxu3 }
 0x14b   :  { %5586 = vmatpush.bf16.msra.mxu3 %v9411_v14  ;;  %v9258_v14 = vld [vmem:[%s16165_s1 + $0x14b0] sm:$0xf]  ;;  %v10629_v40 = vld [vmem:[%s16165_s1 + $0x15a4] sm:$0xf0] }
 0x14c   :  { %5548 = vmatpush.bf16.msra.mxu0 %v9211_v56  ;;  %v10631_v56 = vld [vmem:[%s16165_s1 + $0x15b4] sm:$0xf0]  ;;  %v5322_v15 = vadd.f32 %v5321_v62, %v5309_v4  ;;  %v9178_v4 = vld [vmem:[%s16165_s1 + $0x1410] sm:$0xf]  ;;  %v10593_v62 = vld [vmem:[%s16165_s1 + $0x1484] sm:$0xf0] }
 0x14d   :  { %5561 = vmatpush.bf16.msra.mxu1 %v9275_v57  ;;  %v9195_v57 = vor.u32 %v10583_v50, %v9194_v61  ;;  %v9387_v60 = vor.u32 %v10631_v56, %v9386_v54  ;;  %v10595_v54 = vld [vmem:[%s16165_s1 + $0x1494] sm:$0xf0]  ;;  %v9306_v56 = vld [vmem:[%s16165_s1 + $0x1510] sm:$0xf] }
 0x14e   :  { %5574 = vmatpush.bf16.msra.mxu2 %v9339_v58  ;;  %v9259_v58 = vor.u32 %v10599_v6, %v9258_v14  ;;  %v13065_v50 = vadd.f32 %v5334_v21, %v5322_v15  ;;  %v10579_v6 = vld [vmem:[%s16165_s1 + $0x1414] sm:$0xf0]  ;;  %v10609_v15 = vld [vmem:[%s16165_s1 + $0x1504] sm:$0xf0]  ;;  %v40_v21 = vld [vmem:[%s16166_s0 + $0xa0] sm:$0xff] }
 0x14f   :  { %5587 = vmatpush.bf16.msra.mxu3 %v9403_v59  ;;  %v9250_v59 = vld [vmem:[%s16165_s1 + $0x14a0] sm:$0xf] }
 0x150   :  { %5549 = vmatpush.bf16.msra.mxu0 %v9203_v39  ;;  %v9378_v39 = vld [vmem:[%s16165_s1 + $0x15a0] sm:$0xf]  ;;  %v9251_v14 = vor.u32 %v10597_v1, %v9250_v59  ;;  %v10577_v59 = vld [vmem:[%s16165_s1 + $0x1404] sm:$0xf0]  ;;  %v9243_v1 = vor.u32 %v10595_v54, %v9242_v51  ;;  %v9610_v54 = vld [vmem:[%s16165_s1 + $0x1770] sm:$0xf] }
 0x151   :  { %5562 = vmatpush.bf16.msra.mxu1 %v9267_v47  ;;  %v5297_v47 = vpop.f32.mrf.mxu0  ;;  %v5310_v61 = vpop.f32.mrf.mxu1  ;;  %v9379_v52 = vor.u32 %v10629_v40, %v9378_v39  ;;  %v9362_v40 = vld [vmem:[%s16165_s1 + $0x1580] sm:$0xf] }
 0x152   :  { %5575 = vmatpush.bf16.msra.mxu2 %v9331_v48  ;;  %v9187_v48 = vor.u32 %v10581_v9, %v9186_v26  ;;  %v9170_v26 = vld [vmem:[%s16165_s1 + $0x1400] sm:$0xf]  ;;  %v9179_v9 = vor.u32 %v10579_v6, %v9178_v4  ;;  %v10625_v47 = vld [vmem:[%s16165_s1 + $0x1584] sm:$0xf0]  ;;  %v5323_v61 = vpop.f32.mrf.mxu2  ;;  %v9546_v4 = vld [vmem:[%s16165_s1 + $0x16f0] sm:$0xf]  ;;  %v5336_v6 = vpop.f32.mrf.mxu3 }
 0x153   :  { %5588 = vmatpush.bf16.msra.mxu3 %v9395_v27  ;;  %v9315_v27 = vor.u32 %v10613_v3, %v9314_v2  ;;  %v9298_v3 = vld [vmem:[%s16165_s1 + $0x1500] sm:$0xf]  ;;  %v9171_v51 = vor.u32 %v10577_v59, %v9170_v26  ;;  %v9674_v26 = vld [vmem:[%s16165_s1 + $0x17f0] sm:$0xf]  ;;  %v917_v61 = vunpack.c.h.b16 %v40_v21  ;;  %v9363_v6 = vor.u32 %v10625_v47, %v9362_v40 }
 0x154   :  { %5550 = vmatpush.bf16.msra.mxu0 %v9195_v57  ;;  %v10611_v57 = vld [vmem:[%s16165_s1 + $0x1514] sm:$0xf0] }
 0x155   :  { %5563 = vmatpush.bf16.msra.mxu1 %v9259_v58  ;;  %v9370_v58 = vld [vmem:[%s16165_s1 + $0x1590] sm:$0xf]  ;;  %v9307_v2 = vor.u32 %v10611_v57, %v9306_v56  ;;  %v10687_v56 = vld [vmem:[%s16165_s1 + $0x1774] sm:$0xf0]  ;;  %v916_v57 = vunpack.c.l.b16 %v40_v21  ;;  %v9602_v21 = vld [vmem:[%s16165_s1 + $0x1760] sm:$0xf]  ;;  %v13167_v47 = vpack.c.b16 %v917_v61, %v917_v61 }
 0x156   :  { %5576 = vmatpush.bf16.msra.mxu2 %v9323_v17  ;;  %v10627_v17 = vld [vmem:[%s16165_s1 + $0x1594] sm:$0xf0]  ;;  %v9611_v63 = vor.u32 %v10687_v56, %v9610_v54  ;;  %v9466_v54 = vld [vmem:[%s16165_s1 + $0x1650] sm:$0xf]  ;;  %v9458_v61 = vld [vmem:[%s16165_s1 + $0x1640] sm:$0xf] }
 0x157   :  { %5589 = vmatpush.bf16.msra.mxu3 %v9387_v60  ;;  %v9234_v60 = vld [vmem:[%s16165_s1 + $0x1480] sm:$0xf]  ;;  %v9371_v39 = vor.u32 %v10627_v17, %v9370_v58  ;;  %v9299_v17 = vor.u32 %v10609_v15, %v9298_v3  ;;  %v13154_v3 = vpack.c.b16 %v916_v57, %v916_v57  ;;  %v10669_v15 = vld [vmem:[%s16165_s1 + $0x16e4] sm:$0xf0]  ;;  %16192 = vst [vmem:[#allocation11_spill] sm:$0xff] %v13167_v47 }
 0x158   :  { %5551 = vmatpush.bf16.msra.mxu0 %v9187_v48  ;;  %v41_v48 = vld [vmem:[%s16166_s0 + $0xa8] sm:$0xff]  ;;  %v9235_v58 = vor.u32 %v10593_v62, %v9234_v60  ;;  %v9474_v60 = vld [vmem:[%s16165_s1 + $0x1660] sm:$0xf]  ;;  %v10651_v56 = vld [vmem:[%s16165_s1 + $0x1654] sm:$0xf0] }
 0x159   :  { %5564 = vmatpush.bf16.msra.mxu1 %v9251_v14  ;;  %v9482_v14 = vld [vmem:[%s16165_s1 + $0x1670] sm:$0xf]  ;;  %v918_v59 = vunpack.c.l.b16 %v41_v48  ;;  %v919_v8 = vunpack.c.h.b16 %v41_v48  ;;  %v10653_v62 = vld [vmem:[%s16165_s1 + $0x1664] sm:$0xf0]  ;;  %16190 = vst [vmem:[#allocation9_spill] sm:$0xff] %v13154_v3 }
 0x15a   :  { %5577 = vmatpush.bf16.msra.mxu2 %v9315_v27  ;;  %v10655_v27 = vld [vmem:[%s16165_s1 + $0x1674] sm:$0xf0]  ;;  %v9666_v48 = vld [vmem:[%s16165_s1 + $0x17e0] sm:$0xf]  ;;  %v9530_v57 = vld [vmem:[%s16165_s1 + $0x16d0] sm:$0xf] }
 0x15b   :  { %5590 = vmatpush.bf16.msra.mxu3 %v9379_v52  ;;  %v10671_v52 = vld [vmem:[%s16165_s1 + $0x16f4] sm:$0xf0]  ;;  %v9483_v32 = vor.u32 %v10655_v27, %v9482_v14  ;;  %v13165_v40 = vpack.c.b16 %v918_v59, %v918_v59  ;;  %v10701_v14 = vld [vmem:[%s16165_s1 + $0x17e4] sm:$0xf0]  ;;  %v13175_v27 = vpack.c.b16 %v919_v8, %v919_v8 }
 0x15c   :  { %5552 = vmatpush.bf16.msra.mxu0 %v9179_v9  ;;  %v10703_v9 = vld [vmem:[%s16165_s1 + $0x17f4] sm:$0xf0]  ;;  %v9547_v55 = vor.u32 %v10671_v52, %v9546_v4  ;;  %v9475_v4 = vor.u32 %v10653_v62, %v9474_v60  ;;  %v9667_v8 = vor.u32 %v10701_v14, %v9666_v48  ;;  %v9522_v60 = vld [vmem:[%s16165_s1 + $0x16c0] sm:$0xf]  ;;  %v10697_v48 = vld [vmem:[%s16165_s1 + $0x17c4] sm:$0xf0] }
 0x15d   :  { %5565 = vmatpush.bf16.msra.mxu1 %v9243_v1  ;;  %v9538_v1 = vld [vmem:[%s16165_s1 + $0x16e0] sm:$0xf]  ;;  %16191 = vst [vmem:[#allocation10_spill] sm:$0xff] %v13165_v40 }
 0x15e   :  { %5578 = vmatpush.bf16.msra.mxu2 %v9307_v2  ;;  %v9675_v2 = vor.u32 %v10703_v9, %v9674_v26  ;;  %16193 = vst [vmem:[#allocation12_spill] sm:$0xff] %v13175_v27  ;;  %v9467_v26 = vor.u32 %v10651_v56, %v9466_v54  ;;  %v9450_v56 = vld [vmem:[%s16165_s1 + $0x1630] sm:$0xf] }
 0x15f   :  { %5591 = vmatpush.bf16.msra.mxu3 %v9371_v39  ;;  %v10685_v39 = vld [vmem:[%s16165_s1 + $0x1764] sm:$0xf0] }
 0x160   :  { %5553 = vmatpush.bf16.msra.mxu0 %v9171_v51  ;;  %v9539_v51 = vor.u32 %v10669_v15, %v9538_v1  ;;  %v9603_v52 = vor.u32 %v10685_v39, %v9602_v21  ;;  %v10665_v1 = vld [vmem:[%s16165_s1 + $0x16c4] sm:$0xf0]  ;;  %v5347_v21 = vpop.f32.mrf.mxu0  ;;  %v9650_v39 = vld [vmem:[%s16165_s1 + $0x17c0] sm:$0xf] }
 0x161   :  { %5566 = vmatpush.bf16.msra.mxu1 %v9235_v58  ;;  %v9658_v58 = vld [vmem:[%s16165_s1 + $0x17d0] sm:$0xf]  ;;  %v10681_v15 = vld [vmem:[%s16165_s1 + $0x1744] sm:$0xf0]  ;;  %v5348_v14 = vadd.f32 %v5347_v21, %v13065_v50  ;;  %v9651_v50 = vor.u32 %v10697_v48, %v9650_v39  ;;  %v9570_v21 = vld [vmem:[%s16165_s1 + $0x1720] sm:$0xf] }
 0x162   :  { %5579 = vmatpush.bf16.msra.mxu2 %v9299_v17  ;;  %v10699_v17 = vld [vmem:[%s16165_s1 + $0x17d4] sm:$0xf0]  ;;  %v10677_v39 = vld [vmem:[%s16165_s1 + $0x1724] sm:$0xf0] }
 0x163   :  { %5592 = vmatpush.bf16.msra.mxu3 %v9363_v6  ;;  %5554 = vmatmul.bf16.vlgmr.msra.gmra.mxu0 %v13154_v3  ;;  %v10649_v6 = vld [vmem:[%s16165_s1 + $0x1644] sm:$0xf0]  ;;  %v9659_v62 = vor.u32 %v10699_v17, %v9658_v58  ;;  %v10679_v58 = vld [vmem:[%s16165_s1 + $0x1734] sm:$0xf0]  ;;  %v9642_v17 = vld [vmem:[%s16165_s1 + $0x17b0] sm:$0xf] }
 0x164   :  { %5598 = vmatpush.bf16.msrb.mxu0 %v9483_v32  ;;  %v10683_v32 = vld [vmem:[%s16165_s1 + $0x1754] sm:$0xf0]  ;;  %5567 = vmatmul.bf16.vlgmr.msra.gmra.mxu1 %v13167_v47 }
 0x165   :  { %5611 = vmatpush.bf16.msrb.mxu1 %v9547_v55  ;;  %v9594_v55 = vld [vmem:[%s16165_s1 + $0x1750] sm:$0xf]  ;;  %5580 = vmatmul.bf16.vlgmr.msra.gmra.mxu2 %v13165_v40 }
 0x166   :  { %5624 = vmatpush.bf16.msrb.mxu2 %v9611_v63  ;;  %v10667_v63 = vld [vmem:[%s16165_s1 + $0x16d4] sm:$0xf0]  ;;  %5593 = vmatmul.bf16.vlgmr.msra.gmra.mxu3 %v13175_v27  ;;  %v9595_v59 = vor.u32 %v10683_v32, %v9594_v55  ;;  %v9578_v32 = vld [vmem:[%s16165_s1 + $0x1730] sm:$0xf] }
 0x167   :  { %5637 = vmatpush.bf16.msrb.mxu3 %v9675_v2  ;;  %v9531_v9 = vor.u32 %v10667_v63, %v9530_v57  ;;  %v9586_v2 = vld [vmem:[%s16165_s1 + $0x1740] sm:$0xf]  ;;  %v10647_v57 = vld [vmem:[%s16165_s1 + $0x1634] sm:$0xf0] }
 0x168   :  { %5599 = vmatpush.bf16.msrb.mxu0 %v9475_v4  ;;  %v9459_v4 = vor.u32 %v10649_v6, %v9458_v61  ;;  %v9587_v54 = vor.u32 %v10681_v15, %v9586_v2  ;;  %v10663_v55 = vld [vmem:[%s16165_s1 + $0x16b4] sm:$0xf0]  ;;  %v9579_v61 = vor.u32 %v10679_v58, %v9578_v32  ;;  %v9442_v6 = vld [vmem:[%s16165_s1 + $0x1620] sm:$0xf]  ;;  %v5373_v2 = vpop.f32.mrf.mxu2  ;;  %v10661_v15 = vld [vmem:[%s16165_s1 + $0x16a4] sm:$0xf0] }
 0x169   :  { %5612 = vmatpush.bf16.msrb.mxu1 %v9539_v51  ;;  %v5360_v51 = vpop.f32.mrf.mxu1  ;;  %v9498_v32 = vld [vmem:[%s16165_s1 + $0x1690] sm:$0xf] }
 0x16a   :  { %5625 = vmatpush.bf16.msrb.mxu2 %v9603_v52  ;;  %v9523_v52 = vor.u32 %v10665_v1, %v9522_v60  ;;  %v5361_v63 = vadd.f32 %v5360_v51, %v5348_v14  ;;  %v10645_v60 = vld [vmem:[%s16165_s1 + $0x1624] sm:$0xf0]  ;;  %v5386_v14 = vpop.f32.mrf.mxu3 }
 0x16b   :  { %5638 = vmatpush.bf16.msrb.mxu3 %v9667_v8  ;;  %v9514_v8 = vld [vmem:[%s16165_s1 + $0x16b0] sm:$0xf]  ;;  %v10693_v51 = vld [vmem:[%s16165_s1 + $0x17a4] sm:$0xf0] }
 0x16c   :  { %5600 = vmatpush.bf16.msrb.mxu0 %v9467_v26  ;;  %v10695_v26 = vld [vmem:[%s16165_s1 + $0x17b4] sm:$0xf0]  ;;  %v5374_v48 = vadd.f32 %v5373_v2, %v5361_v63  ;;  %v9434_v63 = vld [vmem:[%s16165_s1 + $0x1610] sm:$0xf]  ;;  %v10657_v2 = vld [vmem:[%s16165_s1 + $0x1684] sm:$0xf0] }
 0x16d   :  { %5613 = vmatpush.bf16.msrb.mxu1 %v9531_v9  ;;  %v9451_v9 = vor.u32 %v10647_v57, %v9450_v56  ;;  %v9643_v1 = vor.u32 %v10695_v26, %v9642_v17  ;;  %v10659_v17 = vld [vmem:[%s16165_s1 + $0x1694] sm:$0xf0]  ;;  %v9562_v26 = vld [vmem:[%s16165_s1 + $0x1710] sm:$0xf] }
 0x16e   :  { %5626 = vmatpush.bf16.msrb.mxu2 %v9595_v59  ;;  %v9515_v59 = vor.u32 %v10663_v55, %v9514_v8  ;;  %v13278_v57 = vadd.f32 %v5386_v14, %v5374_v48  ;;  %v10643_v55 = vld [vmem:[%s16165_s1 + $0x1614] sm:$0xf0]  ;;  %v10673_v48 = vld [vmem:[%s16165_s1 + $0x1704] sm:$0xf0]  ;;  %v42_v14 = vld [vmem:[%s16166_s0 + $0xb0] sm:$0xff] }
 0x16f   :  { %5639 = vmatpush.bf16.msrb.mxu3 %v9659_v62  ;;  %v9506_v62 = vld [vmem:[%s16165_s1 + $0x16a0] sm:$0xf] }
 0x170   :  { %5601 = vmatpush.bf16.msrb.mxu0 %v9459_v4  ;;  %v9634_v4 = vld [vmem:[%s16165_s1 + $0x17a0] sm:$0xf]  ;;  %v9507_v8 = vor.u32 %v10661_v15, %v9506_v62  ;;  %v10641_v62 = vld [vmem:[%s16165_s1 + $0x1604] sm:$0xf0]  ;;  %v9499_v15 = vor.u32 %v10659_v17, %v9498_v32  ;;  %v9950_v17 = vld [vmem:[%s16165_s1 + $0x74] sm:$0xf] }
 0x171   :  { %5614 = vmatpush.bf16.msrb.mxu1 %v9523_v52  ;;  %v5349_v52 = vpop.f32.mrf.mxu0  ;;  %v5362_v56 = vpop.f32.mrf.mxu1  ;;  %v9635_v58 = vor.u32 %v10693_v51, %v9634_v4  ;;  %v9618_v51 = vld [vmem:[%s16165_s1 + $0x1780] sm:$0xf] }
 0x172   :  { %5627 = vmatpush.bf16.msrb.mxu2 %v9587_v54  ;;  %v9443_v54 = vor.u32 %v10645_v60, %v9442_v6  ;;  %v9426_v6 = vld [vmem:[%s16165_s1 + $0x1600] sm:$0xf]  ;;  %v9435_v60 = vor.u32 %v10643_v55, %v9434_v63  ;;  %v10689_v52 = vld [vmem:[%s16165_s1 + $0x1784] sm:$0xf0]  ;;  %v5375_v56 = vpop.f32.mrf.mxu2  ;;  %v9802_v63 = vld [vmem:[%s16165_s1 + $0x18f0] sm:$0xf]  ;;  %v5388_v55 = vpop.f32.mrf.mxu3 }
 0x173   :  { %5640 = vmatpush.bf16.msrb.mxu3 %v9651_v50  ;;  %v9571_v50 = vor.u32 %v10677_v39, %v9570_v21  ;;  %v9554_v39 = vld [vmem:[%s16165_s1 + $0x1700] sm:$0xf]  ;;  %v9427_v32 = vor.u32 %v10641_v62, %v9426_v6  ;;  %v9966_v6 = vld [vmem:[%s16165_s1 + $0xf4] sm:$0xf]  ;;  %v921_v56 = vunpack.c.h.b16 %v42_v14  ;;  %v9619_v55 = vor.u32 %v10689_v52, %v9618_v51 }
 0x174   :  { %5602 = vmatpush.bf16.msrb.mxu0 %v9451_v9  ;;  %v10675_v9 = vld [vmem:[%s16165_s1 + $0x1714] sm:$0xf0] }
 0x175   :  { %5615 = vmatpush.bf16.msrb.mxu1 %v9515_v59  ;;  %v9626_v59 = vld [vmem:[%s16165_s1 + $0x1790] sm:$0xf]  ;;  %v9563_v21 = vor.u32 %v10675_v9, %v9562_v26  ;;  %v6668_v26 = vld [vmem:[%s16165_s1 + $0x78] sm:$0xf0]  ;;  %v920_v9 = vunpack.c.l.b16 %v42_v14  ;;  %v9948_v14 = vld [vmem:[%s16165_s1 + $0x64] sm:$0xf]  ;;  %v13380_v52 = vpack.c.b16 %v921_v56, %v921_v56 }
 0x176   :  { %5628 = vmatpush.bf16.msrb.mxu2 %v9579_v61  ;;  %v10691_v61 = vld [vmem:[%s16165_s1 + $0x1794] sm:$0xf0]  ;;  %v6671_v3 = vor.u32 %v9950_v17, %v6668_v26  ;;  %v9722_v17 = vld [vmem:[%s16165_s1 + $0x1850] sm:$0xf]  ;;  %v9714_v56 = vld [vmem:[%s16165_s1 + $0x1840] sm:$0xf] }
 0x177   :  { %5641 = vmatpush.bf16.msrb.mxu3 %v9643_v1  ;;  %v9490_v1 = vld [vmem:[%s16165_s1 + $0x1680] sm:$0xf]  ;;  %v9627_v4 = vor.u32 %v10691_v61, %v9626_v59  ;;  %v9555_v61 = vor.u32 %v10673_v48, %v9554_v39  ;;  %v13367_v39 = vpack.c.b16 %v920_v9, %v920_v9  ;;  %v10733_v48 = vld [vmem:[%s16165_s1 + $0x18e4] sm:$0xf0]  ;;  %v10715_v26 = vld [vmem:[%s16165_s1 + $0x1854] sm:$0xf0] }
 0x178   :  { %5603 = vmatpush.bf16.msrb.mxu0 %v9443_v54  ;;  %v43_v54 = vld [vmem:[%s16166_s0 + $0xb8] sm:$0xff]  ;;  %v9491_v59 = vor.u32 %v10657_v2, %v9490_v1  ;;  %v9730_v1 = vld [vmem:[%s16165_s1 + $0x1860] sm:$0xf]  ;;  %v10717_v2 = vld [vmem:[%s16165_s1 + $0x1864] sm:$0xf0] }
 0x179   :  { %5616 = vmatpush.bf16.msrb.mxu1 %v9507_v8  ;;  %v9738_v8 = vld [vmem:[%s16165_s1 + $0x1870] sm:$0xf]  ;;  %v922_v62 = vunpack.c.l.b16 %v43_v54  ;;  %v923_v40 = vunpack.c.h.b16 %v43_v54  ;;  %v9964_v54 = vld [vmem:[%s16165_s1 + $0xe4] sm:$0xf] }
 0x17a   :  { %5629 = vmatpush.bf16.msrb.mxu2 %v9571_v50  ;;  %v10719_v50 = vld [vmem:[%s16165_s1 + $0x1874] sm:$0xf0]  ;;  %v9786_v9 = vld [vmem:[%s16165_s1 + $0x18d0] sm:$0xf] }
 0x17b   :  { %5642 = vmatpush.bf16.msrb.mxu3 %v9635_v58  ;;  %v10735_v58 = vld [vmem:[%s16165_s1 + $0x18f4] sm:$0xf0]  ;;  %v9739_v27 = vor.u32 %v10719_v50, %v9738_v8  ;;  %v13378_v51 = vpack.c.b16 %v922_v62, %v922_v62  ;;  %v6724_v8 = vld [vmem:[%s16165_s1 + $0xe8] sm:$0xf0]  ;;  %v13388_v50 = vpack.c.b16 %v923_v40, %v923_v40 }
 0x17c   :  { %5604 = vmatpush.bf16.msrb.mxu0 %v9435_v60  ;;  %v6732_v60 = vld [vmem:[%s16165_s1 + $0xf8] sm:$0xf0]  ;;  %v9803_v47 = vor.u32 %v10735_v58, %v9802_v63  ;;  %v9731_v63 = vor.u32 %v10717_v2, %v9730_v1  ;;  %v6727_v40 = vor.u32 %v9964_v54, %v6724_v8  ;;  %v9778_v1 = vld [vmem:[%s16165_s1 + $0x18c0] sm:$0xf]  ;;  %v6708_v54 = vld [vmem:[%s16165_s1 + $0xc8] sm:$0xf0] }
 0x17d   :  { %5617 = vmatpush.bf16.msrb.mxu1 %v9499_v15  ;;  %v9794_v15 = vld [vmem:[%s16165_s1 + $0x18e0] sm:$0xf]  ;;  %16194 = vst [vmem:[#allocation13_spill] sm:$0xff] %v13388_v50 }
 0x17e   :  { %5630 = vmatpush.bf16.msrb.mxu2 %v9563_v21  ;;  %v6735_v21 = vor.u32 %v9966_v6, %v6732_v60  ;;  %v9723_v6 = vor.u32 %v10715_v26, %v9722_v17  ;;  %v9706_v26 = vld [vmem:[%s16165_s1 + $0x1830] sm:$0xf] }
 0x17f   :  { %5643 = vmatpush.bf16.msrb.mxu3 %v9627_v4  ;;  %v6660_v4 = vld [vmem:[%s16165_s1 + $0x68] sm:$0xf0] }
 0x180   :  { %5605 = vmatpush.bf16.msrb.mxu0 %v9427_v32  ;;  %v9795_v32 = vor.u32 %v10733_v48, %v9794_v15  ;;  %v6663_v58 = vor.u32 %v9948_v14, %v6660_v4  ;;  %v10729_v15 = vld [vmem:[%s16165_s1 + $0x18c4] sm:$0xf0]  ;;  %v6644_v48 = vld [vmem:[%s16165_s1 + $0x48] sm:$0xf0]  ;;  %v5399_v14 = vpop.f32.mrf.mxu0  ;;  %v9960_v4 = vld [vmem:[%s16165_s1 + $0xc4] sm:$0xf] }
 0x181   :  { %5618 = vmatpush.bf16.msrb.mxu1 %v9491_v59  ;;  %v9962_v59 = vld [vmem:[%s16165_s1 + $0xd4] sm:$0xf]  ;;  %v5400_v8 = vadd.f32 %v5399_v14, %v13278_v57  ;;  %v6711_v57 = vor.u32 %v9960_v4, %v6708_v54  ;;  %v9940_v14 = vld [vmem:[%s16165_s1 + $0x24] sm:$0xf]  ;;  %v6628_v4 = vld [vmem:[%s16165_s1 + $0x28] sm:$0xf0] }
 0x182   :  { %5631 = vmatpush.bf16.msrb.mxu2 %v9555_v61  ;;  %v6716_v61 = vld [vmem:[%s16165_s1 + $0xd8] sm:$0xf0] }
 0x183   :  { %5644 = vmatpush.bf16.msrb.mxu3 %v9619_v55  ;;  %5606 = vmatmul.bf16.vlgmr.msrb.gmra.mxu0 %v13367_v39  ;;  %v10713_v55 = vld [vmem:[%s16165_s1 + $0x1844] sm:$0xf0]  ;;  %v6719_v2 = vor.u32 %v9962_v59, %v6716_v61  ;;  %v6636_v59 = vld [vmem:[%s16165_s1 + $0x38] sm:$0xf0]  ;;  %v9958_v61 = vld [vmem:[%s16165_s1 + $0xb4] sm:$0xf] }
 0x184   :  { %5650 = vmatpush.bf16.msra.mxu0 %v9739_v27  ;;  %v6652_v27 = vld [vmem:[%s16165_s1 + $0x58] sm:$0xf0]  ;;  %5619 = vmatmul.bf16.vlgmr.msrb.gmra.mxu1 %v13380_v52 }
 0x185   :  { %5663 = vmatpush.bf16.msra.mxu1 %v9803_v47  ;;  %v9946_v47 = vld [vmem:[%s16165_s1 + $0x54] sm:$0xf]  ;;  %5632 = vmatmul.bf16.vlgmr.msrb.gmra.mxu2 %v13378_v51 }
 0x186   :  { %5676 = vmatpush.bf16.msra.mxu2 %v6671_v3  ;;  %v10731_v3 = vld [vmem:[%s16165_s1 + $0x18d4] sm:$0xf0]  ;;  %5645 = vmatmul.bf16.vlgmr.msrb.gmra.mxu3 %v13388_v50  ;;  %v6655_v62 = vor.u32 %v9946_v47, %v6652_v27  ;;  %v9942_v27 = vld [vmem:[%s16165_s1 + $0x34] sm:$0xf] }
 0x187   :  { %5689 = vmatpush.bf16.msra.mxu3 %v6735_v21  ;;  %v9787_v60 = vor.u32 %v10731_v3, %v9786_v9  ;;  %v9944_v21 = vld [vmem:[%s16165_s1 + $0x44] sm:$0xf]  ;;  %v10711_v9 = vld [vmem:[%s16165_s1 + $0x1834] sm:$0xf0] }
 0x188   :  { %5651 = vmatpush.bf16.msra.mxu0 %v9731_v63  ;;  %v9715_v63 = vor.u32 %v10713_v55, %v9714_v56  ;;  %v6647_v17 = vor.u32 %v9944_v21, %v6644_v48  ;;  %v10727_v47 = vld [vmem:[%s16165_s1 + $0x18b4] sm:$0xf0]  ;;  %v6639_v56 = vor.u32 %v9942_v27, %v6636_v59  ;;  %v9698_v55 = vld [vmem:[%s16165_s1 + $0x1820] sm:$0xf]  ;;  %v5425_v21 = vpop.f32.mrf.mxu2  ;;  %v10725_v48 = vld [vmem:[%s16165_s1 + $0x18a4] sm:$0xf0] }
 0x189   :  { %5664 = vmatpush.bf16.msra.mxu1 %v9795_v32  ;;  %v5412_v32 = vpop.f32.mrf.mxu1  ;;  %v9754_v27 = vld [vmem:[%s16165_s1 + $0x1890] sm:$0xf] }
 0x18a   :  { %5677 = vmatpush.bf16.msra.mxu2 %v6663_v58  ;;  %v9779_v58 = vor.u32 %v10729_v15, %v9778_v1  ;;  %v5413_v3 = vadd.f32 %v5412_v32, %v5400_v8  ;;  %v10709_v1 = vld [vmem:[%s16165_s1 + $0x1824] sm:$0xf0]  ;;  %v5438_v8 = vpop.f32.mrf.mxu3  ;;  %v6692_v32 = vld [vmem:[%s16165_s1 + $0xa8] sm:$0xf0] }
 0x18b   :  { %5690 = vmatpush.bf16.msra.mxu3 %v6727_v40  ;;  %v9770_v40 = vld [vmem:[%s16165_s1 + $0x18b0] sm:$0xf] }
 0x18c   :  { %5652 = vmatpush.bf16.msra.mxu0 %v9723_v6  ;;  %v6700_v6 = vld [vmem:[%s16165_s1 + $0xb8] sm:$0xf0]  ;;  %v5426_v54 = vadd.f32 %v5425_v21, %v5413_v3  ;;  %v9690_v3 = vld [vmem:[%s16165_s1 + $0x1810] sm:$0xf] }
 0x18d   :  { %5665 = vmatpush.bf16.msra.mxu1 %v9787_v60  ;;  %v9707_v60 = vor.u32 %v10711_v9, %v9706_v26  ;;  %v6703_v15 = vor.u32 %v9958_v61, %v6700_v6  ;;  %v10723_v61 = vld [vmem:[%s16165_s1 + $0x1894] sm:$0xf0]  ;;  %v9938_v6 = vld [vmem:[%s16165_s1 + $0x14] sm:$0xf] }
 0x18e   :  { %5678 = vmatpush.bf16.msra.mxu2 %v6655_v62  ;;  %v9771_v62 = vor.u32 %v10727_v47, %v9770_v40  ;;  %v13491_v9 = vadd.f32 %v5438_v8, %v5426_v54  ;;  %v10707_v47 = vld [vmem:[%s16165_s1 + $0x1814] sm:$0xf0]  ;;  %v9755_v21 = vor.u32 %v10723_v61, %v9754_v27  ;;  %v44_v54 = vld [vmem:[%s16166_s0 + $0xc0] sm:$0xff]  ;;  %v6860_v27 = vld [vmem:[%s16165_s1 + $0x1f8] sm:$0xf0] }
 0x18f   :  { %5691 = vmatpush.bf16.msra.mxu3 %v6719_v2  ;;  %v9762_v2 = vld [vmem:[%s16165_s1 + $0x18a0] sm:$0xf]  ;;  %v6924_v61 = vld [vmem:[%s16165_s1 + $0x278] sm:$0xf0] }
 0x190   :  { %5653 = vmatpush.bf16.msra.mxu0 %v9715_v63  ;;  %v9956_v63 = vld [vmem:[%s16165_s1 + $0xa4] sm:$0xf]  ;;  %v9763_v40 = vor.u32 %v10725_v48, %v9762_v2  ;;  %v10705_v2 = vld [vmem:[%s16165_s1 + $0x1804] sm:$0xf0] }
 0x191   :  { %5666 = vmatpush.bf16.msra.mxu1 %v9779_v58  ;;  %v5401_v58 = vpop.f32.mrf.mxu0  ;;  %v5414_v26 = vpop.f32.mrf.mxu1  ;;  %v6695_v59 = vor.u32 %v9956_v63, %v6692_v32  ;;  %v6612_v63 = vld [vmem:[%s16165_s1 + $0x8] sm:$0xf0]  ;;  %v9952_v32 = vld [vmem:[%s16165_s1 + $0x84] sm:$0xf] }
 0x192   :  { %5679 = vmatpush.bf16.msra.mxu2 %v6647_v17  ;;  %v9699_v17 = vor.u32 %v10709_v1, %v9698_v55  ;;  %v9691_v55 = vor.u32 %v10707_v47, %v9690_v3  ;;  %v9682_v1 = vld [vmem:[%s16165_s1 + $0x1800] sm:$0xf]  ;;  %v6676_v58 = vld [vmem:[%s16165_s1 + $0x88] sm:$0xf0]  ;;  %v9982_v26 = vld [vmem:[%s16165_s1 + $0x174] sm:$0xf]  ;;  %v5440_v3 = vpop.f32.mrf.mxu3 }
 0x193   :  { %5692 = vmatpush.bf16.msra.mxu3 %v6711_v57  ;;  %v6631_v57 = vor.u32 %v9940_v14, %v6628_v4  ;;  %v10721_v14 = vld [vmem:[%s16165_s1 + $0x1884] sm:$0xf0]  ;;  %v9936_v4 = vld [vmem:[%s16165_s1 + $0x4] sm:$0xf]  ;;  %v9683_v47 = vor.u32 %v10705_v2, %v9682_v1  ;;  %v925_v1 = vunpack.c.h.b16 %v44_v54  ;;  %v6679_v2 = vor.u32 %v9952_v32, %v6676_v58 }
 0x194   :  { %5654 = vmatpush.bf16.msra.mxu0 %v9707_v60  ;;  %v6620_v60 = vld [vmem:[%s16165_s1 + $0x18] sm:$0xf0]  ;;  %v10028_v58 = vld [vmem:[%s16165_s1 + $0x2e4] sm:$0xf] }
 0x195   :  { %5667 = vmatpush.bf16.msra.mxu1 %v9771_v62  ;;  %v9954_v62 = vld [vmem:[%s16165_s1 + $0x94] sm:$0xf]  ;;  %v6623_v48 = vor.u32 %v9938_v6, %v6620_v60  ;;  %v924_v6 = vunpack.c.l.b16 %v44_v54  ;;  %v6852_v54 = vld [vmem:[%s16165_s1 + $0x1e8] sm:$0xf0]  ;;  %v13588_v32 = vpack.c.b16 %v925_v1, %v925_v1 }
 0x196   :  { %5680 = vmatpush.bf16.msra.mxu2 %v6639_v56  ;;  %v6684_v56 = vld [vmem:[%s16165_s1 + $0x98] sm:$0xf0] }
 0x197   :  { %5693 = vmatpush.bf16.msra.mxu3 %v6703_v15  ;;  %v9746_v15 = vld [vmem:[%s16165_s1 + $0x1880] sm:$0xf]  ;;  %v6687_v8 = vor.u32 %v9954_v62, %v6684_v56  ;;  %v6615_v62 = vor.u32 %v9936_v4, %v6612_v63  ;;  %v10030_v56 = vld [vmem:[%s16165_s1 + $0x2f4] sm:$0xf]  ;;  %v13577_v4 = vpack.c.b16 %v924_v6, %v924_v6  ;;  %v6916_v63 = vld [vmem:[%s16165_s1 + $0x268] sm:$0xf0] }
 0x198   :  { %5655 = vmatpush.bf16.msra.mxu0 %v9699_v17  ;;  %v5427_v17 = vpop.f32.mrf.mxu2  ;;  %v9747_v60 = vor.u32 %v10721_v14, %v9746_v15  ;;  %v6788_v15 = vld [vmem:[%s16165_s1 + $0x168] sm:$0xf0] }
 0x199   :  { %5668 = vmatpush.bf16.msra.mxu1 %v9763_v40  ;;  %v6796_v40 = vld [vmem:[%s16165_s1 + $0x178] sm:$0xf0] }
 0x19a   :  { %5681 = vmatpush.bf16.msra.mxu2 %v6631_v57  ;;  %v9998_v57 = vld [vmem:[%s16165_s1 + $0x1f4] sm:$0xf]  ;;  %v6799_v17 = vor.u32 %v9982_v26, %v6796_v40  ;;  %v6980_v26 = vld [vmem:[%s16165_s1 + $0x2e8] sm:$0xf0] }
 0x19b   :  { %5694 = vmatpush.bf16.msra.mxu3 %v6695_v59  ;;  %v10014_v59 = vld [vmem:[%s16165_s1 + $0x274] sm:$0xf]  ;;  %v6863_v3 = vor.u32 %v9998_v57, %v6860_v27  ;;  %v6983_v6 = vor.u32 %v10028_v58, %v6980_v26 }
 0x19c   :  { %5656 = vmatpush.bf16.msra.mxu0 %v9691_v55  ;;  %v6988_v55 = vld [vmem:[%s16165_s1 + $0x2f8] sm:$0xf0]  ;;  %v6927_v50 = vor.u32 %v10014_v59, %v6924_v61  ;;  %v9978_v27 = vld [vmem:[%s16165_s1 + $0x154] sm:$0xf] }
 0x19d   :  { %5669 = vmatpush.bf16.msra.mxu1 %v9755_v21  ;;  %v9980_v21 = vld [vmem:[%s16165_s1 + $0x164] sm:$0xf]  ;;  %v6991_v14 = vor.u32 %v10030_v56, %v6988_v55  ;;  %v6780_v59 = vld [vmem:[%s16165_s1 + $0x158] sm:$0xf0]  ;;  %v9994_v61 = vld [vmem:[%s16165_s1 + $0x1d4] sm:$0xf] }
 0x19e   :  { %5682 = vmatpush.bf16.msra.mxu2 %v6623_v48  ;;  %v9996_v48 = vld [vmem:[%s16165_s1 + $0x1e4] sm:$0xf]  ;;  %v6791_v40 = vor.u32 %v9980_v21, %v6788_v15  ;;  %v10026_v56 = vld [vmem:[%s16165_s1 + $0x2d4] sm:$0xf]  ;;  %v6972_v55 = vld [vmem:[%s16165_s1 + $0x2d8] sm:$0xf0]  ;;  %v6783_v1 = vor.u32 %v9978_v27, %v6780_v59 }
 0x19f   :  { %5695 = vmatpush.bf16.msra.mxu3 %v6687_v8  ;;  %v10012_v8 = vld [vmem:[%s16165_s1 + $0x264] sm:$0xf]  ;;  %v6855_v57 = vor.u32 %v9996_v48, %v6852_v54  ;;  %v6772_v21 = vld [vmem:[%s16165_s1 + $0x148] sm:$0xf0]  ;;  %v6975_v15 = vor.u32 %v10026_v56, %v6972_v55  ;;  %v9974_v27 = vld [vmem:[%s16165_s1 + $0x134] sm:$0xf] }
 0x1a0   :  { %5657 = vmatpush.bf16.msra.mxu0 %v9683_v47  ;;  %v6919_v47 = vor.u32 %v10012_v8, %v6916_v63  ;;  %v10008_v48 = vld [vmem:[%s16165_s1 + $0x244] sm:$0xf]  ;;  %v5451_v54 = vpop.f32.mrf.mxu0  ;;  %v6964_v63 = vld [vmem:[%s16165_s1 + $0x2c8] sm:$0xf0]  ;;  %v6764_v59 = vld [vmem:[%s16165_s1 + $0x138] sm:$0xf0] }
 0x1a1   :  { %5670 = vmatpush.bf16.msra.mxu1 %v9747_v60  ;;  %v10010_v60 = vld [vmem:[%s16165_s1 + $0x254] sm:$0xf]  ;;  %v10024_v8 = vld [vmem:[%s16165_s1 + $0x2c4] sm:$0xf]  ;;  %v5452_v58 = vadd.f32 %v5451_v54, %v13491_v9  ;;  %v6956_v55 = vld [vmem:[%s16165_s1 + $0x2b8] sm:$0xf0] }
 0x1a2   :  { %5683 = vmatpush.bf16.msra.mxu2 %v6615_v62  ;;  %v6908_v62 = vld [vmem:[%s16165_s1 + $0x258] sm:$0xf0]  ;;  %v6967_v9 = vor.u32 %v10024_v8, %v6964_v63  ;;  %v10022_v56 = vld [vmem:[%s16165_s1 + $0x2b4] sm:$0xf]  ;;  %v6884_v54 = vld [vmem:[%s16165_s1 + $0x228] sm:$0xf0] }
 0x1a3   :  { %5696 = vmatpush.bf16.msra.mxu3 %v6679_v2  ;;  %5658 = vmatmul.bf16.vlgmr.msra.gmra.mxu0 %v13577_v4 }
 0x1a4   :  { %5702 = vmatpush.bf16.msrb.mxu0 %v6799_v17  ;;  %5671 = vmatmul.bf16.vlgmr.msra.gmra.mxu1 %v13588_v32  ;;  %v6911_v17 = vor.u32 %v10010_v60, %v6908_v62  ;;  %v10006_v60 = vld [vmem:[%s16165_s1 + $0x234] sm:$0xf]  ;;  %v6892_v62 = vld [vmem:[%s16165_s1 + $0x238] sm:$0xf0] }
 0x1a5   :  { %5715 = vmatpush.bf16.msrb.mxu1 %v6863_v3  ;;  %5684 = vmatmul.bf16.vlgmr.msra.gmra.mxu2 %v11099_v19  ;;  %v9976_v3 = vld [vmem:[%s16165_s1 + $0x144] sm:$0xf] }
 0x1a6   :  { %5728 = vmatpush.bf16.msrb.mxu2 %v6927_v50  ;;  %v6844_v50 = vld [vmem:[%s16165_s1 + $0x1d8] sm:$0xf0]  ;;  %5697 = vmatmul.bf16.vlgmr.msra.gmra.mxu3 %v11103_v22  ;;  %v9992_v19 = vld [vmem:[%s16165_s1 + $0x1c4] sm:$0xf]  ;;  %v6836_v22 = vld [vmem:[%s16165_s1 + $0x1c8] sm:$0xf0]  ;;  %v6775_v26 = vor.u32 %v9976_v3, %v6772_v21 }
 0x1a7   :  { %5741 = vmatpush.bf16.msrb.mxu3 %v6991_v14  ;;  %v6847_v2 = vor.u32 %v9994_v61, %v6844_v50  ;;  %v6900_v14 = vld [vmem:[%s16165_s1 + $0x248] sm:$0xf0]  ;;  %v9990_v61 = vld [vmem:[%s16165_s1 + $0x1b4] sm:$0xf]  ;;  %v6828_v50 = vld [vmem:[%s16165_s1 + $0x1b8] sm:$0xf0] }
 0x1a8   :  { %5703 = vmatpush.bf16.msrb.mxu0 %v6791_v40  ;;  %v5464_v40 = vpop.f32.mrf.mxu1  ;;  %v9972_v3 = vld [vmem:[%s16165_s1 + $0x124] sm:$0xf]  ;;  %v6756_v21 = vld [vmem:[%s16165_s1 + $0x128] sm:$0xf0] }
 0x1a9   :  { %5716 = vmatpush.bf16.msrb.mxu1 %v6855_v57  ;;  %v6839_v57 = vor.u32 %v9992_v19, %v6836_v22  ;;  %v9988_v19 = vld [vmem:[%s16165_s1 + $0x1a4] sm:$0xf]  ;;  %v5477_v22 = vpop.f32.mrf.mxu2  ;;  %v5490_v63 = vpop.f32.mrf.mxu3 }
 0x1aa   :  { %5729 = vmatpush.bf16.msrb.mxu2 %v6919_v47  ;;  %v6903_v47 = vor.u32 %v10008_v48, %v6900_v14  ;;  %v6820_v48 = vld [vmem:[%s16165_s1 + $0x1a8] sm:$0xf0]  ;;  %v10004_v14 = vld [vmem:[%s16165_s1 + $0x224] sm:$0xf] }
 0x1ab   :  { %5742 = vmatpush.bf16.msrb.mxu3 %v6983_v6  ;;  %v5465_v6 = vadd.f32 %v5464_v40, %v5452_v58  ;;  %v10020_v58 = vld [vmem:[%s16165_s1 + $0x2a4] sm:$0xf]  ;;  %v5453_v40 = vpop.f32.mrf.mxu0 }
 0x1ac   :  { %5704 = vmatpush.bf16.msrb.mxu0 %v6783_v1  ;;  %v6767_v1 = vor.u32 %v9974_v27, %v6764_v59  ;;  %v6823_v59 = vor.u32 %v9988_v19, %v6820_v48  ;;  %v6804_v48 = vld [vmem:[%s16165_s1 + $0x188] sm:$0xf0]  ;;  %v10046_v40 = vld [vmem:[%s16165_s1 + $0x374] sm:$0xf] }
 0x1ad   :  { %5717 = vmatpush.bf16.msrb.mxu1 %v6847_v2  ;;  %v6831_v2 = vor.u32 %v9990_v61, %v6828_v50  ;;  %v5478_v8 = vadd.f32 %v5477_v22, %v5465_v6  ;;  %v6887_v61 = vor.u32 %v10004_v14, %v6884_v54  ;;  %v6748_v6 = vld [vmem:[%s16165_s1 + $0x118] sm:$0xf0]  ;;  %v9986_v50 = vld [vmem:[%s16165_s1 + $0x194] sm:$0xf]  ;;  %v9984_v22 = vld [vmem:[%s16165_s1 + $0x184] sm:$0xf] }
 0x1ae   :  { %5730 = vmatpush.bf16.msrb.mxu2 %v6911_v17  ;;  %v6895_v17 = vor.u32 %v10006_v60, %v6892_v62  ;;  %v6812_v62 = vld [vmem:[%s16165_s1 + $0x198] sm:$0xf0]  ;;  %v10000_v14 = vld [vmem:[%s16165_s1 + $0x204] sm:$0xf] }
 0x1af   :  { %5743 = vmatpush.bf16.msrb.mxu3 %v6975_v15  ;;  %v6959_v15 = vor.u32 %v10022_v56, %v6956_v55  ;;  %v13697_v27 = vadd.f32 %v5490_v63, %v5478_v8  ;;  %v10002_v56 = vld [vmem:[%s16165_s1 + $0x214] sm:$0xf]  ;;  %v6876_v55 = vld [vmem:[%s16165_s1 + $0x218] sm:$0xf0]  ;;  %v6815_v19 = vor.u32 %v9986_v50, %v6812_v62  ;;  %v6868_v8 = vld [vmem:[%s16165_s1 + $0x208] sm:$0xf0] }
 0x1b0   :  { %5705 = vmatpush.bf16.msrb.mxu0 %v6775_v26  ;;  %v6948_v26 = vld [vmem:[%s16165_s1 + $0x2a8] sm:$0xf0]  ;;  %v10016_v63 = vld [vmem:[%s16165_s1 + $0x284] sm:$0xf]  ;;  %v7180_v50 = vld [vmem:[%s16165_s1 + $0x478] sm:$0xf0]  ;;  %v6871_v62 = vor.u32 %v10000_v14, %v6868_v8 }
 0x1b1   :  { %5718 = vmatpush.bf16.msrb.mxu1 %v6839_v57  ;;  %v6759_v57 = vor.u32 %v9972_v3, %v6756_v21  ;;  %v6951_v60 = vor.u32 %v10020_v58, %v6948_v26  ;;  %v9968_v3 = vld [vmem:[%s16165_s1 + $0x104] sm:$0xf]  ;;  %v6740_v21 = vld [vmem:[%s16165_s1 + $0x108] sm:$0xf0]  ;;  %v5479_v26 = vpop.f32.mrf.mxu2 }
 0x1b2   :  { %5731 = vmatpush.bf16.msrb.mxu2 %v6903_v47  ;;  %v5466_v47 = vpop.f32.mrf.mxu1  ;;  %v6932_v58 = vld [vmem:[%s16165_s1 + $0x288] sm:$0xf0]  ;;  %v10076_v14 = vld [vmem:[%s16165_s1 + $0x464] sm:$0xf] }
 0x1b3   :  { %5744 = vmatpush.bf16.msrb.mxu3 %v6967_v9  ;;  %v9970_v9 = vld [vmem:[%s16165_s1 + $0x114] sm:$0xf]  ;;  %v10092_v8 = vld [vmem:[%s16165_s1 + $0x4e4] sm:$0xf] }
 0x1b4   :  { %5706 = vmatpush.bf16.msrb.mxu0 %v6767_v1  ;;  %v10018_v1 = vld [vmem:[%s16165_s1 + $0x294] sm:$0xf] }
 0x1b5   :  { %5719 = vmatpush.bf16.msrb.mxu1 %v6831_v2  ;;  %v6940_v2 = vld [vmem:[%s16165_s1 + $0x298] sm:$0xf0]  ;;  %v10062_v47 = vld [vmem:[%s16165_s1 + $0x3f4] sm:$0xf] }
 0x1b6   :  { %5732 = vmatpush.bf16.msrb.mxu2 %v6895_v17  ;;  %v6751_v17 = vor.u32 %v9970_v9, %v6748_v6  ;;  %v6943_v54 = vor.u32 %v10018_v1, %v6940_v2  ;;  %v7116_v9 = vld [vmem:[%s16165_s1 + $0x3f8] sm:$0xf0]  ;;  %v10078_v6 = vld [vmem:[%s16165_s1 + $0x474] sm:$0xf]  ;;  %v6935_v1 = vor.u32 %v10016_v63, %v6932_v58  ;;  %v7236_v63 = vld [vmem:[%s16165_s1 + $0x4e8] sm:$0xf0] }
 0x1b7   :  { %5745 = vmatpush.bf16.msrb.mxu3 %v6959_v15  ;;  %v6879_v15 = vor.u32 %v10002_v56, %v6876_v55  ;;  %v10094_v56 = vld [vmem:[%s16165_s1 + $0x4f4] sm:$0xf]  ;;  %v7244_v55 = vld [vmem:[%s16165_s1 + $0x4f8] sm:$0xf0] }
 0x1b8   :  { %5707 = vmatpush.bf16.msrb.mxu0 %v6759_v57  ;;  %v7052_v57 = vld [vmem:[%s16165_s1 + $0x378] sm:$0xf0] }
 0x1b9   :  { %5720 = vmatpush.bf16.msrb.mxu1 %v6823_v59  ;;  %v5492_v59 = vpop.f32.mrf.mxu3  ;;  %v7055_v2 = vor.u32 %v10046_v40, %v7052_v57  ;;  %v10042_v57 = vld [vmem:[%s16165_s1 + $0x354] sm:$0xf] }
 0x1ba   :  { %5733 = vmatpush.bf16.msrb.mxu2 %v6887_v61  ;;  %v6743_v61 = vor.u32 %v9968_v3, %v6740_v21  ;;  %v7183_v3 = vor.u32 %v10078_v6, %v7180_v50  ;;  %v10044_v21 = vld [vmem:[%s16165_s1 + $0x364] sm:$0xf]  ;;  %v10058_v59 = vld [vmem:[%s16165_s1 + $0x3d4] sm:$0xf]  ;;  %v7164_v50 = vld [vmem:[%s16165_s1 + $0x458] sm:$0xf0] }
 0x1bb   :  { %5746 = vmatpush.bf16.msrb.mxu3 %v6951_v60  ;;  %v6807_v60 = vor.u32 %v9984_v22, %v6804_v48  ;;  %v7247_v22 = vor.u32 %v10094_v56, %v7244_v55  ;;  %v7108_v48 = vld [vmem:[%s16165_s1 + $0x3e8] sm:$0xf0]  ;;  %v10074_v6 = vld [vmem:[%s16165_s1 + $0x454] sm:$0xf] }
 0x1bc   :  { %5708 = vmatpush.bf16.msrb.mxu0 %v6751_v17  ;;  %v7119_v17 = vor.u32 %v10062_v47, %v7116_v9  ;;  %v7036_v47 = vld [vmem:[%s16165_s1 + $0x358] sm:$0xf0]  ;;  %v7167_v55 = vor.u32 %v10074_v6, %v7164_v50 }
 0x1bd   :  { %5721 = vmatpush.bf16.msrb.mxu1 %v6815_v19  ;;  %v7044_v19 = vld [vmem:[%s16165_s1 + $0x368] sm:$0xf0]  ;;  %v7100_v9 = vld [vmem:[%s16165_s1 + $0x3d8] sm:$0xf0] }
 0x1be   :  { %5734 = vmatpush.bf16.msrb.mxu2 %v6879_v15  ;;  %v10060_v15 = vld [vmem:[%s16165_s1 + $0x3e4] sm:$0xf]  ;;  %v7047_v58 = vor.u32 %v10044_v21, %v7044_v19  ;;  %v7103_v56 = vor.u32 %v10058_v59, %v7100_v9  ;;  %v7148_v59 = vld [vmem:[%s16165_s1 + $0x438] sm:$0xf0] }
 0x1bf   :  { %5747 = vmatpush.bf16.msrb.mxu3 %v6943_v54  ;;  %v7172_v54 = vld [vmem:[%s16165_s1 + $0x468] sm:$0xf0]  ;;  %v7111_v26 = vor.u32 %v10060_v15, %v7108_v48  ;;  %v10088_v19 = vld [vmem:[%s16165_s1 + $0x4c4] sm:$0xf]  ;;  %v7212_v9 = vld [vmem:[%s16165_s1 + $0x4b8] sm:$0xf0] }
 0x1c0   :  { %5709 = vmatpush.bf16.msrb.mxu0 %v6743_v61  ;;  %v7175_v40 = vor.u32 %v10076_v14, %v7172_v54  ;;  %v7239_v61 = vor.u32 %v10092_v8, %v7236_v63  ;;  %v5503_v21 = vpop.f32.mrf.mxu0  ;;  %v7220_v15 = vld [vmem:[%s16165_s1 + $0x4c8] sm:$0xf0]  ;;  %v10038_v63 = vld [vmem:[%s16165_s1 + $0x334] sm:$0xf] }
 0x1c1   :  { %5722 = vmatpush.bf16.msrb.mxu1 %v6807_v60  ;;  %v10090_v60 = vld [vmem:[%s16165_s1 + $0x4d4] sm:$0xf]  ;;  %v5516_v14 = vpop.f32.mrf.mxu1 }
 0x1c2   :  { %5735 = vmatpush.bf16.msrb.mxu2 %v6871_v62  ;;  %v7039_v62 = vor.u32 %v10042_v57, %v7036_v47  ;;  %v7084_v57 = vld [vmem:[%s16165_s1 + $0x3b8] sm:$0xf0]  ;;  %v10070_v47 = vld [vmem:[%s16165_s1 + $0x434] sm:$0xf] }
 0x1c3   :  { %5748 = vmatpush.bf16.msrb.mxu3 %v6935_v1  ;;  %5710 = vmatmul.bf16.vlgmr.msrb.gmra.mxu0 %v11097_v18  ;;  %v10040_v1 = vld [vmem:[%s16165_s1 + $0x344] sm:$0xf] }
 0x1c4   :  { %5754 = vmatpush.bf16.msra.mxu0 %v7055_v2  ;;  %5723 = vmatmul.bf16.vlgmr.msrb.gmra.mxu1 %v11101_v20  ;;  %v7028_v2 = vld [vmem:[%s16165_s1 + $0x348] sm:$0xf0]  ;;  %v10056_v18 = vld [vmem:[%s16165_s1 + $0x3c4] sm:$0xf] }
 0x1c5   :  { %5767 = vmatpush.bf16.msra.mxu1 %v7119_v17  ;;  %5736 = vmatmul.bf16.vlgmr.msrb.gmra.mxu2 %v11261_v41  ;;  %v7228_v41 = vld [vmem:[%s16165_s1 + $0x4d8] sm:$0xf0]  ;;  %v7092_v20 = vld [vmem:[%s16165_s1 + $0x3c8] sm:$0xf0]  ;;  %v10072_v17 = vld [vmem:[%s16165_s1 + $0x444] sm:$0xf]  ;;  %v7031_v48 = vor.u32 %v10040_v1, %v7028_v2 }
 0x1c6   :  { %5780 = vmatpush.bf16.msra.mxu2 %v7183_v3  ;;  %5749 = vmatmul.bf16.vlgmr.msrb.gmra.mxu3 %v11265_v44  ;;  %v7231_v44 = vor.u32 %v10090_v60, %v7228_v41  ;;  %v7156_v3 = vld [vmem:[%s16165_s1 + $0x448] sm:$0xf0]  ;;  %v7095_v54 = vor.u32 %v10056_v18, %v7092_v20  ;;  %v7151_v60 = vor.u32 %v10070_v47, %v7148_v59  ;;  %v10036_v41 = vld [vmem:[%s16165_s1 + $0x324] sm:$0xf]  ;;  %v10082_v47 = vld [vmem:[%s16165_s1 + $0x494] sm:$0xf] }
 0x1c7   :  { %5793 = vmatpush.bf16.msra.mxu3 %v7247_v22  ;;  %v5504_v22 = vadd.f32 %v5503_v21, %v13697_v27  ;;  %v7159_v8 = vor.u32 %v10072_v17, %v7156_v3  ;;  %v7223_v27 = vor.u32 %v10088_v19, %v7220_v15  ;;  %v7076_v2 = vld [vmem:[%s16165_s1 + $0x3a8] sm:$0xf0]  ;;  %v10068_v18 = vld [vmem:[%s16165_s1 + $0x424] sm:$0xf]  ;;  %v7196_v59 = vld [vmem:[%s16165_s1 + $0x498] sm:$0xf0] }
 0x1c8   :  { %5755 = vmatpush.bf16.msra.mxu0 %v7047_v58  ;;  %v7020_v58 = vld [vmem:[%s16165_s1 + $0x338] sm:$0xf0]  ;;  %v5529_v1 = vpop.f32.mrf.mxu2  ;;  %v10084_v3 = vld [vmem:[%s16165_s1 + $0x4a4] sm:$0xf]  ;;  %v7204_v21 = vld [vmem:[%s16165_s1 + $0x4a8] sm:$0xf0]  ;;  %v5505_v19 = vpop.f32.mrf.mxu0 }
 0x1c9   :  { %5768 = vmatpush.bf16.msra.mxu1 %v7111_v26  ;;  %v10054_v26 = vld [vmem:[%s16165_s1 + $0x3b4] sm:$0xf]  ;;  %v7023_v6 = vor.u32 %v10038_v63, %v7020_v58  ;;  %v5542_v17 = vpop.f32.mrf.mxu3  ;;  %v7004_v63 = vld [vmem:[%s16165_s1 + $0x318] sm:$0xf0] }
 0x1ca   :  { %5781 = vmatpush.bf16.msra.mxu2 %v7175_v40  ;;  %v5517_v40 = vadd.f32 %v5516_v14, %v5504_v22  ;;  %v7087_v50 = vor.u32 %v10054_v26, %v7084_v57  ;;  %v5518_v22 = vpop.f32.mrf.mxu1  ;;  %v10050_v58 = vld [vmem:[%s16165_s1 + $0x394] sm:$0xf]  ;;  %v7207_v26 = vor.u32 %v10084_v3, %v7204_v21  ;;  %v7132_v57 = vld [vmem:[%s16165_s1 + $0x418] sm:$0xf0] }
 0x1cb   :  { %5794 = vmatpush.bf16.msra.mxu3 %v7239_v61  ;;  %v10086_v61 = vld [vmem:[%s16165_s1 + $0x4b4] sm:$0xf] }
 0x1cc   :  { %5756 = vmatpush.bf16.msra.mxu0 %v7039_v62  ;;  %v7012_v62 = vld [vmem:[%s16165_s1 + $0x328] sm:$0xf0]  ;;  %v5530_v20 = vadd.f32 %v5529_v1, %v5517_v40  ;;  %v10066_v40 = vld [vmem:[%s16165_s1 + $0x414] sm:$0xf] }
 0x1cd   :  { %5769 = vmatpush.bf16.msra.mxu1 %v7103_v56  ;;  %v10052_v56 = vld [vmem:[%s16165_s1 + $0x3a4] sm:$0xf]  ;;  %v7015_v15 = vor.u32 %v10036_v41, %v7012_v62  ;;  %v7060_v62 = vld [vmem:[%s16165_s1 + $0x388] sm:$0xf0]  ;;  %v10126_v3 = vld [vmem:[%s16165_s1 + $0x5f4] sm:$0xf] }
 0x1ce   :  { %5782 = vmatpush.bf16.msra.mxu2 %v7167_v55  ;;  %v7215_v55 = vor.u32 %v10086_v61, %v7212_v9  ;;  %v7079_v14 = vor.u32 %v10052_v56, %v7076_v2  ;;  %v10032_v9 = vld [vmem:[%s16165_s1 + $0x304] sm:$0xf]  ;;  %v7124_v1 = vld [vmem:[%s16165_s1 + $0x408] sm:$0xf0]  ;;  %v10142_v22 = vld [vmem:[%s16165_s1 + $0x674] sm:$0xf] }
 0x1cf   :  { %5795 = vmatpush.bf16.msra.mxu3 %v7231_v44  ;;  %v7140_v44 = vld [vmem:[%s16165_s1 + $0x428] sm:$0xf0]  ;;  %v10048_v41 = vld [vmem:[%s16165_s1 + $0x384] sm:$0xf] }
 0x1d0   :  { %5757 = vmatpush.bf16.msra.mxu0 %v7031_v48  ;;  %v13896_v48 = vadd.f32 %v5542_v17, %v5530_v20  ;;  %v10064_v56 = vld [vmem:[%s16165_s1 + $0x404] sm:$0xf]  ;;  %v10110_v20 = vld [vmem:[%s16165_s1 + $0x574] sm:$0xf]  ;;  %v7308_v17 = vld [vmem:[%s16165_s1 + $0x578] sm:$0xf0] }
 0x1d1   :  { %5770 = vmatpush.bf16.msra.mxu1 %v7095_v54  ;;  %v7143_v54 = vor.u32 %v10068_v18, %v7140_v44  ;;  %v10080_v2 = vld [vmem:[%s16165_s1 + $0x484] sm:$0xf]  ;;  %v7188_v18 = vld [vmem:[%s16165_s1 + $0x488] sm:$0xf0]  ;;  %v5531_v44 = vpop.f32.mrf.mxu2  ;;  %v5544_v21 = vpop.f32.mrf.mxu3 }
 0x1d2   :  { %5783 = vmatpush.bf16.msra.mxu2 %v7159_v8  ;;  %v10034_v8 = vld [vmem:[%s16165_s1 + $0x314] sm:$0xf]  ;;  %v7420_v21 = vld [vmem:[%s16165_s1 + $0x658] sm:$0xf0] }
 0x1d3   :  { %5796 = vmatpush.bf16.msra.mxu3 %v7223_v27  ;;  %v7068_v27 = vld [vmem:[%s16165_s1 + $0x398] sm:$0xf0]  ;;  %v7007_v61 = vor.u32 %v10034_v8, %v7004_v63  ;;  %v7127_v8 = vor.u32 %v10064_v56, %v7124_v1  ;;  %v10158_v63 = vld [vmem:[%s16165_s1 + $0x6f4] sm:$0xf] }
 0x1d4   :  { %5758 = vmatpush.bf16.msra.mxu0 %v7023_v6  ;;  %v6996_v6 = vld [vmem:[%s16165_s1 + $0x308] sm:$0xf0]  ;;  %v10122_v44 = vld [vmem:[%s16165_s1 + $0x5d4] sm:$0xf] }
 0x1d5   :  { %5771 = vmatpush.bf16.msra.mxu1 %v7087_v50  ;;  %v7071_v50 = vor.u32 %v10050_v58, %v7068_v27  ;;  %v6999_v19 = vor.u32 %v10032_v9, %v6996_v6  ;;  %v7500_v58 = vld [vmem:[%s16165_s1 + $0x6f8] sm:$0xf0]  ;;  %v7311_v27 = vor.u32 %v10110_v20, %v7308_v17  ;;  %v7364_v6 = vld [vmem:[%s16165_s1 + $0x5e8] sm:$0xf0] }
 0x1d6   :  { %5784 = vmatpush.bf16.msra.mxu2 %v7151_v60  ;;  %v7135_v60 = vor.u32 %v10066_v40, %v7132_v57  ;;  %v7503_v9 = vor.u32 %v10158_v63, %v7500_v58  ;;  %v7356_v17 = vld [vmem:[%s16165_s1 + $0x5d8] sm:$0xf0]  ;;  %v10136_v63 = vld [vmem:[%s16165_s1 + $0x644] sm:$0xf]  ;;  %v7412_v58 = vld [vmem:[%s16165_s1 + $0x648] sm:$0xf0] }
 0x1d7   :  { %5797 = vmatpush.bf16.msra.mxu3 %v7215_v55  ;;  %v7199_v55 = vor.u32 %v10082_v47, %v7196_v59  ;;  %v10108_v47 = vld [vmem:[%s16165_s1 + $0x564] sm:$0xf]  ;;  %v7300_v59 = vld [vmem:[%s16165_s1 + $0x568] sm:$0xf0] }
 0x1d8   :  { %5759 = vmatpush.bf16.msra.mxu0 %v7015_v15  ;;  %v7372_v15 = vld [vmem:[%s16165_s1 + $0x5f8] sm:$0xf0]  ;;  %v7303_v56 = vor.u32 %v10108_v47, %v7300_v59 }
 0x1d9   :  { %5772 = vmatpush.bf16.msra.mxu1 %v7079_v14  ;;  %v7436_v14 = vld [vmem:[%s16165_s1 + $0x678] sm:$0xf0]  ;;  %v7375_v40 = vor.u32 %v10126_v3, %v7372_v15  ;;  %v10138_v3 = vld [vmem:[%s16165_s1 + $0x654] sm:$0xf] }
 0x1da   :  { %5785 = vmatpush.bf16.msra.mxu2 %v7143_v54  ;;  %v7063_v54 = vor.u32 %v10048_v41, %v7060_v62  ;;  %v7439_v57 = vor.u32 %v10142_v22, %v7436_v14  ;;  %v10156_v41 = vld [vmem:[%s16165_s1 + $0x6e4] sm:$0xf]  ;;  %v7492_v62 = vld [vmem:[%s16165_s1 + $0x6e8] sm:$0xf0]  ;;  %v7359_v22 = vor.u32 %v10122_v44, %v7356_v17  ;;  %v7423_v14 = vor.u32 %v10138_v3, %v7420_v21 }
 0x1db   :  { %5798 = vmatpush.bf16.msra.mxu3 %v7207_v26  ;;  %v7191_v26 = vor.u32 %v10080_v2, %v7188_v18  ;;  %v10106_v2 = vld [vmem:[%s16165_s1 + $0x554] sm:$0xf]  ;;  %v7292_v18 = vld [vmem:[%s16165_s1 + $0x558] sm:$0xf0]  ;;  %v7495_v20 = vor.u32 %v10156_v41, %v7492_v62  ;;  %v10100_v17 = vld [vmem:[%s16165_s1 + $0x524] sm:$0xf] }
 0x1dc   :  { %5760 = vmatpush.bf16.msra.mxu0 %v7007_v61  ;;  %v10124_v61 = vld [vmem:[%s16165_s1 + $0x5e4] sm:$0xf]  ;;  %v7295_v15 = vor.u32 %v10106_v2, %v7292_v18  ;;  %v7340_v62 = vld [vmem:[%s16165_s1 + $0x5b8] sm:$0xf0]  ;;  %v7268_v3 = vld [vmem:[%s16165_s1 + $0x528] sm:$0xf0] }
 0x1dd   :  { %5773 = vmatpush.bf16.msra.mxu1 %v7071_v50  ;;  %v10140_v50 = vld [vmem:[%s16165_s1 + $0x664] sm:$0xf]  ;;  %v7468_v2 = vld [vmem:[%s16165_s1 + $0x6b8] sm:$0xf0] }
 0x1de   :  { %5786 = vmatpush.bf16.msra.mxu2 %v7135_v60  ;;  %v7428_v60 = vld [vmem:[%s16165_s1 + $0x668] sm:$0xf0]  ;;  %v10116_v21 = vld [vmem:[%s16165_s1 + $0x5a4] sm:$0xf] }
 0x1df   :  { %5799 = vmatpush.bf16.msra.mxu3 %v7199_v55  ;;  %v7367_v55 = vor.u32 %v10124_v61, %v7364_v6  ;;  %v7431_v1 = vor.u32 %v10140_v50, %v7428_v60  ;;  %v10102_v6 = vld [vmem:[%s16165_s1 + $0x534] sm:$0xf]  ;;  %v7276_v50 = vld [vmem:[%s16165_s1 + $0x538] sm:$0xf0] }
 0x1e0   :  { %5761 = vmatpush.bf16.msra.mxu0 %v6999_v19  ;;  %v7484_v19 = vld [vmem:[%s16165_s1 + $0x6d8] sm:$0xf0]  ;;  %v10118_v60 = vld [vmem:[%s16165_s1 + $0x5b4] sm:$0xf]  ;;  %v7279_v18 = vor.u32 %v10102_v6, %v7276_v50 }
 0x1e1   :  { %5774 = vmatpush.bf16.msra.mxu1 %v7063_v54  ;;  %v10120_v54 = vld [vmem:[%s16165_s1 + $0x5c4] sm:$0xf]  ;;  %v5568_v59 = vpop.f32.mrf.mxu1  ;;  %v7343_v44 = vor.u32 %v10118_v60, %v7340_v62  ;;  %v10130_v6 = vld [vmem:[%s16165_s1 + $0x614] sm:$0xf]  ;;  %v7388_v50 = vld [vmem:[%s16165_s1 + $0x618] sm:$0xf0] }
 0x1e2   :  { %5787 = vmatpush.bf16.msra.mxu2 %v7127_v8  ;;  %v7348_v8 = vld [vmem:[%s16165_s1 + $0x5c8] sm:$0xf0]  ;;  %v10146_v60 = vld [vmem:[%s16165_s1 + $0x694] sm:$0xf]  ;;  %v10096_v62 = vld [vmem:[%s16165_s1 + $0x504] sm:$0xf] }
 0x1e3   :  { %5800 = vmatpush.bf16.msra.mxu3 %v7191_v26  ;;  %5762 = vmatmul.bf16.vlgmr.msra.gmra.mxu0 %v11253_v38  ;;  %v10154_v38 = vld [vmem:[%s16165_s1 + $0x6d4] sm:$0xf]  ;;  %v5555_v26 = vpop.f32.mrf.mxu0  ;;  %v7351_v61 = vor.u32 %v10120_v54, %v7348_v8  ;;  %v10148_v54 = vld [vmem:[%s16165_s1 + $0x6a4] sm:$0xf] }
 0x1e4   :  { %5806 = vmatpush.bf16.msrb.mxu0 %v7311_v27  ;;  %5775 = vmatmul.bf16.vlgmr.msra.gmra.mxu1 %v11263_v42  ;;  %v10104_v42 = vld [vmem:[%s16165_s1 + $0x544] sm:$0xf] }
 0x1e5   :  { %5819 = vmatpush.bf16.msrb.mxu1 %v7375_v40  ;;  %5788 = vmatmul.bf16.vlgmr.msra.gmra.mxu2 %v11454_v25  ;;  %v7284_v25 = vld [vmem:[%s16165_s1 + $0x548] sm:$0xf0]  ;;  %v10152_v27 = vld [vmem:[%s16165_s1 + $0x6c4] sm:$0xf] }
 0x1e6   :  { %5832 = vmatpush.bf16.msrb.mxu2 %v7439_v57  ;;  %5801 = vmatmul.bf16.vlgmr.msra.gmra.mxu3 %v11467_v30  ;;  %v7487_v30 = vor.u32 %v10154_v38, %v7484_v19  ;;  %v7476_v40 = vld [vmem:[%s16165_s1 + $0x6c8] sm:$0xf0]  ;;  %v5556_v57 = vadd.f32 %v5555_v26, %v13896_v48  ;;  %v7287_v47 = vor.u32 %v10104_v42, %v7284_v25 }
 0x1e7   :  { %5845 = vmatpush.bf16.msrb.mxu3 %v7503_v9  ;;  %v7415_v9 = vor.u32 %v10136_v63, %v7412_v58  ;;  %v7479_v48 = vor.u32 %v10152_v27, %v7476_v40  ;;  %v7271_v63 = vor.u32 %v10100_v17, %v7268_v3  ;;  %v7380_v17 = vld [vmem:[%s16165_s1 + $0x608] sm:$0xf0]  ;;  %v10144_v3 = vld [vmem:[%s16165_s1 + $0x684] sm:$0xf] }
 0x1e8   :  { %5807 = vmatpush.bf16.msrb.mxu0 %v7303_v56  ;;  %v5569_v41 = vadd.f32 %v5568_v59, %v5556_v57  ;;  %v10134_v56 = vld [vmem:[%s16165_s1 + $0x634] sm:$0xf]  ;;  %v5581_v19 = vpop.f32.mrf.mxu2 }
 0x1e9   :  { %5820 = vmatpush.bf16.msrb.mxu1 %v7367_v55  ;;  %v7404_v55 = vld [vmem:[%s16165_s1 + $0x638] sm:$0xf0]  ;;  %v5594_v25 = vpop.f32.mrf.mxu3  ;;  %v5570_v58 = vpop.f32.mrf.mxu1  ;;  %v10098_v57 = vld [vmem:[%s16165_s1 + $0x514] sm:$0xf] }
 0x1ea   :  { %5833 = vmatpush.bf16.msrb.mxu2 %v7431_v1  ;;  %v10150_v1 = vld [vmem:[%s16165_s1 + $0x6b4] sm:$0xf]  ;;  %v5582_v42 = vadd.f32 %v5581_v19, %v5569_v41 }
 0x1eb   :  { %5846 = vmatpush.bf16.msrb.mxu3 %v7495_v20  ;;  %v7407_v20 = vor.u32 %v10134_v56, %v7404_v55  ;;  %v7471_v38 = vor.u32 %v10150_v1, %v7468_v2  ;;  %v5557_v8 = vpop.f32.mrf.mxu0  ;;  %v10114_v59 = vld [vmem:[%s16165_s1 + $0x594] sm:$0xf]  ;;  %v7252_v56 = vld [vmem:[%s16165_s1 + $0x508] sm:$0xf0]  ;;  %v7391_v1 = vor.u32 %v10130_v6, %v7388_v50  ;;  %v10112_v2 = vld [vmem:[%s16165_s1 + $0x584] sm:$0xf] }
 0x1ec   :  { %5808 = vmatpush.bf16.msrb.mxu0 %v7295_v15  ;;  %v7332_v15 = vld [vmem:[%s16165_s1 + $0x5a8] sm:$0xf0]  ;;  %v14095_v26 = vadd.f32 %v5594_v25, %v5582_v42  ;;  %v10174_v19 = vld [vmem:[%s16165_s1 + $0x774] sm:$0xf]  ;;  %v7255_v42 = vor.u32 %v10096_v62, %v7252_v56  ;;  %v7628_v25 = vld [vmem:[%s16165_s1 + $0x7f8] sm:$0xf0] }
 0x1ed   :  { %5821 = vmatpush.bf16.msrb.mxu1 %v7359_v22  ;;  %v10132_v22 = vld [vmem:[%s16165_s1 + $0x624] sm:$0xf]  ;;  %v7335_v27 = vor.u32 %v10116_v21, %v7332_v15  ;;  %v7444_v21 = vld [vmem:[%s16165_s1 + $0x688] sm:$0xf0]  ;;  %v7564_v15 = vld [vmem:[%s16165_s1 + $0x778] sm:$0xf0] }
 0x1ee   :  { %5834 = vmatpush.bf16.msrb.mxu2 %v7423_v14  ;;  %v7396_v14 = vld [vmem:[%s16165_s1 + $0x628] sm:$0xf0]  ;;  %v10222_v58 = vld [vmem:[%s16165_s1 + $0x8f4] sm:$0xf]  ;;  %v10188_v6 = vld [vmem:[%s16165_s1 + $0x7e4] sm:$0xf] }
 0x1ef   :  { %5847 = vmatpush.bf16.msrb.mxu3 %v7487_v30  ;;  %v7460_v30 = vld [vmem:[%s16165_s1 + $0x6a8] sm:$0xf0]  ;;  %v7399_v40 = vor.u32 %v10132_v22, %v7396_v14  ;;  %v10190_v22 = vld [vmem:[%s16165_s1 + $0x7f4] sm:$0xf]  ;;  %v10220_v62 = vld [vmem:[%s16165_s1 + $0x8e4] sm:$0xf] }
 0x1f0   :  { %5809 = vmatpush.bf16.msrb.mxu0 %v7287_v47  ;;  %v7260_v47 = vld [vmem:[%s16165_s1 + $0x518] sm:$0xf0]  ;;  %v7748_v56 = vld [vmem:[%s16165_s1 + $0x8e8] sm:$0xf0] }
 0x1f1   :  { %5822 = vmatpush.bf16.msrb.mxu1 %v7351_v61  ;;  %v7463_v61 = vor.u32 %v10148_v54, %v7460_v30  ;;  %v7263_v41 = vor.u32 %v10098_v57, %v7260_v47  ;;  %v5596_v14 = vpop.f32.mrf.mxu3  ;;  %v10206_v54 = vld [vmem:[%s16165_s1 + $0x874] sm:$0xf]  ;;  %v7692_v30 = vld [vmem:[%s16165_s1 + $0x878] sm:$0xf0]  ;;  %v7567_v57 = vor.u32 %v10174_v19, %v7564_v15  ;;  %v7631_v47 = vor.u32 %v10190_v22, %v7628_v25  ;;  %v7604_v25 = vld [vmem:[%s16165_s1 + $0x7c8] sm:$0xf0] }
 0x1f2   :  { %5835 = vmatpush.bf16.msrb.mxu2 %v7415_v9  ;;  %v7324_v9 = vld [vmem:[%s16165_s1 + $0x598] sm:$0xf0] }
 0x1f3   :  { %5848 = vmatpush.bf16.msrb.mxu3 %v7479_v48  ;;  %v7452_v48 = vld [vmem:[%s16165_s1 + $0x698] sm:$0xf0]  ;;  %v7327_v55 = vor.u32 %v10114_v59, %v7324_v9  ;;  %v7695_v59 = vor.u32 %v10206_v54, %v7692_v30  ;;  %v7556_v9 = vld [vmem:[%s16165_s1 + $0x768] sm:$0xf0]  ;;  %v10200_v54 = vld [vmem:[%s16165_s1 + $0x844] sm:$0xf] }
 0x1f4   :  { %5810 = vmatpush.bf16.msrb.mxu0 %v7279_v18  ;;  %v7316_v18 = vld [vmem:[%s16165_s1 + $0x588] sm:$0xf0]  ;;  %v7740_v19 = vld [vmem:[%s16165_s1 + $0x8d8] sm:$0xf0] }
 0x1f5   :  { %5823 = vmatpush.bf16.msrb.mxu1 %v7343_v44  ;;  %v10128_v44 = vld [vmem:[%s16165_s1 + $0x604] sm:$0xf]  ;;  %v7319_v8 = vor.u32 %v10112_v2, %v7316_v18  ;;  %v10170_v18 = vld [vmem:[%s16165_s1 + $0x754] sm:$0xf]  ;;  %v7668_v30 = vld [vmem:[%s16165_s1 + $0x848] sm:$0xf0] }
 0x1f6   :  { %5836 = vmatpush.bf16.msrb.mxu2 %v7407_v20  ;;  %v7455_v20 = vor.u32 %v10146_v60, %v7452_v48  ;;  %v7620_v60 = vld [vmem:[%s16165_s1 + $0x7e8] sm:$0xf0]  ;;  %v10204_v48 = vld [vmem:[%s16165_s1 + $0x864] sm:$0xf] }
 0x1f7   :  { %5849 = vmatpush.bf16.msrb.mxu3 %v7471_v38  ;;  %v5583_v38 = vpop.f32.mrf.mxu2 }
 0x1f8   :  { %5811 = vmatpush.bf16.msrb.mxu0 %v7271_v63  ;;  %v7383_v63 = vor.u32 %v10128_v44, %v7380_v17  ;;  %v7548_v44 = vld [vmem:[%s16165_s1 + $0x758] sm:$0xf0]  ;;  %v7751_v17 = vor.u32 %v10220_v62, %v7748_v56  ;;  %v10214_v62 = vld [vmem:[%s16165_s1 + $0x8b4] sm:$0xf] }
 0x1f9   :  { %5824 = vmatpush.bf16.msrb.mxu1 %v7335_v27  ;;  %v7756_v27 = vld [vmem:[%s16165_s1 + $0x8f8] sm:$0xf0]  ;;  %v7551_v15 = vor.u32 %v10170_v18, %v7548_v44  ;;  %v10164_v18 = vld [vmem:[%s16165_s1 + $0x724] sm:$0xf]  ;;  %v7524_v44 = vld [vmem:[%s16165_s1 + $0x728] sm:$0xf0] }
 0x1fa   :  { %5837 = vmatpush.bf16.msrb.mxu2 %v7399_v40  ;;  %v7447_v40 = vor.u32 %v10144_v3, %v7444_v21  ;;  %v7759_v50 = vor.u32 %v10222_v58, %v7756_v27  ;;  %v7612_v3 = vld [vmem:[%s16165_s1 + $0x7d8] sm:$0xf0]  ;;  %v10202_v21 = vld [vmem:[%s16165_s1 + $0x854] sm:$0xf]  ;;  %v7732_v58 = vld [vmem:[%s16165_s1 + $0x8c8] sm:$0xf0] }
 0x1fb   :  { %5850 = vmatpush.bf16.msrb.mxu3 %v7463_v61  ;;  %v10172_v61 = vld [vmem:[%s16165_s1 + $0x764] sm:$0xf]  ;;  %v7676_v38 = vld [vmem:[%s16165_s1 + $0x858] sm:$0xf0] }
 0x1fc   :  { %5812 = vmatpush.bf16.msrb.mxu0 %v7263_v41  ;;  %v7684_v41 = vld [vmem:[%s16165_s1 + $0x868] sm:$0xf0]  ;;  %v7679_v14 = vor.u32 %v10202_v21, %v7676_v38  ;;  %v7724_v56 = vld [vmem:[%s16165_s1 + $0x8b8] sm:$0xf0]  ;;  %v10196_v38 = vld [vmem:[%s16165_s1 + $0x824] sm:$0xf] }
 0x1fd   :  { %5825 = vmatpush.bf16.msrb.mxu1 %v7327_v55  ;;  %v7559_v55 = vor.u32 %v10172_v61, %v7556_v9  ;;  %v7687_v2 = vor.u32 %v10204_v48, %v7684_v41  ;;  %v10166_v61 = vld [vmem:[%s16165_s1 + $0x734] sm:$0xf]  ;;  %v7532_v9 = vld [vmem:[%s16165_s1 + $0x738] sm:$0xf0]  ;;  %v7588_v21 = vld [vmem:[%s16165_s1 + $0x7a8] sm:$0xf0] }
 0x1fe   :  { %5838 = vmatpush.bf16.msrb.mxu2 %v7391_v1  ;;  %v7623_v1 = vor.u32 %v10188_v6, %v7620_v60  ;;  %v10182_v6 = vld [vmem:[%s16165_s1 + $0x7b4] sm:$0xf]  ;;  %v7596_v60 = vld [vmem:[%s16165_s1 + $0x7b8] sm:$0xf0] }
 0x1ff   :  { %5851 = vmatpush.bf16.msrb.mxu3 %v7455_v20  ;;  %v10186_v20 = vld [vmem:[%s16165_s1 + $0x7d4] sm:$0xf]  ;;  %v7660_v41 = vld [vmem:[%s16165_s1 + $0x838] sm:$0xf0] }
 0x200   :  { %5813 = vmatpush.bf16.msrb.mxu0 %v7255_v42  ;;  %v7615_v22 = vor.u32 %v10186_v20, %v7612_v3  ;;  %v10184_v42 = vld [vmem:[%s16165_s1 + $0x7c4] sm:$0xf]  ;;  %v10198_v48 = vld [vmem:[%s16165_s1 + $0x834] sm:$0xf] }
 0x201   :  { %5826 = vmatpush.bf16.msrb.mxu1 %v7319_v8  ;;  %v5607_v8 = vpop.f32.mrf.mxu0  ;;  %v10180_v20 = vld [vmem:[%s16165_s1 + $0x7a4] sm:$0xf] }
 0x202   :  { %5839 = vmatpush.bf16.msrb.mxu2 %v7383_v63  ;;  %v10216_v63 = vld [vmem:[%s16165_s1 + $0x8c4] sm:$0xf]  ;;  %v5608_v27 = vadd.f32 %v5607_v8, %v14095_v26  ;;  %v7516_v8 = vld [vmem:[%s16165_s1 + $0x718] sm:$0xf0] }
 0x203   :  { %5852 = vmatpush.bf16.msrb.mxu3 %v7447_v40  ;;  %5814 = vmatmul.bf16.vlgmr.msrb.gmra.mxu0 %v11465_v29  ;;  %v10218_v29 = vld [vmem:[%s16165_s1 + $0x8d4] sm:$0xf]  ;;  %v7735_v26 = vor.u32 %v10216_v63, %v7732_v58 }
 0x204   :  { %5858 = vmatpush.bf16.msra.mxu0 %v7567_v57  ;;  %5827 = vmatmul.bf16.vlgmr.msrb.gmra.mxu1 %v11475_v33  ;;  %v10168_v33 = vld [vmem:[%s16165_s1 + $0x744] sm:$0xf]  ;;  %v5620_v57 = vpop.f32.mrf.mxu1  ;;  %v10178_v63 = vld [vmem:[%s16165_s1 + $0x794] sm:$0xf] }
 0x205   :  { %5871 = vmatpush.bf16.msra.mxu1 %v7631_v47  ;;  %5840 = vmatmul.bf16.vlgmr.msrb.gmra.mxu2 %v11664_v23  ;;  %v7540_v23 = vld [vmem:[%s16165_s1 + $0x748] sm:$0xf0]  ;;  %v7607_v47 = vor.u32 %v10184_v42, %v7604_v25  ;;  %v7591_v25 = vor.u32 %v10180_v20, %v7588_v21  ;;  %v10254_v20 = vld [vmem:[%s16165_s1 + $0x9f4] sm:$0xf]  ;;  %v7884_v21 = vld [vmem:[%s16165_s1 + $0x9f8] sm:$0xf0] }
 0x206   :  { %5884 = vmatpush.bf16.msra.mxu2 %v7695_v59  ;;  %5853 = vmatmul.bf16.vlgmr.msrb.gmra.mxu3 %v11677_v31  ;;  %v7743_v31 = vor.u32 %v10218_v29, %v7740_v19  ;;  %v7543_v40 = vor.u32 %v10168_v33, %v7540_v23  ;;  %v7671_v59 = vor.u32 %v10200_v54, %v7668_v30  ;;  %v7652_v29 = vld [vmem:[%s16165_s1 + $0x828] sm:$0xf0]  ;;  %v10162_v30 = vld [vmem:[%s16165_s1 + $0x714] sm:$0xf] }
 0x207   :  { %5897 = vmatpush.bf16.msra.mxu3 %v7759_v50  ;;  %v5621_v50 = vadd.f32 %v5620_v57, %v5608_v27  ;;  %v7527_v23 = vor.u32 %v10164_v18, %v7524_v44  ;;  %v7655_v54 = vor.u32 %v10196_v38, %v7652_v29  ;;  %v7580_v27 = vld [vmem:[%s16165_s1 + $0x798] sm:$0xf0]  ;;  %v10238_v18 = vld [vmem:[%s16165_s1 + $0x974] sm:$0xf] }
 0x208   :  { %5859 = vmatpush.bf16.msra.mxu0 %v7559_v55  ;;  %v7535_v55 = vor.u32 %v10166_v61, %v7532_v9  ;;  %v5633_v3 = vpop.f32.mrf.mxu2  ;;  %v7644_v57 = vld [vmem:[%s16165_s1 + $0x818] sm:$0xf0]  ;;  %v7519_v61 = vor.u32 %v10162_v30, %v7516_v8  ;;  %v10160_v9 = vld [vmem:[%s16165_s1 + $0x704] sm:$0xf]  ;;  %v10270_v38 = vld [vmem:[%s16165_s1 + $0xa74] sm:$0xf] }
 0x209   :  { %5872 = vmatpush.bf16.msra.mxu1 %v7623_v1  ;;  %v7599_v1 = vor.u32 %v10182_v6, %v7596_v60  ;;  %v5634_v19 = vadd.f32 %v5633_v3, %v5621_v50  ;;  %v5609_v33 = vpop.f32.mrf.mxu0  ;;  %v7508_v6 = vld [vmem:[%s16165_s1 + $0x708] sm:$0xf0]  ;;  %v10176_v60 = vld [vmem:[%s16165_s1 + $0x784] sm:$0xf]  ;;  %v7820_v44 = vld [vmem:[%s16165_s1 + $0x978] sm:$0xf0] }
 0x20a   :  { %5885 = vmatpush.bf16.msra.mxu2 %v7687_v2  ;;  %v7663_v2 = vor.u32 %v10198_v48, %v7660_v41  ;;  %v7572_v48 = vld [vmem:[%s16165_s1 + $0x788] sm:$0xf0]  ;;  %v10192_v41 = vld [vmem:[%s16165_s1 + $0x804] sm:$0xf]  ;;  %v7511_v3 = vor.u32 %v10160_v9, %v7508_v6  ;;  %v7948_v29 = vld [vmem:[%s16165_s1 + $0xa78] sm:$0xf0] }
 0x20b   :  { %5898 = vmatpush.bf16.msra.mxu3 %v7751_v17  ;;  %v7727_v17 = vor.u32 %v10214_v62, %v7724_v56  ;;  %v7636_v56 = vld [vmem:[%s16165_s1 + $0x808] sm:$0xf0]  ;;  %v10252_v8 = vld [vmem:[%s16165_s1 + $0x9e4] sm:$0xf]  ;;  %v10234_v6 = vld [vmem:[%s16165_s1 + $0x954] sm:$0xf] }
 0x20c   :  { %5860 = vmatpush.bf16.msra.mxu0 %v7551_v15  ;;  %v5646_v15 = vpop.f32.mrf.mxu3  ;;  %v5622_v42 = vpop.f32.mrf.mxu1  ;;  %v7812_v30 = vld [vmem:[%s16165_s1 + $0x968] sm:$0xf0] }
 0x20d   :  { %5873 = vmatpush.bf16.msra.mxu1 %v7615_v22  ;;  %v10212_v22 = vld [vmem:[%s16165_s1 + $0x8a4] sm:$0xf]  ;;  %v7887_v42 = vor.u32 %v10254_v20, %v7884_v21 }
 0x20e   :  { %5886 = vmatpush.bf16.msra.mxu2 %v7679_v14  ;;  %v7716_v14 = vld [vmem:[%s16165_s1 + $0x8a8] sm:$0xf0]  ;;  %v10264_v20 = vld [vmem:[%s16165_s1 + $0xa44] sm:$0xf] }
 0x20f   :  { %5899 = vmatpush.bf16.msra.mxu3 %v7743_v31  ;;  %v14294_v31 = vadd.f32 %v5646_v15, %v5634_v19  ;;  %v7719_v58 = vor.u32 %v10212_v22, %v7716_v14  ;;  %v7575_v19 = vor.u32 %v10176_v60, %v7572_v48  ;;  %v7639_v15 = vor.u32 %v10192_v41, %v7636_v56  ;;  %v10286_v22 = vld [vmem:[%s16165_s1 + $0xaf4] sm:$0xf]  ;;  %v8012_v14 = vld [vmem:[%s16165_s1 + $0xaf8] sm:$0xf0]  ;;  %v10280_v21 = vld [vmem:[%s16165_s1 + $0xac4] sm:$0xf] }
 0x210   :  { %5861 = vmatpush.bf16.msra.mxu0 %v7543_v40  ;;  %v10194_v40 = vld [vmem:[%s16165_s1 + $0x814] sm:$0xf]  ;;  %v7868_v48 = vld [vmem:[%s16165_s1 + $0x9d8] sm:$0xf0] }
 0x211   :  { %5874 = vmatpush.bf16.msra.mxu1 %v7607_v47  ;;  %v10210_v47 = vld [vmem:[%s16165_s1 + $0x894] sm:$0xf]  ;;  %v7647_v50 = vor.u32 %v10194_v40, %v7644_v57  ;;  %v7940_v40 = vld [vmem:[%s16165_s1 + $0xa68] sm:$0xf0]  ;;  %v10284_v57 = vld [vmem:[%s16165_s1 + $0xae4] sm:$0xf] }
 0x212   :  { %5887 = vmatpush.bf16.msra.mxu2 %v7671_v59  ;;  %v7708_v59 = vld [vmem:[%s16165_s1 + $0x898] sm:$0xf0]  ;;  %v10266_v41 = vld [vmem:[%s16165_s1 + $0xa54] sm:$0xf] }
 0x213   :  { %5900 = vmatpush.bf16.msra.mxu3 %v7735_v26  ;;  %v7583_v26 = vor.u32 %v10178_v63, %v7580_v27  ;;  %v7711_v62 = vor.u32 %v10210_v47, %v7708_v59  ;;  %v8015_v63 = vor.u32 %v10286_v22, %v8012_v14  ;;  %v10268_v27 = vld [vmem:[%s16165_s1 + $0xa64] sm:$0xf]  ;;  %v8004_v47 = vld [vmem:[%s16165_s1 + $0xae8] sm:$0xf0]  ;;  %v7996_v56 = vld [vmem:[%s16165_s1 + $0xad8] sm:$0xf0] }
 0x214   :  { %5862 = vmatpush.bf16.msra.mxu0 %v7535_v55  ;;  %v10208_v55 = vld [vmem:[%s16165_s1 + $0x884] sm:$0xf]  ;;  %v7943_v9 = vor.u32 %v10268_v27, %v7940_v40  ;;  %v8007_v60 = vor.u32 %v10284_v57, %v8004_v47  ;;  %v10772_v27 = vld [vmem:[%s16167_s2] sm:$0x3] }
 0x215   :  { %5875 = vmatpush.bf16.msra.mxu1 %v7599_v1  ;;  %v7700_v1 = vld [vmem:[%s16165_s1 + $0x888] sm:$0xf0]  ;;  %v848_v40 = vperm.slane %v10772_v27, 1 }
 0x216   :  { %5888 = vmatpush.bf16.msra.mxu2 %v7663_v2  ;;  %v5635_v2 = vpop.f32.mrf.mxu2  ;;  %v7703_v33 = vor.u32 %v10208_v55, %v7700_v1  ;;  %v7956_v27 = vld [vmem:[%s16165_s1 + $0xa88] sm:$0xf0] }
 0x217   :  { %5901 = vmatpush.bf16.msra.mxu3 %v7727_v17  ;;  %v5648_v17 = vpop.f32.mrf.mxu3 }
 0x218   :  { %5863 = vmatpush.bf16.msra.mxu0 %v7527_v23  ;;  %v7823_v23 = vor.u32 %v10238_v18, %v7820_v44  ;;  %v10248_v18 = vld [vmem:[%s16165_s1 + $0x9c4] sm:$0xf]  ;;  %v7860_v44 = vld [vmem:[%s16165_s1 + $0x9c8] sm:$0xf0] }
 0x219   :  { %5876 = vmatpush.bf16.msra.mxu1 %v7591_v25  ;;  %v7951_v25 = vor.u32 %v10270_v38, %v7948_v29  ;;  %v7924_v17 = vld [vmem:[%s16165_s1 + $0xa48] sm:$0xf0]  ;;  %v7863_v22 = vor.u32 %v10248_v18, %v7860_v44  ;;  %v7772_v44 = vld [vmem:[%s16165_s1 + $0x918] sm:$0xf0] }
 0x21a   :  { %5889 = vmatpush.bf16.msra.mxu2 %v7655_v54  ;;  %v10236_v54 = vld [vmem:[%s16165_s1 + $0x964] sm:$0xf]  ;;  %v7988_v38 = vld [vmem:[%s16165_s1 + $0xac8] sm:$0xf0]  ;;  %v7927_v14 = vor.u32 %v10264_v20, %v7924_v17  ;;  %v10242_v20 = vld [vmem:[%s16165_s1 + $0x994] sm:$0xf] }
 0x21b   :  { %5902 = vmatpush.bf16.msra.mxu3 %v7719_v58  ;;  %v7876_v58 = vld [vmem:[%s16165_s1 + $0x9e8] sm:$0xf0]  ;;  %v7815_v59 = vor.u32 %v10236_v54, %v7812_v30  ;;  %v7852_v54 = vld [vmem:[%s16165_s1 + $0x9b8] sm:$0xf0]  ;;  %v10262_v30 = vld [vmem:[%s16165_s1 + $0xa34] sm:$0xf] }
 0x21c   :  { %5864 = vmatpush.bf16.msra.mxu0 %v7519_v61  ;;  %v7879_v61 = vor.u32 %v10252_v8, %v7876_v58  ;;  %v7916_v8 = vld [vmem:[%s16165_s1 + $0xa38] sm:$0xf0] }
 0x21d   :  { %5877 = vmatpush.bf16.msra.mxu1 %v7583_v26  ;;  %v7804_v26 = vld [vmem:[%s16165_s1 + $0x958] sm:$0xf0] }
 0x21e   :  { %5890 = vmatpush.bf16.msra.mxu2 %v7647_v50  ;;  %v10250_v50 = vld [vmem:[%s16165_s1 + $0x9d4] sm:$0xf]  ;;  %v7807_v55 = vor.u32 %v10234_v6, %v7804_v26  ;;  %v7980_v58 = vld [vmem:[%s16165_s1 + $0xab8] sm:$0xf0]  ;;  %v10244_v6 = vld [vmem:[%s16165_s1 + $0x9a4] sm:$0xf] }
 0x21f   :  { %5903 = vmatpush.bf16.msra.mxu3 %v7711_v62  ;;  %v7932_v62 = vld [vmem:[%s16165_s1 + $0xa58] sm:$0xf0]  ;;  %v7871_v1 = vor.u32 %v10250_v50, %v7868_v48  ;;  %v7844_v50 = vld [vmem:[%s16165_s1 + $0x9a8] sm:$0xf0] }
 0x220   :  { %5865 = vmatpush.bf16.msra.mxu0 %v7511_v3  ;;  %v7935_v2 = vor.u32 %v10266_v41, %v7932_v62  ;;  %v5659_v3 = vpop.f32.mrf.mxu0  ;;  %v7908_v48 = vld [vmem:[%s16165_s1 + $0xa28] sm:$0xf0]  ;;  %v10276_v62 = vld [vmem:[%s16165_s1 + $0xaa4] sm:$0xf] }
 0x221   :  { %5878 = vmatpush.bf16.msra.mxu1 %v7575_v19  ;;  %v5660_v29 = vadd.f32 %v5659_v3, %v14294_v31  ;;  %v7991_v31 = vor.u32 %v10280_v21, %v7988_v38  ;;  %v7836_v21 = vld [vmem:[%s16165_s1 + $0x998] sm:$0xf0]  ;;  %v10258_v38 = vld [vmem:[%s16165_s1 + $0xa14] sm:$0xf] }
 0x222   :  { %5891 = vmatpush.bf16.msra.mxu2 %v7639_v15  ;;  %v5672_v15 = vpop.f32.mrf.mxu1 }
 0x223   :  { %5904 = vmatpush.bf16.msra.mxu3 %v7703_v33  ;;  %5866 = vmatmul.bf16.vlgmr.msra.gmra.mxu0 %v11675_v28  ;;  %v10282_v28 = vld [vmem:[%s16165_s1 + $0xad4] sm:$0xf] }
 0x224   :  { %5910 = vmatpush.bf16.msrb.mxu0 %v7823_v23  ;;  %5879 = vmatmul.bf16.vlgmr.msra.gmra.mxu1 %v11685_v35  ;;  %v10232_v35 = vld [vmem:[%s16165_s1 + $0x944] sm:$0xf]  ;;  %v10230_v33 = vld [vmem:[%s16165_s1 + $0x934] sm:$0xf]  ;;  %v7788_v23 = vld [vmem:[%s16165_s1 + $0x938] sm:$0xf0] }
 0x225   :  { %5923 = vmatpush.bf16.msrb.mxu1 %v7887_v42  ;;  %5892 = vmatmul.bf16.vlgmr.msra.gmra.mxu2 %v11874_v37  ;;  %v7796_v37 = vld [vmem:[%s16165_s1 + $0x948] sm:$0xf0]  ;;  %v10246_v42 = vld [vmem:[%s16165_s1 + $0x9b4] sm:$0xf]  ;;  %v7791_v57 = vor.u32 %v10230_v33, %v7788_v23  ;;  %v7839_v23 = vor.u32 %v10242_v20, %v7836_v21 }
 0x226   :  { %5936 = vmatpush.bf16.msrb.mxu2 %v7951_v25  ;;  %5905 = vmatmul.bf16.vlgmr.msra.gmra.mxu3 %v11887_v46  ;;  %v7999_v46 = vor.u32 %v10282_v28, %v7996_v56  ;;  %v7799_v19 = vor.u32 %v10232_v35, %v7796_v37  ;;  %v14454_v25 = vadd.f32 %v5672_v15, %v5660_v29  ;;  %v7972_v28 = vld [vmem:[%s16165_s1 + $0xaa8] sm:$0xf0]  ;;  %v7900_v29 = vld [vmem:[%s16165_s1 + $0xa18] sm:$0xf0] }
 0x227   :  { %5949 = vmatpush.bf16.msrb.mxu3 %v8015_v63  ;;  %v10278_v63 = vld [vmem:[%s16165_s1 + $0xab4] sm:$0xf]  ;;  %v7855_v47 = vor.u32 %v10246_v42, %v7852_v54  ;;  %v7847_v37 = vor.u32 %v10244_v6, %v7844_v50  ;;  %v7975_v3 = vor.u32 %v10276_v62, %v7972_v28  ;;  %v7964_v15 = vld [vmem:[%s16165_s1 + $0xa98] sm:$0xf0]  ;;  %v7764_v33 = vld [vmem:[%s16165_s1 + $0x908] sm:$0xf0]  ;;  %v7903_v42 = vor.u32 %v10258_v38, %v7900_v29 }
 0x228   :  { %5911 = vmatpush.bf16.msrb.mxu0 %v7815_v59  ;;  %v7919_v59 = vor.u32 %v10262_v30, %v7916_v8  ;;  %v7983_v26 = vor.u32 %v10278_v63, %v7980_v58  ;;  %v5685_v41 = vpop.f32.mrf.mxu2  ;;  %v7828_v54 = vld [vmem:[%s16165_s1 + $0x988] sm:$0xf0]  ;;  %v10256_v30 = vld [vmem:[%s16165_s1 + $0xa04] sm:$0xf]  ;;  %v8140_v6 = vld [vmem:[%s16165_s1 + $0xbf8] sm:$0xf0] }
 0x229   :  { %5924 = vmatpush.bf16.msrb.mxu1 %v7879_v61  ;;  %v10228_v61 = vld [vmem:[%s16165_s1 + $0x924] sm:$0xf]  ;;  %v5686_v56 = vadd.f32 %v5685_v41, %v848_v40  ;;  %v7892_v63 = vld [vmem:[%s16165_s1 + $0xa08] sm:$0xf0]  ;;  %v8204_v50 = vld [vmem:[%s16165_s1 + $0xc78] sm:$0xf0] }
 0x22a   :  { %5937 = vmatpush.bf16.msrb.mxu2 %v7943_v9  ;;  %v7780_v9 = vld [vmem:[%s16165_s1 + $0x928] sm:$0xf0]  ;;  %v5674_v35 = vpop.f32.mrf.mxu1  ;;  %v10272_v58 = vld [vmem:[%s16165_s1 + $0xa84] sm:$0xf]  ;;  %v10350_v41 = vld [vmem:[%s16165_s1 + $0xcf4] sm:$0xf] }
 0x22b   :  { %5950 = vmatpush.bf16.msrb.mxu3 %v8007_v60  ;;  %v10260_v60 = vld [vmem:[%s16165_s1 + $0xa24] sm:$0xf]  ;;  %v8268_v62 = vld [vmem:[%s16165_s1 + $0xcf8] sm:$0xf0]  ;;  %v7959_v28 = vor.u32 %v10272_v58, %v7956_v27  ;;  %v8068_v35 = vld [vmem:[%s16165_s1 + $0xb68] sm:$0xf0] }
 0x22c   :  { %5912 = vmatpush.bf16.msrb.mxu0 %v7807_v55  ;;  %v5698_v55 = vpop.f32.mrf.mxu3  ;;  %v7911_v18 = vor.u32 %v10260_v60, %v7908_v48  ;;  %v7895_v48 = vor.u32 %v10256_v30, %v7892_v63  ;;  %v8196_v20 = vld [vmem:[%s16165_s1 + $0xc68] sm:$0xf0]  ;;  %v10312_v58 = vld [vmem:[%s16165_s1 + $0xbc4] sm:$0xf] }
 0x22d   :  { %5925 = vmatpush.bf16.msrb.mxu1 %v7871_v1  ;;  %v5661_v1 = vpop.f32.mrf.mxu0  ;;  %v14507_v17 = vadd.f32 %v5698_v55, %v5686_v56  ;;  %v8260_v21 = vld [vmem:[%s16165_s1 + $0xce8] sm:$0xf0] }
 0x22e   :  { %5938 = vmatpush.bf16.msrb.mxu2 %v7935_v2  ;;  %v7783_v2 = vor.u32 %v10228_v61, %v7780_v9  ;;  %v8116_v27 = vld [vmem:[%s16165_s1 + $0xbc8] sm:$0xf0] }
 0x22f   :  { %5951 = vmatpush.bf16.msrb.mxu3 %v7999_v46  ;;  %v10226_v46 = vld [vmem:[%s16165_s1 + $0x914] sm:$0xf] }
 0x230   :  { %5913 = vmatpush.bf16.msrb.mxu0 %v7799_v19  ;;  %v10274_v19 = vld [vmem:[%s16165_s1 + $0xa94] sm:$0xf]  ;;  %v5687_v40 = vpop.f32.mrf.mxu2 }
 0x231   :  { %5926 = vmatpush.bf16.msrb.mxu1 %v7863_v22  ;;  %v7775_v22 = vor.u32 %v10226_v46, %v7772_v44  ;;  %v7967_v8 = vor.u32 %v10274_v19, %v7964_v15  ;;  %v8132_v46 = vld [vmem:[%s16165_s1 + $0xbe8] sm:$0xf0]  ;;  %v10332_v44 = vld [vmem:[%s16165_s1 + $0xc64] sm:$0xf]  ;;  %v10298_v15 = vld [vmem:[%s16165_s1 + $0xb54] sm:$0xf] }
 0x232   :  { %5939 = vmatpush.bf16.msrb.mxu2 %v7927_v14  ;;  %v10224_v14 = vld [vmem:[%s16165_s1 + $0x904] sm:$0xf]  ;;  %v8199_v19 = vor.u32 %v10332_v44, %v8196_v20  ;;  %v8036_v20 = vld [vmem:[%s16165_s1 + $0xb28] sm:$0xf0] }
 0x233   :  { %5952 = vmatpush.bf16.msrb.mxu3 %v7991_v31  ;;  %v10240_v31 = vld [vmem:[%s16165_s1 + $0x984] sm:$0xf]  ;;  %v7767_v9 = vor.u32 %v10224_v14, %v7764_v33  ;;  %v10314_v14 = vld [vmem:[%s16165_s1 + $0xbd4] sm:$0xf] }
 0x234   :  { %5914 = vmatpush.bf16.msrb.mxu0 %v7791_v57  ;;  %v10302_v57 = vld [vmem:[%s16165_s1 + $0xb74] sm:$0xf]  ;;  %v5700_v61 = vpop.f32.mrf.mxu3  ;;  %v7831_v60 = vor.u32 %v10240_v31, %v7828_v54  ;;  %v8188_v31 = vld [vmem:[%s16165_s1 + $0xc58] sm:$0xf0]  ;;  %v10328_v40 = vld [vmem:[%s16165_s1 + $0xc44] sm:$0xf] }
 0x235   :  { %5927 = vmatpush.bf16.msrb.mxu1 %v7855_v47  ;;  %v8076_v47 = vld [vmem:[%s16165_s1 + $0xb78] sm:$0xf0]  ;;  %v10292_v44 = vld [vmem:[%s16165_s1 + $0xb24] sm:$0xf] }
 0x236   :  { %5940 = vmatpush.bf16.msrb.mxu2 %v7919_v59  ;;  %v10318_v59 = vld [vmem:[%s16165_s1 + $0xbf4] sm:$0xf]  ;;  %v8079_v56 = vor.u32 %v10302_v57, %v8076_v47  ;;  %v8252_v54 = vld [vmem:[%s16165_s1 + $0xcd8] sm:$0xf0]  ;;  %v8180_v57 = vld [vmem:[%s16165_s1 + $0xc48] sm:$0xf0] }
 0x237   :  { %5953 = vmatpush.bf16.msrb.mxu3 %v7983_v26  ;;  %v10334_v26 = vld [vmem:[%s16165_s1 + $0xc74] sm:$0xf]  ;;  %v8143_v55 = vor.u32 %v10318_v59, %v8140_v6  ;;  %v10344_v47 = vld [vmem:[%s16165_s1 + $0xcc4] sm:$0xf]  ;;  %v8244_v59 = vld [vmem:[%s16165_s1 + $0xcc8] sm:$0xf0]  ;;  %v8119_v6 = vor.u32 %v10312_v58, %v8116_v27 }
 0x238   :  { %5915 = vmatpush.bf16.msrb.mxu0 %v7783_v2  ;;  %v8207_v1 = vor.u32 %v10334_v26, %v8204_v50  ;;  %v10300_v2 = vld [vmem:[%s16165_s1 + $0xb64] sm:$0xf]  ;;  %v8183_v26 = vor.u32 %v10328_v40, %v8180_v57  ;;  %v10294_v50 = vld [vmem:[%s16165_s1 + $0xb34] sm:$0xf]  ;;  %v8156_v40 = vld [vmem:[%s16165_s1 + $0xc18] sm:$0xf0] }
 0x239   :  { %5928 = vmatpush.bf16.msrb.mxu1 %v7847_v37  ;;  %v10316_v37 = vld [vmem:[%s16165_s1 + $0xbe4] sm:$0xf]  ;;  %v8071_v38 = vor.u32 %v10300_v2, %v8068_v35  ;;  %v10342_v2 = vld [vmem:[%s16165_s1 + $0xcb4] sm:$0xf] }
 0x23a   :  { %5941 = vmatpush.bf16.msrb.mxu2 %v7911_v18  ;;  %v8271_v18 = vor.u32 %v10350_v41, %v8268_v62  ;;  %v8135_v29 = vor.u32 %v10316_v37, %v8132_v46  ;;  %v10322_v27 = vld [vmem:[%s16165_s1 + $0xc14] sm:$0xf] }
 0x23b   :  { %5954 = vmatpush.bf16.msrb.mxu3 %v7975_v3  ;;  %v10348_v3 = vld [vmem:[%s16165_s1 + $0xce4] sm:$0xf]  ;;  %v10338_v57 = vld [vmem:[%s16165_s1 + $0xc94] sm:$0xf] }
 0x23c   :  { %5916 = vmatpush.bf16.msrb.mxu0 %v7775_v22  ;;  %v8060_v22 = vld [vmem:[%s16165_s1 + $0xb58] sm:$0xf0]  ;;  %v8263_v33 = vor.u32 %v10348_v3, %v8260_v21  ;;  %v10308_v3 = vld [vmem:[%s16165_s1 + $0xba4] sm:$0xf] }
 0x23d   :  { %5929 = vmatpush.bf16.msrb.mxu1 %v7839_v23  ;;  %v8124_v23 = vld [vmem:[%s16165_s1 + $0xbd8] sm:$0xf0]  ;;  %v8063_v30 = vor.u32 %v10298_v15, %v8060_v22  ;;  %v8164_v15 = vld [vmem:[%s16165_s1 + $0xc28] sm:$0xf0] }
 0x23e   :  { %5942 = vmatpush.bf16.msrb.mxu2 %v7903_v42  ;;  %v10330_v42 = vld [vmem:[%s16165_s1 + $0xc54] sm:$0xf] }
 0x23f   :  { %5955 = vmatpush.bf16.msrb.mxu3 %v7967_v8  ;;  %v8127_v8 = vor.u32 %v10314_v14, %v8124_v23  ;;  %v8191_v63 = vor.u32 %v10330_v42, %v8188_v31  ;;  %v8228_v23 = vld [vmem:[%s16165_s1 + $0xca8] sm:$0xf0]  ;;  %v8039_v42 = vor.u32 %v10292_v44, %v8036_v20  ;;  %v8460_v44 = vld [vmem:[%s16165_s1 + $0xe78] sm:$0xf0] }
 0x240   :  { %5917 = vmatpush.bf16.msrb.mxu0 %v7767_v9  ;;  %v5711_v9 = vpop.f32.mrf.mxu0 }
 0x241   :  { %5930 = vmatpush.bf16.msrb.mxu1 %v7831_v60  ;;  %v8044_v60 = vld [vmem:[%s16165_s1 + $0xb38] sm:$0xf0]  ;;  %v5712_v41 = vadd.f32 %v5711_v9, %v14507_v17  ;;  %v5724_v62 = vpop.f32.mrf.mxu1  ;;  %v8020_v9 = vld [vmem:[%s16165_s1 + $0xb08] sm:$0xf0] }
 0x242   :  { %5943 = vmatpush.bf16.msrb.mxu2 %v7895_v48  ;;  %v10310_v48 = vld [vmem:[%s16165_s1 + $0xbb4] sm:$0xf]  ;;  %v8236_v17 = vld [vmem:[%s16165_s1 + $0xcb8] sm:$0xf0]  ;;  %v8047_v37 = vor.u32 %v10294_v50, %v8044_v60  ;;  %v10304_v50 = vld [vmem:[%s16165_s1 + $0xb84] sm:$0xf] }
 0x243   :  { %5956 = vmatpush.bf16.msrb.mxu3 %v7959_v28  ;;  %5918 = vmatmul.bf16.vlgmr.msrb.gmra.mxu0 %v11885_v45  ;;  %v10346_v45 = vld [vmem:[%s16165_s1 + $0xcd4] sm:$0xf]  ;;  %v8247_v28 = vor.u32 %v10344_v47, %v8244_v59  ;;  %v5725_v35 = vadd.f32 %v5724_v62, %v5712_v41  ;;  %v8220_v47 = vld [vmem:[%s16165_s1 + $0xc98] sm:$0xf0]  ;;  %v8084_v60 = vld [vmem:[%s16165_s1 + $0xb88] sm:$0xf0] }
 0x244   :  { %5962 = vmatpush.bf16.msra.mxu0 %v8079_v56  ;;  %5931 = vmatmul.bf16.vlgmr.msrb.gmra.mxu1 %v11895_v49  ;;  %v10296_v49 = vld [vmem:[%s16165_s1 + $0xb44] sm:$0xf]  ;;  %v8108_v56 = vld [vmem:[%s16165_s1 + $0xbb8] sm:$0xf0]  ;;  %v8223_v62 = vor.u32 %v10338_v57, %v8220_v47  ;;  %v8087_v20 = vor.u32 %v10304_v50, %v8084_v60 }
 0x245   :  { %5975 = vmatpush.bf16.msra.mxu1 %v8143_v55  ;;  %5944 = vmatmul.bf16.vlgmr.msrb.gmra.mxu2 %v12089_v7  ;;  %v8052_v7 = vld [vmem:[%s16165_s1 + $0xb48] sm:$0xf0]  ;;  %v10326_v55 = vld [vmem:[%s16165_s1 + $0xc34] sm:$0xf]  ;;  %v8380_v47 = vld [vmem:[%s16165_s1 + $0xdd8] sm:$0xf0] }
 0x246   :  { %5988 = vmatpush.bf16.msra.mxu2 %v8207_v1  ;;  %5957 = vmatmul.bf16.vlgmr.msrb.gmra.mxu3 %v12102_v12  ;;  %v8255_v12 = vor.u32 %v10346_v45, %v8252_v54  ;;  %v8055_v61 = vor.u32 %v10296_v49, %v8052_v7  ;;  %v8172_v1 = vld [vmem:[%s16165_s1 + $0xc38] sm:$0xf0]  ;;  %v10306_v49 = vld [vmem:[%s16165_s1 + $0xb94] sm:$0xf]  ;;  %v10376_v60 = vld [vmem:[%s16165_s1 + $0xdc4] sm:$0xf] }
 0x247   :  { %6001 = vmatpush.bf16.msra.mxu3 %v8271_v18  ;;  %v8111_v18 = vor.u32 %v10310_v48, %v8108_v56  ;;  %v8175_v46 = vor.u32 %v10326_v55, %v8172_v1  ;;  %v10320_v48 = vld [vmem:[%s16165_s1 + $0xc04] sm:$0xf]  ;;  %v8212_v55 = vld [vmem:[%s16165_s1 + $0xc88] sm:$0xf0] }
 0x248   :  { %5963 = vmatpush.bf16.msra.mxu0 %v8071_v38  ;;  %v5737_v21 = vpop.f32.mrf.mxu2  ;;  %v8239_v38 = vor.u32 %v10342_v2, %v8236_v17  ;;  %v5713_v45 = vpop.f32.mrf.mxu0  ;;  %v10336_v56 = vld [vmem:[%s16165_s1 + $0xc84] sm:$0xf]  ;;  %v10366_v2 = vld [vmem:[%s16165_s1 + $0xd74] sm:$0xf]  ;;  %v8332_v17 = vld [vmem:[%s16165_s1 + $0xd78] sm:$0xf0] }
 0x249   :  { %5976 = vmatpush.bf16.msra.mxu1 %v8135_v29  ;;  %v8100_v29 = vld [vmem:[%s16165_s1 + $0xba8] sm:$0xf0]  ;;  %v5738_v22 = vadd.f32 %v5737_v21, %v5725_v35  ;;  %v5750_v14 = vpop.f32.mrf.mxu3  ;;  %v5726_v7 = vpop.f32.mrf.mxu1  ;;  %v10382_v35 = vld [vmem:[%s16165_s1 + $0xdf4] sm:$0xf] }
 0x24a   :  { %5989 = vmatpush.bf16.msra.mxu2 %v8199_v19  ;;  %v10324_v19 = vld [vmem:[%s16165_s1 + $0xc24] sm:$0xf]  ;;  %v8103_v54 = vor.u32 %v10308_v3, %v8100_v29  ;;  %v10414_v21 = vld [vmem:[%s16165_s1 + $0xef4] sm:$0xf]  ;;  %v8215_v29 = vor.u32 %v10336_v56, %v8212_v55  ;;  %v8388_v45 = vld [vmem:[%s16165_s1 + $0xde8] sm:$0xf0] }
 0x24b   :  { %6002 = vmatpush.bf16.msra.mxu3 %v8263_v33  ;;  %v10340_v33 = vld [vmem:[%s16165_s1 + $0xca4] sm:$0xf]  ;;  %v14697_v31 = vadd.f32 %v5750_v14, %v5738_v22  ;;  %v8500_v55 = vld [vmem:[%s16165_s1 + $0xec8] sm:$0xf0] }
 0x24c   :  { %5964 = vmatpush.bf16.msra.mxu0 %v8063_v30  ;;  %v8167_v30 = vor.u32 %v10324_v19, %v8164_v15  ;;  %v8231_v58 = vor.u32 %v10340_v33, %v8228_v23  ;;  %v8335_v19 = vor.u32 %v10366_v2, %v8332_v17  ;;  %v10364_v14 = vld [vmem:[%s16165_s1 + $0xd64] sm:$0xf]  ;;  %v8324_v33 = vld [vmem:[%s16165_s1 + $0xd68] sm:$0xf0] }
 0x24d   :  { %5977 = vmatpush.bf16.msra.mxu1 %v8127_v8  ;;  %v10290_v8 = vld [vmem:[%s16165_s1 + $0xb14] sm:$0xf]  ;;  %v10380_v23 = vld [vmem:[%s16165_s1 + $0xde4] sm:$0xf] }
 0x24e   :  { %5990 = vmatpush.bf16.msra.mxu2 %v8191_v63  ;;  %v8028_v63 = vld [vmem:[%s16165_s1 + $0xb18] sm:$0xf0]  ;;  %v8391_v7 = vor.u32 %v10380_v23, %v8388_v45  ;;  %v10408_v56 = vld [vmem:[%s16165_s1 + $0xec4] sm:$0xf]  ;;  %v8292_v23 = vld [vmem:[%s16165_s1 + $0xd28] sm:$0xf0] }
 0x24f   :  { %6003 = vmatpush.bf16.msra.mxu3 %v8255_v12  ;;  %v8092_v12 = vld [vmem:[%s16165_s1 + $0xb98] sm:$0xf0]  ;;  %v8031_v59 = vor.u32 %v10290_v8, %v8028_v63  ;;  %v10412_v8 = vld [vmem:[%s16165_s1 + $0xee4] sm:$0xf]  ;;  %v8516_v63 = vld [vmem:[%s16165_s1 + $0xee8] sm:$0xf0] }
 0x250   :  { %5965 = vmatpush.bf16.msra.mxu0 %v8055_v61  ;;  %v10288_v61 = vld [vmem:[%s16165_s1 + $0xb04] sm:$0xf]  ;;  %v5739_v41 = vpop.f32.mrf.mxu2  ;;  %v8519_v57 = vor.u32 %v10412_v8, %v8516_v63  ;;  %v8420_v63 = vld [vmem:[%s16165_s1 + $0xe28] sm:$0xf0] }
 0x251   :  { %5978 = vmatpush.bf16.msra.mxu1 %v8119_v6  ;;  %v8095_v6 = vor.u32 %v10306_v49, %v8092_v12  ;;  %v5752_v1 = vpop.f32.mrf.mxu3  ;;  %v8327_v49 = vor.u32 %v10364_v14, %v8324_v33  ;;  %v10362_v12 = vld [vmem:[%s16165_s1 + $0xd54] sm:$0xf]  ;;  %v10392_v41 = vld [vmem:[%s16165_s1 + $0xe44] sm:$0xf] }
 0x252   :  { %5991 = vmatpush.bf16.msra.mxu2 %v8183_v26  ;;  %v8159_v26 = vor.u32 %v10322_v27, %v8156_v40  ;;  %v8316_v27 = vld [vmem:[%s16165_s1 + $0xd58] sm:$0xf0]  ;;  %v10378_v40 = vld [vmem:[%s16165_s1 + $0xdd4] sm:$0xf]  ;;  %v10356_v33 = vld [vmem:[%s16165_s1 + $0xd24] sm:$0xf] }
 0x253   :  { %6004 = vmatpush.bf16.msra.mxu3 %v8247_v28  ;;  %v8148_v28 = vld [vmem:[%s16165_s1 + $0xc08] sm:$0xf0]  ;;  %v10388_v8 = vld [vmem:[%s16165_s1 + $0xe24] sm:$0xf] }
 0x254   :  { %5966 = vmatpush.bf16.msra.mxu0 %v8047_v37  ;;  %v8023_v37 = vor.u32 %v10288_v61, %v8020_v9  ;;  %v8151_v3 = vor.u32 %v10320_v48, %v8148_v28  ;;  %v8444_v61 = vld [vmem:[%s16165_s1 + $0xe58] sm:$0xf0]  ;;  %v8372_v48 = vld [vmem:[%s16165_s1 + $0xdc8] sm:$0xf0] }
 0x255   :  { %5979 = vmatpush.bf16.msra.mxu1 %v8111_v18  ;;  %v8396_v18 = vld [vmem:[%s16165_s1 + $0xdf8] sm:$0xf0] }
 0x256   :  { %5992 = vmatpush.bf16.msra.mxu2 %v8175_v46  ;;  %v10398_v46 = vld [vmem:[%s16165_s1 + $0xe74] sm:$0xf]  ;;  %v8399_v15 = vor.u32 %v10382_v35, %v8396_v18  ;;  %v8508_v9 = vld [vmem:[%s16165_s1 + $0xed8] sm:$0xf0]  ;;  %v8375_v35 = vor.u32 %v10376_v60, %v8372_v48 }
 0x257   :  { %6005 = vmatpush.bf16.msra.mxu3 %v8239_v38  ;;  %v8524_v38 = vld [vmem:[%s16165_s1 + $0xef8] sm:$0xf0]  ;;  %v8463_v22 = vor.u32 %v10398_v46, %v8460_v44  ;;  %v10358_v18 = vld [vmem:[%s16165_s1 + $0xd34] sm:$0xf] }
 0x258   :  { %5967 = vmatpush.bf16.msra.mxu0 %v8039_v42  ;;  %v8527_v42 = vor.u32 %v10414_v21, %v8524_v38  ;;  %v8300_v46 = vld [vmem:[%s16165_s1 + $0xd38] sm:$0xf0]  ;;  %v10374_v44 = vld [vmem:[%s16165_s1 + $0xdb4] sm:$0xf] }
 0x259   :  { %5980 = vmatpush.bf16.msra.mxu1 %v8103_v54  ;;  %v10396_v54 = vld [vmem:[%s16165_s1 + $0xe64] sm:$0xf]  ;;  %v10390_v21 = vld [vmem:[%s16165_s1 + $0xe34] sm:$0xf]  ;;  %v8428_v38 = vld [vmem:[%s16165_s1 + $0xe38] sm:$0xf0] }
 0x25a   :  { %5993 = vmatpush.bf16.msra.mxu2 %v8167_v30  ;;  %v8452_v30 = vld [vmem:[%s16165_s1 + $0xe68] sm:$0xf0]  ;;  %v8431_v14 = vor.u32 %v10390_v21, %v8428_v38  ;;  %v10402_v60 = vld [vmem:[%s16165_s1 + $0xe94] sm:$0xf]  ;;  %v8652_v38 = vld [vmem:[%s16165_s1 + $0xff8] sm:$0xf0] }
 0x25b   :  { %6006 = vmatpush.bf16.msra.mxu3 %v8231_v58  ;;  %v8455_v58 = vor.u32 %v10396_v54, %v8452_v30  ;;  %v8356_v30 = vld [vmem:[%s16165_s1 + $0xda8] sm:$0xf0] }
 0x25c   :  { %5968 = vmatpush.bf16.msra.mxu0 %v8031_v59  ;;  %v10394_v59 = vld [vmem:[%s16165_s1 + $0xe54] sm:$0xf] }
 0x25d   :  { %5981 = vmatpush.bf16.msra.mxu1 %v8095_v6  ;;  %v8319_v6 = vor.u32 %v10362_v12, %v8316_v27  ;;  %v8447_v50 = vor.u32 %v10394_v59, %v8444_v61  ;;  %v8484_v12 = vld [vmem:[%s16165_s1 + $0xea8] sm:$0xf0]  ;;  %v8423_v61 = vor.u32 %v10388_v8, %v8420_v63  ;;  %v10444_v63 = vld [vmem:[%s16165_s1 + $0xfe4] sm:$0xf] }
 0x25e   :  { %5994 = vmatpush.bf16.msra.mxu2 %v8159_v26  ;;  %v8383_v26 = vor.u32 %v10378_v40, %v8380_v47  ;;  %v8295_v40 = vor.u32 %v10356_v33, %v8292_v23  ;;  %v8780_v33 = vld [vmem:[%s16165_s1 + $0x10f8] sm:$0xf0]  ;;  %v8580_v8 = vld [vmem:[%s16165_s1 + $0xf68] sm:$0xf0] }
 0x25f   :  { %6007 = vmatpush.bf16.msra.mxu3 %v8223_v62  ;;  %v8436_v62 = vld [vmem:[%s16165_s1 + $0xe48] sm:$0xf0] }
 0x260   :  { %5969 = vmatpush.bf16.msra.mxu0 %v8023_v37  ;;  %v5763_v28 = vpop.f32.mrf.mxu0  ;;  %v8439_v37 = vor.u32 %v10392_v41, %v8436_v62  ;;  %v10352_v41 = vld [vmem:[%s16165_s1 + $0xd04] sm:$0xf]  ;;  %v8276_v62 = vld [vmem:[%s16165_s1 + $0xd08] sm:$0xf0] }
 0x261   :  { %5982 = vmatpush.bf16.msra.mxu1 %v8087_v20  ;;  %v5764_v1 = vadd.f32 %v5763_v28, %v14697_v31  ;;  %v5776_v17 = vpop.f32.mrf.mxu1  ;;  %v8503_v31 = vor.u32 %v10408_v56, %v8500_v55  ;;  %v10368_v55 = vld [vmem:[%s16165_s1 + $0xd84] sm:$0xf]  ;;  %v8279_v21 = vor.u32 %v10352_v41, %v8276_v62 }
 0x262   :  { %5995 = vmatpush.bf16.msra.mxu2 %v8151_v3  ;;  %v8364_v3 = vld [vmem:[%s16165_s1 + $0xdb8] sm:$0xf0]  ;;  %v10440_v62 = vld [vmem:[%s16165_s1 + $0xfc4] sm:$0xf] }
 0x263   :  { %6008 = vmatpush.bf16.msra.mxu3 %v8215_v29  ;;  %5970 = vmatmul.bf16.vlgmr.msra.gmra.mxu0 %v12100_v11  ;;  %v10410_v11 = vld [vmem:[%s16165_s1 + $0xed4] sm:$0xf]  ;;  %v5777_v20 = vadd.f32 %v5776_v17, %v5764_v1  ;;  %v8340_v1 = vld [vmem:[%s16165_s1 + $0xd88] sm:$0xf0] }
 0x264   :  { %6014 = vmatpush.bf16.msrb.mxu0 %v8335_v19  ;;  %5983 = vmatmul.bf16.vlgmr.msra.gmra.mxu1 %v12110_v16  ;;  %v10360_v16 = vld [vmem:[%s16165_s1 + $0xd44] sm:$0xf]  ;;  %v10406_v29 = vld [vmem:[%s16165_s1 + $0xeb4] sm:$0xf]  ;;  %v8492_v19 = vld [vmem:[%s16165_s1 + $0xeb8] sm:$0xf0] }
 0x265   :  { %6027 = vmatpush.bf16.msrb.mxu1 %v8399_v15  ;;  %5996 = vmatmul.bf16.vlgmr.msra.gmra.mxu2 %v12302_v5  ;;  %v8308_v5 = vld [vmem:[%s16165_s1 + $0xd48] sm:$0xf0]  ;;  %v8303_v15 = vor.u32 %v10358_v18, %v8300_v46  ;;  %v8495_v45 = vor.u32 %v10406_v29, %v8492_v19  ;;  %v10462_v29 = vld [vmem:[%s16165_s1 + $0x1074] sm:$0xf]  ;;  %v8716_v19 = vld [vmem:[%s16165_s1 + $0x1078] sm:$0xf0] }
 0x266   :  { %6040 = vmatpush.bf16.msrb.mxu2 %v8463_v22  ;;  %6009 = vmatmul.bf16.vlgmr.msra.gmra.mxu3 %v12315_v13  ;;  %v8511_v13 = vor.u32 %v10410_v11, %v8508_v9  ;;  %v8311_v2 = vor.u32 %v10360_v16, %v8308_v5  ;;  %v8367_v22 = vor.u32 %v10374_v44, %v8364_v3  ;;  %v10354_v11 = vld [vmem:[%s16165_s1 + $0xd14] sm:$0xf]  ;;  %v8284_v9 = vld [vmem:[%s16165_s1 + $0xd18] sm:$0xf0]  ;;  %v8468_v18 = vld [vmem:[%s16165_s1 + $0xe88] sm:$0xf0] }
 0x267   :  { %6053 = vmatpush.bf16.msrb.mxu3 %v8527_v42  ;;  %v10372_v42 = vld [vmem:[%s16165_s1 + $0xda4] sm:$0xf]  ;;  %v10386_v16 = vld [vmem:[%s16165_s1 + $0xe14] sm:$0xf]  ;;  %v8412_v5 = vld [vmem:[%s16165_s1 + $0xe18] sm:$0xf0]  ;;  %v8287_v48 = vor.u32 %v10354_v11, %v8284_v9 }
 0x268   :  { %6015 = vmatpush.bf16.msrb.mxu0 %v8327_v49  ;;  %v5789_v54 = vpop.f32.mrf.mxu2  ;;  %v5765_v27 = vpop.f32.mrf.mxu0  ;;  %v8359_v59 = vor.u32 %v10372_v42, %v8356_v30  ;;  %v8415_v56 = vor.u32 %v10386_v16, %v8412_v5  ;;  %v10430_v44 = vld [vmem:[%s16165_s1 + $0xf74] sm:$0xf]  ;;  %v10428_v30 = vld [vmem:[%s16165_s1 + $0xf64] sm:$0xf]  ;;  %v8572_v9 = vld [vmem:[%s16165_s1 + $0xf58] sm:$0xf0] }
 0x269   :  { %6028 = vmatpush.bf16.msrb.mxu1 %v8391_v7  ;;  %v5790_v49 = vadd.f32 %v5789_v54, %v5777_v20  ;;  %v5802_v7 = vpop.f32.mrf.mxu3  ;;  %v10446_v20 = vld [vmem:[%s16165_s1 + $0xff4] sm:$0xf]  ;;  %v8719_v54 = vor.u32 %v10462_v29, %v8716_v19  ;;  %v10476_v27 = vld [vmem:[%s16165_s1 + $0x10e4] sm:$0xf]  ;;  %v8700_v5 = vld [vmem:[%s16165_s1 + $0x1058] sm:$0xf0] }
 0x26a   :  { %6041 = vmatpush.bf16.msrb.mxu2 %v8455_v58  ;;  %v10404_v58 = vld [vmem:[%s16165_s1 + $0xea4] sm:$0xf]  ;;  %v10426_v11 = vld [vmem:[%s16165_s1 + $0xf54] sm:$0xf]  ;;  %v8684_v19 = vld [vmem:[%s16165_s1 + $0x1038] sm:$0xf0] }
 0x26b   :  { %6054 = vmatpush.bf16.msrb.mxu3 %v8519_v57  ;;  %v5778_v57 = vpop.f32.mrf.mxu1  ;;  %v14896_v47 = vadd.f32 %v5802_v7, %v5790_v49  ;;  %v8644_v7 = vld [vmem:[%s16165_s1 + $0xfe8] sm:$0xf0]  ;;  %v10458_v16 = vld [vmem:[%s16165_s1 + $0x1054] sm:$0xf] }
 0x26c   :  { %6016 = vmatpush.bf16.msrb.mxu0 %v8319_v6  ;;  %v10370_v6 = vld [vmem:[%s16165_s1 + $0xd94] sm:$0xf]  ;;  %v8583_v57 = vor.u32 %v10428_v30, %v8580_v8  ;;  %v8703_v41 = vor.u32 %v10458_v16, %v8700_v5 }
 0x26d   :  { %6029 = vmatpush.bf16.msrb.mxu1 %v8383_v26  ;;  %v8487_v26 = vor.u32 %v10404_v58, %v8484_v12  ;;  %v10460_v58 = vld [vmem:[%s16165_s1 + $0x1064] sm:$0xf]  ;;  %v8708_v12 = vld [vmem:[%s16165_s1 + $0x1068] sm:$0xf0]  ;;  %v10454_v29 = vld [vmem:[%s16165_s1 + $0x1034] sm:$0xf] }
 0x26e   :  { %6042 = vmatpush.bf16.msrb.mxu2 %v8447_v50  ;;  %v8348_v50 = vld [vmem:[%s16165_s1 + $0xd98] sm:$0xf0]  ;;  %v10434_v16 = vld [vmem:[%s16165_s1 + $0xf94] sm:$0xf] }
 0x26f   :  { %6055 = vmatpush.bf16.msrb.mxu3 %v8511_v13  ;;  %v8476_v13 = vld [vmem:[%s16165_s1 + $0xe98] sm:$0xf0]  ;;  %v8351_v28 = vor.u32 %v10370_v6, %v8348_v50  ;;  %v10442_v6 = vld [vmem:[%s16165_s1 + $0xfd4] sm:$0xf] }
 0x270   :  { %6017 = vmatpush.bf16.msrb.mxu0 %v8311_v2  ;;  %v10384_v2 = vld [vmem:[%s16165_s1 + $0xe04] sm:$0xf]  ;;  %v8479_v17 = vor.u32 %v10402_v60, %v8476_v13  ;;  %v5791_v46 = vpop.f32.mrf.mxu2  ;;  %v8636_v50 = vld [vmem:[%s16165_s1 + $0xfd8] sm:$0xf0]  ;;  %v8575_v13 = vor.u32 %v10426_v11, %v8572_v9 }
 0x271   :  { %6030 = vmatpush.bf16.msrb.mxu1 %v8375_v35  ;;  %v8404_v35 = vld [vmem:[%s16165_s1 + $0xe08] sm:$0xf0]  ;;  %v5804_v3 = vpop.f32.mrf.mxu3  ;;  %v8764_v60 = vld [vmem:[%s16165_s1 + $0x10d8] sm:$0xf0] }
 0x272   :  { %6043 = vmatpush.bf16.msrb.mxu2 %v8439_v37  ;;  %v10400_v37 = vld [vmem:[%s16165_s1 + $0xe84] sm:$0xf]  ;;  %v10438_v3 = vld [vmem:[%s16165_s1 + $0xfb4] sm:$0xf] }
 0x273   :  { %6056 = vmatpush.bf16.msrb.mxu3 %v8503_v31  ;;  %v8588_v31 = vld [vmem:[%s16165_s1 + $0xf78] sm:$0xf0]  ;;  %v8471_v23 = vor.u32 %v10400_v37, %v8468_v18 }
 0x274   :  { %6018 = vmatpush.bf16.msrb.mxu0 %v8303_v15  ;;  %v8343_v15 = vor.u32 %v10368_v55, %v8340_v1  ;;  %v8591_v42 = vor.u32 %v10430_v44, %v8588_v31  ;;  %v8692_v55 = vld [vmem:[%s16165_s1 + $0x1048] sm:$0xf0]  ;;  %v10422_v31 = vld [vmem:[%s16165_s1 + $0xf34] sm:$0xf] }
 0x275   :  { %6031 = vmatpush.bf16.msrb.mxu1 %v8367_v22  ;;  %v8407_v22 = vor.u32 %v10384_v2, %v8404_v35  ;;  %v10472_v2 = vld [vmem:[%s16165_s1 + $0x10c4] sm:$0xf] }
 0x276   :  { %6044 = vmatpush.bf16.msrb.mxu2 %v8431_v14  ;;  %v10478_v14 = vld [vmem:[%s16165_s1 + $0x10f4] sm:$0xf] }
 0x277   :  { %6057 = vmatpush.bf16.msrb.mxu3 %v8495_v45  ;;  %v8655_v45 = vor.u32 %v10446_v20, %v8652_v38  ;;  %v8783_v49 = vor.u32 %v10478_v14, %v8780_v33  ;;  %v8556_v20 = vld [vmem:[%s16165_s1 + $0xf38] sm:$0xf0] }
 0x278   :  { %6019 = vmatpush.bf16.msrb.mxu0 %v8295_v40  ;;  %v8772_v40 = vld [vmem:[%s16165_s1 + $0x10e8] sm:$0xf0]  ;;  %v8620_v38 = vld [vmem:[%s16165_s1 + $0xfb8] sm:$0xf0]  ;;  %v8559_v14 = vor.u32 %v10422_v31, %v8556_v20  ;;  %v10510_v31 = vld [vmem:[%s16165_s1 + $0x11f4] sm:$0xf] }
 0x279   :  { %6032 = vmatpush.bf16.msrb.mxu1 %v8359_v59  ;;  %v8647_v59 = vor.u32 %v10444_v63, %v8644_v7  ;;  %v8623_v33 = vor.u32 %v10438_v3, %v8620_v38  ;;  %v8612_v63 = vld [vmem:[%s16165_s1 + $0xfa8] sm:$0xf0]  ;;  %v8972_v38 = vld [vmem:[%s16165_s1 + $0x1278] sm:$0xf0] }
 0x27a   :  { %6045 = vmatpush.bf16.msrb.mxu2 %v8423_v61  ;;  %v8711_v61 = vor.u32 %v10460_v58, %v8708_v12  ;;  %v8676_v7 = vld [vmem:[%s16165_s1 + $0x1028] sm:$0xf0] }
 0x27b   :  { %6058 = vmatpush.bf16.msrb.mxu3 %v8487_v26  ;;  %v8775_v26 = vor.u32 %v10476_v27, %v8772_v40  ;;  %v10468_v27 = vld [vmem:[%s16165_s1 + $0x10a4] sm:$0xf]  ;;  %v8740_v40 = vld [vmem:[%s16165_s1 + $0x10a8] sm:$0xf0] }
 0x27c   :  { %6020 = vmatpush.bf16.msrb.mxu0 %v8287_v48  ;;  %v8639_v48 = vor.u32 %v10442_v6, %v8636_v50  ;;  %v8540_v50 = vld [vmem:[%s16165_s1 + $0xf18] sm:$0xf0]  ;;  %v8743_v5 = vor.u32 %v10468_v27, %v8740_v40 }
 0x27d   :  { %6033 = vmatpush.bf16.msrb.mxu1 %v8351_v28  ;;  %v8628_v28 = vld [vmem:[%s16165_s1 + $0xfc8] sm:$0xf0] }
 0x27e   :  { %6046 = vmatpush.bf16.msrb.mxu2 %v8415_v56  ;;  %v10456_v56 = vld [vmem:[%s16165_s1 + $0x1044] sm:$0xf]  ;;  %v8631_v46 = vor.u32 %v10440_v62, %v8628_v28  ;;  %v8532_v62 = vld [vmem:[%s16165_s1 + $0xf08] sm:$0xf0] }
 0x27f   :  { %6059 = vmatpush.bf16.msrb.mxu3 %v8479_v17  ;;  %v8756_v17 = vld [vmem:[%s16165_s1 + $0x10c8] sm:$0xf0]  ;;  %v8695_v44 = vor.u32 %v10456_v56, %v8692_v55  ;;  %v10432_v56 = vld [vmem:[%s16165_s1 + $0xf84] sm:$0xf] }
 0x280   :  { %6021 = vmatpush.bf16.msrb.mxu0 %v8279_v21  ;;  %v5815_v1 = vpop.f32.mrf.mxu0  ;;  %v8596_v55 = vld [vmem:[%s16165_s1 + $0xf88] sm:$0xf0] }
 0x281   :  { %6034 = vmatpush.bf16.msrb.mxu1 %v8343_v15  ;;  %v5816_v35 = vadd.f32 %v5815_v1, %v14896_v47  ;;  %v5828_v18 = vpop.f32.mrf.mxu1  ;;  %v8759_v47 = vor.u32 %v10472_v2, %v8756_v17  ;;  %v10470_v15 = vld [vmem:[%s16165_s1 + $0x10b4] sm:$0xf]  ;;  %v10448_v1 = vld [vmem:[%s16165_s1 + $0x1004] sm:$0xf]  ;;  %v8660_v17 = vld [vmem:[%s16165_s1 + $0x1008] sm:$0xf0] }
 0x282   :  { %6047 = vmatpush.bf16.msrb.mxu2 %v8407_v22  ;;  %v8748_v22 = vld [vmem:[%s16165_s1 + $0x10b8] sm:$0xf0] }
 0x283   :  { %6060 = vmatpush.bf16.msrb.mxu3 %v8471_v23  ;;  %6022 = vmatmul.bf16.vlgmr.msrb.gmra.mxu0 %v12313_v10  ;;  %v10474_v10 = vld [vmem:[%s16165_s1 + $0x10d4] sm:$0xf]  ;;  %v5829_v21 = vadd.f32 %v5828_v18, %v5816_v35  ;;  %v8687_v23 = vor.u32 %v10454_v29, %v8684_v19  ;;  %v8751_v30 = vor.u32 %v10470_v15, %v8748_v22  ;;  %v10464_v35 = vld [vmem:[%s16165_s1 + $0x1084] sm:$0xf]  ;;  %v9036_v22 = vld [vmem:[%s16165_s1 + $0x12f8] sm:$0xf0] }
 0x284   :  { %6066 = vmatpush.bf16.msra.mxu0 %v8591_v42  ;;  %6035 = vmatmul.bf16.vlgmr.msrb.gmra.mxu1 %v12323_v53  ;;  %v10424_v53 = vld [vmem:[%s16165_s1 + $0xf44] sm:$0xf]  ;;  %v8599_v29 = vor.u32 %v10432_v56, %v8596_v55  ;;  %v8663_v19 = vor.u32 %v10448_v1, %v8660_v17  ;;  %v10542_v15 = vld [vmem:[%s16165_s1 + $0x12f4] sm:$0xf]  ;;  %v9012_v55 = vld [vmem:[%s16165_s1 + $0x12c8] sm:$0xf0] }
 0x285   :  { %6079 = vmatpush.bf16.msra.mxu1 %v8655_v45  ;;  %6048 = vmatmul.bf16.vlgmr.msrb.gmra.mxu2 %v12515_v24  ;;  %v8564_v24 = vld [vmem:[%s16165_s1 + $0xf48] sm:$0xf0]  ;;  %v10420_v42 = vld [vmem:[%s16165_s1 + $0xf24] sm:$0xf] }
 0x286   :  { %6092 = vmatpush.bf16.msra.mxu2 %v8719_v54  ;;  %6061 = vmatmul.bf16.vlgmr.msrb.gmra.mxu3 %v12528_v36  ;;  %v8767_v36 = vor.u32 %v10474_v10, %v8764_v60  ;;  %v8567_v37 = vor.u32 %v10424_v53, %v8564_v24  ;;  %v8548_v45 = vld [vmem:[%s16165_s1 + $0xf28] sm:$0xf0]  ;;  %v10436_v54 = vld [vmem:[%s16165_s1 + $0xfa4] sm:$0xf]  ;;  %v8604_v10 = vld [vmem:[%s16165_s1 + $0xf98] sm:$0xf0] }
 0x287   :  { %6105 = vmatpush.bf16.msra.mxu3 %v8783_v49  ;;  %v10452_v49 = vld [vmem:[%s16165_s1 + $0x1024] sm:$0xf]  ;;  %v8615_v9 = vor.u32 %v10436_v54, %v8612_v63  ;;  %v10450_v60 = vld [vmem:[%s16165_s1 + $0x1014] sm:$0xf]  ;;  %v8836_v54 = vld [vmem:[%s16165_s1 + $0x1168] sm:$0xf0] }
 0x288   :  { %6067 = vmatpush.bf16.msra.mxu0 %v8583_v57  ;;  %v5841_v8 = vpop.f32.mrf.mxu2  ;;  %v5817_v57 = vpop.f32.mrf.mxu0  ;;  %v8679_v6 = vor.u32 %v10452_v49, %v8676_v7  ;;  %v10416_v24 = vld [vmem:[%s16165_s1 + $0xf04] sm:$0xf]  ;;  %v8900_v63 = vld [vmem:[%s16165_s1 + $0x11e8] sm:$0xf0] }
 0x289   :  { %6080 = vmatpush.bf16.msra.mxu1 %v8647_v59  ;;  %v5842_v58 = vadd.f32 %v5841_v8, %v5829_v21  ;;  %v5854_v12 = vpop.f32.mrf.mxu3  ;;  %v8551_v59 = vor.u32 %v10420_v42, %v8548_v45  ;;  %v8535_v3 = vor.u32 %v10416_v24, %v8532_v62  ;;  %v10526_v21 = vld [vmem:[%s16165_s1 + $0x1274] sm:$0xf]  ;;  %v10492_v45 = vld [vmem:[%s16165_s1 + $0x1164] sm:$0xf]  ;;  %v9039_v8 = vor.u32 %v10542_v15, %v9036_v22  ;;  %v8964_v7 = vld [vmem:[%s16165_s1 + $0x1268] sm:$0xf0] }
 0x28a   :  { %6093 = vmatpush.bf16.msra.mxu2 %v8711_v61  ;;  %v5830_v61 = vpop.f32.mrf.mxu1  ;;  %v8975_v42 = vor.u32 %v10526_v21, %v8972_v38  ;;  %v10524_v49 = vld [vmem:[%s16165_s1 + $0x1264] sm:$0xf]  ;;  %v8839_v27 = vor.u32 %v10492_v45, %v8836_v54  ;;  %v8884_v24 = vld [vmem:[%s16165_s1 + $0x11c8] sm:$0xf0]  ;;  %v10534_v21 = vld [vmem:[%s16165_s1 + $0x12b4] sm:$0xf] }
 0x28b   :  { %6106 = vmatpush.bf16.msra.mxu3 %v8775_v26  ;;  %v15095_v11 = vadd.f32 %v5854_v12, %v5842_v58  ;;  %v10418_v26 = vld [vmem:[%s16165_s1 + $0xf14] sm:$0xf]  ;;  %v10540_v58 = vld [vmem:[%s16165_s1 + $0x12e4] sm:$0xf]  ;;  %v9028_v12 = vld [vmem:[%s16165_s1 + $0x12e8] sm:$0xf0]  ;;  %v8967_v57 = vor.u32 %v10524_v49, %v8964_v7 }
 0x28c   :  { %6068 = vmatpush.bf16.msra.mxu0 %v8575_v13  ;;  %v8668_v13 = vld [vmem:[%s16165_s1 + $0x1018] sm:$0xf0]  ;;  %v8543_v53 = vor.u32 %v10418_v26, %v8540_v50  ;;  %v10522_v50 = vld [vmem:[%s16165_s1 + $0x1254] sm:$0xf]  ;;  %v10520_v62 = vld [vmem:[%s16165_s1 + $0x1244] sm:$0xf] }
 0x28d   :  { %6081 = vmatpush.bf16.msra.mxu1 %v8639_v48  ;;  %v10466_v48 = vld [vmem:[%s16165_s1 + $0x1094] sm:$0xf]  ;;  %v8671_v28 = vor.u32 %v10450_v60, %v8668_v13  ;;  %v8828_v61 = vld [vmem:[%s16165_s1 + $0x1158] sm:$0xf0]  ;;  %v10536_v56 = vld [vmem:[%s16165_s1 + $0x12c4] sm:$0xf] }
 0x28e   :  { %6094 = vmatpush.bf16.msra.mxu2 %v8703_v41  ;;  %v8732_v41 = vld [vmem:[%s16165_s1 + $0x1098] sm:$0xf0]  ;;  %v10484_v22 = vld [vmem:[%s16165_s1 + $0x1124] sm:$0xf]  ;;  %v8868_v45 = vld [vmem:[%s16165_s1 + $0x11a8] sm:$0xf0] }
 0x28f   :  { %6107 = vmatpush.bf16.msra.mxu3 %v8767_v36  ;;  %v8607_v36 = vor.u32 %v10434_v16, %v8604_v10  ;;  %v8735_v2 = vor.u32 %v10466_v48, %v8732_v41  ;;  %v8892_v26 = vld [vmem:[%s16165_s1 + $0x11d8] sm:$0xf0]  ;;  %v16195_v10 = vld [vmem:[#allocation3_spill] sm:$0xff]  ;;  %v10504_v41 = vld [vmem:[%s16165_s1 + $0x11c4] sm:$0xf] }
 0x290   :  { %6069 = vmatpush.bf16.msra.mxu0 %v8567_v37  ;;  %v8724_v37 = vld [vmem:[%s16165_s1 + $0x1088] sm:$0xf0]  ;;  %v5843_v18 = vpop.f32.mrf.mxu2  ;;  %v8956_v16 = vld [vmem:[%s16165_s1 + $0x1258] sm:$0xf0]  ;;  %v10516_v54 = vld [vmem:[%s16165_s1 + $0x1224] sm:$0xf] }
 0x291   :  { %6082 = vmatpush.bf16.msra.mxu1 %v8631_v46  ;;  %v10494_v46 = vld [vmem:[%s16165_s1 + $0x1174] sm:$0xf]  ;;  %v5856_v20 = vpop.f32.mrf.mxu3  ;;  %v8959_v48 = vor.u32 %v10522_v50, %v8956_v16  ;;  %v9004_v38 = vld [vmem:[%s16165_s1 + $0x12b8] sm:$0xf0]  ;;  %v10532_v49 = vld [vmem:[%s16165_s1 + $0x12a4] sm:$0xf] }
 0x292   :  { %6095 = vmatpush.bf16.msra.mxu2 %v8695_v44  ;;  %v8844_v44 = vld [vmem:[%s16165_s1 + $0x1178] sm:$0xf0]  ;;  %v10486_v18 = vld [vmem:[%s16165_s1 + $0x1134] sm:$0xf]  ;;  %v8996_v7 = vld [vmem:[%s16165_s1 + $0x12a8] sm:$0xf0] }
 0x293   :  { %6108 = vmatpush.bf16.msra.mxu3 %v8759_v47  ;;  %v8908_v47 = vld [vmem:[%s16165_s1 + $0x11f8] sm:$0xf0]  ;;  %v10514_v16 = vld [vmem:[%s16165_s1 + $0x1214] sm:$0xf] }
 0x294   :  { %6070 = vmatpush.bf16.msra.mxu0 %v8559_v14  ;;  %v8727_v14 = vor.u32 %v10464_v35, %v8724_v37  ;;  %v8887_v35 = vor.u32 %v10504_v41, %v8884_v24  ;;  %v8876_v20 = vld [vmem:[%s16165_s1 + $0x11b8] sm:$0xf0]  ;;  %v10496_v41 = vld [vmem:[%s16165_s1 + $0x1184] sm:$0xf] }
 0x295   :  { %6083 = vmatpush.bf16.msra.mxu1 %v8623_v33  ;;  %v8847_v33 = vor.u32 %v10494_v46, %v8844_v44  ;;  %v8812_v46 = vld [vmem:[%s16165_s1 + $0x1138] sm:$0xf0]  ;;  %v10502_v44 = vld [vmem:[%s16165_s1 + $0x11b4] sm:$0xf]  ;;  %v10512_v24 = vld [vmem:[%s16165_s1 + $0x1204] sm:$0xf] }
 0x296   :  { %6096 = vmatpush.bf16.msra.mxu2 %v8687_v23  ;;  %v8911_v23 = vor.u32 %v10510_v31, %v8908_v47  ;;  %v8940_v47 = vld [vmem:[%s16165_s1 + $0x1238] sm:$0xf0] }
 0x297   :  { %6109 = vmatpush.bf16.msra.mxu3 %v8751_v30  ;;  %v10508_v30 = vld [vmem:[%s16165_s1 + $0x11e4] sm:$0xf]  ;;  %v8860_v50 = vld [vmem:[%s16165_s1 + $0x1198] sm:$0xf0] }
 0x298   :  { %6071 = vmatpush.bf16.msra.mxu0 %v8551_v59  ;;  %v8903_v40 = vor.u32 %v10508_v30, %v8900_v63  ;;  %v10490_v59 = vld [vmem:[%s16165_s1 + $0x1154] sm:$0xf]  ;;  %v8932_v30 = vld [vmem:[%s16165_s1 + $0x1228] sm:$0xf0] }
 0x299   :  { %6084 = vmatpush.bf16.msra.mxu1 %v8615_v9  ;;  %v10506_v9 = vld [vmem:[%s16165_s1 + $0x11d4] sm:$0xf]  ;;  %v8831_v60 = vor.u32 %v10490_v59, %v8828_v61  ;;  %v8935_v59 = vor.u32 %v10516_v54, %v8932_v30  ;;  %v9284_v54 = vld [vmem:[%s16165_s1 + $0x14e8] sm:$0xf0] }
 0x29a   :  { %6097 = vmatpush.bf16.msra.mxu2 %v8679_v6  ;;  %v9031_v6 = vor.u32 %v10540_v58, %v9028_v12  ;;  %v8895_v13 = vor.u32 %v10506_v9, %v8892_v26  ;;  %v10482_v61 = vld [vmem:[%s16165_s1 + $0x1114] sm:$0xf]  ;;  %v8796_v9 = vld [vmem:[%s16165_s1 + $0x1118] sm:$0xf0]  ;;  %v8999_v26 = vor.u32 %v10532_v49, %v8996_v7 }
 0x29b   :  { %6110 = vmatpush.bf16.msra.mxu3 %v8743_v5  ;;  %v9020_v5 = vld [vmem:[%s16165_s1 + $0x12d8] sm:$0xf0]  ;;  %v10554_v49 = vld [vmem:[%s16165_s1 + $0x1354] sm:$0xf] }
 0x29c   :  { %6072 = vmatpush.bf16.msra.mxu0 %v8543_v53  ;;  %v9084_v7 = vld [vmem:[%s16165_s1 + $0x1358] sm:$0xf0] }
 0x29d   :  { %6085 = vmatpush.bf16.msra.mxu1 %v8607_v36  ;;  %v8948_v36 = vld [vmem:[%s16165_s1 + $0x1248] sm:$0xf0] }
 0x29e   :  { %6098 = vmatpush.bf16.msra.mxu2 %v8671_v28  ;;  %v8951_v37 = vor.u32 %v10520_v62, %v8948_v36  ;;  %v8916_v36 = vld [vmem:[%s16165_s1 + $0x1208] sm:$0xf0] }
 0x29f   :  { %6111 = vmatpush.bf16.msra.mxu3 %v8735_v2 }
 0x2a0   :  { %6073 = vmatpush.bf16.msra.mxu0 %v8535_v3  ;;  %v5867_v28 = vpop.f32.mrf.mxu0  ;;  %v10518_v3 = vld [vmem:[%s16165_s1 + $0x1234] sm:$0xf] }
 0x2a1   :  { %6086 = vmatpush.bf16.msra.mxu1 %v8599_v29  ;;  %v5868_v1 = vadd.f32 %v5867_v28, %v15095_v11  ;;  %v5880_v17 = vpop.f32.mrf.mxu1  ;;  %v9015_v11 = vor.u32 %v10536_v56, %v9012_v55  ;;  %v8815_v29 = vor.u32 %v10486_v18, %v8812_v46  ;;  %v8943_v15 = vor.u32 %v10518_v3, %v8940_v47  ;;  %v10528_v28 = vld [vmem:[%s16165_s1 + $0x1284] sm:$0xf]  ;;  %v8980_v56 = vld [vmem:[%s16165_s1 + $0x1288] sm:$0xf0]  ;;  %v9164_v18 = vld [vmem:[%s16165_s1 + $0x13f8] sm:$0xf0] }
 0x2a2   :  { %6099 = vmatpush.bf16.msra.mxu2 %v8663_v19  ;;  %v8879_v19 = vor.u32 %v10502_v44, %v8876_v20  ;;  %v10590_v46 = vld [vmem:[%s16165_s1 + $0x1474] sm:$0xf]  ;;  %v9228_v44 = vld [vmem:[%s16165_s1 + $0x1478] sm:$0xf0]  ;;  %v8983_v47 = vor.u32 %v10528_v28, %v8980_v56 }
 0x2a3   :  { %6112 = vmatpush.bf16.msra.mxu3 %v8727_v14  ;;  %6074 = vmatmul.bf16.vlgmr.msra.gmra.mxu0 %v12526_v34  ;;  %v10538_v34 = vld [vmem:[%s16165_s1 + $0x12d4] sm:$0xf]  ;;  %v5881_v31 = vadd.f32 %v5880_v17, %v5868_v1  ;;  %v8804_v14 = vld [vmem:[%s16165_s1 + $0x1128] sm:$0xf0]  ;;  %v9292_v3 = vld [vmem:[%s16165_s1 + $0x14f8] sm:$0xf0] }
 0x2a4   :  { %6118 = vmatpush.bf16.msrb.mxu0 %v8847_v33  ;;  %6087 = vmatmul.bf16.vlgmr.msra.gmra.mxu1 %v12536_v43  ;;  %v10488_v43 = vld [vmem:[%s16165_s1 + $0x1144] sm:$0xf]  ;;  %v9023_v53 = vor.u32 %v10538_v34, %v9020_v5  ;;  %v8807_v12 = vor.u32 %v10484_v22, %v8804_v14  ;;  %v8924_v34 = vld [vmem:[%s16165_s1 + $0x1218] sm:$0xf0]  ;;  %v10530_v5 = vld [vmem:[%s16165_s1 + $0x1294] sm:$0xf] }
 0x2a5   :  { %6131 = vmatpush.bf16.msrb.mxu1 %v8911_v23  ;;  %6100 = vmatmul.bf16.vlgmr.msra.gmra.mxu2 %v12728_v0  ;;  %v8820_v0 = vld [vmem:[%s16165_s1 + $0x1148] sm:$0xf0]  ;;  %v10500_v33 = vld [vmem:[%s16165_s1 + $0x11a4] sm:$0xf]  ;;  %v9007_v23 = vor.u32 %v10534_v21, %v9004_v38  ;;  %v10558_v1 = vld [vmem:[%s16165_s1 + $0x1374] sm:$0xf] }
 0x2a6   :  { %6144 = vmatpush.bf16.msrb.mxu2 %v8975_v42  ;;  %6113 = vmatmul.bf16.vlgmr.msra.gmra.mxu3 %v16195_v10  ;;  %v8823_v2 = vor.u32 %v10488_v43, %v8820_v0  ;;  %v8988_v10 = vld [vmem:[%s16165_s1 + $0x1298] sm:$0xf0]  ;;  %v8927_v0 = vor.u32 %v10514_v16, %v8924_v34  ;;  %v10574_v17 = vld [vmem:[%s16165_s1 + $0x13f4] sm:$0xf]  ;;  %v10572_v22 = vld [vmem:[%s16165_s1 + $0x13e4] sm:$0xf]  ;;  %v9087_v34 = vor.u32 %v10554_v49, %v9084_v7 }
 0x2a7   :  { %6157 = vmatpush.bf16.msrb.mxu3 %v9039_v8  ;;  %v8991_v62 = vor.u32 %v10530_v5, %v8988_v10  ;;  %v10606_v20 = vld [vmem:[%s16165_s1 + $0x14f4] sm:$0xf]  ;;  %v9167_v38 = vor.u32 %v10574_v17, %v9164_v18  ;;  %v16199_v16 = vld [vmem:[#allocation7_spill] sm:$0xff] }
 0x2a8   :  { %6119 = vmatpush.bf16.msrb.mxu0 %v8839_v27  ;;  %v5893_v42 = vpop.f32.mrf.mxu2  ;;  %v5869_v58 = vpop.f32.mrf.mxu0  ;;  %v9295_v14 = vor.u32 %v10606_v20, %v9292_v3  ;;  %v10550_v17 = vld [vmem:[%s16165_s1 + $0x1334] sm:$0xf]  ;;  %v9260_v20 = vld [vmem:[%s16165_s1 + $0x14b8] sm:$0xf0] }
 0x2a9   :  { %6132 = vmatpush.bf16.msrb.mxu1 %v8903_v40  ;;  %v5894_v8 = vadd.f32 %v5893_v42, %v5881_v31  ;;  %v5906_v63 = vpop.f32.mrf.mxu3  ;;  %v5882_v27 = vpop.f32.mrf.mxu1  ;;  %v8919_v31 = vor.u32 %v10512_v24, %v8916_v36  ;;  %v9220_v42 = vld [vmem:[%s16165_s1 + $0x1468] sm:$0xf0]  ;;  %v10570_v58 = vld [vmem:[%s16165_s1 + $0x13d4] sm:$0xf] }
 0x2aa   :  { %6145 = vmatpush.bf16.msrb.mxu2 %v8967_v57  ;;  %v8871_v57 = vor.u32 %v10500_v33, %v8868_v45  ;;  %v9156_v33 = vld [vmem:[%s16165_s1 + $0x13e8] sm:$0xf0]  ;;  %v10604_v45 = vld [vmem:[%s16165_s1 + $0x14e4] sm:$0xf] }
 0x2ab   :  { %6158 = vmatpush.bf16.msrb.mxu3 %v9031_v6  ;;  %v15294_v40 = vadd.f32 %v5906_v63, %v5894_v8  ;;  %v10498_v6 = vld [vmem:[%s16165_s1 + $0x1194] sm:$0xf]  ;;  %v9159_v8 = vor.u32 %v10572_v22, %v9156_v33  ;;  %v9287_v27 = vor.u32 %v10604_v45, %v9284_v54  ;;  %v9268_v36 = vld [vmem:[%s16165_s1 + $0x14c8] sm:$0xf0]  ;;  %v10580_v33 = vld [vmem:[%s16165_s1 + $0x1424] sm:$0xf] }
 0x2ac   :  { %6120 = vmatpush.bf16.msrb.mxu0 %v8831_v60  ;;  %v8799_v60 = vor.u32 %v10482_v61, %v8796_v9  ;;  %v8863_v43 = vor.u32 %v10498_v6, %v8860_v50  ;;  %v9212_v61 = vld [vmem:[%s16165_s1 + $0x1458] sm:$0xf0]  ;;  %v16198_v6 = vld [vmem:[#allocation4_spill] sm:$0xff]  ;;  %v10596_v54 = vld [vmem:[%s16165_s1 + $0x14a4] sm:$0xf] }
 0x2ad   :  { %6133 = vmatpush.bf16.msrb.mxu1 %v8895_v13  ;;  %v10480_v13 = vld [vmem:[%s16165_s1 + $0x1104] sm:$0xf]  ;;  %v16197_v9 = vld [vmem:[#allocation5_spill] sm:$0xff] }
 0x2ae   :  { %6146 = vmatpush.bf16.msrb.mxu2 %v8959_v48  ;;  %v8788_v48 = vld [vmem:[%s16165_s1 + $0x1108] sm:$0xf0]  ;;  %v9276_v50 = vld [vmem:[%s16165_s1 + $0x14d8] sm:$0xf0] }
 0x2af   :  { %6159 = vmatpush.bf16.msrb.mxu3 %v9023_v53  ;;  %v8852_v53 = vld [vmem:[%s16165_s1 + $0x1188] sm:$0xf0] }
 0x2b0   :  { %6121 = vmatpush.bf16.msrb.mxu0 %v8823_v2  ;;  %v5895_v55 = vpop.f32.mrf.mxu2  ;;  %v9100_v2 = vld [vmem:[%s16165_s1 + $0x1378] sm:$0xf0] }
 0x2b1   :  { %6134 = vmatpush.bf16.msrb.mxu1 %v8887_v35  ;;  %v5908_v35 = vpop.f32.mrf.mxu3  ;;  %v9103_v21 = vor.u32 %v10558_v1, %v9100_v2 }
 0x2b2   :  { %6147 = vmatpush.bf16.msrb.mxu2 %v8951_v37  ;;  %v8791_v37 = vor.u32 %v10480_v13, %v8788_v48  ;;  %v9076_v13 = vld [vmem:[%s16165_s1 + $0x1348] sm:$0xf0]  ;;  %v10568_v48 = vld [vmem:[%s16165_s1 + $0x13c4] sm:$0xf]  ;;  %v9068_v35 = vld [vmem:[%s16165_s1 + $0x1338] sm:$0xf0] }
 0x2b3   :  { %6160 = vmatpush.bf16.msrb.mxu3 %v9015_v11  ;;  %v8855_v11 = vor.u32 %v10496_v41, %v8852_v53  ;;  %v10584_v41 = vld [vmem:[%s16165_s1 + $0x1444] sm:$0xf]  ;;  %v9204_v53 = vld [vmem:[%s16165_s1 + $0x1448] sm:$0xf0]  ;;  %v9071_v3 = vor.u32 %v10550_v17, %v9068_v35  ;;  %v9420_v17 = vld [vmem:[%s16165_s1 + $0x15f8] sm:$0xf0] }
 0x2b4   :  { %6122 = vmatpush.bf16.msrb.mxu0 %v8815_v29  ;;  %v9231_v29 = vor.u32 %v10590_v46, %v9228_v44  ;;  %v9207_v2 = vor.u32 %v10584_v41, %v9204_v53  ;;  %v9132_v46 = vld [vmem:[%s16165_s1 + $0x13b8] sm:$0xf0]  ;;  %v10582_v44 = vld [vmem:[%s16165_s1 + $0x1434] sm:$0xf]  ;;  %v9172_v53 = vld [vmem:[%s16165_s1 + $0x1408] sm:$0xf0] }
 0x2b5   :  { %6135 = vmatpush.bf16.msrb.mxu1 %v8879_v19  ;;  %v10556_v19 = vld [vmem:[%s16165_s1 + $0x1364] sm:$0xf]  ;;  %v10654_v35 = vld [vmem:[%s16165_s1 + $0x1674] sm:$0xf] }
 0x2b6   :  { %6148 = vmatpush.bf16.msrb.mxu2 %v8943_v15  ;;  %v9092_v15 = vld [vmem:[%s16165_s1 + $0x1368] sm:$0xf0] }
 0x2b7   :  { %6161 = vmatpush.bf16.msrb.mxu3 %v9007_v23  ;;  %v10588_v23 = vld [vmem:[%s16165_s1 + $0x1464] sm:$0xf]  ;;  %v9095_v30 = vor.u32 %v10556_v19, %v9092_v15 }
 0x2b8   :  { %6123 = vmatpush.bf16.msrb.mxu0 %v8807_v12  ;;  %v9223_v63 = vor.u32 %v10588_v23, %v9220_v42  ;;  %v16196_v12 = vld [vmem:[#allocation2_spill] sm:$0xff]  ;;  %v9188_v23 = vld [vmem:[%s16165_s1 + $0x1428] sm:$0xf0] }
 0x2b9   :  { %6136 = vmatpush.bf16.msrb.mxu1 %v8871_v57  ;;  %v9148_v57 = vld [vmem:[%s16165_s1 + $0x13d8] sm:$0xf0]  ;;  %v10564_v19 = vld [vmem:[%s16165_s1 + $0x13a4] sm:$0xf] }
 0x2ba   :  { %6149 = vmatpush.bf16.msrb.mxu2 %v8935_v59  ;;  %v10586_v59 = vld [vmem:[%s16165_s1 + $0x1454] sm:$0xf]  ;;  %v9151_v5 = vor.u32 %v10570_v58, %v9148_v57  ;;  %v9052_v57 = vld [vmem:[%s16165_s1 + $0x1318] sm:$0xf0] }
 0x2bb   :  { %6162 = vmatpush.bf16.msrb.mxu3 %v8999_v26  ;;  %v10602_v26 = vld [vmem:[%s16165_s1 + $0x14d4] sm:$0xf]  ;;  %v9215_v10 = vor.u32 %v10586_v59, %v9212_v61 }
 0x2bc   :  { %6124 = vmatpush.bf16.msrb.mxu0 %v8799_v60  ;;  %v10552_v60 = vld [vmem:[%s16165_s1 + $0x1344] sm:$0xf]  ;;  %v10562_v59 = vld [vmem:[%s16165_s1 + $0x1394] sm:$0xf] }
 0x2bd   :  { %6137 = vmatpush.bf16.msrb.mxu1 %v8863_v43  ;;  %v9279_v43 = vor.u32 %v10602_v26, %v9276_v50  ;;  %v9079_v56 = vor.u32 %v10552_v60, %v9076_v13  ;;  %v9180_v26 = vld [vmem:[%s16165_s1 + $0x1418] sm:$0xf0]  ;;  %v10594_v50 = vld [vmem:[%s16165_s1 + $0x1494] sm:$0xf] }
 0x2be   :  { %6150 = vmatpush.bf16.msrb.mxu2 %v8927_v0  ;;  %v9140_v0 = vld [vmem:[%s16165_s1 + $0x13c8] sm:$0xf0] }
 0x2bf   :  { %6163 = vmatpush.bf16.msrb.mxu3 %v8991_v62  ;;  %v10600_v62 = vld [vmem:[%s16165_s1 + $0x14c4] sm:$0xf]  ;;  %v9143_v1 = vor.u32 %v10568_v48, %v9140_v0 }
 0x2c0   :  { %6125 = vmatpush.bf16.msrb.mxu0 %v8791_v37  ;;  %v5919_v24 = vpop.f32.mrf.mxu0  ;;  %v10566_v37 = vld [vmem:[%s16165_s1 + $0x13b4] sm:$0xf]  ;;  %v10560_v48 = vld [vmem:[%s16165_s1 + $0x1384] sm:$0xf] }
 0x2c1   :  { %6138 = vmatpush.bf16.msrb.mxu1 %v8855_v11  ;;  %v5920_v28 = vadd.f32 %v5919_v24, %v15294_v40  ;;  %v5932_v55 = vpop.f32.mrf.mxu1  ;;  %v9271_v40 = vor.u32 %v10600_v62, %v9268_v36  ;;  %v9196_v11 = vld [vmem:[%s16165_s1 + $0x1438] sm:$0xf0]  ;;  %v10576_v0 = vld [vmem:[%s16165_s1 + $0x1404] sm:$0xf]  ;;  %v9236_v62 = vld [vmem:[%s16165_s1 + $0x1488] sm:$0xf0] }
 0x2c2   :  { %6151 = vmatpush.bf16.msrb.mxu2 %v8919_v31  ;;  %v10598_v31 = vld [vmem:[%s16165_s1 + $0x14b4] sm:$0xf]  ;;  %v10592_v24 = vld [vmem:[%s16165_s1 + $0x1484] sm:$0xf] }
 0x2c3   :  { %6164 = vmatpush.bf16.msrb.mxu3 %v8983_v47  ;;  %6126 = vmatmul.bf16.vlgmr.msrb.gmra.mxu0 %v16196_v12  ;;  %v5933_v18 = vadd.f32 %v5932_v55, %v5920_v28  ;;  %v9135_v47 = vor.u32 %v10566_v37, %v9132_v46  ;;  %v9263_v15 = vor.u32 %v10598_v31, %v9260_v20  ;;  %v10622_v28 = vld [vmem:[%s16165_s1 + $0x1574] sm:$0xf]  ;;  %v9484_v37 = vld [vmem:[%s16165_s1 + $0x1678] sm:$0xf0] }
 0x2c4   :  { %6170 = vmatpush.bf16.msra.mxu0 %v9103_v21  ;;  %6139 = vmatmul.bf16.vlgmr.msrb.gmra.mxu1 %v16198_v6  ;;  %v9199_v21 = vor.u32 %v10582_v44, %v9196_v11  ;;  %v9191_v12 = vor.u32 %v10580_v33, %v9188_v23  ;;  %v10578_v6 = vld [vmem:[%s16165_s1 + $0x1414] sm:$0xf]  ;;  %v9548_v44 = vld [vmem:[%s16165_s1 + $0x16f8] sm:$0xf0]  ;;  %v9239_v11 = vor.u32 %v10592_v24, %v9236_v62  ;;  %v9540_v33 = vld [vmem:[%s16165_s1 + $0x16e8] sm:$0xf0] }
 0x2c5   :  { %6183 = vmatpush.bf16.msra.mxu1 %v9167_v38  ;;  %6152 = vmatmul.bf16.vlgmr.msrb.gmra.mxu2 %v16197_v9  ;;  %v10548_v38 = vld [vmem:[%s16165_s1 + $0x1324] sm:$0xf]  ;;  %v9116_v9 = vld [vmem:[%s16165_s1 + $0x1398] sm:$0xf0]  ;;  %v9183_v13 = vor.u32 %v10578_v6, %v9180_v26  ;;  %v10638_v55 = vld [vmem:[%s16165_s1 + $0x15f4] sm:$0xf] }
 0x2c6   :  { %6196 = vmatpush.bf16.msra.mxu2 %v9231_v29  ;;  %6165 = vmatmul.bf16.vlgmr.msrb.gmra.mxu3 %v16199_v16  ;;  %v9060_v29 = vld [vmem:[%s16165_s1 + $0x1328] sm:$0xf0]  ;;  %v9244_v16 = vld [vmem:[%s16165_s1 + $0x1498] sm:$0xf0]  ;;  %v9119_v60 = vor.u32 %v10562_v59, %v9116_v9  ;;  %v10670_v46 = vld [vmem:[%s16165_s1 + $0x16f4] sm:$0xf]  ;;  %v9423_v20 = vor.u32 %v10638_v55, %v9420_v17 }
 0x2c7   :  { %6209 = vmatpush.bf16.msra.mxu3 %v9295_v14  ;;  %v9124_v14 = vld [vmem:[%s16165_s1 + $0x13a8] sm:$0xf0]  ;;  %v9247_v41 = vor.u32 %v10594_v50, %v9244_v16  ;;  %v16202_v59 = vld [vmem:[#allocation8_spill] sm:$0xff]  ;;  %v9532_v9 = vld [vmem:[%s16165_s1 + $0x16d8] sm:$0xf0] }
 0x2c8   :  { %6171 = vmatpush.bf16.msra.mxu0 %v9095_v30  ;;  %v5945_v22 = vpop.f32.mrf.mxu2  ;;  %v9252_v30 = vld [vmem:[%s16165_s1 + $0x14a8] sm:$0xf0]  ;;  %v9127_v58 = vor.u32 %v10564_v19, %v9124_v14  ;;  %v10668_v14 = vld [vmem:[%s16165_s1 + $0x16e4] sm:$0xf]  ;;  %v10614_v55 = vld [vmem:[%s16165_s1 + $0x1534] sm:$0xf] }
 0x2c9   :  { %6184 = vmatpush.bf16.msra.mxu1 %v9159_v8  ;;  %v5946_v42 = vadd.f32 %v5945_v22, %v5933_v18  ;;  %v5958_v45 = vpop.f32.mrf.mxu3  ;;  %v5921_v8 = vpop.f32.mrf.mxu0  ;;  %v9255_v61 = vor.u32 %v10596_v54, %v9252_v30  ;;  %v9175_v18 = vor.u32 %v10576_v0, %v9172_v53  ;;  %v9412_v19 = vld [vmem:[%s16165_s1 + $0x15e8] sm:$0xf0]  ;;  %v10618_v54 = vld [vmem:[%s16165_s1 + $0x1554] sm:$0xf]  ;;  %v9340_v30 = vld [vmem:[%s16165_s1 + $0x1558] sm:$0xf0] }
 0x2ca   :  { %6197 = vmatpush.bf16.msra.mxu2 %v9223_v63  ;;  %v9063_v63 = vor.u32 %v10548_v38, %v9060_v29  ;;  %v5934_v49 = vpop.f32.mrf.mxu1  ;;  %v10636_v38 = vld [vmem:[%s16165_s1 + $0x15e4] sm:$0xf]  ;;  %v9551_v29 = vor.u32 %v10670_v46, %v9548_v44  ;;  %v9476_v22 = vld [vmem:[%s16165_s1 + $0x1668] sm:$0xf0]  ;;  %v10634_v8 = vld [vmem:[%s16165_s1 + $0x15d4] sm:$0xf]  ;;  %v9343_v26 = vor.u32 %v10618_v54, %v9340_v30 }
 0x2cb   :  { %6210 = vmatpush.bf16.msra.mxu3 %v9287_v27  ;;  %v15493_v7 = vadd.f32 %v5958_v45, %v5946_v42  ;;  %v10546_v27 = vld [vmem:[%s16165_s1 + $0x1314] sm:$0xf]  ;;  %v9415_v42 = vor.u32 %v10636_v38, %v9412_v19  ;;  %v9543_v49 = vor.u32 %v10668_v14, %v9540_v33  ;;  %v16203_v6 = vld [vmem:[#allocation11_spill] sm:$0xff]  ;;  %v9516_v46 = vld [vmem:[%s16165_s1 + $0x16b8] sm:$0xf0] }
 0x2cc   :  { %6172 = vmatpush.bf16.msra.mxu0 %v9087_v34  ;;  %v9055_v34 = vor.u32 %v10546_v27, %v9052_v57  ;;  %v9468_v27 = vld [vmem:[%s16165_s1 + $0x1658] sm:$0xf0]  ;;  %v9524_v53 = vld [vmem:[%s16165_s1 + $0x16c8] sm:$0xf0]  ;;  %v10644_v19 = vld [vmem:[%s16165_s1 + $0x1624] sm:$0xf] }
 0x2cd   :  { %6185 = vmatpush.bf16.msra.mxu1 %v9151_v5  ;;  %v10544_v5 = vld [vmem:[%s16165_s1 + $0x1304] sm:$0xf]  ;;  %v16201_v57 = vld [vmem:[#allocation9_spill] sm:$0xff] }
 0x2ce   :  { %6198 = vmatpush.bf16.msra.mxu2 %v9215_v10  ;;  %v9044_v10 = vld [vmem:[%s16165_s1 + $0x1308] sm:$0xf0]  ;;  %v10660_v33 = vld [vmem:[%s16165_s1 + $0x16a4] sm:$0xf] }
 0x2cf   :  { %6211 = vmatpush.bf16.msra.mxu3 %v9279_v43  ;;  %v9108_v43 = vld [vmem:[%s16165_s1 + $0x1388] sm:$0xf0] }
 0x2d0   :  { %6173 = vmatpush.bf16.msra.mxu0 %v9079_v56  ;;  %v5947_v36 = vpop.f32.mrf.mxu2  ;;  %v9356_v56 = vld [vmem:[%s16165_s1 + $0x1578] sm:$0xf0] }
 0x2d1   :  { %6186 = vmatpush.bf16.msra.mxu1 %v9143_v1  ;;  %v5960_v1 = vpop.f32.mrf.mxu3  ;;  %v9359_v31 = vor.u32 %v10622_v28, %v9356_v56 }
 0x2d2   :  { %6199 = vmatpush.bf16.msra.mxu2 %v9207_v2  ;;  %v9047_v2 = vor.u32 %v10544_v5, %v9044_v10  ;;  %v9332_v5 = vld [vmem:[%s16165_s1 + $0x1548] sm:$0xf0]  ;;  %v10632_v10 = vld [vmem:[%s16165_s1 + $0x15c4] sm:$0xf]  ;;  %v9324_v1 = vld [vmem:[%s16165_s1 + $0x1538] sm:$0xf0] }
 0x2d3   :  { %6212 = vmatpush.bf16.msra.mxu3 %v9271_v40  ;;  %v9111_v40 = vor.u32 %v10560_v48, %v9108_v43  ;;  %v10648_v48 = vld [vmem:[%s16165_s1 + $0x1644] sm:$0xf]  ;;  %v9460_v43 = vld [vmem:[%s16165_s1 + $0x1648] sm:$0xf0]  ;;  %v9327_v44 = vor.u32 %v10614_v55, %v9324_v1  ;;  %v9676_v55 = vld [vmem:[%s16165_s1 + $0x17f8] sm:$0xf0] }
 0x2d4   :  { %6174 = vmatpush.bf16.msra.mxu0 %v9071_v3  ;;  %v9487_v3 = vor.u32 %v10654_v35, %v9484_v37  ;;  %v9463_v56 = vor.u32 %v10648_v48, %v9460_v43  ;;  %v9388_v35 = vld [vmem:[%s16165_s1 + $0x15b8] sm:$0xf0]  ;;  %v10646_v37 = vld [vmem:[%s16165_s1 + $0x1634] sm:$0xf]  ;;  %v9428_v43 = vld [vmem:[%s16165_s1 + $0x1608] sm:$0xf0] }
 0x2d5   :  { %6187 = vmatpush.bf16.msra.mxu1 %v9135_v47  ;;  %v10620_v47 = vld [vmem:[%s16165_s1 + $0x1564] sm:$0xf]  ;;  %v10718_v1 = vld [vmem:[%s16165_s1 + $0x1874] sm:$0xf] }
 0x2d6   :  { %6200 = vmatpush.bf16.msra.mxu2 %v9199_v21  ;;  %v9348_v21 = vld [vmem:[%s16165_s1 + $0x1568] sm:$0xf0] }
 0x2d7   :  { %6213 = vmatpush.bf16.msra.mxu3 %v9263_v15  ;;  %v10652_v15 = vld [vmem:[%s16165_s1 + $0x1664] sm:$0xf]  ;;  %v9351_v23 = vor.u32 %v10620_v47, %v9348_v21 }
 0x2d8   :  { %6175 = vmatpush.bf16.msra.mxu0 %v9063_v63  ;;  %v9479_v45 = vor.u32 %v10652_v15, %v9476_v22  ;;  %v16200_v63 = vld [vmem:[#allocation6_spill] sm:$0xff]  ;;  %v9444_v15 = vld [vmem:[%s16165_s1 + $0x1628] sm:$0xf0] }
 0x2d9   :  { %6188 = vmatpush.bf16.msra.mxu1 %v9127_v58  ;;  %v9404_v58 = vld [vmem:[%s16165_s1 + $0x15d8] sm:$0xf0]  ;;  %v10628_v47 = vld [vmem:[%s16165_s1 + $0x15a4] sm:$0xf] }
 0x2da   :  { %6201 = vmatpush.bf16.msra.mxu2 %v9191_v12  ;;  %v10650_v12 = vld [vmem:[%s16165_s1 + $0x1654] sm:$0xf]  ;;  %v9407_v50 = vor.u32 %v10634_v8, %v9404_v58  ;;  %v9308_v58 = vld [vmem:[%s16165_s1 + $0x1518] sm:$0xf0] }
 0x2db   :  { %6214 = vmatpush.bf16.msra.mxu3 %v9255_v61  ;;  %v10666_v61 = vld [vmem:[%s16165_s1 + $0x16d4] sm:$0xf]  ;;  %v9471_v16 = vor.u32 %v10650_v12, %v9468_v27 }
 0x2dc   :  { %6176 = vmatpush.bf16.msra.mxu0 %v9055_v34  ;;  %v10616_v34 = vld [vmem:[%s16165_s1 + $0x1544] sm:$0xf]  ;;  %v10626_v12 = vld [vmem:[%s16165_s1 + $0x1594] sm:$0xf] }
 0x2dd   :  { %6189 = vmatpush.bf16.msra.mxu1 %v9119_v60  ;;  %v9535_v60 = vor.u32 %v10666_v61, %v9532_v9  ;;  %v9335_v62 = vor.u32 %v10616_v34, %v9332_v5  ;;  %v9436_v61 = vld [vmem:[%s16165_s1 + $0x1618] sm:$0xf0]  ;;  %v10658_v9 = vld [vmem:[%s16165_s1 + $0x1694] sm:$0xf] }
 0x2de   :  { %6202 = vmatpush.bf16.msra.mxu2 %v9183_v13  ;;  %v9396_v13 = vld [vmem:[%s16165_s1 + $0x15c8] sm:$0xf0] }
 0x2df   :  { %6215 = vmatpush.bf16.msra.mxu3 %v9247_v41  ;;  %v10664_v41 = vld [vmem:[%s16165_s1 + $0x16c4] sm:$0xf]  ;;  %v9399_v28 = vor.u32 %v10632_v10, %v9396_v13 }
 0x2e0   :  { %6177 = vmatpush.bf16.msra.mxu0 %v9047_v2  ;;  %v5971_v0 = vpop.f32.mrf.mxu0  ;;  %v10630_v2 = vld [vmem:[%s16165_s1 + $0x15b4] sm:$0xf]  ;;  %v10624_v10 = vld [vmem:[%s16165_s1 + $0x1584] sm:$0xf] }
 0x2e1   :  { %6190 = vmatpush.bf16.msra.mxu1 %v9111_v40  ;;  %v5972_v24 = vadd.f32 %v5971_v0, %v15493_v7  ;;  %v5984_v36 = vpop.f32.mrf.mxu1  ;;  %v9527_v7 = vor.u32 %v10664_v41, %v9524_v53  ;;  %v9452_v40 = vld [vmem:[%s16165_s1 + $0x1638] sm:$0xf0]  ;;  %v10640_v13 = vld [vmem:[%s16165_s1 + $0x1604] sm:$0xf]  ;;  %v9492_v41 = vld [vmem:[%s16165_s1 + $0x1688] sm:$0xf0] }
 0x2e2   :  { %6203 = vmatpush.bf16.msra.mxu2 %v9175_v18  ;;  %v10662_v18 = vld [vmem:[%s16165_s1 + $0x16b4] sm:$0xf]  ;;  %v10656_v0 = vld [vmem:[%s16165_s1 + $0x1684] sm:$0xf] }
 0x2e3   :  { %6216 = vmatpush.bf16.msra.mxu3 %v9239_v11  ;;  %6178 = vmatmul.bf16.vlgmr.msra.gmra.mxu0 %v16200_v63  ;;  %v5985_v17 = vadd.f32 %v5984_v36, %v5972_v24  ;;  %v9391_v11 = vor.u32 %v10630_v2, %v9388_v35  ;;  %v9519_v21 = vor.u32 %v10662_v18, %v9516_v46  ;;  %v10686_v24 = vld [vmem:[%s16165_s1 + $0x1774] sm:$0xf]  ;;  %v9740_v2 = vld [vmem:[%s16165_s1 + $0x1878] sm:$0xf0] }
 0x2e4   :  { %6222 = vmatpush.bf16.msrb.mxu0 %v9359_v31  ;;  %6191 = vmatmul.bf16.vlgmr.msra.gmra.mxu1 %v16202_v59  ;;  %v9455_v31 = vor.u32 %v10646_v37, %v9452_v40  ;;  %v9447_v63 = vor.u32 %v10644_v19, %v9444_v15  ;;  %v10642_v59 = vld [vmem:[%s16165_s1 + $0x1614] sm:$0xf]  ;;  %v9804_v37 = vld [vmem:[%s16165_s1 + $0x18f8] sm:$0xf0]  ;;  %v9495_v40 = vor.u32 %v10656_v0, %v9492_v41  ;;  %v9796_v19 = vld [vmem:[%s16165_s1 + $0x18e8] sm:$0xf0] }
 0x2e5   :  { %6235 = vmatpush.bf16.msrb.mxu1 %v9423_v20  ;;  %6204 = vmatmul.bf16.vlgmr.msra.gmra.mxu2 %v16201_v57  ;;  %v10612_v20 = vld [vmem:[%s16165_s1 + $0x1524] sm:$0xf]  ;;  %v9372_v57 = vld [vmem:[%s16165_s1 + $0x1598] sm:$0xf0]  ;;  %v9439_v5 = vor.u32 %v10642_v59, %v9436_v61  ;;  %v10702_v36 = vld [vmem:[%s16165_s1 + $0x17f4] sm:$0xf] }
 0x2e6   :  { %6248 = vmatpush.bf16.msrb.mxu2 %v9487_v3  ;;  %6217 = vmatmul.bf16.vlgmr.msra.gmra.mxu3 %v16203_v6  ;;  %v9316_v3 = vld [vmem:[%s16165_s1 + $0x1528] sm:$0xf0]  ;;  %v9500_v6 = vld [vmem:[%s16165_s1 + $0x1698] sm:$0xf0]  ;;  %v9375_v34 = vor.u32 %v10626_v12, %v9372_v57  ;;  %v10734_v35 = vld [vmem:[%s16165_s1 + $0x18f4] sm:$0xf]  ;;  %v9679_v46 = vor.u32 %v10702_v36, %v9676_v55 }
 0x2e7   :  { %6261 = vmatpush.bf16.msrb.mxu3 %v9551_v29  ;;  %v9380_v29 = vld [vmem:[%s16165_s1 + $0x15a8] sm:$0xf0]  ;;  %v9503_v48 = vor.u32 %v10658_v9, %v9500_v6  ;;  %v10730_v12 = vld [vmem:[%s16165_s1 + $0x18d4] sm:$0xf]  ;;  %v10696_v6 = vld [vmem:[%s16165_s1 + $0x17c4] sm:$0xf] }
 0x2e8   :  { %6223 = vmatpush.bf16.msrb.mxu0 %v9351_v23  ;;  %v5997_v38 = vpop.f32.mrf.mxu2  ;;  %v9508_v23 = vld [vmem:[%s16165_s1 + $0x16a8] sm:$0xf0]  ;;  %v9383_v8 = vor.u32 %v10628_v47, %v9380_v29  ;;  %v10732_v29 = vld [vmem:[%s16165_s1 + $0x18e4] sm:$0xf]  ;;  %v10678_v41 = vld [vmem:[%s16165_s1 + $0x1734] sm:$0xf] }
 0x2e9   :  { %6236 = vmatpush.bf16.msrb.mxu1 %v9415_v42  ;;  %v5998_v22 = vadd.f32 %v5997_v38, %v5985_v17  ;;  %v6010_v14 = vpop.f32.mrf.mxu3  ;;  %v5973_v42 = vpop.f32.mrf.mxu0  ;;  %v9511_v27 = vor.u32 %v10660_v33, %v9508_v23  ;;  %v9431_v17 = vor.u32 %v10640_v13, %v9428_v43  ;;  %v9668_v47 = vld [vmem:[%s16165_s1 + $0x17e8] sm:$0xf0]  ;;  %v10682_v33 = vld [vmem:[%s16165_s1 + $0x1754] sm:$0xf]  ;;  %v9596_v23 = vld [vmem:[%s16165_s1 + $0x1758] sm:$0xf0] }
 0x2ea   :  { %6249 = vmatpush.bf16.msrb.mxu2 %v9479_v45  ;;  %v9319_v45 = vor.u32 %v10612_v20, %v9316_v3  ;;  %v5986_v54 = vpop.f32.mrf.mxu1  ;;  %v10700_v20 = vld [vmem:[%s16165_s1 + $0x17e4] sm:$0xf]  ;;  %v9807_v3 = vor.u32 %v10734_v35, %v9804_v37  ;;  %v9732_v38 = vld [vmem:[%s16165_s1 + $0x1868] sm:$0xf0]  ;;  %v10698_v42 = vld [vmem:[%s16165_s1 + $0x17d4] sm:$0xf]  ;;  %v9599_v57 = vor.u32 %v10682_v33, %v9596_v23 }
 0x2eb   :  { %6262 = vmatpush.bf16.msrb.mxu3 %v9543_v49  ;;  %v15692_v30 = vadd.f32 %v6010_v14, %v5998_v22  ;;  %v10610_v49 = vld [vmem:[%s16165_s1 + $0x1514] sm:$0xf]  ;;  %v9671_v22 = vor.u32 %v10700_v20, %v9668_v47  ;;  %v9799_v54 = vor.u32 %v10732_v29, %v9796_v19  ;;  %v9588_v9 = vld [vmem:[%s16165_s1 + $0x1748] sm:$0xf0]  ;;  %v9644_v36 = vld [vmem:[%s16165_s1 + $0x17b8] sm:$0xf0] }
 0x2ec   :  { %6224 = vmatpush.bf16.msrb.mxu0 %v9343_v26  ;;  %v9311_v26 = vor.u32 %v10610_v49, %v9308_v58  ;;  %v9724_v49 = vld [vmem:[%s16165_s1 + $0x1858] sm:$0xf0]  ;;  %v16205_v58 = vld [vmem:[#allocation12_spill] sm:$0xff]  ;;  %v10676_v35 = vld [vmem:[%s16165_s1 + $0x1724] sm:$0xf] }
 0x2ed   :  { %6237 = vmatpush.bf16.msrb.mxu1 %v9407_v50  ;;  %v10608_v50 = vld [vmem:[%s16165_s1 + $0x1504] sm:$0xf]  ;;  %v10726_v55 = vld [vmem:[%s16165_s1 + $0x18b4] sm:$0xf]  ;;  %v9572_v37 = vld [vmem:[%s16165_s1 + $0x1728] sm:$0xf0] }
 0x2ee   :  { %6250 = vmatpush.bf16.msrb.mxu2 %v9471_v16  ;;  %v9300_v16 = vld [vmem:[%s16165_s1 + $0x1508] sm:$0xf0]  ;;  %v10724_v47 = vld [vmem:[%s16165_s1 + $0x18a4] sm:$0xf]  ;;  %v9575_v29 = vor.u32 %v10676_v35, %v9572_v37  ;;  %v10674_v33 = vld [vmem:[%s16165_s1 + $0x1714] sm:$0xf] }
 0x2ef   :  { %6263 = vmatpush.bf16.msrb.mxu3 %v9535_v60  ;;  %v9364_v60 = vld [vmem:[%s16165_s1 + $0x1588] sm:$0xf0]  ;;  %v9564_v23 = vld [vmem:[%s16165_s1 + $0x1718] sm:$0xf0]  ;;  %v10746_v35 = vld [vmem:[%s16168_s3 + $0x54] sm:$0xf] }
 0x2f0   :  { %6225 = vmatpush.bf16.msrb.mxu0 %v9335_v62  ;;  %v5999_v53 = vpop.f32.mrf.mxu2  ;;  %v9612_v62 = vld [vmem:[%s16165_s1 + $0x1778] sm:$0xf0] }
 0x2f1   :  { %6238 = vmatpush.bf16.msrb.mxu1 %v9399_v28  ;;  %v6012_v28 = vpop.f32.mrf.mxu3  ;;  %v9615_v18 = vor.u32 %v10686_v24, %v9612_v62  ;;  %v9580_v53 = vld [vmem:[%s16165_s1 + $0x1738] sm:$0xf0]  ;;  %v10694_v24 = vld [vmem:[%s16165_s1 + $0x17b4] sm:$0xf] }
 0x2f2   :  { %6251 = vmatpush.bf16.msrb.mxu2 %v9463_v56  ;;  %v9303_v56 = vor.u32 %v10608_v50, %v9300_v16  ;;  %v10712_v50 = vld [vmem:[%s16165_s1 + $0x1844] sm:$0xf]  ;;  %v9716_v16 = vld [vmem:[%s16165_s1 + $0x1848] sm:$0xf0]  ;;  %v10710_v28 = vld [vmem:[%s16165_s1 + $0x1834] sm:$0xf] }
 0x2f3   :  { %6264 = vmatpush.bf16.msrb.mxu3 %v9527_v7  ;;  %v9367_v7 = vor.u32 %v10624_v10, %v9364_v60  ;;  %v9780_v10 = vld [vmem:[%s16165_s1 + $0x18c8] sm:$0xf0]  ;;  %v9719_v0 = vor.u32 %v10712_v50, %v9716_v16  ;;  %v10720_v50 = vld [vmem:[%s16165_s1 + $0x1884] sm:$0xf] }
 0x2f4   :  { %6226 = vmatpush.bf16.msrb.mxu0 %v9327_v44  ;;  %v9743_v44 = vor.u32 %v10718_v1, %v9740_v2  ;;  %v9772_v1 = vld [vmem:[%s16165_s1 + $0x18b8] sm:$0xf0]  ;;  %v9583_v2 = vor.u32 %v10678_v41, %v9580_v53 }
 0x2f5   :  { %6239 = vmatpush.bf16.msrb.mxu1 %v9391_v11  ;;  %v10684_v11 = vld [vmem:[%s16165_s1 + $0x1764] sm:$0xf] }
 0x2f6   :  { %6252 = vmatpush.bf16.msrb.mxu2 %v9455_v31  ;;  %v9604_v31 = vld [vmem:[%s16165_s1 + $0x1768] sm:$0xf0] }
 0x2f7   :  { %6265 = vmatpush.bf16.msrb.mxu3 %v9519_v21  ;;  %v10716_v21 = vld [vmem:[%s16165_s1 + $0x1864] sm:$0xf]  ;;  %v9607_v15 = vor.u32 %v10684_v11, %v9604_v31  ;;  %v9700_v31 = vld [vmem:[%s16165_s1 + $0x1828] sm:$0xf0] }
 0x2f8   :  { %6227 = vmatpush.bf16.msrb.mxu0 %v9319_v45  ;;  %v9735_v14 = vor.u32 %v10716_v21, %v9732_v38  ;;  %v16204_v45 = vld [vmem:[#allocation10_spill] sm:$0xff]  ;;  %v9764_v21 = vld [vmem:[%s16165_s1 + $0x18a8] sm:$0xf0] }
 0x2f9   :  { %6240 = vmatpush.bf16.msrb.mxu1 %v9383_v8  ;;  %v9660_v8 = vld [vmem:[%s16165_s1 + $0x17d8] sm:$0xf0]  ;;  %v10708_v11 = vld [vmem:[%s16165_s1 + $0x1824] sm:$0xf] }
 0x2fa   :  { %6253 = vmatpush.bf16.msrb.mxu2 %v9447_v63  ;;  %v10714_v63 = vld [vmem:[%s16165_s1 + $0x1854] sm:$0xf]  ;;  %v9663_v59 = vor.u32 %v10698_v42, %v9660_v8 }
 0x2fb   :  { %6266 = vmatpush.bf16.msrb.mxu3 %v9511_v27  ;;  %v9788_v27 = vld [vmem:[%s16165_s1 + $0x18d8] sm:$0xf0]  ;;  %v9727_v61 = vor.u32 %v10714_v63, %v9724_v49  ;;  %v10690_v42 = vld [vmem:[%s16165_s1 + $0x1794] sm:$0xf] }
 0x2fc   :  { %6228 = vmatpush.bf16.msrb.mxu0 %v9311_v26  ;;  %v9652_v26 = vld [vmem:[%s16165_s1 + $0x17c8] sm:$0xf0]  ;;  %v10706_v8 = vld [vmem:[%s16165_s1 + $0x1814] sm:$0xf]  ;;  %v9692_v63 = vld [vmem:[%s16165_s1 + $0x1818] sm:$0xf0] }
 0x2fd   :  { %6241 = vmatpush.bf16.msrb.mxu1 %v9375_v34  ;;  %v9655_v43 = vor.u32 %v10696_v6, %v9652_v26  ;;  %v10722_v49 = vld [vmem:[%s16165_s1 + $0x1894] sm:$0xf]  ;;  %v9684_v26 = vld [vmem:[%s16165_s1 + $0x1808] sm:$0xf0] }
 0x2fe   :  { %6254 = vmatpush.bf16.msrb.mxu2 %v9439_v5  ;;  %v10728_v5 = vld [vmem:[%s16165_s1 + $0x18c4] sm:$0xf] }
 0x2ff   :  { %6267 = vmatpush.bf16.msrb.mxu3 %v9503_v48 }
 0x300   :  { %6229 = vmatpush.bf16.msrb.mxu0 %v9303_v56  ;;  %v6023_v34 = vpop.f32.mrf.mxu0  ;;  %v9708_v56 = vld [vmem:[%s16165_s1 + $0x1838] sm:$0xf0] }
 0x301   :  { %6242 = vmatpush.bf16.msrb.mxu1 %v9367_v7  ;;  %v6024_v60 = vadd.f32 %v6023_v34, %v15692_v30  ;;  %v6036_v48 = vpop.f32.mrf.mxu1  ;;  %v9783_v30 = vor.u32 %v10728_v5, %v9780_v10  ;;  %v9647_v7 = vor.u32 %v10694_v24, %v9644_v36  ;;  %v9748_v34 = vld [vmem:[%s16165_s1 + $0x1888] sm:$0xf0]  ;;  %v9866_v5 = vld [vmem:[%s16168_s3 + $0x70] sm:$0xf]  ;;  %v10751_v10 = vld [vmem:[%s16168_s3 + $0x74] sm:$0xf0] }
 0x302   :  { %6255 = vmatpush.bf16.msrb.mxu2 %v9431_v17  ;;  %v9711_v17 = vor.u32 %v10710_v28, %v9708_v56  ;;  %v9751_v53 = vor.u32 %v10720_v50, %v9748_v34  ;;  %v9867_v24 = vor.u32 %v10751_v10, %v9866_v5  ;;  %v10749_v36 = vld [vmem:[%s16168_s3 + $0x64] sm:$0xf0]  ;;  %v10748_v28 = vld [vmem:[%s16168_s3 + $0x64] sm:$0xf]  ;;  %v9860_v56 = vld [vmem:[%s16168_s3 + $0x68] sm:$0xf0] }
 0x303   :  { %6268 = vmatpush.bf16.msrb.mxu3 %v9495_v40  ;;  %6230 = vmatmul.bf16.vlgmr.msrb.gmra.mxu0 %v16204_v45  ;;  %v6037_v62 = vadd.f32 %v6036_v48, %v6024_v60  ;;  %v10692_v40 = vld [vmem:[%s16165_s1 + $0x17a4] sm:$0xf]  ;;  %v9767_v45 = vor.u32 %v10724_v47, %v9764_v21  ;;  %v10750_v48 = vld [vmem:[%s16168_s3 + $0x74] sm:$0xf]  ;;  %v9834_v47 = vld [vmem:[%s16168_s3 + $0x30] sm:$0xf] }
 0x304   :  { %6274 = vmatpush.bf16.msra.mxu0 %v9615_v18  ;;  %6243 = vmatmul.bf16.vlgmr.msrb.gmra.mxu1 %v16205_v58  ;;  %v9775_v18 = vor.u32 %v10726_v55, %v9772_v1  ;;  %v9756_v58 = vld [vmem:[%s16165_s1 + $0x1898] sm:$0xf0]  ;;  %v9863_v1 = vor.u32 %v10748_v28, %v9860_v56  ;;  %v10743_v21 = vld [vmem:[%s16168_s3 + $0x34] sm:$0xf0]  ;;  %v10736_v50 = vld [vmem:[%s16168_s3 + $0x4] sm:$0xf] }
 0x305   :  { %6287 = vmatpush.bf16.msra.mxu1 %v9679_v46  ;;  %6256 = vmatmul.bf16.vlgmr.msrb.gmra.mxu2 %v13367_v39  ;;  %v10680_v39 = vld [vmem:[%s16165_s1 + $0x1744] sm:$0xf]  ;;  %v9759_v6 = vor.u32 %v10722_v49, %v9756_v58 }
 0x306   :  { %6300 = vmatpush.bf16.msra.mxu2 %v9743_v44  ;;  %6269 = vmatmul.bf16.vlgmr.msrb.gmra.mxu3 %v13380_v52  ;;  %v9791_v52 = vor.u32 %v10730_v12, %v9788_v27  ;;  %v9591_v13 = vor.u32 %v10680_v39, %v9588_v9  ;;  %v9636_v44 = vld [vmem:[%s16165_s1 + $0x17a8] sm:$0xf0]  ;;  %v9567_v12 = vor.u32 %v10674_v33, %v9564_v23  ;;  %v10672_v27 = vld [vmem:[%s16165_s1 + $0x1704] sm:$0xf]  ;;  %v10741_v33 = vld [vmem:[%s16168_s3 + $0x24] sm:$0xf0] }
 0x307   :  { %6313 = vmatpush.bf16.msra.mxu3 %v9807_v3  ;;  %v10688_v39 = vld [vmem:[%s16165_s1 + $0x1784] sm:$0xf]  ;;  %v9620_v9 = vld [vmem:[%s16165_s1 + $0x1788] sm:$0xf0] }
 0x308   :  { %6275 = vmatpush.bf16.msra.mxu0 %v9607_v15  ;;  %v6049_v46 = vpop.f32.mrf.mxu2  ;;  %v6025_v38 = vpop.f32.mrf.mxu0 }
 0x309   :  { %6288 = vmatpush.bf16.msra.mxu1 %v9671_v22  ;;  %v6050_v20 = vadd.f32 %v6049_v46, %v6037_v62  ;;  %v6062_v3 = vpop.f32.mrf.mxu3  ;;  %v6038_v19 = vpop.f32.mrf.mxu1  ;;  %v9639_v22 = vor.u32 %v10692_v40, %v9636_v44  ;;  %v9858_v62 = vld [vmem:[%s16168_s3 + $0x60] sm:$0xf]  ;;  %v10744_v46 = vld [vmem:[%s16168_s3 + $0x44] sm:$0xf] }
 0x30a   :  { %6301 = vmatpush.bf16.msra.mxu2 %v9735_v14  ;;  %v9703_v14 = vor.u32 %v10708_v11, %v9700_v31  ;;  %v9859_v55 = vor.u32 %v10749_v36, %v9858_v62  ;;  %v9836_v19 = vld [vmem:[%s16168_s3 + $0x38] sm:$0xf0] }
 0x30b   :  { %6314 = vmatpush.bf16.msra.mxu3 %v9799_v54  ;;  %v15891_v15 = vadd.f32 %v6062_v3, %v6050_v20  ;;  %v9628_v54 = vld [vmem:[%s16165_s1 + $0x1798] sm:$0xf0] }
 0x30c   :  { %6276 = vmatpush.bf16.msra.mxu0 %v9599_v57  ;;  %v9631_v57 = vor.u32 %v10690_v42, %v9628_v54  ;;  %v10740_v42 = vld [vmem:[%s16168_s3 + $0x24] sm:$0xf] }
 0x30d   :  { %6289 = vmatpush.bf16.msra.mxu1 %v9663_v59  ;;  %v9695_v59 = vor.u32 %v10706_v8, %v9692_v63 }
 0x30e   :  { %6302 = vmatpush.bf16.msra.mxu2 %v9727_v61  ;;  %v9556_v61 = vld [vmem:[%s16165_s1 + $0x1708] sm:$0xf0] }
 0x30f   :  { %6315 = vmatpush.bf16.msra.mxu3 %v9791_v52  ;;  %v10704_v52 = vld [vmem:[%s16165_s1 + $0x1804] sm:$0xf] }
 0x310   :  { %6277 = vmatpush.bf16.msra.mxu0 %v9591_v13  ;;  %v6051_v16 = vpop.f32.mrf.mxu2  ;;  %v9559_v13 = vor.u32 %v10672_v27, %v9556_v61  ;;  %v9687_v41 = vor.u32 %v10704_v52, %v9684_v26  ;;  %v10738_v61 = vld [vmem:[%s16168_s3 + $0x14] sm:$0xf]  ;;  %v9810_v52 = vld [vmem:[%s16168_s3] sm:$0xf]  ;;  %v10737_v26 = vld [vmem:[%s16168_s3 + $0x4] sm:$0xf0] }
 0x311   :  { %6290 = vmatpush.bf16.msra.mxu1 %v9655_v43  ;;  %v6064_v60 = vpop.f32.mrf.mxu3  ;;  %v9868_v43 = vld [vmem:[%s16168_s3 + $0x78] sm:$0xf0]  ;;  %v9812_v16 = vld [vmem:[%s16168_s3 + $0x8] sm:$0xf0]  ;;  %v9811_v10 = vor.u32 %v10737_v26, %v9810_v52  ;;  %v10756_v52 = vld [vmem:[%s16168_s3 + $0xa4] sm:$0xf] }
 0x312   :  { %6303 = vmatpush.bf16.msra.mxu2 %v9719_v0  ;;  %v9623_v0 = vor.u32 %v10688_v39, %v9620_v9  ;;  %v9820_v39 = vld [vmem:[%s16168_s3 + $0x18] sm:$0xf0]  ;;  %v6326_v60 = vmul.f32 %v14454_v25, %v14454_v25 }
 0x313   :  { %6316 = vmatpush.bf16.msra.mxu3 %v9783_v30  ;;  %v9871_v30 = vor.u32 %v10750_v48, %v9868_v43 }
 0x314   :  { %6278 = vmatpush.bf16.msra.mxu0 %v9583_v2  ;;  %v9850_v2 = vld [vmem:[%s16168_s3 + $0x50] sm:$0xf]  ;;  %v6328_v48 = vpack.c.bf16 %v6326_v60, %v6326_v60  ;;  %v10754_v60 = vld [vmem:[%s16168_s3 + $0x94] sm:$0xf] }
 0x315   :  { %6291 = vmatpush.bf16.msra.mxu1 %v9647_v7  ;;  %v10747_v7 = vld [vmem:[%s16168_s3 + $0x54] sm:$0xf0] }
 0x316   :  { %6304 = vmatpush.bf16.msra.mxu2 %v9711_v17  ;;  %v16206_v17 = vld [vmem:[#allocation13_spill] sm:$0xff]  ;;  %v9851_v37 = vor.u32 %v10747_v7, %v9850_v2 }
 0x317   :  { %6317 = vmatpush.bf16.msra.mxu3 %v9775_v18  ;;  %v9842_v18 = vld [vmem:[%s16168_s3 + $0x40] sm:$0xf] }
 0x318   :  { %6279 = vmatpush.bf16.msra.mxu0 %v9575_v29  ;;  %v10742_v29 = vld [vmem:[%s16168_s3 + $0x34] sm:$0xf] }
 0x319   :  { %6292 = vmatpush.bf16.msra.mxu1 %v9639_v22  ;;  %v9839_v22 = vor.u32 %v10742_v29, %v9836_v19  ;;  %v10763_v29 = vld [vmem:[%s16168_s3 + $0xd4] sm:$0xf0]  ;;  %v10762_v19 = vld [vmem:[%s16168_s3 + $0xd4] sm:$0xf] }
 0x31a   :  { %6305 = vmatpush.bf16.msra.mxu2 %v9703_v14  ;;  %v9826_v14 = vld [vmem:[%s16168_s3 + $0x20] sm:$0xf] }
 0x31b   :  { %6318 = vmatpush.bf16.msra.mxu3 %v9767_v45  ;;  %v9828_v45 = vld [vmem:[%s16168_s3 + $0x28] sm:$0xf0]  ;;  %v9827_v49 = vor.u32 %v10741_v33, %v9826_v14  ;;  %v9916_v14 = vld [vmem:[%s16168_s3 + $0xd8] sm:$0xf0] }
 0x31c   :  { %6280 = vmatpush.bf16.msra.mxu0 %v9567_v12  ;;  %v9831_v27 = vor.u32 %v10740_v42, %v9828_v45  ;;  %v9906_v42 = vld [vmem:[%s16168_s3 + $0xc0] sm:$0xf]  ;;  %v10761_v45 = vld [vmem:[%s16168_s3 + $0xc4] sm:$0xf0] }
 0x31d   :  { %6293 = vmatpush.bf16.msra.mxu1 %v9631_v57  ;;  %v9818_v57 = vld [vmem:[%s16168_s3 + $0x10] sm:$0xf] }
 0x31e   :  { %6306 = vmatpush.bf16.msra.mxu2 %v9695_v59  ;;  %v10739_v59 = vld [vmem:[%s16168_s3 + $0x14] sm:$0xf0] }
 0x31f   :  { %6319 = vmatpush.bf16.msra.mxu3 %v9759_v6  ;;  %v9819_v9 = vor.u32 %v10739_v59, %v9818_v57  ;;  %v9823_v6 = vor.u32 %v10738_v61, %v9820_v39  ;;  %v9900_v59 = vld [vmem:[%s16168_s3 + $0xb8] sm:$0xf0] }
 0x320   :  { %6281 = vmatpush.bf16.msra.mxu0 %v9559_v13  ;;  %v6075_v44 = vpop.f32.mrf.mxu0  ;;  %v9815_v13 = vor.u32 %v10736_v50, %v9812_v16  ;;  %v9892_v16 = vld [vmem:[%s16168_s3 + $0xa8] sm:$0xf0] }
 0x321   :  { %6294 = vmatpush.bf16.msra.mxu1 %v9623_v0  ;;  %v6076_v11 = vadd.f32 %v6075_v44, %v15891_v15  ;;  %v6088_v20 = vpop.f32.mrf.mxu1  ;;  %v9835_v15 = vor.u32 %v10743_v21, %v9834_v47  ;;  %v9922_v44 = vld [vmem:[%s16168_s3 + $0xe0] sm:$0xf] }
 0x322   :  { %6307 = vmatpush.bf16.msra.mxu2 %v9687_v41 }
 0x323   :  { %6320 = vmatpush.bf16.msra.mxu3 %v9751_v53  ;;  %6282 = vmatmul.bf16.vlgmr.msra.gmra.mxu0 %v13378_v51  ;;  %v9852_v51 = vld [vmem:[%s16168_s3 + $0x58] sm:$0xf0]  ;;  %v6089_v38 = vadd.f32 %v6088_v20, %v6076_v11  ;;  %v10765_v11 = vld [vmem:[%s16168_s3 + $0xe4] sm:$0xf0]  ;;  %v10764_v20 = vld [vmem:[%s16168_s3 + $0xe4] sm:$0xf] }
 0x324   :  { %6528 = vmatpush.bf16.msrb.mxu0 %v9867_v24  ;;  %6295 = vmatmul.bf16.vlgmr.msra.gmra.mxu1 %v16206_v17  ;;  %v9855_v40 = vor.u32 %v10746_v35, %v9852_v51  ;;  %v9923_v47 = vor.u32 %v10765_v11, %v9922_v44 }
 0x325   :  { %6308 = vmatmul.bf16.vlgmr.msra.gmra.mxu2 %v13577_v4  ;;  %v10745_v4 = vld [vmem:[%s16168_s3 + $0x44] sm:$0xf0] }
 0x326   :  { %6554 = vmatpush.bf16.msrb.mxu2 %v9871_v30  ;;  %6321 = vmatmul.bf16.vlgmr.msra.gmra.mxu3 %v13588_v32  ;;  %v9844_v32 = vld [vmem:[%s16168_s3 + $0x48] sm:$0xf0]  ;;  %v9843_v31 = vor.u32 %v10745_v4, %v9842_v18  ;;  %v10766_v18 = vld [vmem:[%s16168_s3 + $0xf4] sm:$0xf] }
 0x327   :  { %v9847_v3 = vor.u32 %v10744_v46, %v9844_v32  ;;  %v9932_v32 = vld [vmem:[%s16168_s3 + $0xf8] sm:$0xf0] }
 0x328   :  { %6529 = vmatpush.bf16.msrb.mxu0 %v9859_v55  ;;  %v6101_v23 = vpop.f32.mrf.mxu2  ;;  %v6077_v63 = vpop.f32.mrf.mxu0 }
 0x329   :  { %v6102_v54 = vadd.f32 %v6101_v23, %v6089_v38  ;;  %v6114_v8 = vpop.f32.mrf.mxu3  ;;  %v6090_v58 = vpop.f32.mrf.mxu1  ;;  %v9914_v38 = vld [vmem:[%s16168_s3 + $0xd0] sm:$0xf]  ;;  %v9919_v23 = vor.u32 %v10762_v19, %v9916_v14  ;;  %v9907_v63 = vor.u32 %v10761_v45, %v9906_v42  ;;  %v6362_v45 = vld [vmem:[%s16169_s4] sm:$0x3] }
 0x32a   :  { %6555 = vmatpush.bf16.msrb.mxu2 %v9863_v1  ;;  %v9898_v58 = vld [vmem:[%s16168_s3 + $0xb0] sm:$0xf] }
 0x32b   :  { %v6115_v12 = vadd.f32 %v6114_v8, %v6102_v54  ;;  %v10760_v54 = vld [vmem:[%s16168_s3 + $0xc4] sm:$0xf]  ;;  %v9908_v8 = vld [vmem:[%s16168_s3 + $0xc8] sm:$0xf0] }
 0x32c   :  { %6530 = vmatpush.bf16.msrb.mxu0 %v9851_v37  ;;  %v9930_v37 = vld [vmem:[%s16168_s3 + $0xf0] sm:$0xf] }
 0x32e   :  { %6556 = vmatpush.bf16.msrb.mxu2 %v9855_v40  ;;  %v10767_v40 = vld [vmem:[%s16168_s3 + $0xf4] sm:$0xf0] }
 0x32f   :  { %v9931_v46 = vor.u32 %v10767_v40, %v9930_v37 }
 0x330   :  { %6531 = vmatpush.bf16.msrb.mxu0 %v9843_v31  ;;  %v6103_v34 = vpop.f32.mrf.mxu2  ;;  %v9935_v31 = vor.u32 %v10766_v18, %v9932_v32 }
 0x331   :  { %v6116_v5 = vpop.f32.mrf.mxu3  ;;  %6541 = vmatpush.bf16.msrb.mxu1 %v9931_v46  ;;  %v9895_v34 = vor.u32 %v10756_v52, %v9892_v16 }
 0x332   :  { %6557 = vmatpush.bf16.msrb.mxu2 %v9847_v3  ;;  %v9924_v3 = vld [vmem:[%s16168_s3 + $0xe8] sm:$0xf0]  ;;  %6567 = vmatpush.bf16.msrb.mxu3 %v9935_v31  ;;  %v9882_v5 = vld [vmem:[%s16168_s3 + $0x90] sm:$0xf] }
 0x333   :  { %v9927_v21 = vor.u32 %v10764_v20, %v9924_v3 }
 0x334   :  { %6532 = vmatpush.bf16.msrb.mxu0 %v9835_v15 }
 0x335   :  { %6542 = vmatpush.bf16.msrb.mxu1 %v9923_v47 }
 0x336   :  { %6558 = vmatpush.bf16.msrb.mxu2 %v9839_v22  ;;  %v9915_v22 = vor.u32 %v10763_v29, %v9914_v38  ;;  %6568 = vmatpush.bf16.msrb.mxu3 %v9927_v21 }
 0x338   :  { %6533 = vmatpush.bf16.msrb.mxu0 %v9827_v49  ;;  %v9911_v49 = vor.u32 %v10760_v54, %v9908_v8  ;;  %v6364_v54 = vperm.slane %v6362_v45, 0 }
 0x339   :  { %6543 = vmatpush.bf16.msrb.mxu1 %v9915_v22 }
 0x33a   :  { %6559 = vmatpush.bf16.msrb.mxu2 %v9831_v27  ;;  %6569 = vmatpush.bf16.msrb.mxu3 %v9919_v23  ;;  %v10758_v27 = vld [vmem:[%s16168_s3 + $0xb4] sm:$0xf] }
 0x33b   :  { %v9903_v61 = vor.u32 %v10758_v27, %v9900_v59 }
 0x33c   :  { %6534 = vmatpush.bf16.msrb.mxu0 %v9819_v9  ;;  %v9890_v9 = vld [vmem:[%s16168_s3 + $0xa0] sm:$0xf] }
 0x33d   :  { %6544 = vmatpush.bf16.msrb.mxu1 %v9907_v63 }
 0x33e   :  { %6560 = vmatpush.bf16.msrb.mxu2 %v9823_v6  ;;  %6570 = vmatpush.bf16.msrb.mxu3 %v9911_v49  ;;  %v10757_v6 = vld [vmem:[%s16168_s3 + $0xa4] sm:$0xf0]  ;;  %v6365_v49 = vperm.slane %v6362_v45, 1 }
 0x33f   :  { %v9891_v50 = vor.u32 %v10757_v6, %v9890_v9 }
 0x340   :  { %6535 = vmatpush.bf16.msrb.mxu0 %v9811_v10  ;;  %v6127_v43 = vpop.f32.mrf.mxu0  ;;  %v10755_v10 = vld [vmem:[%s16168_s3 + $0x94] sm:$0xf0] }
 0x341   :  { %v6128_v0 = vadd.f32 %v6127_v43, %v6115_v12  ;;  %v6140_v41 = vpop.f32.mrf.mxu1  ;;  %v10759_v12 = vld [vmem:[%s16168_s3 + $0xb4] sm:$0xf0] }
 0x342   :  { %6561 = vmatpush.bf16.msrb.mxu2 %v9815_v13  ;;  %v9899_v57 = vor.u32 %v10759_v12, %v9898_v58  ;;  %6571 = vmatpush.bf16.msrb.mxu3 %v9903_v61  ;;  %v9883_v13 = vor.u32 %v10755_v10, %v9882_v5 }
 0x343   :  { %6536 = vmatmul.bf16.vlgmr.msrb.gmra.mxu0 %v6328_v48  ;;  %v6141_v53 = vadd.f32 %v6140_v41, %v6128_v0 }
 0x344   :  { %6545 = vmatpush.bf16.msrb.mxu1 %v9899_v57 }
 0x345   :  { %6562 = vmatmul.bf16.vlgmr.msrb.gmra.mxu2 %v6328_v48  ;;  %v9884_v48 = vld [vmem:[%s16168_s3 + $0x98] sm:$0xf0] }
 0x346   :  { %6572 = vmatpush.bf16.msrb.mxu3 %v9895_v34  ;;  %v9887_v43 = vor.u32 %v10754_v60, %v9884_v48 }
 0x348   :  { %v6153_v24 = vpop.f32.mrf.mxu2  ;;  %v6129_v36 = vpop.f32.mrf.mxu0  ;;  %6546 = vmatpush.bf16.msrb.mxu1 %v9891_v50 }
 0x349   :  { %v6154_v30 = vadd.f32 %v6153_v24, %v6141_v53  ;;  %v6166_v62 = vpop.f32.mrf.mxu3  ;;  %v6142_v28 = vpop.f32.mrf.mxu1  ;;  %v10752_v36 = vld [vmem:[%s16168_s3 + $0x84] sm:$0xf] }
 0x34a   :  { %6573 = vmatpush.bf16.msrb.mxu3 %v9887_v43 }
 0x34b   :  { %v16044_v56 = vadd.f32 %v6166_v62, %v6154_v30  ;;  %v9874_v30 = vld [vmem:[%s16168_s3 + $0x80] sm:$0xf]  ;;  %v10753_v62 = vld [vmem:[%s16168_s3 + $0x84] sm:$0xf0] }
 0x34c   :  { %6547 = vmatpush.bf16.msrb.mxu1 %v9883_v13 }
 0x350   :  { %v6155_v55 = vpop.f32.mrf.mxu2 }
 0x351   :  { %v6168_v1 = vpop.f32.mrf.mxu3  ;;  %v9875_v55 = vor.u32 %v10753_v62, %v9874_v30 }
 0x353   :  { %6548 = vmatpush.bf16.msrb.mxu1 %v9875_v55 }
 0x360   :  { %v16046_v2 = vpop.f32.mrf.mxu0 }
 0x361   :  { %v16048_v7 = vpop.f32.mrf.mxu1  ;;  %v6180_v0 = vadd.f32 %v16046_v2, %v16044_v56  ;;  %v9876_v56 = vld [vmem:[%s16168_s3 + $0x88] sm:$0xf0] }
 0x362   :  { %v9879_v1 = vor.u32 %v10752_v36, %v9876_v56 }
 0x363   :  { %v6193_v2 = vadd.f32 %v16048_v7, %v6180_v0 }
 0x364   :  { %6574 = vmatpush.bf16.msrb.mxu3 %v9879_v1 }
 0x368   :  { %v16050_v17 = vpop.f32.mrf.mxu2  ;;  %v6181_v51 = vpop.f32.mrf.mxu0 }
 0x369   :  { %v16052_v35 = vpop.f32.mrf.mxu3  ;;  %v6194_v4 = vpop.f32.mrf.mxu1  ;;  %v6206_v51 = vadd.f32 %v16050_v17, %v6193_v2 }
 0x36b   :  { %v6219_v18 = vadd.f32 %v16052_v35, %v6206_v51 }
 0x370   :  { %v6207_v15 = vpop.f32.mrf.mxu2 }
 0x371   :  { %v6220_v33 = vpop.f32.mrf.mxu3 }
 0x380   :  { %v6231_v39 = vpop.f32.mrf.mxu0 }
 0x381   :  { %v6244_v26 = vpop.f32.mrf.mxu1  ;;  %v6232_v4 = vadd.f32 %v6231_v39, %v6219_v18 }
 0x383   :  { %v6245_v46 = vadd.f32 %v6244_v26, %v6232_v4 }
 0x388   :  { %v6257_v41 = vpop.f32.mrf.mxu2  ;;  %v6233_v24 = vpop.f32.mrf.mxu0 }
 0x389   :  { %v6270_v53 = vpop.f32.mrf.mxu3  ;;  %v6246_v28 = vpop.f32.mrf.mxu1  ;;  %v6258_v32 = vadd.f32 %v6257_v41, %v6245_v46 }
 0x38b   :  { %v6271_v44 = vadd.f32 %v6270_v53, %v6258_v32 }
 0x390   :  { %v6259_v37 = vpop.f32.mrf.mxu2 }
 0x391   :  { %v6272_v40 = vpop.f32.mrf.mxu3 }
 0x3a0   :  { %v6283_v11 = vpop.f32.mrf.mxu0 }
 0x3a1   :  { %v6296_v31 = vpop.f32.mrf.mxu1  ;;  %v6284_v20 = vadd.f32 %v6283_v11, %v6271_v44 }
 0x3a3   :  { %v6297_v3 = vadd.f32 %v6296_v31, %v6284_v20 }
 0x3a8   :  { %v6309_v47 = vpop.f32.mrf.mxu2  ;;  %v6285_v7 = vpop.f32.mrf.mxu0 }
 0x3a9   :  { %v6310_v21 = vadd.f32 %v6309_v47, %v6297_v3  ;;  %v6322_v38 = vpop.f32.mrf.mxu3  ;;  %v6298_v29 = vpop.f32.mrf.mxu1 }
 0x3ab   :  { %v6323_v19 = vadd.f32 %v6322_v38, %v6310_v21 }
 0x3ad   :  { %v6327_v15 = vmul.f32 %v6323_v19, %v6323_v19 }
 0x3af   :  { %v6329_v17 = vpack.c.bf16 %v6327_v15, %v6327_v15 }
 0x3b0   :  { %v6311_v22 = vpop.f32.mrf.mxu2 }
 0x3b1   :  { %v6324_v14 = vpop.f32.mrf.mxu3  ;;  %6549 = vmatmul.bf16.vlgmr.msrb.gmra.mxu1 %v6329_v17  ;;  %6575 = vmatmul.bf16.vlgmr.msrb.gmra.mxu3 %v6329_v17 }
 0x3c0   :  { %v6537_v35 = vpop.f32.mrf.mxu0 }
 0x3c1   :  { %v6538_v8 = vadd.f32 %v6537_v35, %v6364_v54 }
 0x3c8   :  { %v6563_v33 = vpop.f32.mrf.mxu2  ;;  %v6539_v23 = vpop.f32.mrf.mxu0 }
 0x3c9   :  { %v6564_v12 = vadd.f32 %v6563_v33, %v6365_v49 }
 0x3d0   :  { %v6565_v42 = vpop.f32.mrf.mxu2 }
 0x42e   :  { %v6550_v63 = vpop.f32.mrf.mxu1 }
 0x42f   :  { %v6551_v58 = vadd.f32 %v6550_v63, %v6538_v8 }
 0x431   :  { %10768 = vrsqrt.f32 %v6551_v58  ;;  %vm6586_vm1 = vweird.f32 %v6551_v58 }
 0x434   :  { %v6576_v27 = vpop.f32.mrf.mxu3 }
 0x435   :  { %v6577_v57 = vadd.f32 %v6576_v27, %v6564_v12 }
 0x436   :  { %v6552_v59 = vpop.f32.mrf.mxu1 }
 0x437   :  { %v10769_v61 = vpop.eup %10768  ;;  %10770 = vrsqrt.f32 %v6577_v57  ;;  %vm6596_vm4 = vweird.f32 %v6577_v57 }
 0x438   :  { %v6581_v39 = vmul.f32 %v10769_v61, %v6551_v58  ;;  %vm6587_vm0 = vweird.f32 %v10769_v61 }
 0x439   :  { %vm6588_vm2 = vmor %vm6586_vm1, %vm6587_vm0 }
 0x43a   :  { %v6582_v9 = vmul.f32 %v10769_v61, %v6581_v39 }
 0x43c   :  { %v6583_v6 = vmul.f32 0.5, %v6582_v9  ;;  %v6578_v52 = vpop.f32.mrf.mxu3 }
 0x43d   :  { %v10771_v26 = vpop.eup %10770 }
 0x43e   :  { %v6584_v50 = vsub.f32 1.5, %v6583_v6  ;;  %v6591_v16 = vmul.f32 %v10771_v26, %v6577_v57  ;;  %vm6597_vm3 = vweird.f32 %v10771_v26 }
 0x43f   :  { %vm6598_vm5 = vmor %vm6596_vm4, %vm6597_vm3 }
 0x440   :  { %v6585_v34 = vmul.f32 %v10769_v61, %v6584_v50  ;;  %v6592_v5 = vmul.f32 %v10771_v26, %v6591_v16 }
 0x442   :  { %v6589_v10 = vsel %vm6588_vm2, %v10769_v61, %v6585_v34  ;;  %v6593_v60 = vmul.f32 0.5, %v6592_v5 }
 0x443   :  { %v6600_v13 = vmul.f32 %v6589_v10, %v14454_v25 }
 0x444   :  { %v6594_v48 = vsub.f32 1.5, %v6593_v60 }
 0x445   :  { %6602 = vst [vmem:[%s16170_s5] sm:$0xff] %v6600_v13 }
 0x446   :  { %v6595_v43 = vmul.f32 %v10771_v26, %v6594_v48 }
 0x448   :  { %v6599_v0 = vsel %vm6598_vm5, %v10771_v26, %v6595_v43 }
 0x449   :  { %v6601_v41 = vmul.f32 %v6599_v0, %v6323_v19 }
 0x44b   :  { %6603 = vst [vmem:[%s16170_s5 + $0x8] sm:$0xff] %v6601_v41 }

// kernel: analysis_net_forward.5
= control target key start
LH: loop header
LB: loop body
LE: loop exit
PB: predicated region body
PF: predicated region fallthrough
CT: control target
= control target key end

     0   :  { %s12457_s1 = inlined_call_operand.vmem [shape: bf16[4864,256], index: 1, kind: input, shape index: {}]   ;;  %s12458_s0 = inlined_call_operand.vmem [shape: bf16[8,4864], index: 0, kind: input, shape index: {}]   ;;  %s12459_s2 = inlined_call_operand.vmem [shape: f32[1,256], index: 2, kind: input, shape index: {}]   ;;  %s12460_s3 = inlined_call_operand.vmem [shape: bf16[256,256], index: 3, kind: input, shape index: {}]   ;;  %s12461_s4 = inlined_call_operand.vmem [shape: f32[1,256], index: 4, kind: input, shape index: {}]   ;;  %s12462_s5 = inlined_call_operand.vmem [shape: f32[8,256], index: 5, kind: output, shape index: {}]  }
   0x1   :  { %v5154_v0 = vld [vmem:[%s12457_s1 + $0x70] sm:$0xf]  ;;  %v7671_v1 = vld [vmem:[%s12457_s1 + $0x74] sm:$0xf0]  ;;  %v5146_v11 = vld [vmem:[%s12457_s1 + $0x60] sm:$0xf] }
   0x2   :  { %v5218_v2 = vld [vmem:[%s12457_s1 + $0xf0] sm:$0xf]  ;;  %v5155_v3 = vor.u32 %v7671_v1, %v5154_v0  ;;  %v7687_v4 = vld [vmem:[%s12457_s1 + $0xf4] sm:$0xf0]  ;;  %v7669_v13 = vld [vmem:[%s12457_s1 + $0x64] sm:$0xf0] }
   0x3   :  { %v5282_v5 = vld [vmem:[%s12457_s1 + $0x170] sm:$0xf]  ;;  %v7703_v6 = vld [vmem:[%s12457_s1 + $0x174] sm:$0xf0]  ;;  %v5219_v7 = vor.u32 %v7687_v4, %v5218_v2  ;;  %v5210_v14 = vld [vmem:[%s12457_s1 + $0xe0] sm:$0xf]  ;;  %v5147_v16 = vor.u32 %v7669_v13, %v5146_v11 }
   0x4   :  { %v5283_v8 = vor.u32 %v7703_v6, %v5282_v5  ;;  %v5346_v9 = vld [vmem:[%s12457_s1 + $0x1f0] sm:$0xf]  ;;  %v7719_v10 = vld [vmem:[%s12457_s1 + $0x1f4] sm:$0xf0]  ;;  %3826 = vmatpush.bf16.msra.mxu0 %v5155_v3  ;;  %v7685_v15 = vld [vmem:[%s12457_s1 + $0xe4] sm:$0xf0] }
   0x5   :  { %v5347_v12 = vor.u32 %v7719_v10, %v5346_v9  ;;  %3839 = vmatpush.bf16.msra.mxu1 %v5219_v7  ;;  %v5211_v17 = vor.u32 %v7685_v15, %v5210_v14  ;;  %v5274_v18 = vld [vmem:[%s12457_s1 + $0x160] sm:$0xf]  ;;  %v7701_v19 = vld [vmem:[%s12457_s1 + $0x164] sm:$0xf0]  ;;  %v5138_v23 = vld [vmem:[%s12457_s1 + $0x50] sm:$0xf] }
   0x6   :  { %3852 = vmatpush.bf16.msra.mxu2 %v5283_v8  ;;  %v5338_v20 = vld [vmem:[%s12457_s1 + $0x1e0] sm:$0xf]  ;;  %v5275_v21 = vor.u32 %v7701_v19, %v5274_v18  ;;  %v7717_v22 = vld [vmem:[%s12457_s1 + $0x1e4] sm:$0xf0]  ;;  %v7667_v24 = vld [vmem:[%s12457_s1 + $0x54] sm:$0xf0] }
   0x7   :  { %3865 = vmatpush.bf16.msra.mxu3 %v5347_v12  ;;  %v5339_v25 = vor.u32 %v7717_v22, %v5338_v20  ;;  %v5202_v26 = vld [vmem:[%s12457_s1 + $0xd0] sm:$0xf]  ;;  %v7683_v27 = vld [vmem:[%s12457_s1 + $0xd4] sm:$0xf0]  ;;  %v5139_v29 = vor.u32 %v7667_v24, %v5138_v23  ;;  %v5130_v35 = vld [vmem:[%s12457_s1 + $0x40] sm:$0xf] }
   0x8   :  { %v5266_v28 = vld [vmem:[%s12457_s1 + $0x150] sm:$0xf]  ;;  %3827 = vmatpush.bf16.msra.mxu0 %v5147_v16  ;;  %v7699_v30 = vld [vmem:[%s12457_s1 + $0x154] sm:$0xf0]  ;;  %v5203_v33 = vor.u32 %v7683_v27, %v5202_v26  ;;  %v7665_v36 = vld [vmem:[%s12457_s1 + $0x44] sm:$0xf0] }
   0x9   :  { %v5330_v31 = vld [vmem:[%s12457_s1 + $0x1d0] sm:$0xf]  ;;  %v7715_v32 = vld [vmem:[%s12457_s1 + $0x1d4] sm:$0xf0]  ;;  %3840 = vmatpush.bf16.msra.mxu1 %v5211_v17  ;;  %v5267_v34 = vor.u32 %v7699_v30, %v5266_v28  ;;  %v5194_v37 = vld [vmem:[%s12457_s1 + $0xc0] sm:$0xf]  ;;  %v5131_v44 = vor.u32 %v7665_v36, %v5130_v35 }
   0xa   :  { %3853 = vmatpush.bf16.msra.mxu2 %v5275_v21  ;;  %v5331_v38 = vor.u32 %v7715_v32, %v5330_v31  ;;  %v7681_v39 = vld [vmem:[%s12457_s1 + $0xc4] sm:$0xf0]  ;;  %v5258_v40 = vld [vmem:[%s12457_s1 + $0x140] sm:$0xf]  ;;  %v5122_v47 = vld [vmem:[%s12457_s1 + $0x30] sm:$0xf] }
   0xb   :  { %3866 = vmatpush.bf16.msra.mxu3 %v5339_v25  ;;  %v7697_v41 = vld [vmem:[%s12457_s1 + $0x144] sm:$0xf0]  ;;  %v5322_v42 = vld [vmem:[%s12457_s1 + $0x1c0] sm:$0xf]  ;;  %v5195_v45 = vor.u32 %v7681_v39, %v5194_v37  ;;  %v7663_v48 = vld [vmem:[%s12457_s1 + $0x34] sm:$0xf0] }
   0xc   :  { %v7713_v43 = vld [vmem:[%s12457_s1 + $0x1c4] sm:$0xf0]  ;;  %3828 = vmatpush.bf16.msra.mxu0 %v5139_v29  ;;  %v5259_v46 = vor.u32 %v7697_v41, %v5258_v40  ;;  %v5186_v49 = vld [vmem:[%s12457_s1 + $0xb0] sm:$0xf]  ;;  %v7679_v51 = vld [vmem:[%s12457_s1 + $0xb4] sm:$0xf0]  ;;  %v5123_v56 = vor.u32 %v7663_v48, %v5122_v47 }
   0xd   :  { %3841 = vmatpush.bf16.msra.mxu1 %v5203_v33  ;;  %v5323_v50 = vor.u32 %v7713_v43, %v5322_v42  ;;  %v5250_v52 = vld [vmem:[%s12457_s1 + $0x130] sm:$0xf]  ;;  %v7695_v53 = vld [vmem:[%s12457_s1 + $0x134] sm:$0xf0]  ;;  %v5187_v57 = vor.u32 %v7679_v51, %v5186_v49  ;;  %v5114_v59 = vld [vmem:[%s12457_s1 + $0x20] sm:$0xf] }
   0xe   :  { %3854 = vmatpush.bf16.msra.mxu2 %v5267_v34  ;;  %v5314_v54 = vld [vmem:[%s12457_s1 + $0x1b0] sm:$0xf]  ;;  %v7711_v55 = vld [vmem:[%s12457_s1 + $0x1b4] sm:$0xf0]  ;;  %v5251_v58 = vor.u32 %v7695_v53, %v5250_v52  ;;  %v7661_v60 = vld [vmem:[%s12457_s1 + $0x24] sm:$0xf0] }
   0xf   :  { %3867 = vmatpush.bf16.msra.mxu3 %v5331_v38  ;;  %v5178_v61 = vld [vmem:[%s12457_s1 + $0xa0] sm:$0xf]  ;;  %v5315_v62 = vor.u32 %v7711_v55, %v5314_v54  ;;  %v7677_v63 = vld [vmem:[%s12457_s1 + $0xa4] sm:$0xf0]  ;;  %v5115_v4 = vor.u32 %v7661_v60, %v5114_v59  ;;  %v5106_v7 = vld [vmem:[%s12457_s1 + $0x10] sm:$0xf] }
  0x10   :  { %3829 = vmatpush.bf16.msra.mxu0 %v5131_v44  ;;  %v5242_v0 = vld [vmem:[%s12457_s1 + $0x120] sm:$0xf]  ;;  %v7693_v1 = vld [vmem:[%s12457_s1 + $0x124] sm:$0xf0]  ;;  %v5179_v5 = vor.u32 %v7677_v63, %v5178_v61  ;;  %v7659_v8 = vld [vmem:[%s12457_s1 + $0x14] sm:$0xf0] }
  0x11   :  { %3842 = vmatpush.bf16.msra.mxu1 %v5195_v45  ;;  %v5306_v2 = vld [vmem:[%s12457_s1 + $0x1a0] sm:$0xf]  ;;  %v7709_v3 = vld [vmem:[%s12457_s1 + $0x1a4] sm:$0xf0]  ;;  %v5243_v6 = vor.u32 %v7693_v1, %v5242_v0  ;;  %v5170_v9 = vld [vmem:[%s12457_s1 + $0x90] sm:$0xf]  ;;  %v5107_v16 = vor.u32 %v7659_v8, %v5106_v7 }
  0x12   :  { %3855 = vmatpush.bf16.msra.mxu2 %v5259_v46  ;;  %v5307_v10 = vor.u32 %v7709_v3, %v5306_v2  ;;  %v7675_v11 = vld [vmem:[%s12457_s1 + $0x94] sm:$0xf0]  ;;  %v5234_v12 = vld [vmem:[%s12457_s1 + $0x110] sm:$0xf]  ;;  %v5098_v17 = vld [vmem:[%s12457_s1] sm:$0xf] }
  0x13   :  { %3868 = vmatpush.bf16.msra.mxu3 %v5323_v50  ;;  %v7691_v13 = vld [vmem:[%s12457_s1 + $0x114] sm:$0xf0]  ;;  %v5298_v14 = vld [vmem:[%s12457_s1 + $0x190] sm:$0xf]  ;;  %v7657_v18 = vld [vmem:[%s12457_s1 + $0x4] sm:$0xf0]  ;;  %v5171_v19 = vor.u32 %v7675_v11, %v5170_v9 }
  0x14   :  { %3830 = vmatpush.bf16.msra.mxu0 %v5123_v56  ;;  %v7707_v15 = vld [vmem:[%s12457_s1 + $0x194] sm:$0xf0]  ;;  %v5235_v20 = vor.u32 %v7691_v13, %v5234_v12  ;;  %v5162_v21 = vld [vmem:[%s12457_s1 + $0x80] sm:$0xf]  ;;  %v7673_v22 = vld [vmem:[%s12457_s1 + $0x84] sm:$0xf0]  ;;  %v5099_v31 = vor.u32 %v7657_v18, %v5098_v17 }
  0x15   :  { %3843 = vmatpush.bf16.msra.mxu1 %v5187_v57  ;;  %v5226_v23 = vld [vmem:[%s12457_s1 + $0x100] sm:$0xf]  ;;  %v5299_v24 = vor.u32 %v7707_v15, %v5298_v14  ;;  %v7689_v25 = vld [vmem:[%s12457_s1 + $0x104] sm:$0xf0]  ;;  %v5410_v28 = vld [vmem:[%s12457_s1 + $0x270] sm:$0xf]  ;;  %v5163_v35 = vor.u32 %v7673_v22, %v5162_v21 }
  0x16   :  { %3856 = vmatpush.bf16.msra.mxu2 %v5251_v58  ;;  %v5290_v26 = vld [vmem:[%s12457_s1 + $0x180] sm:$0xf]  ;;  %v7705_v27 = vld [vmem:[%s12457_s1 + $0x184] sm:$0xf0]  ;;  %v7735_v29 = vld [vmem:[%s12457_s1 + $0x274] sm:$0xf0]  ;;  %v5227_v36 = vor.u32 %v7689_v25, %v5226_v23 }
  0x17   :  { %3869 = vmatpush.bf16.msra.mxu3 %v5315_v62  ;;  %v5474_v30 = vld [vmem:[%s12457_s1 + $0x2f0] sm:$0xf]  ;;  %v7751_v32 = vld [vmem:[%s12457_s1 + $0x2f4] sm:$0xf0]  ;;  %v5291_v39 = vor.u32 %v7705_v27, %v5290_v26  ;;  %v5411_v40 = vor.u32 %v7735_v29, %v5410_v28  ;;  %v5402_v43 = vld [vmem:[%s12457_s1 + $0x260] sm:$0xf] }
  0x18   :  { %3831 = vmatpush.bf16.msra.mxu0 %v5115_v4  ;;  %v5538_v33 = vld [vmem:[%s12457_s1 + $0x370] sm:$0xf]  ;;  %v7767_v34 = vld [vmem:[%s12457_s1 + $0x374] sm:$0xf0]  ;;  %v5475_v41 = vor.u32 %v7751_v32, %v5474_v30  ;;  %v7733_v44 = vld [vmem:[%s12457_s1 + $0x264] sm:$0xf0] }
  0x19   :  { %3844 = vmatpush.bf16.msra.mxu1 %v5179_v5  ;;  %v5602_v37 = vld [vmem:[%s12457_s1 + $0x3f0] sm:$0xf]  ;;  %v7783_v38 = vld [vmem:[%s12457_s1 + $0x3f4] sm:$0xf0]  ;;  %v5539_v42 = vor.u32 %v7767_v34, %v5538_v33  ;;  %v5466_v45 = vld [vmem:[%s12457_s1 + $0x2e0] sm:$0xf]  ;;  %v5403_v52 = vor.u32 %v7733_v44, %v5402_v43 }
  0x1a   :  { %3857 = vmatpush.bf16.msra.mxu2 %v5243_v6  ;;  %v5603_v46 = vor.u32 %v7783_v38, %v5602_v37  ;;  %v7749_v47 = vld [vmem:[%s12457_s1 + $0x2e4] sm:$0xf0]  ;;  %v5530_v48 = vld [vmem:[%s12457_s1 + $0x360] sm:$0xf]  ;;  %v5394_v53 = vld [vmem:[%s12457_s1 + $0x250] sm:$0xf] }
  0x1b   :  { %3870 = vmatpush.bf16.msra.mxu3 %v5307_v10  ;;  %v7765_v49 = vld [vmem:[%s12457_s1 + $0x364] sm:$0xf0]  ;;  %v5594_v50 = vld [vmem:[%s12457_s1 + $0x3e0] sm:$0xf]  ;;  %v5467_v54 = vor.u32 %v7749_v47, %v5466_v45  ;;  %v7731_v56 = vld [vmem:[%s12457_s1 + $0x254] sm:$0xf0] }
  0x1c   :  { %3832 = vmatpush.bf16.msra.mxu0 %v5107_v16  ;;  %v7781_v51 = vld [vmem:[%s12457_s1 + $0x3e4] sm:$0xf0]  ;;  %v5531_v55 = vor.u32 %v7765_v49, %v5530_v48  ;;  %v5458_v57 = vld [vmem:[%s12457_s1 + $0x2d0] sm:$0xf]  ;;  %v7747_v58 = vld [vmem:[%s12457_s1 + $0x2d4] sm:$0xf0]  ;;  %v5395_v0 = vor.u32 %v7731_v56, %v5394_v53 }
  0x1d   :  { %3845 = vmatpush.bf16.msra.mxu1 %v5171_v19  ;;  %v5595_v59 = vor.u32 %v7781_v51, %v5594_v50  ;;  %v5522_v60 = vld [vmem:[%s12457_s1 + $0x350] sm:$0xf]  ;;  %v7763_v61 = vld [vmem:[%s12457_s1 + $0x354] sm:$0xf0]  ;;  %v5459_v1 = vor.u32 %v7747_v58, %v5458_v57  ;;  %v21_v2 = vld [vmem:[%s12458_s0 + $0x8] sm:$0xff] }
  0x1e   :  { %3858 = vmatpush.bf16.msra.mxu2 %v5235_v20  ;;  %v5586_v62 = vld [vmem:[%s12457_s1 + $0x3d0] sm:$0xf]  ;;  %v7779_v63 = vld [vmem:[%s12457_s1 + $0x3d4] sm:$0xf0]  ;;  %v20_v3 = vld [vmem:[%s12458_s0] sm:$0xff]  ;;  %v5523_v4 = vor.u32 %v7763_v61, %v5522_v60  ;;  %v674_v8 = vunpack.c.l.b16 %v21_v2  ;;  %v675_v10 = vunpack.c.h.b16 %v21_v2 }
  0x1f   :  { %3871 = vmatpush.bf16.msra.mxu3 %v5299_v24  ;;  %v5386_v5 = vld [vmem:[%s12457_s1 + $0x240] sm:$0xf]  ;;  %v7729_v6 = vld [vmem:[%s12457_s1 + $0x244] sm:$0xf0]  ;;  %v672_v9 = vunpack.c.l.b16 %v20_v3  ;;  %v5587_v11 = vor.u32 %v7779_v63, %v5586_v62  ;;  %v673_v15 = vunpack.c.h.b16 %v20_v3  ;;  %v5378_v25 = vld [vmem:[%s12457_s1 + $0x230] sm:$0xf] }
  0x20   :  { %3833 = vmatpush.bf16.msra.mxu0 %v5099_v31  ;;  %v5450_v7 = vld [vmem:[%s12457_s1 + $0x2c0] sm:$0xf]  ;;  %v7745_v12 = vld [vmem:[%s12457_s1 + $0x2c4] sm:$0xf0]  ;;  %v8625_v18 = vpack.c.b16 %v674_v8, %v674_v8  ;;  %v8629_v20 = vpack.c.b16 %v675_v10, %v675_v10  ;;  %v5387_v21 = vor.u32 %v7729_v6, %v5386_v5  ;;  %v7727_v26 = vld [vmem:[%s12457_s1 + $0x234] sm:$0xf0] }
  0x21   :  { %3846 = vmatpush.bf16.msra.mxu1 %v5163_v35  ;;  %v5514_v13 = vld [vmem:[%s12457_s1 + $0x340] sm:$0xf]  ;;  %v7761_v14 = vld [vmem:[%s12457_s1 + $0x344] sm:$0xf0]  ;;  %v8627_v19 = vpack.c.b16 %v672_v9, %v672_v9  ;;  %v8631_v22 = vpack.c.b16 %v673_v15, %v673_v15  ;;  %v5451_v23 = vor.u32 %v7745_v12, %v5450_v7  ;;  %v5442_v27 = vld [vmem:[%s12457_s1 + $0x2b0] sm:$0xf]  ;;  %v5379_v34 = vor.u32 %v7727_v26, %v5378_v25 }
  0x22   :  { %3859 = vmatpush.bf16.msra.mxu2 %v5227_v36  ;;  %v5578_v16 = vld [vmem:[%s12457_s1 + $0x3c0] sm:$0xf]  ;;  %v7777_v17 = vld [vmem:[%s12457_s1 + $0x3c4] sm:$0xf0]  ;;  %v5515_v24 = vor.u32 %v7761_v14, %v5514_v13  ;;  %v7743_v29 = vld [vmem:[%s12457_s1 + $0x2b4] sm:$0xf0] }
  0x23   :  { %3872 = vmatpush.bf16.msra.mxu3 %v5291_v39  ;;  %v5579_v28 = vor.u32 %v7777_v17, %v5578_v16  ;;  %v5506_v30 = vld [vmem:[%s12457_s1 + $0x330] sm:$0xf]  ;;  %v7759_v31 = vld [vmem:[%s12457_s1 + $0x334] sm:$0xf0]  ;;  %3834 = vmatmul.bf16.vlgmr.msra.gmra.mxu0 %v8627_v19  ;;  %v5443_v35 = vor.u32 %v7743_v29, %v5442_v27  ;;  %v5370_v37 = vld [vmem:[%s12457_s1 + $0x220] sm:$0xf] }
  0x24   :  { %3878 = vmatpush.bf16.msrb.mxu0 %v5411_v40  ;;  %v5570_v32 = vld [vmem:[%s12457_s1 + $0x3b0] sm:$0xf]  ;;  %v7775_v33 = vld [vmem:[%s12457_s1 + $0x3b4] sm:$0xf0]  ;;  %3847 = vmatmul.bf16.vlgmr.msra.gmra.mxu1 %v8631_v22  ;;  %v5507_v36 = vor.u32 %v7759_v31, %v5506_v30  ;;  %v7725_v38 = vld [vmem:[%s12457_s1 + $0x224] sm:$0xf0] }
  0x25   :  { %3891 = vmatpush.bf16.msrb.mxu1 %v5475_v41  ;;  %3860 = vmatmul.bf16.vlgmr.msra.gmra.mxu2 %v8625_v18  ;;  %v5434_v39 = vld [vmem:[%s12457_s1 + $0x2a0] sm:$0xf]  ;;  %v5571_v40 = vor.u32 %v7775_v33, %v5570_v32  ;;  %v7741_v41 = vld [vmem:[%s12457_s1 + $0x2a4] sm:$0xf0]  ;;  %v5362_v49 = vld [vmem:[%s12457_s1 + $0x210] sm:$0xf] }
  0x26   :  { %3904 = vmatpush.bf16.msrb.mxu2 %v5539_v42  ;;  %3873 = vmatmul.bf16.vlgmr.msra.gmra.mxu3 %v8629_v20  ;;  %v5498_v42 = vld [vmem:[%s12457_s1 + $0x320] sm:$0xf]  ;;  %v7757_v43 = vld [vmem:[%s12457_s1 + $0x324] sm:$0xf0]  ;;  %v5435_v47 = vor.u32 %v7741_v41, %v5434_v39  ;;  %v7723_v50 = vld [vmem:[%s12457_s1 + $0x214] sm:$0xf0] }
  0x27   :  { %3917 = vmatpush.bf16.msrb.mxu3 %v5603_v46  ;;  %v5562_v44 = vld [vmem:[%s12457_s1 + $0x3a0] sm:$0xf]  ;;  %v7773_v45 = vld [vmem:[%s12457_s1 + $0x3a4] sm:$0xf0]  ;;  %v5371_v46 = vor.u32 %v7725_v38, %v5370_v37  ;;  %v5499_v48 = vor.u32 %v7757_v43, %v5498_v42  ;;  %v5426_v51 = vld [vmem:[%s12457_s1 + $0x290] sm:$0xf] }
  0x28   :  { %3879 = vmatpush.bf16.msrb.mxu0 %v5403_v52  ;;  %v5563_v52 = vor.u32 %v7773_v45, %v5562_v44  ;;  %v7739_v53 = vld [vmem:[%s12457_s1 + $0x294] sm:$0xf0]  ;;  %v5554_v56 = vld [vmem:[%s12457_s1 + $0x390] sm:$0xf]  ;;  %v5354_v58 = vld [vmem:[%s12457_s1 + $0x200] sm:$0xf] }
  0x29   :  { %3892 = vmatpush.bf16.msrb.mxu1 %v5467_v54  ;;  %v5490_v54 = vld [vmem:[%s12457_s1 + $0x310] sm:$0xf]  ;;  %v7771_v57 = vld [vmem:[%s12457_s1 + $0x394] sm:$0xf0]  ;;  %v7721_v60 = vld [vmem:[%s12457_s1 + $0x204] sm:$0xf0]  ;;  %v5427_v63 = vor.u32 %v7739_v53, %v5426_v51 }
  0x2a   :  { %3905 = vmatpush.bf16.msrb.mxu2 %v5531_v55  ;;  %v7755_v55 = vld [vmem:[%s12457_s1 + $0x314] sm:$0xf0]  ;;  %v5418_v61 = vld [vmem:[%s12457_s1 + $0x280] sm:$0xf]  ;;  %v7737_v62 = vld [vmem:[%s12457_s1 + $0x284] sm:$0xf0] }
  0x2b   :  { %3918 = vmatpush.bf16.msrb.mxu3 %v5595_v59  ;;  %v5363_v59 = vor.u32 %v7723_v50, %v5362_v49  ;;  %v7753_v2 = vld [vmem:[%s12457_s1 + $0x304] sm:$0xf0]  ;;  %v23_v3 = vld [vmem:[%s12458_s0 + $0x18] sm:$0xff]  ;;  %v5546_v5 = vld [vmem:[%s12457_s1 + $0x380] sm:$0xf]  ;;  %v5419_v16 = vor.u32 %v7737_v62, %v5418_v61 }
  0x2c   :  { %3880 = vmatpush.bf16.msrb.mxu0 %v5395_v0  ;;  %v5491_v0 = vor.u32 %v7755_v55, %v5490_v54  ;;  %v7769_v6 = vld [vmem:[%s12457_s1 + $0x384] sm:$0xf0]  ;;  %v22_v7 = vld [vmem:[%s12458_s0 + $0x10] sm:$0xff]  ;;  %v7799_v9 = vld [vmem:[%s12457_s1 + $0x474] sm:$0xf0]  ;;  %v678_v15 = vunpack.c.l.b16 %v23_v3  ;;  %v679_v25 = vunpack.c.h.b16 %v23_v3 }
  0x2d   :  { %3893 = vmatpush.bf16.msrb.mxu1 %v5459_v1  ;;  %v5482_v1 = vld [vmem:[%s12457_s1 + $0x300] sm:$0xf]  ;;  %v5666_v8 = vld [vmem:[%s12457_s1 + $0x470] sm:$0xf]  ;;  %v7815_v12 = vld [vmem:[%s12457_s1 + $0x4f4] sm:$0xf0]  ;;  %v5547_v26 = vor.u32 %v7769_v6, %v5546_v5 }
  0x2e   :  { %3906 = vmatpush.bf16.msrb.mxu2 %v5523_v4  ;;  %v5555_v4 = vor.u32 %v7771_v57, %v5554_v56  ;;  %v5730_v10 = vld [vmem:[%s12457_s1 + $0x4f0] sm:$0xf]  ;;  %v7831_v14 = vld [vmem:[%s12457_s1 + $0x574] sm:$0xf0]  ;;  %v5483_v17 = vor.u32 %v7753_v2, %v5482_v1  ;;  %v5667_v27 = vor.u32 %v7799_v9, %v5666_v8  ;;  %v5658_v31 = vld [vmem:[%s12457_s1 + $0x460] sm:$0xf]  ;;  %v8781_v38 = vpack.c.b16 %v678_v15, %v678_v15 }
  0x2f   :  { %3919 = vmatpush.bf16.msrb.mxu3 %v5587_v11  ;;  %v5355_v11 = vor.u32 %v7721_v60, %v5354_v58  ;;  %v5794_v13 = vld [vmem:[%s12457_s1 + $0x570] sm:$0xf]  ;;  %v5731_v29 = vor.u32 %v7815_v12, %v5730_v10  ;;  %v7797_v32 = vld [vmem:[%s12457_s1 + $0x464] sm:$0xf0]  ;;  %v5722_v33 = vld [vmem:[%s12457_s1 + $0x4e0] sm:$0xf]  ;;  %v8791_v42 = vpack.c.b16 %v679_v25, %v679_v25 }
  0x30   :  { %3881 = vmatpush.bf16.msrb.mxu0 %v5387_v21  ;;  %v5858_v21 = vld [vmem:[%s12457_s1 + $0x5f0] sm:$0xf]  ;;  %v5795_v30 = vor.u32 %v7831_v14, %v5794_v13  ;;  %v7829_v37 = vld [vmem:[%s12457_s1 + $0x564] sm:$0xf0]  ;;  %v5850_v39 = vld [vmem:[%s12457_s1 + $0x5e0] sm:$0xf]  ;;  %v5659_v43 = vor.u32 %v7797_v32, %v5658_v31 }
  0x31   :  { %3894 = vmatpush.bf16.msrb.mxu1 %v5451_v23  ;;  %v7847_v23 = vld [vmem:[%s12457_s1 + $0x5f4] sm:$0xf0]  ;;  %v5714_v49 = vld [vmem:[%s12457_s1 + $0x4d0] sm:$0xf]  ;;  %v7793_v60 = vld [vmem:[%s12457_s1 + $0x444] sm:$0xf0] }
  0x32   :  { %3907 = vmatpush.bf16.msrb.mxu2 %v5515_v24  ;;  %v676_v24 = vunpack.c.l.b16 %v22_v7  ;;  %v7811_v51 = vld [vmem:[%s12457_s1 + $0x4d4] sm:$0xf0]  ;;  %v5842_v54 = vld [vmem:[%s12457_s1 + $0x5d0] sm:$0xf]  ;;  %v5706_v61 = vld [vmem:[%s12457_s1 + $0x4c0] sm:$0xf] }
  0x33   :  { %3920 = vmatpush.bf16.msrb.mxu3 %v5579_v28  ;;  %v677_v28 = vunpack.c.h.b16 %v22_v7  ;;  %v7827_v53 = vld [vmem:[%s12457_s1 + $0x554] sm:$0xf0]  ;;  %v5715_v57 = vor.u32 %v7811_v51, %v5714_v49  ;;  %v7825_v1 = vld [vmem:[%s12457_s1 + $0x544] sm:$0xf0]  ;;  %v5834_v2 = vld [vmem:[%s12457_s1 + $0x5c0] sm:$0xf] }
  0x34   :  { %3882 = vmatpush.bf16.msrb.mxu0 %v5379_v34  ;;  %v5859_v34 = vor.u32 %v7847_v23, %v5858_v21  ;;  %v8789_v41 = vpack.c.b16 %v676_v24, %v676_v24  ;;  %v7843_v55 = vld [vmem:[%s12457_s1 + $0x5d4] sm:$0xf0]  ;;  %v7841_v3 = vld [vmem:[%s12457_s1 + $0x5c4] sm:$0xf0]  ;;  %v5634_v7 = vld [vmem:[%s12457_s1 + $0x430] sm:$0xf] }
  0x35   :  { %3895 = vmatpush.bf16.msrb.mxu1 %v5443_v35  ;;  %v7813_v35 = vld [vmem:[%s12457_s1 + $0x4e4] sm:$0xf0]  ;;  %v8793_v44 = vpack.c.b16 %v677_v28, %v677_v28  ;;  %v5843_v62 = vor.u32 %v7843_v55, %v5842_v54  ;;  %v7791_v8 = vld [vmem:[%s12457_s1 + $0x434] sm:$0xf0]  ;;  %v5698_v9 = vld [vmem:[%s12457_s1 + $0x4b0] sm:$0xf]  ;;  %v5835_v10 = vor.u32 %v7841_v3, %v5834_v2 }
  0x36   :  { %3908 = vmatpush.bf16.msrb.mxu2 %v5507_v36  ;;  %v5786_v36 = vld [vmem:[%s12457_s1 + $0x560] sm:$0xf]  ;;  %v5723_v45 = vor.u32 %v7813_v35, %v5722_v33  ;;  %v5762_v12 = vld [vmem:[%s12457_s1 + $0x530] sm:$0xf]  ;;  %v7823_v13 = vld [vmem:[%s12457_s1 + $0x534] sm:$0xf0] }
  0x37   :  { %3921 = vmatpush.bf16.msrb.mxu3 %v5571_v40  ;;  %v7845_v40 = vld [vmem:[%s12457_s1 + $0x5e4] sm:$0xf0]  ;;  %v5826_v14 = vld [vmem:[%s12457_s1 + $0x5b0] sm:$0xf]  ;;  %v7839_v15 = vld [vmem:[%s12457_s1 + $0x5b4] sm:$0xf0]  ;;  %v5763_v21 = vor.u32 %v7823_v13, %v5762_v12 }
  0x38   :  { %3883 = vmatpush.bf16.msrb.mxu0 %v5371_v46  ;;  %v5787_v46 = vor.u32 %v7829_v37, %v5786_v36  ;;  %v5851_v50 = vor.u32 %v7845_v40, %v5850_v39  ;;  %v5626_v23 = vld [vmem:[%s12457_s1 + $0x420] sm:$0xf]  ;;  %v7789_v24 = vld [vmem:[%s12457_s1 + $0x424] sm:$0xf0]  ;;  %v5618_v35 = vld [vmem:[%s12457_s1 + $0x410] sm:$0xf] }
  0x39   :  { %3896 = vmatpush.bf16.msrb.mxu1 %v5435_v47  ;;  %v5650_v47 = vld [vmem:[%s12457_s1 + $0x450] sm:$0xf]  ;;  %v5690_v25 = vld [vmem:[%s12457_s1 + $0x4a0] sm:$0xf]  ;;  %v7837_v31 = vld [vmem:[%s12457_s1 + $0x5a4] sm:$0xf0]  ;;  %v5627_v32 = vor.u32 %v7789_v24, %v5626_v23 }
  0x3a   :  { %3909 = vmatpush.bf16.msrb.mxu2 %v5499_v48  ;;  %v7795_v48 = vld [vmem:[%s12457_s1 + $0x454] sm:$0xf0]  ;;  %v5754_v28 = vld [vmem:[%s12457_s1 + $0x520] sm:$0xf]  ;;  %v5682_v37 = vld [vmem:[%s12457_s1 + $0x490] sm:$0xf] }
  0x3b   :  { %3922 = vmatpush.bf16.msrb.mxu3 %v5563_v52  ;;  %v5778_v52 = vld [vmem:[%s12457_s1 + $0x550] sm:$0xf]  ;;  %v5651_v56 = vor.u32 %v7795_v48, %v5650_v47  ;;  %v7787_v36 = vld [vmem:[%s12457_s1 + $0x414] sm:$0xf0]  ;;  %v5610_v48 = vld [vmem:[%s12457_s1 + $0x400] sm:$0xf] }
  0x3c   :  { %3884 = vmatpush.bf16.msrb.mxu0 %v5363_v59  ;;  %v5779_v58 = vor.u32 %v7827_v53, %v5778_v52  ;;  %v5642_v59 = vld [vmem:[%s12457_s1 + $0x440] sm:$0xf]  ;;  %v7803_v40 = vld [vmem:[%s12457_s1 + $0x494] sm:$0xf0]  ;;  %v5619_v49 = vor.u32 %v7787_v36, %v5618_v35  ;;  %v7801_v52 = vld [vmem:[%s12457_s1 + $0x484] sm:$0xf0] }
  0x3d   :  { %3897 = vmatpush.bf16.msrb.mxu1 %v5427_v63  ;;  %v7809_v63 = vld [vmem:[%s12457_s1 + $0x4c4] sm:$0xf0]  ;;  %v7835_v47 = vld [vmem:[%s12457_s1 + $0x594] sm:$0xf0]  ;;  %v5674_v51 = vld [vmem:[%s12457_s1 + $0x480] sm:$0xf]  ;;  %v5683_v53 = vor.u32 %v7803_v40, %v5682_v37 }
  0x3e   :  { %3910 = vmatpush.bf16.msrb.mxu2 %v5491_v0  ;;  %v5770_v0 = vld [vmem:[%s12457_s1 + $0x540] sm:$0xf]  ;;  %v5707_v5 = vor.u32 %v7809_v63, %v5706_v61  ;;  %v25_v61 = vld [vmem:[%s12458_s0 + $0x28] sm:$0xff]  ;;  %v7863_v63 = vld [vmem:[%s12457_s1 + $0x674] sm:$0xf0] }
  0x3f   :  { %3923 = vmatpush.bf16.msrb.mxu3 %v5555_v4  ;;  %v5643_v4 = vor.u32 %v7793_v60, %v5642_v59  ;;  %v5771_v6 = vor.u32 %v7825_v1, %v5770_v0  ;;  %v5738_v55 = vld [vmem:[%s12457_s1 + $0x500] sm:$0xf]  ;;  %v7833_v60 = vld [vmem:[%s12457_s1 + $0x584] sm:$0xf0]  ;;  %v5986_v0 = vld [vmem:[%s12457_s1 + $0x6f0] sm:$0xf] }
  0x40   :  { %3885 = vmatpush.bf16.msrb.mxu0 %v5355_v11  ;;  %v7807_v11 = vld [vmem:[%s12457_s1 + $0x4b4] sm:$0xf0]  ;;  %v5802_v59 = vld [vmem:[%s12457_s1 + $0x580] sm:$0xf]  ;;  %v6050_v3 = vld [vmem:[%s12457_s1 + $0x770] sm:$0xf] }
  0x41   :  { %3898 = vmatpush.bf16.msrb.mxu1 %v5419_v16  ;;  %v5635_v16 = vor.u32 %v7791_v8, %v5634_v7  ;;  %v7879_v2 = vld [vmem:[%s12457_s1 + $0x6f4] sm:$0xf0]  ;;  %v6114_v8 = vld [vmem:[%s12457_s1 + $0x7f0] sm:$0xf]  ;;  %v5803_v12 = vor.u32 %v7833_v60, %v5802_v59  ;;  %v5978_v23 = vld [vmem:[%s12457_s1 + $0x6e0] sm:$0xf] }
  0x42   :  { %3911 = vmatpush.bf16.msrb.mxu2 %v5483_v17  ;;  %v5699_v17 = vor.u32 %v7807_v11, %v5698_v9  ;;  %v7911_v9 = vld [vmem:[%s12457_s1 + $0x7f4] sm:$0xf0]  ;;  %v5906_v37 = vld [vmem:[%s12457_s1 + $0x650] sm:$0xf]  ;;  %v7889_v59 = vld [vmem:[%s12457_s1 + $0x744] sm:$0xf0] }
  0x43   :  { %3924 = vmatpush.bf16.msrb.mxu3 %v5547_v26  ;;  %3886 = vmatmul.bf16.vlgmr.msrb.gmra.mxu0 %v8789_v41  ;;  %v5827_v26 = vor.u32 %v7839_v15, %v5826_v14  ;;  %v683_v14 = vunpack.c.h.b16 %v25_v61  ;;  %v5987_v15 = vor.u32 %v7879_v2, %v5986_v0  ;;  %v6115_v24 = vor.u32 %v7911_v9, %v6114_v8  ;;  %v5970_v40 = vld [vmem:[%s12457_s1 + $0x6d0] sm:$0xf]  ;;  %v6090_v60 = vld [vmem:[%s12457_s1 + $0x7c0] sm:$0xf]  ;;  %v7855_v2 = vld [vmem:[%s12457_s1 + $0x634] sm:$0xf0] }
  0x44   :  { %3930 = vmatpush.bf16.msra.mxu0 %v5667_v27  ;;  %3899 = vmatmul.bf16.vlgmr.msrb.gmra.mxu1 %v8793_v44  ;;  %v7805_v27 = vld [vmem:[%s12457_s1 + $0x4a4] sm:$0xf0]  ;;  %v6082_v8 = vld [vmem:[%s12457_s1 + $0x7b0] sm:$0xf]  ;;  %v7903_v9 = vld [vmem:[%s12457_s1 + $0x7b4] sm:$0xf0] }
  0x45   :  { %3943 = vmatpush.bf16.msra.mxu1 %v5731_v29  ;;  %3912 = vmatmul.bf16.vlgmr.msrb.gmra.mxu2 %v8781_v38  ;;  %v7821_v29 = vld [vmem:[%s12457_s1 + $0x524] sm:$0xf0]  ;;  %v5691_v33 = vor.u32 %v7805_v27, %v5690_v25  ;;  %v6042_v27 = vld [vmem:[%s12457_s1 + $0x760] sm:$0xf] }
  0x46   :  { %3956 = vmatpush.bf16.msra.mxu2 %v5795_v30  ;;  %3925 = vmatmul.bf16.vlgmr.msrb.gmra.mxu3 %v8791_v42  ;;  %v5818_v30 = vld [vmem:[%s12457_s1 + $0x5a0] sm:$0xf] }
  0x47   :  { %3969 = vmatpush.bf16.msra.mxu3 %v5859_v34  ;;  %v5755_v34 = vor.u32 %v7821_v29, %v5754_v28  ;;  %v5819_v39 = vor.u32 %v7837_v31, %v5818_v30  ;;  %v7893_v28 = vld [vmem:[%s12457_s1 + $0x764] sm:$0xf0]  ;;  %v6106_v31 = vld [vmem:[%s12457_s1 + $0x7e0] sm:$0xf] }
  0x48   :  { %3931 = vmatpush.bf16.msra.mxu0 %v5659_v43  ;;  %v5746_v43 = vld [vmem:[%s12457_s1 + $0x510] sm:$0xf]  ;;  %v6043_v36 = vor.u32 %v7893_v28, %v6042_v27 }
  0x49   :  { %3944 = vmatpush.bf16.msra.mxu1 %v5723_v45  ;;  %v7819_v45 = vld [vmem:[%s12457_s1 + $0x514] sm:$0xf0] }
  0x4a   :  { %3957 = vmatpush.bf16.msra.mxu2 %v5787_v46  ;;  %v5810_v46 = vld [vmem:[%s12457_s1 + $0x590] sm:$0xf]  ;;  %v5747_v54 = vor.u32 %v7819_v45, %v5746_v43  ;;  %v7875_v45 = vld [vmem:[%s12457_s1 + $0x6d4] sm:$0xf0] }
  0x4b   :  { %3970 = vmatpush.bf16.msra.mxu3 %v5851_v50  ;;  %v7785_v50 = vld [vmem:[%s12457_s1 + $0x404] sm:$0xf0] }
  0x4c   :  { %3932 = vmatpush.bf16.msra.mxu0 %v5651_v56  ;;  %v7817_v56 = vld [vmem:[%s12457_s1 + $0x504] sm:$0xf0]  ;;  %v5611_v1 = vor.u32 %v7785_v50, %v5610_v48  ;;  %v6098_v48 = vld [vmem:[%s12457_s1 + $0x7d0] sm:$0xf] }
  0x4d   :  { %3945 = vmatpush.bf16.msra.mxu1 %v5715_v57  ;;  %v24_v57 = vld [vmem:[%s12458_s0 + $0x20] sm:$0xff]  ;;  %v5739_v7 = vor.u32 %v7817_v56, %v5738_v55 }
  0x4e   :  { %3958 = vmatpush.bf16.msra.mxu2 %v5779_v58  ;;  %v5811_v58 = vor.u32 %v7835_v47, %v5810_v46  ;;  %v681_v11 = vunpack.c.h.b16 %v24_v57  ;;  %v6034_v46 = vld [vmem:[%s12457_s1 + $0x750] sm:$0xf]  ;;  %v7891_v47 = vld [vmem:[%s12457_s1 + $0x754] sm:$0xf0]  ;;  %v5962_v55 = vld [vmem:[%s12457_s1 + $0x6c0] sm:$0xf] }
  0x4f   :  { %3971 = vmatpush.bf16.msra.mxu3 %v5843_v62  ;;  %v5922_v62 = vld [vmem:[%s12457_s1 + $0x670] sm:$0xf] }
  0x50   :  { %3933 = vmatpush.bf16.msra.mxu0 %v5643_v4  ;;  %v7895_v4 = vld [vmem:[%s12457_s1 + $0x774] sm:$0xf0]  ;;  %v5923_v13 = vor.u32 %v7863_v63, %v5922_v62  ;;  %v8995_v30 = vpack.c.b16 %v681_v11, %v681_v11 }
  0x51   :  { %3946 = vmatpush.bf16.msra.mxu1 %v5707_v5  ;;  %v680_v5 = vunpack.c.l.b16 %v24_v57  ;;  %v7873_v57 = vld [vmem:[%s12457_s1 + $0x6c4] sm:$0xf0] }
  0x52   :  { %3959 = vmatpush.bf16.msra.mxu2 %v5771_v6  ;;  %v5675_v6 = vor.u32 %v7801_v52, %v5674_v51  ;;  %v5971_v51 = vor.u32 %v7875_v45, %v5970_v40  ;;  %v6035_v52 = vor.u32 %v7891_v47, %v6034_v46  ;;  %v5963_v63 = vor.u32 %v7873_v57, %v5962_v55  ;;  %v7883_v40 = vld [vmem:[%s12457_s1 + $0x714] sm:$0xf0]  ;;  %v5866_v46 = vld [vmem:[%s12457_s1 + $0x600] sm:$0xf]  ;;  %v26_v55 = vld [vmem:[%s12458_s0 + $0x30] sm:$0xff] }
  0x53   :  { %3972 = vmatpush.bf16.msra.mxu3 %v5835_v10  ;;  %v682_v10 = vunpack.c.l.b16 %v25_v61  ;;  %v8982_v25 = vpack.c.b16 %v680_v5, %v680_v5  ;;  %v7905_v61 = vld [vmem:[%s12457_s1 + $0x7c4] sm:$0xf0]  ;;  %v7871_v5 = vld [vmem:[%s12457_s1 + $0x6b4] sm:$0xf0]  ;;  %v6058_v57 = vld [vmem:[%s12457_s1 + $0x780] sm:$0xf] }
  0x54   :  { %3934 = vmatpush.bf16.msra.mxu0 %v5635_v16  ;;  %v6051_v16 = vor.u32 %v7895_v4, %v6050_v3  ;;  %v5954_v3 = vld [vmem:[%s12457_s1 + $0x6b0] sm:$0xf]  ;;  %v6091_v4 = vor.u32 %v7905_v61, %v6090_v60  ;;  %v7899_v45 = vld [vmem:[%s12457_s1 + $0x794] sm:$0xf0] }
  0x55   :  { %3947 = vmatpush.bf16.msra.mxu1 %v5699_v17  ;;  %v5914_v17 = vld [vmem:[%s12457_s1 + $0x660] sm:$0xf]  ;;  %v8993_v29 = vpack.c.b16 %v682_v10, %v682_v10  ;;  %v5955_v11 = vor.u32 %v7871_v5, %v5954_v3  ;;  %v6178_v60 = vld [vmem:[%s12457_s1 + $0x870] sm:$0xf]  ;;  %v7927_v61 = vld [vmem:[%s12457_s1 + $0x874] sm:$0xf0]  ;;  %v684_v3 = vunpack.c.l.b16 %v26_v55 }
  0x56   :  { %3960 = vmatpush.bf16.msra.mxu2 %v5763_v21  ;;  %v7861_v21 = vld [vmem:[%s12457_s1 + $0x664] sm:$0xf0] }
  0x57   :  { %3973 = vmatpush.bf16.msra.mxu3 %v5827_v26  ;;  %v7877_v26 = vld [vmem:[%s12457_s1 + $0x6e4] sm:$0xf0] }
  0x58   :  { %3935 = vmatpush.bf16.msra.mxu0 %v5627_v32  ;;  %v7909_v32 = vld [vmem:[%s12457_s1 + $0x7e4] sm:$0xf0]  ;;  %v5979_v35 = vor.u32 %v7877_v26, %v5978_v23 }
  0x59   :  { %3948 = vmatpush.bf16.msra.mxu1 %v5691_v33  ;;  %v9003_v33 = vpack.c.b16 %v683_v14, %v683_v14  ;;  %v6107_v43 = vor.u32 %v7909_v32, %v6106_v31  ;;  %v7853_v14 = vld [vmem:[%s12457_s1 + $0x624] sm:$0xf0]  ;;  %v5874_v32 = vld [vmem:[%s12457_s1 + $0x610] sm:$0xf] }
  0x5a   :  { %3961 = vmatpush.bf16.msra.mxu2 %v5755_v34  ;;  %v5915_v34 = vor.u32 %v7861_v21, %v5914_v17  ;;  %v7869_v17 = vld [vmem:[%s12457_s1 + $0x6a4] sm:$0xf0]  ;;  %v6010_v21 = vld [vmem:[%s12457_s1 + $0x720] sm:$0xf] }
  0x5b   :  { %3974 = vmatpush.bf16.msra.mxu3 %v5819_v39  ;;  %v7859_v39 = vld [vmem:[%s12457_s1 + $0x654] sm:$0xf0]  ;;  %v7885_v23 = vld [vmem:[%s12457_s1 + $0x724] sm:$0xf0] }
  0x5c   :  { %3936 = vmatpush.bf16.msra.mxu0 %v5619_v49  ;;  %v7907_v49 = vld [vmem:[%s12457_s1 + $0x7d4] sm:$0xf0]  ;;  %v5907_v50 = vor.u32 %v7859_v39, %v5906_v37  ;;  %v7901_v26 = vld [vmem:[%s12457_s1 + $0x7a4] sm:$0xf0]  ;;  %v6011_v31 = vor.u32 %v7885_v23, %v6010_v21  ;;  %v6002_v39 = vld [vmem:[%s12457_s1 + $0x710] sm:$0xf]  ;;  %v9192_v23 = vpack.c.b16 %v684_v3, %v684_v3 }
  0x5d   :  { %3949 = vmatpush.bf16.msra.mxu1 %v5683_v53  ;;  %v5898_v53 = vld [vmem:[%s12457_s1 + $0x640] sm:$0xf]  ;;  %v6099_v56 = vor.u32 %v7907_v49, %v6098_v48  ;;  %v7867_v37 = vld [vmem:[%s12457_s1 + $0x694] sm:$0xf0]  ;;  %v7849_v48 = vld [vmem:[%s12457_s1 + $0x604] sm:$0xf0] }
  0x5e   :  { %3962 = vmatpush.bf16.msra.mxu2 %v5747_v54  ;;  %v7857_v54 = vld [vmem:[%s12457_s1 + $0x644] sm:$0xf0]  ;;  %v5930_v49 = vld [vmem:[%s12457_s1 + $0x680] sm:$0xf]  ;;  %v6146_v3 = vld [vmem:[%s12457_s1 + $0x830] sm:$0xf] }
  0x5f   :  { %3975 = vmatpush.bf16.msra.mxu3 %v5811_v58  ;;  %v6026_v58 = vld [vmem:[%s12457_s1 + $0x740] sm:$0xf]  ;;  %v5899_v62 = vor.u32 %v7857_v54, %v5898_v53  ;;  %v7881_v54 = vld [vmem:[%s12457_s1 + $0x704] sm:$0xf0] }
  0x60   :  { %3937 = vmatpush.bf16.msra.mxu0 %v5611_v1  ;;  %v6027_v0 = vor.u32 %v7889_v59, %v6026_v58  ;;  %v5890_v1 = vld [vmem:[%s12457_s1 + $0x630] sm:$0xf]  ;;  %v5994_v53 = vld [vmem:[%s12457_s1 + $0x700] sm:$0xf]  ;;  %v7897_v58 = vld [vmem:[%s12457_s1 + $0x784] sm:$0xf0] }
  0x61   :  { %3950 = vmatpush.bf16.msra.mxu1 %v5675_v6  ;;  %v6018_v6 = vld [vmem:[%s12457_s1 + $0x730] sm:$0xf]  ;;  %v5891_v10 = vor.u32 %v7855_v2, %v5890_v1  ;;  %v27_v59 = vld [vmem:[%s12458_s0 + $0x38] sm:$0xff]  ;;  %v5995_v5 = vor.u32 %v7881_v54, %v5994_v53 }
  0x62   :  { %3963 = vmatpush.bf16.msra.mxu2 %v5739_v7  ;;  %v7887_v7 = vld [vmem:[%s12457_s1 + $0x734] sm:$0xf0]  ;;  %v6306_v1 = vld [vmem:[%s12457_s1 + $0x970] sm:$0xf] }
  0x63   :  { %3976 = vmatpush.bf16.msra.mxu3 %v5803_v12  ;;  %3938 = vmatmul.bf16.vlgmr.msra.gmra.mxu0 %v8982_v25  ;;  %v6019_v12 = vor.u32 %v7887_v7, %v6018_v6  ;;  %v7959_v2 = vld [vmem:[%s12457_s1 + $0x974] sm:$0xf0]  ;;  %v6370_v6 = vld [vmem:[%s12457_s1 + $0x9f0] sm:$0xf] }
  0x64   :  { %3982 = vmatpush.bf16.msrb.mxu0 %v5923_v13  ;;  %3951 = vmatmul.bf16.vlgmr.msra.gmra.mxu1 %v8995_v30  ;;  %v5882_v13 = vld [vmem:[%s12457_s1 + $0x620] sm:$0xf]  ;;  %v7975_v7 = vld [vmem:[%s12457_s1 + $0x9f4] sm:$0xf0] }
  0x65   :  { %3995 = vmatpush.bf16.msrb.mxu1 %v5987_v15  ;;  %3964 = vmatmul.bf16.vlgmr.msra.gmra.mxu2 %v8993_v29  ;;  %v5946_v15 = vld [vmem:[%s12457_s1 + $0x6a0] sm:$0xf]  ;;  %v5883_v27 = vor.u32 %v7853_v14, %v5882_v13  ;;  %v6307_v14 = vor.u32 %v7959_v2, %v6306_v1  ;;  %v6371_v21 = vor.u32 %v7975_v7, %v6370_v6  ;;  %v7935_v7 = vld [vmem:[%s12457_s1 + $0x8b4] sm:$0xf0] }
  0x66   :  { %4008 = vmatpush.bf16.msrb.mxu2 %v6051_v16  ;;  %3977 = vmatmul.bf16.vlgmr.msra.gmra.mxu3 %v9003_v33  ;;  %v6083_v16 = vor.u32 %v7903_v9, %v6082_v8  ;;  %v5947_v28 = vor.u32 %v7869_v17, %v5946_v15  ;;  %v686_v8 = vunpack.c.l.b16 %v27_v59  ;;  %v685_v9 = vunpack.c.h.b16 %v26_v55  ;;  %v6170_v15 = vld [vmem:[%s12457_s1 + $0x860] sm:$0xf] }
  0x67   :  { %4021 = vmatpush.bf16.msrb.mxu3 %v6115_v24  ;;  %v6074_v24 = vld [vmem:[%s12457_s1 + $0x7a0] sm:$0xf] }
  0x68   :  { %3983 = vmatpush.bf16.msrb.mxu0 %v5915_v34  ;;  %v7851_v34 = vld [vmem:[%s12457_s1 + $0x614] sm:$0xf0]  ;;  %v6234_v17 = vld [vmem:[%s12457_s1 + $0x8e0] sm:$0xf] }
  0x69   :  { %3996 = vmatpush.bf16.msrb.mxu1 %v5979_v35  ;;  %v5938_v35 = vld [vmem:[%s12457_s1 + $0x690] sm:$0xf]  ;;  %v5875_v47 = vor.u32 %v7851_v34, %v5874_v32  ;;  %v6362_v32 = vld [vmem:[%s12457_s1 + $0x9e0] sm:$0xf]  ;;  %v7973_v34 = vld [vmem:[%s12457_s1 + $0x9e4] sm:$0xf0] }
  0x6a   :  { %4009 = vmatpush.bf16.msrb.mxu2 %v6043_v36  ;;  %v6075_v36 = vor.u32 %v7901_v26, %v6074_v24  ;;  %v7941_v24 = vld [vmem:[%s12457_s1 + $0x8e4] sm:$0xf0]  ;;  %v6298_v26 = vld [vmem:[%s12457_s1 + $0x960] sm:$0xf] }
  0x6b   :  { %4022 = vmatpush.bf16.msrb.mxu3 %v6107_v43  ;;  %v6066_v43 = vld [vmem:[%s12457_s1 + $0x790] sm:$0xf]  ;;  %v6154_v55 = vld [vmem:[%s12457_s1 + $0x840] sm:$0xf] }
  0x6c   :  { %3984 = vmatpush.bf16.msrb.mxu0 %v5907_v50  ;;  %v7865_v50 = vld [vmem:[%s12457_s1 + $0x684] sm:$0xf0] }
  0x6d   :  { %3997 = vmatpush.bf16.msrb.mxu1 %v5971_v51  ;;  %v5939_v51 = vor.u32 %v7867_v37, %v5938_v35  ;;  %v6235_v37 = vor.u32 %v7941_v24, %v6234_v17  ;;  %v6202_v17 = vld [vmem:[%s12457_s1 + $0x8a0] sm:$0xf]  ;;  %v7933_v24 = vld [vmem:[%s12457_s1 + $0x8a4] sm:$0xf0] }
  0x6e   :  { %4010 = vmatpush.bf16.msrb.mxu2 %v6035_v52  ;;  %v6003_v52 = vor.u32 %v7883_v40, %v6002_v39  ;;  %v6162_v40 = vld [vmem:[%s12457_s1 + $0x850] sm:$0xf] }
  0x6f   :  { %4023 = vmatpush.bf16.msrb.mxu3 %v6099_v56  ;;  %v6067_v56 = vor.u32 %v7899_v45, %v6066_v43  ;;  %v7923_v43 = vld [vmem:[%s12457_s1 + $0x854] sm:$0xf0]  ;;  %v6226_v45 = vld [vmem:[%s12457_s1 + $0x8d0] sm:$0xf] }
  0x70   :  { %3985 = vmatpush.bf16.msrb.mxu0 %v5899_v62  ;;  %v6242_v62 = vld [vmem:[%s12457_s1 + $0x8f0] sm:$0xf] }
  0x71   :  { %3998 = vmatpush.bf16.msrb.mxu1 %v5963_v63  ;;  %v5867_v63 = vor.u32 %v7849_v48, %v5866_v46  ;;  %v6363_v46 = vor.u32 %v7973_v34, %v6362_v32  ;;  %v6290_v48 = vld [vmem:[%s12457_s1 + $0x950] sm:$0xf]  ;;  %v6330_v32 = vld [vmem:[%s12457_s1 + $0x9a0] sm:$0xf]  ;;  %v7965_v34 = vld [vmem:[%s12457_s1 + $0x9a4] sm:$0xf0] }
  0x72   :  { %4011 = vmatpush.bf16.msrb.mxu2 %v6027_v0  ;;  %v7943_v0 = vld [vmem:[%s12457_s1 + $0x8f4] sm:$0xf0] }
  0x73   :  { %4024 = vmatpush.bf16.msrb.mxu3 %v6091_v4  ;;  %v5931_v4 = vor.u32 %v7865_v50, %v5930_v49  ;;  %v6243_v13 = vor.u32 %v7943_v0, %v6242_v62  ;;  %v7955_v49 = vld [vmem:[%s12457_s1 + $0x954] sm:$0xf0]  ;;  %v6354_v50 = vld [vmem:[%s12457_s1 + $0x9d0] sm:$0xf]  ;;  %v6346_v62 = vld [vmem:[%s12457_s1 + $0x9c0] sm:$0xf] }
  0x74   :  { %3986 = vmatpush.bf16.msrb.mxu0 %v5891_v10  ;;  %v6059_v10 = vor.u32 %v7897_v58, %v6058_v57  ;;  %v6291_v54 = vor.u32 %v7955_v49, %v6290_v48  ;;  %v6218_v57 = vld [vmem:[%s12457_s1 + $0x8c0] sm:$0xf]  ;;  %v6258_v48 = vld [vmem:[%s12457_s1 + $0x910] sm:$0xf]  ;;  %v7947_v49 = vld [vmem:[%s12457_s1 + $0x914] sm:$0xf0] }
  0x75   :  { %3999 = vmatpush.bf16.msrb.mxu1 %v5955_v11  ;;  %v6179_v11 = vor.u32 %v7927_v61, %v6178_v60  ;;  %v6282_v60 = vld [vmem:[%s12457_s1 + $0x940] sm:$0xf]  ;;  %v7953_v61 = vld [vmem:[%s12457_s1 + $0x944] sm:$0xf0] }
  0x76   :  { %4012 = vmatpush.bf16.msrb.mxu2 %v6019_v12  ;;  %v687_v12 = vunpack.c.h.b16 %v27_v59  ;;  %v7937_v59 = vld [vmem:[%s12457_s1 + $0x8c4] sm:$0xf0]  ;;  %v6283_v2 = vor.u32 %v7953_v61, %v6282_v60  ;;  %v28_v61 = vld [vmem:[%s12458_s0 + $0x40] sm:$0xff] }
  0x77   :  { %4025 = vmatpush.bf16.msrb.mxu3 %v6083_v16  ;;  %v7925_v16 = vld [vmem:[%s12457_s1 + $0x864] sm:$0xf0]  ;;  %v6219_v1 = vor.u32 %v7937_v59, %v6218_v57  ;;  %v6250_v59 = vld [vmem:[%s12457_s1 + $0x900] sm:$0xf] }
  0x78   :  { %3987 = vmatpush.bf16.msrb.mxu0 %v5883_v27  ;;  %v7957_v27 = vld [vmem:[%s12457_s1 + $0x964] sm:$0xf0]  ;;  %v9213_v35 = vpack.c.b16 %v687_v12, %v687_v12 }
  0x79   :  { %4000 = vmatpush.bf16.msrb.mxu1 %v5947_v28  ;;  %v9203_v28 = vpack.c.b16 %v686_v8, %v686_v8  ;;  %v6299_v39 = vor.u32 %v7957_v27, %v6298_v26  ;;  %v6274_v8 = vld [vmem:[%s12457_s1 + $0x930] sm:$0xf]  ;;  %v6266_v26 = vld [vmem:[%s12457_s1 + $0x920] sm:$0xf]  ;;  %v7949_v27 = vld [vmem:[%s12457_s1 + $0x924] sm:$0xf0] }
  0x7a   :  { %4013 = vmatpush.bf16.msrb.mxu2 %v6011_v31  ;;  %v9205_v31 = vpack.c.b16 %v685_v9, %v685_v9  ;;  %v7951_v9 = vld [vmem:[%s12457_s1 + $0x934] sm:$0xf0]  ;;  %v7945_v60 = vld [vmem:[%s12457_s1 + $0x904] sm:$0xf0] }
  0x7b   :  { %4026 = vmatpush.bf16.msrb.mxu3 %v6075_v36  ;;  %v6171_v36 = vor.u32 %v7925_v16, %v6170_v15  ;;  %v6138_v15 = vld [vmem:[%s12457_s1 + $0x820] sm:$0xf]  ;;  %v7917_v16 = vld [vmem:[%s12457_s1 + $0x824] sm:$0xf0] }
  0x7c   :  { %3988 = vmatpush.bf16.msrb.mxu0 %v5875_v47  ;;  %v7939_v47 = vld [vmem:[%s12457_s1 + $0x8d4] sm:$0xf0] }
  0x7d   :  { %4001 = vmatpush.bf16.msrb.mxu1 %v5939_v51  ;;  %v7971_v51 = vld [vmem:[%s12457_s1 + $0x9d4] sm:$0xf0]  ;;  %v6227_v53 = vor.u32 %v7939_v47, %v6226_v45  ;;  %v6194_v45 = vld [vmem:[%s12457_s1 + $0x890] sm:$0xf] }
  0x7e   :  { %4014 = vmatpush.bf16.msrb.mxu2 %v6003_v52  ;;  %v6163_v52 = vor.u32 %v7923_v43, %v6162_v40  ;;  %v6355_v58 = vor.u32 %v7971_v51, %v6354_v50  ;;  %v6130_v40 = vld [vmem:[%s12457_s1 + $0x810] sm:$0xf]  ;;  %v7915_v43 = vld [vmem:[%s12457_s1 + $0x814] sm:$0xf0] }
  0x7f   :  { %4027 = vmatpush.bf16.msrb.mxu3 %v6067_v56  ;;  %v7921_v56 = vld [vmem:[%s12457_s1 + $0x844] sm:$0xf0]  ;;  %v7931_v47 = vld [vmem:[%s12457_s1 + $0x894] sm:$0xf0]  ;;  %v6322_v50 = vld [vmem:[%s12457_s1 + $0x990] sm:$0xf] }
  0x80   :  { %3989 = vmatpush.bf16.msrb.mxu0 %v5867_v63  ;;  %v7969_v63 = vld [vmem:[%s12457_s1 + $0x9c4] sm:$0xf0]  ;;  %v6155_v0 = vor.u32 %v7921_v56, %v6154_v55  ;;  %v7963_v51 = vld [vmem:[%s12457_s1 + $0x994] sm:$0xf0]  ;;  %v6186_v55 = vld [vmem:[%s12457_s1 + $0x880] sm:$0xf]  ;;  %v6195_v57 = vor.u32 %v7931_v47, %v6194_v45 }
  0x81   :  { %4002 = vmatpush.bf16.msrb.mxu1 %v5931_v4  ;;  %v7919_v4 = vld [vmem:[%s12457_s1 + $0x834] sm:$0xf0]  ;;  %v6347_v6 = vor.u32 %v7969_v63, %v6346_v62  ;;  %v7929_v56 = vld [vmem:[%s12457_s1 + $0x884] sm:$0xf0]  ;;  %v6323_v62 = vor.u32 %v7963_v51, %v6322_v50  ;;  %v6314_v63 = vld [vmem:[%s12457_s1 + $0x980] sm:$0xf] }
  0x82   :  { %4015 = vmatpush.bf16.msrb.mxu2 %v5995_v5  ;;  %v6210_v5 = vld [vmem:[%s12457_s1 + $0x8b0] sm:$0xf]  ;;  %v6147_v12 = vor.u32 %v7919_v4, %v6146_v3  ;;  %v7991_v3 = vld [vmem:[%s12457_s1 + $0xa74] sm:$0xf0]  ;;  %v6618_v47 = vld [vmem:[%s12457_s1 + $0xbe0] sm:$0xf] }
  0x83   :  { %4028 = vmatpush.bf16.msrb.mxu3 %v6059_v10  ;;  %3990 = vmatmul.bf16.vlgmr.msrb.gmra.mxu0 %v9192_v23  ;;  %v6338_v10 = vld [vmem:[%s12457_s1 + $0x9b0] sm:$0xf] }
  0x84   :  { %4034 = vmatpush.bf16.msra.mxu0 %v6179_v11  ;;  %4003 = vmatmul.bf16.vlgmr.msrb.gmra.mxu1 %v9205_v31  ;;  %v7967_v11 = vld [vmem:[%s12457_s1 + $0x9b4] sm:$0xf0]  ;;  %v6498_v4 = vld [vmem:[%s12457_s1 + $0xaf0] sm:$0xf] }
  0x85   :  { %4047 = vmatpush.bf16.msra.mxu1 %v6243_v13  ;;  %4016 = vmatmul.bf16.vlgmr.msrb.gmra.mxu2 %v9203_v28  ;;  %v6211_v13 = vor.u32 %v7935_v7, %v6210_v5  ;;  %v6562_v7 = vld [vmem:[%s12457_s1 + $0xb70] sm:$0xf] }
  0x86   :  { %4060 = vmatpush.bf16.msra.mxu2 %v6307_v14  ;;  %4029 = vmatmul.bf16.vlgmr.msrb.gmra.mxu3 %v9213_v35  ;;  %v6275_v14 = vor.u32 %v7951_v9, %v6274_v8  ;;  %v8023_v8 = vld [vmem:[%s12457_s1 + $0xb74] sm:$0xf0]  ;;  %v688_v9 = vunpack.c.l.b16 %v28_v61 }
  0x87   :  { %4073 = vmatpush.bf16.msra.mxu3 %v6371_v21  ;;  %v6339_v21 = vor.u32 %v7967_v11, %v6338_v10  ;;  %v6187_v10 = vor.u32 %v7929_v56, %v6186_v55  ;;  %v6251_v11 = vor.u32 %v7945_v60, %v6250_v59  ;;  %v6482_v55 = vld [vmem:[%s12457_s1 + $0xad0] sm:$0xf]  ;;  %v8019_v59 = vld [vmem:[%s12457_s1 + $0xb54] sm:$0xf0] }
  0x88   :  { %4035 = vmatpush.bf16.msra.mxu0 %v6171_v36  ;;  %v6139_v36 = vor.u32 %v7917_v16, %v6138_v15  ;;  %v689_v15 = vunpack.c.h.b16 %v28_v61  ;;  %v6610_v60 = vld [vmem:[%s12457_s1 + $0xbd0] sm:$0xf]  ;;  %v8035_v61 = vld [vmem:[%s12457_s1 + $0xbd4] sm:$0xf0] }
  0x89   :  { %4048 = vmatpush.bf16.msra.mxu1 %v6235_v37  ;;  %v6203_v37 = vor.u32 %v7933_v24, %v6202_v17 }
  0x8a   :  { %4061 = vmatpush.bf16.msra.mxu2 %v6299_v39  ;;  %v6267_v39 = vor.u32 %v7949_v27, %v6266_v26  ;;  %v6563_v26 = vor.u32 %v8023_v8, %v6562_v7  ;;  %v6426_v27 = vld [vmem:[%s12457_s1 + $0xa60] sm:$0xf]  ;;  %v8017_v7 = vld [vmem:[%s12457_s1 + $0xb44] sm:$0xf0] }
  0x8b   :  { %4074 = vmatpush.bf16.msra.mxu3 %v6363_v46  ;;  %v6331_v46 = vor.u32 %v7965_v34, %v6330_v32  ;;  %v7989_v32 = vld [vmem:[%s12457_s1 + $0xa64] sm:$0xf0]  ;;  %v6490_v34 = vld [vmem:[%s12457_s1 + $0xae0] sm:$0xf] }
  0x8c   :  { %4036 = vmatpush.bf16.msra.mxu0 %v6163_v52  ;;  %v6122_v52 = vld [vmem:[%s12457_s1 + $0x800] sm:$0xf]  ;;  %v6427_v50 = vor.u32 %v7989_v32, %v6426_v27  ;;  %v6594_v27 = vld [vmem:[%s12457_s1 + $0xbb0] sm:$0xf]  ;;  %v8031_v32 = vld [vmem:[%s12457_s1 + $0xbb4] sm:$0xf0] }
  0x8d   :  { %4049 = vmatpush.bf16.msra.mxu1 %v6227_v53  ;;  %v6131_v53 = vor.u32 %v7915_v43, %v6130_v40  ;;  %v6554_v40 = vld [vmem:[%s12457_s1 + $0xb60] sm:$0xf]  ;;  %v8021_v43 = vld [vmem:[%s12457_s1 + $0xb64] sm:$0xf0] }
  0x8e   :  { %4062 = vmatpush.bf16.msra.mxu2 %v6291_v54  ;;  %v7913_v54 = vld [vmem:[%s12457_s1 + $0x804] sm:$0xf0]  ;;  %v6602_v8 = vld [vmem:[%s12457_s1 + $0xbc0] sm:$0xf] }
  0x8f   :  { %4075 = vmatpush.bf16.msra.mxu3 %v6355_v58  ;;  %v6259_v58 = vor.u32 %v7947_v49, %v6258_v48  ;;  %v6123_v5 = vor.u32 %v7913_v54, %v6122_v52  ;;  %v8037_v48 = vld [vmem:[%s12457_s1 + $0xbe4] sm:$0xf0]  ;;  %v6555_v52 = vor.u32 %v8021_v43, %v6554_v40  ;;  %v7987_v54 = vld [vmem:[%s12457_s1 + $0xa54] sm:$0xf0] }
  0x90   :  { %4037 = vmatpush.bf16.msra.mxu0 %v6155_v0  ;;  %v7961_v0 = vld [vmem:[%s12457_s1 + $0x984] sm:$0xf0]  ;;  %v6619_v56 = vor.u32 %v8037_v48, %v6618_v47  ;;  %v6458_v47 = vld [vmem:[%s12457_s1 + $0xaa0] sm:$0xf] }
  0x91   :  { %4050 = vmatpush.bf16.msra.mxu1 %v6219_v1  ;;  %v29_v1 = vld [vmem:[%s12458_s0 + $0x48] sm:$0xff]  ;;  %v6315_v16 = vor.u32 %v7961_v0, %v6314_v63 }
  0x92   :  { %4063 = vmatpush.bf16.msra.mxu2 %v6283_v2  ;;  %v6434_v2 = vld [vmem:[%s12457_s1 + $0xa70] sm:$0xf]  ;;  %v7981_v43 = vld [vmem:[%s12457_s1 + $0xa24] sm:$0xf0] }
  0x93   :  { %4076 = vmatpush.bf16.msra.mxu3 %v6347_v6  ;;  %v8007_v6 = vld [vmem:[%s12457_s1 + $0xaf4] sm:$0xf0]  ;;  %v6435_v17 = vor.u32 %v7991_v3, %v6434_v2  ;;  %v7985_v2 = vld [vmem:[%s12457_s1 + $0xa44] sm:$0xf0]  ;;  %v6474_v3 = vld [vmem:[%s12457_s1 + $0xac0] sm:$0xf] }
  0x94   :  { %4038 = vmatpush.bf16.msra.mxu0 %v6147_v12  ;;  %v6626_v12 = vld [vmem:[%s12457_s1 + $0xbf0] sm:$0xf]  ;;  %v6499_v24 = vor.u32 %v8007_v6, %v6498_v4  ;;  %v6611_v4 = vor.u32 %v8035_v61, %v6610_v60  ;;  %v6538_v6 = vld [vmem:[%s12457_s1 + $0xb40] sm:$0xf]  ;;  %v7979_v61 = vld [vmem:[%s12457_s1 + $0xa14] sm:$0xf0] }
  0x95   :  { %4051 = vmatpush.bf16.msra.mxu1 %v6211_v13  ;;  %v8039_v13 = vld [vmem:[%s12457_s1 + $0xbf4] sm:$0xf0]  ;;  %v6386_v60 = vld [vmem:[%s12457_s1 + $0xa10] sm:$0xf] }
  0x96   :  { %4064 = vmatpush.bf16.msra.mxu2 %v6275_v14  ;;  %v690_v14 = vunpack.c.l.b16 %v29_v1 }
  0x97   :  { %4077 = vmatpush.bf16.msra.mxu3 %v6339_v21  ;;  %v691_v21 = vunpack.c.h.b16 %v29_v1  ;;  %v6410_v1 = vld [vmem:[%s12457_s1 + $0xa40] sm:$0xf] }
  0x98   :  { %4039 = vmatpush.bf16.msra.mxu0 %v6139_v36  ;;  %v6627_v36 = vor.u32 %v8039_v13, %v6626_v12  ;;  %v9413_v45 = vpack.c.b16 %v690_v14, %v690_v14  ;;  %v6539_v13 = vor.u32 %v8017_v7, %v6538_v6  ;;  %v7983_v14 = vld [vmem:[%s12457_s1 + $0xa34] sm:$0xf0]  ;;  %v6378_v7 = vld [vmem:[%s12457_s1 + $0xa00] sm:$0xf] }
  0x99   :  { %4052 = vmatpush.bf16.msra.mxu1 %v6203_v37  ;;  %v9402_v37 = vpack.c.b16 %v688_v9, %v688_v9  ;;  %v9423_v49 = vpack.c.b16 %v691_v21, %v691_v21  ;;  %v8033_v9 = vld [vmem:[%s12457_s1 + $0xbc4] sm:$0xf0]  ;;  %v6530_v21 = vld [vmem:[%s12457_s1 + $0xb30] sm:$0xf]  ;;  %v8027_v6 = vld [vmem:[%s12457_s1 + $0xb94] sm:$0xf0] }
  0x9a   :  { %4065 = vmatpush.bf16.msra.mxu2 %v6267_v39  ;;  %v8005_v39 = vld [vmem:[%s12457_s1 + $0xae4] sm:$0xf0] }
  0x9b   :  { %4078 = vmatpush.bf16.msra.mxu3 %v6331_v46  ;;  %v9415_v46 = vpack.c.b16 %v689_v15, %v689_v15  ;;  %v6491_v51 = vor.u32 %v8005_v39, %v6490_v34  ;;  %v6466_v15 = vld [vmem:[%s12457_s1 + $0xab0] sm:$0xf] }
  0x9c   :  { %4040 = vmatpush.bf16.msra.mxu0 %v6131_v53  ;;  %v6418_v53 = vld [vmem:[%s12457_s1 + $0xa50] sm:$0xf] }
  0x9d   :  { %4053 = vmatpush.bf16.msra.mxu1 %v6195_v57  ;;  %v8003_v57 = vld [vmem:[%s12457_s1 + $0xad4] sm:$0xf0] }
  0x9e   :  { %4066 = vmatpush.bf16.msra.mxu2 %v6259_v58  ;;  %v6546_v58 = vld [vmem:[%s12457_s1 + $0xb50] sm:$0xf]  ;;  %v6483_v63 = vor.u32 %v8003_v57, %v6482_v55  ;;  %v8029_v55 = vld [vmem:[%s12457_s1 + $0xba4] sm:$0xf0] }
  0x9f   :  { %4079 = vmatpush.bf16.msra.mxu3 %v6323_v62  ;;  %v6419_v62 = vor.u32 %v7987_v54, %v6418_v53  ;;  %v6547_v0 = vor.u32 %v8019_v59, %v6546_v58  ;;  %v8013_v53 = vld [vmem:[%s12457_s1 + $0xb24] sm:$0xf0]  ;;  %v6586_v54 = vld [vmem:[%s12457_s1 + $0xba0] sm:$0xf] }
  0xa0   :  { %4041 = vmatpush.bf16.msra.mxu0 %v6123_v5  ;;  %v8001_v5 = vld [vmem:[%s12457_s1 + $0xac4] sm:$0xf0]  ;;  %v3835_v57 = vpop.f32.mrf.mxu0 }
  0xa1   :  { %4054 = vmatpush.bf16.msra.mxu1 %v6187_v10  ;;  %v6411_v10 = vor.u32 %v7985_v2, %v6410_v1  ;;  %v6475_v12 = vor.u32 %v8001_v5, %v6474_v3  ;;  %v6587_v1 = vor.u32 %v8029_v55, %v6586_v54  ;;  %v7995_v2 = vld [vmem:[%s12457_s1 + $0xa94] sm:$0xf0]  ;;  %v6514_v3 = vld [vmem:[%s12457_s1 + $0xb10] sm:$0xf] }
  0xa2   :  { %4067 = vmatpush.bf16.msra.mxu2 %v6251_v11  ;;  %v6402_v11 = vld [vmem:[%s12457_s1 + $0xa30] sm:$0xf] }
  0xa3   :  { %4080 = vmatpush.bf16.msra.mxu3 %v6315_v16  ;;  %4042 = vmatmul.bf16.vlgmr.msra.gmra.mxu0 %v9402_v37  ;;  %v7999_v16 = vld [vmem:[%s12457_s1 + $0xab4] sm:$0xf0]  ;;  %v6403_v34 = vor.u32 %v7983_v14, %v6402_v11  ;;  %v6578_v5 = vld [vmem:[%s12457_s1 + $0xb90] sm:$0xf]  ;;  %v6442_v11 = vld [vmem:[%s12457_s1 + $0xa80] sm:$0xf] }
  0xa4   :  { %4086 = vmatpush.bf16.msrb.mxu0 %v6435_v17  ;;  %4055 = vmatmul.bf16.vlgmr.msra.gmra.mxu1 %v9415_v46  ;;  %v6603_v17 = vor.u32 %v8033_v9, %v6602_v8  ;;  %v6467_v39 = vor.u32 %v7999_v16, %v6466_v15  ;;  %v6387_v9 = vor.u32 %v7979_v61, %v6386_v60  ;;  %v6506_v15 = vld [vmem:[%s12457_s1 + $0xb00] sm:$0xf]  ;;  %v8009_v16 = vld [vmem:[%s12457_s1 + $0xb04] sm:$0xf0] }
  0xa5   :  { %4099 = vmatpush.bf16.msrb.mxu1 %v6499_v24  ;;  %4068 = vmatmul.bf16.vlgmr.msra.gmra.mxu2 %v9413_v45  ;;  %v8015_v24 = vld [vmem:[%s12457_s1 + $0xb34] sm:$0xf0] }
  0xa6   :  { %4112 = vmatpush.bf16.msrb.mxu2 %v6563_v26  ;;  %4081 = vmatmul.bf16.vlgmr.msra.gmra.mxu3 %v9423_v49  ;;  %v647_v26 = vld [vmem:[%s12459_s2] sm:$0x3]  ;;  %v6531_v40 = vor.u32 %v8015_v24, %v6530_v21  ;;  %v6579_v24 = vor.u32 %v8027_v6, %v6578_v5 }
  0xa7   :  { %4125 = vmatpush.bf16.msrb.mxu3 %v6627_v36  ;;  %v6394_v36 = vld [vmem:[%s12457_s1 + $0xa20] sm:$0xf]  ;;  %v649_v48 = vperm.slane %v647_v26, 0 }
  0xa8   :  { %4087 = vmatpush.bf16.msrb.mxu0 %v6427_v50  ;;  %v6595_v50 = vor.u32 %v8031_v32, %v6594_v27  ;;  %v3861_v21 = vpop.f32.mrf.mxu2  ;;  %v6570_v26 = vld [vmem:[%s12457_s1 + $0xb80] sm:$0xf]  ;;  %v8025_v27 = vld [vmem:[%s12457_s1 + $0xb84] sm:$0xf0]  ;;  %v31_v32 = vld [vmem:[%s12458_s0 + $0x58] sm:$0xff]  ;;  %v3837_v54 = vpop.f32.mrf.mxu0 }
  0xa9   :  { %4100 = vmatpush.bf16.msrb.mxu1 %v6491_v51  ;;  %v7997_v51 = vld [vmem:[%s12457_s1 + $0xaa4] sm:$0xf0]  ;;  %v6746_v5 = vld [vmem:[%s12457_s1 + $0xce0] sm:$0xf] }
  0xaa   :  { %4113 = vmatpush.bf16.msrb.mxu2 %v6555_v52  ;;  %v6522_v52 = vld [vmem:[%s12457_s1 + $0xb20] sm:$0xf]  ;;  %v6459_v58 = vor.u32 %v7997_v51, %v6458_v47  ;;  %v8087_v51 = vld [vmem:[%s12457_s1 + $0xd74] sm:$0xf0] }
  0xab   :  { %4126 = vmatpush.bf16.msrb.mxu3 %v6619_v56  ;;  %v6395_v56 = vor.u32 %v7981_v43, %v6394_v36  ;;  %v6523_v59 = vor.u32 %v8013_v53, %v6522_v52  ;;  %v3874_v36 = vpop.f32.mrf.mxu3  ;;  %v6754_v43 = vld [vmem:[%s12457_s1 + $0xcf0] sm:$0xf]  ;;  %v6666_v54 = vld [vmem:[%s12457_s1 + $0xc40] sm:$0xf] }
  0xac   :  { %4088 = vmatpush.bf16.msrb.mxu0 %v6419_v62  ;;  %v6450_v62 = vld [vmem:[%s12457_s1 + $0xa90] sm:$0xf] }
  0xad   :  { %4101 = vmatpush.bf16.msrb.mxu1 %v6483_v63  ;;  %v3836_v63 = vadd.f32 %v3835_v57, %v649_v48  ;;  %v8071_v48 = vld [vmem:[%s12457_s1 + $0xcf4] sm:$0xf0]  ;;  %v6882_v57 = vld [vmem:[%s12457_s1 + $0xdf0] sm:$0xf] }
  0xae   :  { %4114 = vmatpush.bf16.msrb.mxu2 %v6547_v0  ;;  %v3848_v0 = vpop.f32.mrf.mxu1 }
  0xaf   :  { %4127 = vmatpush.bf16.msrb.mxu3 %v6611_v4  ;;  %v8011_v4 = vld [vmem:[%s12457_s1 + $0xb14] sm:$0xf0]  ;;  %v3849_v8 = vadd.f32 %v3848_v0, %v3836_v63  ;;  %v695_v0 = vunpack.c.h.b16 %v31_v32 }
  0xb0   :  { %4089 = vmatpush.bf16.msrb.mxu0 %v6411_v10  ;;  %v7977_v10 = vld [vmem:[%s12457_s1 + $0xa04] sm:$0xf0]  ;;  %v6515_v14 = vor.u32 %v8011_v4, %v6514_v3  ;;  %v6682_v3 = vld [vmem:[%s12457_s1 + $0xc60] sm:$0xf] }
  0xb1   :  { %4102 = vmatpush.bf16.msrb.mxu1 %v6475_v12  ;;  %v7993_v12 = vld [vmem:[%s12457_s1 + $0xa84] sm:$0xf0]  ;;  %v6379_v47 = vor.u32 %v7977_v10, %v6378_v7 }
  0xb2   :  { %4115 = vmatpush.bf16.msrb.mxu2 %v6539_v13  ;;  %v6451_v13 = vor.u32 %v7995_v2, %v6450_v62  ;;  %v6443_v55 = vor.u32 %v7993_v12, %v6442_v11  ;;  %v6571_v62 = vor.u32 %v8025_v27, %v6570_v26  ;;  %v8053_v4 = vld [vmem:[%s12457_s1 + $0xc64] sm:$0xf0]  ;;  %v6674_v27 = vld [vmem:[%s12457_s1 + $0xc50] sm:$0xf] }
  0xb3   :  { %4128 = vmatpush.bf16.msrb.mxu3 %v6603_v17  ;;  %v30_v17 = vld [vmem:[%s12458_s0 + $0x50] sm:$0xff]  ;;  %v8085_v10 = vld [vmem:[%s12457_s1 + $0xd64] sm:$0xf0] }
  0xb4   :  { %4090 = vmatpush.bf16.msrb.mxu0 %v6403_v34  ;;  %v3862_v34 = vadd.f32 %v3861_v21, %v3849_v8  ;;  %v692_v52 = vunpack.c.l.b16 %v30_v17  ;;  %v693_v60 = vunpack.c.h.b16 %v30_v17  ;;  %v8069_v8 = vld [vmem:[%s12457_s1 + $0xce4] sm:$0xf0]  ;;  %v6683_v17 = vor.u32 %v8053_v4, %v6682_v3  ;;  %v3876_v21 = vpop.f32.mrf.mxu3  ;;  %v6658_v3 = vld [vmem:[%s12457_s1 + $0xc30] sm:$0xf]  ;;  %v8047_v4 = vld [vmem:[%s12457_s1 + $0xc34] sm:$0xf0] }
  0xb5   :  { %4103 = vmatpush.bf16.msrb.mxu1 %v6467_v39  ;;  %v6690_v39 = vld [vmem:[%s12457_s1 + $0xc70] sm:$0xf]  ;;  %v6659_v21 = vor.u32 %v8047_v4, %v6658_v3  ;;  %v8091_v4 = vld [vmem:[%s12457_s1 + $0xd94] sm:$0xf0] }
  0xb6   :  { %4116 = vmatpush.bf16.msrb.mxu2 %v6531_v40  ;;  %v8055_v40 = vld [vmem:[%s12457_s1 + $0xc74] sm:$0xf0]  ;;  %v9600_v53 = vadd.f32 %v3874_v36, %v3862_v34  ;;  %v3850_v61 = vpop.f32.mrf.mxu1  ;;  %v9617_v7 = vpack.c.b16 %v692_v52, %v692_v52  ;;  %v9630_v12 = vpack.c.b16 %v693_v60, %v693_v60  ;;  %v6738_v34 = vld [vmem:[%s12457_s1 + $0xcd0] sm:$0xf]  ;;  %v8081_v60 = vld [vmem:[%s12457_s1 + $0xd44] sm:$0xf0] }
  0xb7   :  { %4129 = vmatpush.bf16.msrb.mxu3 %v6595_v50  ;;  %v6818_v50 = vld [vmem:[%s12457_s1 + $0xd70] sm:$0xf]  ;;  %v6691_v63 = vor.u32 %v8055_v40, %v6690_v39  ;;  %v8067_v39 = vld [vmem:[%s12457_s1 + $0xcd4] sm:$0xf0]  ;;  %v6858_v61 = vld [vmem:[%s12457_s1 + $0xdc0] sm:$0xf] }
  0xb8   :  { %4091 = vmatpush.bf16.msrb.mxu0 %v6395_v56  ;;  %v6507_v56 = vor.u32 %v8009_v16, %v6506_v15  ;;  %v6819_v2 = vor.u32 %v8087_v51, %v6818_v50  ;;  %v3863_v15 = vpop.f32.mrf.mxu2  ;;  %v9638_v16 = vpack.c.b16 %v695_v0, %v695_v0  ;;  %v6802_v40 = vld [vmem:[%s12457_s1 + $0xd50] sm:$0xf]  ;;  %v6739_v51 = vor.u32 %v8067_v39, %v6738_v34  ;;  %v6714_v34 = vld [vmem:[%s12457_s1 + $0xca0] sm:$0xf] }
  0xb9   :  { %4104 = vmatpush.bf16.msrb.mxu1 %v6459_v58  ;;  %v8103_v58 = vld [vmem:[%s12457_s1 + $0xdf4] sm:$0xf0]  ;;  %v6850_v15 = vld [vmem:[%s12457_s1 + $0xdb0] sm:$0xf] }
  0xba   :  { %4117 = vmatpush.bf16.msrb.mxu2 %v6523_v59  ;;  %v694_v59 = vunpack.c.l.b16 %v31_v32  ;;  %v6883_v6 = vor.u32 %v8103_v58, %v6882_v57  ;;  %v8051_v32 = vld [vmem:[%s12457_s1 + $0xc54] sm:$0xf0]  ;;  %v8065_v58 = vld [vmem:[%s12457_s1 + $0xcc4] sm:$0xf0]  ;;  %v6834_v3 = vld [vmem:[%s12457_s1 + $0xd90] sm:$0xf] }
  0xbb   :  { %4130 = vmatpush.bf16.msrb.mxu3 %v6587_v1  ;;  %v6755_v1 = vor.u32 %v8071_v48, %v6754_v43  ;;  %v8083_v43 = vld [vmem:[%s12457_s1 + $0xd54] sm:$0xf0]  ;;  %v6675_v50 = vor.u32 %v8051_v32, %v6674_v27  ;;  %v6650_v27 = vld [vmem:[%s12457_s1 + $0xc20] sm:$0xf]  ;;  %v8045_v32 = vld [vmem:[%s12457_s1 + $0xc24] sm:$0xf0] }
  0xbc   :  { %4092 = vmatpush.bf16.msrb.mxu0 %v6387_v9  ;;  %v6810_v9 = vld [vmem:[%s12457_s1 + $0xd60] sm:$0xf]  ;;  %v9628_v11 = vpack.c.b16 %v694_v59, %v694_v59  ;;  %v8099_v48 = vld [vmem:[%s12457_s1 + $0xdd4] sm:$0xf0]  ;;  %v6803_v52 = vor.u32 %v8083_v43, %v6802_v40  ;;  %v8061_v40 = vld [vmem:[%s12457_s1 + $0xca4] sm:$0xf0] }
  0xbd   :  { %4105 = vmatpush.bf16.msrb.mxu1 %v6451_v13  ;;  %v6874_v13 = vld [vmem:[%s12457_s1 + $0xde0] sm:$0xf]  ;;  %v6811_v26 = vor.u32 %v8085_v10, %v6810_v9  ;;  %v8063_v10 = vld [vmem:[%s12457_s1 + $0xcb4] sm:$0xf0] }
  0xbe   :  { %4118 = vmatpush.bf16.msrb.mxu2 %v6515_v14  ;;  %v8101_v14 = vld [vmem:[%s12457_s1 + $0xde4] sm:$0xf0]  ;;  %v6794_v59 = vld [vmem:[%s12457_s1 + $0xd40] sm:$0xf] }
  0xbf   :  { %4131 = vmatpush.bf16.msrb.mxu3 %v6579_v24  ;;  %v6747_v24 = vor.u32 %v8069_v8, %v6746_v5  ;;  %v6875_v36 = vor.u32 %v8101_v14, %v6874_v13  ;;  %v6722_v5 = vld [vmem:[%s12457_s1 + $0xcb0] sm:$0xf]  ;;  %v8079_v14 = vld [vmem:[%s12457_s1 + $0xd34] sm:$0xf0]  ;;  %v6778_v43 = vld [vmem:[%s12457_s1 + $0xd20] sm:$0xf] }
  0xc0   :  { %4093 = vmatpush.bf16.msrb.mxu0 %v6379_v47  ;;  %v6866_v47 = vld [vmem:[%s12457_s1 + $0xdd0] sm:$0xf]  ;;  %v3887_v0 = vpop.f32.mrf.mxu0 }
  0xc1   :  { %4106 = vmatpush.bf16.msrb.mxu1 %v6443_v55  ;;  %v8049_v55 = vld [vmem:[%s12457_s1 + $0xc44] sm:$0xf0]  ;;  %v6867_v57 = vor.u32 %v8099_v48, %v6866_v47  ;;  %v3900_v8 = vpop.f32.mrf.mxu1  ;;  %v6786_v13 = vld [vmem:[%s12457_s1 + $0xd30] sm:$0xf] }
  0xc2   :  { %4119 = vmatpush.bf16.msrb.mxu2 %v6507_v56  ;;  %v6730_v56 = vld [vmem:[%s12457_s1 + $0xcc0] sm:$0xf]  ;;  %v8077_v47 = vld [vmem:[%s12457_s1 + $0xd24] sm:$0xf0] }
  0xc3   :  { %4132 = vmatpush.bf16.msrb.mxu3 %v6571_v62  ;;  %4094 = vmatmul.bf16.vlgmr.msrb.gmra.mxu0 %v9617_v7  ;;  %v8097_v62 = vld [vmem:[%s12457_s1 + $0xdc4] sm:$0xf0] }
  0xc4   :  { %4138 = vmatpush.bf16.msra.mxu0 %v6691_v63  ;;  %4107 = vmatmul.bf16.vlgmr.msrb.gmra.mxu1 %v9630_v12  ;;  %v6667_v63 = vor.u32 %v8049_v55, %v6666_v54  ;;  %v6859_v9 = vor.u32 %v8097_v62, %v6858_v61  ;;  %v6651_v54 = vor.u32 %v8045_v32, %v6650_v27  ;;  %v6706_v61 = vld [vmem:[%s12457_s1 + $0xc90] sm:$0xf]  ;;  %v8089_v27 = vld [vmem:[%s12457_s1 + $0xd84] sm:$0xf0] }
  0xc5   :  { %4151 = vmatpush.bf16.msra.mxu1 %v6755_v1  ;;  %4120 = vmatmul.bf16.vlgmr.msrb.gmra.mxu2 %v9628_v11  ;;  %v6731_v1 = vor.u32 %v8065_v58, %v6730_v56  ;;  %v6779_v58 = vor.u32 %v8077_v47, %v6778_v43  ;;  %v33_v32 = vld [vmem:[%s12458_s0 + $0x68] sm:$0xff]  ;;  %v8135_v47 = vld [vmem:[%s12457_s1 + $0xef4] sm:$0xf0] }
  0xc6   :  { %4164 = vmatpush.bf16.msra.mxu2 %v6819_v2  ;;  %4133 = vmatmul.bf16.vlgmr.msrb.gmra.mxu3 %v9638_v16  ;;  %v6795_v2 = vor.u32 %v8081_v60, %v6794_v59  ;;  %v6642_v59 = vld [vmem:[%s12457_s1 + $0xc10] sm:$0xf]  ;;  %v8043_v60 = vld [vmem:[%s12457_s1 + $0xc14] sm:$0xf0] }
  0xc7   :  { %4177 = vmatpush.bf16.msra.mxu3 %v6883_v6  ;;  %v3888_v6 = vadd.f32 %v3887_v0, %v9600_v53  ;;  %v8095_v53 = vld [vmem:[%s12457_s1 + $0xdb4] sm:$0xf0] }
  0xc8   :  { %4139 = vmatpush.bf16.msra.mxu0 %v6683_v17  ;;  %v6851_v39 = vor.u32 %v8095_v53, %v6850_v15  ;;  %v3889_v56 = vpop.f32.mrf.mxu0  ;;  %v8059_v0 = vld [vmem:[%s12457_s1 + $0xc94] sm:$0xf0]  ;;  %v6762_v15 = vld [vmem:[%s12457_s1 + $0xd00] sm:$0xf]  ;;  %v8073_v53 = vld [vmem:[%s12457_s1 + $0xd04] sm:$0xf0] }
  0xc9   :  { %4152 = vmatpush.bf16.msra.mxu1 %v6747_v24  ;;  %v3901_v17 = vadd.f32 %v3900_v8, %v3888_v6  ;;  %v6723_v24 = vor.u32 %v8063_v10, %v6722_v5  ;;  %v3902_v62 = vpop.f32.mrf.mxu1  ;;  %v6634_v5 = vld [vmem:[%s12457_s1 + $0xc00] sm:$0xf]  ;;  %v6643_v6 = vor.u32 %v8043_v60, %v6642_v59  ;;  %v8041_v8 = vld [vmem:[%s12457_s1 + $0xc04] sm:$0xf0]  ;;  %v7138_v56 = vld [vmem:[%s12457_s1 + $0xff0] sm:$0xf] }
  0xca   :  { %4165 = vmatpush.bf16.msra.mxu2 %v6811_v26  ;;  %v6787_v26 = vor.u32 %v8079_v14, %v6786_v13  ;;  %v8057_v10 = vld [vmem:[%s12457_s1 + $0xc84] sm:$0xf0]  ;;  %v6707_v13 = vor.u32 %v8059_v0, %v6706_v61  ;;  %v6635_v43 = vor.u32 %v8041_v8, %v6634_v5  ;;  %v699_v62 = vunpack.c.h.b16 %v33_v32  ;;  %v7066_v8 = vld [vmem:[%s12457_s1 + $0xf60] sm:$0xf] }
  0xcb   :  { %4178 = vmatpush.bf16.msra.mxu3 %v6875_v36  ;;  %v3913_v36 = vpop.f32.mrf.mxu2 }
  0xcc   :  { %4140 = vmatpush.bf16.msra.mxu0 %v6675_v50  ;;  %v3914_v48 = vadd.f32 %v3913_v36, %v3901_v17  ;;  %v3926_v50 = vpop.f32.mrf.mxu3  ;;  %v32_v17 = vld [vmem:[%s12458_s0 + $0x60] sm:$0xff]  ;;  %v6946_v36 = vld [vmem:[%s12457_s1 + $0xe70] sm:$0xf] }
  0xcd   :  { %4153 = vmatpush.bf16.msra.mxu1 %v6739_v51  ;;  %v6842_v51 = vld [vmem:[%s12457_s1 + $0xda0] sm:$0xf]  ;;  %v697_v59 = vunpack.c.h.b16 %v32_v17 }
  0xce   :  { %4166 = vmatpush.bf16.msra.mxu2 %v6803_v52  ;;  %v8093_v52 = vld [vmem:[%s12457_s1 + $0xda4] sm:$0xf0]  ;;  %v9741_v55 = vadd.f32 %v3926_v50, %v3914_v48  ;;  %v7074_v48 = vld [vmem:[%s12457_s1 + $0xf70] sm:$0xf]  ;;  %v8151_v50 = vld [vmem:[%s12457_s1 + $0xf74] sm:$0xf0] }
  0xcf   :  { %4179 = vmatpush.bf16.msra.mxu3 %v6867_v57  ;;  %v6715_v57 = vor.u32 %v8061_v40, %v6714_v34  ;;  %v7010_v40 = vld [vmem:[%s12457_s1 + $0xef0] sm:$0xf]  ;;  %v7075_v0 = vor.u32 %v8151_v50, %v7074_v48 }
  0xd0   :  { %4141 = vmatpush.bf16.msra.mxu0 %v6667_v63  ;;  %v6843_v63 = vor.u32 %v8093_v52, %v6842_v51  ;;  %v696_v51 = vunpack.c.l.b16 %v32_v17 }
  0xd1   :  { %4154 = vmatpush.bf16.msra.mxu1 %v6731_v1  ;;  %v6770_v1 = vld [vmem:[%s12457_s1 + $0xd10] sm:$0xf] }
  0xd2   :  { %4167 = vmatpush.bf16.msra.mxu2 %v6795_v2  ;;  %v8075_v2 = vld [vmem:[%s12457_s1 + $0xd14] sm:$0xf0]  ;;  %v9830_v5 = vpack.c.b16 %v696_v51, %v696_v51 }
  0xd3   :  { %4180 = vmatpush.bf16.msra.mxu3 %v6859_v9  ;;  %v6698_v9 = vld [vmem:[%s12457_s1 + $0xc80] sm:$0xf]  ;;  %v6771_v14 = vor.u32 %v8075_v2, %v6770_v1  ;;  %v8117_v2 = vld [vmem:[%s12457_s1 + $0xe64] sm:$0xf0] }
  0xd4   :  { %4142 = vmatpush.bf16.msra.mxu0 %v6659_v21  ;;  %v3915_v21 = vpop.f32.mrf.mxu2  ;;  %v3928_v34 = vpop.f32.mrf.mxu3  ;;  %v6699_v52 = vor.u32 %v8057_v10, %v6698_v9  ;;  %v6938_v1 = vld [vmem:[%s12457_s1 + $0xe60] sm:$0xf]  ;;  %v8149_v9 = vld [vmem:[%s12457_s1 + $0xf64] sm:$0xf0] }
  0xd5   :  { %4155 = vmatpush.bf16.msra.mxu1 %v6723_v24  ;;  %v6835_v24 = vor.u32 %v8091_v4, %v6834_v3  ;;  %v7002_v3 = vld [vmem:[%s12457_s1 + $0xee0] sm:$0xf]  ;;  %v6939_v17 = vor.u32 %v8117_v2, %v6938_v1 }
  0xd6   :  { %4168 = vmatpush.bf16.msra.mxu2 %v6787_v26  ;;  %v6826_v26 = vld [vmem:[%s12457_s1 + $0xd80] sm:$0xf] }
  0xd7   :  { %4181 = vmatpush.bf16.msra.mxu3 %v6851_v39  ;;  %v8119_v39 = vld [vmem:[%s12457_s1 + $0xe74] sm:$0xf0]  ;;  %v6827_v60 = vor.u32 %v8089_v27, %v6826_v26  ;;  %v6930_v26 = vld [vmem:[%s12457_s1 + $0xe50] sm:$0xf] }
  0xd8   :  { %4143 = vmatpush.bf16.msra.mxu0 %v6651_v54  ;;  %v6763_v54 = vor.u32 %v8073_v53, %v6762_v15  ;;  %v6947_v61 = vor.u32 %v8119_v39, %v6946_v36  ;;  %v8165_v15 = vld [vmem:[%s12457_s1 + $0xfe4] sm:$0xf0]  ;;  %v9851_v53 = vpack.c.b16 %v699_v62, %v699_v62  ;;  %v8115_v27 = vld [vmem:[%s12457_s1 + $0xe54] sm:$0xf0]  ;;  %v7058_v39 = vld [vmem:[%s12457_s1 + $0xf50] sm:$0xf] }
  0xd9   :  { %4156 = vmatpush.bf16.msra.mxu1 %v6715_v57  ;;  %v8167_v57 = vld [vmem:[%s12457_s1 + $0xff4] sm:$0xf0]  ;;  %v6931_v48 = vor.u32 %v8115_v27, %v6930_v26  ;;  %v7114_v62 = vld [vmem:[%s12457_s1 + $0xfc0] sm:$0xf] }
  0xda   :  { %4169 = vmatpush.bf16.msra.mxu2 %v6779_v58  ;;  %v698_v58 = vunpack.c.l.b16 %v33_v32  ;;  %v7139_v4 = vor.u32 %v8167_v57, %v7138_v56  ;;  %v6994_v32 = vld [vmem:[%s12457_s1 + $0xed0] sm:$0xf]  ;;  %v8131_v36 = vld [vmem:[%s12457_s1 + $0xed4] sm:$0xf0]  ;;  %v6986_v56 = vld [vmem:[%s12457_s1 + $0xec0] sm:$0xf] }
  0xdb   :  { %4182 = vmatpush.bf16.msra.mxu3 %v6843_v63  ;;  %v7011_v63 = vor.u32 %v8135_v47, %v7010_v40  ;;  %v8147_v40 = vld [vmem:[%s12457_s1 + $0xf54] sm:$0xf0]  ;;  %v6995_v50 = vor.u32 %v8131_v36, %v6994_v32  ;;  %v6906_v36 = vld [vmem:[%s12457_s1 + $0xe20] sm:$0xf] }
  0xdc   :  { %4144 = vmatpush.bf16.msra.mxu0 %v6643_v6  ;;  %v8133_v6 = vld [vmem:[%s12457_s1 + $0xee4] sm:$0xf0]  ;;  %v9841_v10 = vpack.c.b16 %v698_v58, %v698_v58  ;;  %v8163_v47 = vld [vmem:[%s12457_s1 + $0xfd4] sm:$0xf0]  ;;  %v7059_v51 = vor.u32 %v8147_v40, %v7058_v39  ;;  %v6970_v40 = vld [vmem:[%s12457_s1 + $0xea0] sm:$0xf] }
  0xdd   :  { %4157 = vmatpush.bf16.msra.mxu1 %v6707_v13  ;;  %v9843_v13 = vpack.c.b16 %v697_v59, %v697_v59  ;;  %v7003_v21 = vor.u32 %v8133_v6, %v7002_v3  ;;  %v8129_v58 = vld [vmem:[%s12457_s1 + $0xec4] sm:$0xf0]  ;;  %v7050_v59 = vld [vmem:[%s12457_s1 + $0xf40] sm:$0xf]  ;;  %v6914_v6 = vld [vmem:[%s12457_s1 + $0xe30] sm:$0xf] }
  0xde   :  { %4170 = vmatpush.bf16.msra.mxu2 %v6771_v14  ;;  %v7130_v14 = vld [vmem:[%s12457_s1 + $0xfe0] sm:$0xf]  ;;  %v6987_v3 = vor.u32 %v8129_v58, %v6986_v56  ;;  %v8159_v26 = vld [vmem:[%s12457_s1 + $0xfb4] sm:$0xf0]  ;;  %v8109_v39 = vld [vmem:[%s12457_s1 + $0xe24] sm:$0xf0] }
  0xdf   :  { %4183 = vmatpush.bf16.msra.mxu3 %v6835_v24  ;;  %v7067_v24 = vor.u32 %v8149_v9, %v7066_v8  ;;  %v7131_v34 = vor.u32 %v8165_v15, %v7130_v14  ;;  %v8111_v8 = vld [vmem:[%s12457_s1 + $0xe34] sm:$0xf0]  ;;  %v6978_v9 = vld [vmem:[%s12457_s1 + $0xeb0] sm:$0xf]  ;;  %v7098_v56 = vld [vmem:[%s12457_s1 + $0xfa0] sm:$0xf] }
  0xe0   :  { %4145 = vmatpush.bf16.msra.mxu0 %v6635_v43  ;;  %v7122_v43 = vld [vmem:[%s12457_s1 + $0xfd0] sm:$0xf]  ;;  %v8127_v15 = vld [vmem:[%s12457_s1 + $0xeb4] sm:$0xf0]  ;;  %v6915_v27 = vor.u32 %v8111_v8, %v6914_v6 }
  0xe1   :  { %4158 = vmatpush.bf16.msra.mxu1 %v6699_v52  ;;  %v6922_v52 = vld [vmem:[%s12457_s1 + $0xe40] sm:$0xf]  ;;  %v7123_v57 = vor.u32 %v8163_v47, %v7122_v43  ;;  %v3952_v2 = vpop.f32.mrf.mxu1  ;;  %v6979_v32 = vor.u32 %v8127_v15, %v6978_v9  ;;  %v7026_v6 = vld [vmem:[%s12457_s1 + $0xf10] sm:$0xf]  ;;  %v8139_v8 = vld [vmem:[%s12457_s1 + $0xf14] sm:$0xf0] }
  0xe2   :  { %4171 = vmatpush.bf16.msra.mxu2 %v6763_v54  ;;  %v8113_v54 = vld [vmem:[%s12457_s1 + $0xe44] sm:$0xf0]  ;;  %v7090_v9 = vld [vmem:[%s12457_s1 + $0xf90] sm:$0xf] }
  0xe3   :  { %4184 = vmatpush.bf16.msra.mxu3 %v6827_v60  ;;  %4146 = vmatmul.bf16.vlgmr.msra.gmra.mxu0 %v9830_v5  ;;  %v8145_v60 = vld [vmem:[%s12457_s1 + $0xf44] sm:$0xf0]  ;;  %v6923_v1 = vor.u32 %v8113_v54, %v6922_v52 }
  0xe4   :  { %4190 = vmatpush.bf16.msrb.mxu0 %v6947_v61  ;;  %4159 = vmatmul.bf16.vlgmr.msra.gmra.mxu1 %v9843_v13  ;;  %v3939_v61 = vpop.f32.mrf.mxu0 }
  0xe5   :  { %4203 = vmatpush.bf16.msrb.mxu1 %v7011_v63  ;;  %4172 = vmatmul.bf16.vlgmr.msra.gmra.mxu2 %v9841_v10  ;;  %v8161_v63 = vld [vmem:[%s12457_s1 + $0xfc4] sm:$0xf0] }
  0xe6   :  { %4216 = vmatpush.bf16.msrb.mxu2 %v7075_v0  ;;  %4185 = vmatmul.bf16.vlgmr.msra.gmra.mxu3 %v9851_v53  ;;  %v3940_v0 = vadd.f32 %v3939_v61, %v9741_v55  ;;  %v7115_v55 = vor.u32 %v8161_v63, %v7114_v62 }
  0xe7   :  { %4229 = vmatpush.bf16.msrb.mxu3 %v7139_v4  ;;  %v7051_v4 = vor.u32 %v8145_v60, %v7050_v59  ;;  %v6907_v59 = vor.u32 %v8109_v39, %v6906_v36  ;;  %v34_v36 = vld [vmem:[%s12458_s0 + $0x70] sm:$0xff] }
  0xe8   :  { %4191 = vmatpush.bf16.msrb.mxu0 %v6939_v17  ;;  %v3953_v14 = vadd.f32 %v3952_v2, %v3940_v0  ;;  %v7042_v17 = vld [vmem:[%s12457_s1 + $0xf30] sm:$0xf]  ;;  %v3965_v47 = vpop.f32.mrf.mxu2 }
  0xe9   :  { %4204 = vmatpush.bf16.msrb.mxu1 %v7003_v21  ;;  %v8143_v21 = vld [vmem:[%s12457_s1 + $0xf34] sm:$0xf0]  ;;  %v3978_v54 = vpop.f32.mrf.mxu3  ;;  %v3954_v60 = vpop.f32.mrf.mxu1  ;;  %v6898_v0 = vld [vmem:[%s12457_s1 + $0xe10] sm:$0xf] }
  0xea   :  { %4217 = vmatpush.bf16.msrb.mxu2 %v7067_v24  ;;  %v7106_v24 = vld [vmem:[%s12457_s1 + $0xfb0] sm:$0xf]  ;;  %v3966_v52 = vadd.f32 %v3965_v47, %v3953_v14  ;;  %v6890_v14 = vld [vmem:[%s12457_s1 + $0xe00] sm:$0xf]  ;;  %v35_v47 = vld [vmem:[%s12458_s0 + $0x78] sm:$0xff]  ;;  %v700_v60 = vunpack.c.l.b16 %v34_v36 }
  0xeb   :  { %4230 = vmatpush.bf16.msrb.mxu3 %v7131_v34  ;;  %v7043_v34 = vor.u32 %v8143_v21, %v7042_v17  ;;  %v7107_v43 = vor.u32 %v8159_v26, %v7106_v24  ;;  %v6962_v2 = vld [vmem:[%s12457_s1 + $0xe90] sm:$0xf]  ;;  %v8105_v17 = vld [vmem:[%s12457_s1 + $0xe04] sm:$0xf0]  ;;  %v6954_v21 = vld [vmem:[%s12457_s1 + $0xe80] sm:$0xf] }
  0xec   :  { %4192 = vmatpush.bf16.msrb.mxu0 %v6931_v48  ;;  %v8125_v48 = vld [vmem:[%s12457_s1 + $0xea4] sm:$0xf0]  ;;  %v3941_v58 = vpop.f32.mrf.mxu0  ;;  %v9954_v61 = vadd.f32 %v3978_v54, %v3966_v52  ;;  %v7266_v52 = vld [vmem:[%s12457_s1 + $0x10f0] sm:$0xf] }
  0xed   :  { %4205 = vmatpush.bf16.msrb.mxu1 %v6995_v50  ;;  %v7034_v50 = vld [vmem:[%s12457_s1 + $0xf20] sm:$0xf]  ;;  %v6971_v62 = vor.u32 %v8125_v48, %v6970_v40  ;;  %v8121_v24 = vld [vmem:[%s12457_s1 + $0xe84] sm:$0xf0]  ;;  %v7330_v58 = vld [vmem:[%s12457_s1 + $0x1170] sm:$0xf] }
  0xee   :  { %4218 = vmatpush.bf16.msrb.mxu2 %v7059_v51  ;;  %v8141_v51 = vld [vmem:[%s12457_s1 + $0xf24] sm:$0xf0]  ;;  %v7082_v40 = vld [vmem:[%s12457_s1 + $0xf80] sm:$0xf] }
  0xef   :  { %4231 = vmatpush.bf16.msrb.mxu3 %v7123_v57  ;;  %v8157_v57 = vld [vmem:[%s12457_s1 + $0xfa4] sm:$0xf0]  ;;  %v7035_v63 = vor.u32 %v8141_v51, %v7034_v50  ;;  %v7202_v50 = vld [vmem:[%s12457_s1 + $0x1070] sm:$0xf]  ;;  %v8183_v51 = vld [vmem:[%s12457_s1 + $0x1074] sm:$0xf0] }
  0xf0   :  { %4193 = vmatpush.bf16.msrb.mxu0 %v6923_v1  ;;  %v8107_v1 = vld [vmem:[%s12457_s1 + $0xe14] sm:$0xf0]  ;;  %v3967_v48 = vpop.f32.mrf.mxu2 }
  0xf1   :  { %4206 = vmatpush.bf16.msrb.mxu1 %v6987_v3  ;;  %v7099_v3 = vor.u32 %v8157_v57, %v7098_v56  ;;  %v6899_v15 = vor.u32 %v8107_v1, %v6898_v0  ;;  %v3980_v54 = vpop.f32.mrf.mxu3  ;;  %v6891_v56 = vor.u32 %v8105_v17, %v6890_v14  ;;  %v8199_v57 = vld [vmem:[%s12457_s1 + $0x10f4] sm:$0xf0]  ;;  %v7394_v0 = vld [vmem:[%s12457_s1 + $0x11f0] sm:$0xf]  ;;  %v7194_v14 = vld [vmem:[%s12457_s1 + $0x1060] sm:$0xf] }
  0xf2   :  { %4219 = vmatpush.bf16.msrb.mxu2 %v7051_v4  ;;  %v8123_v4 = vld [vmem:[%s12457_s1 + $0xe94] sm:$0xf0]  ;;  %v7258_v17 = vld [vmem:[%s12457_s1 + $0x10e0] sm:$0xf]  ;;  %v7250_v54 = vld [vmem:[%s12457_s1 + $0x10d0] sm:$0xf] }
  0xf3   :  { %4232 = vmatpush.bf16.msrb.mxu3 %v7115_v55  ;;  %v8155_v55 = vld [vmem:[%s12457_s1 + $0xf94] sm:$0xf0]  ;;  %v6963_v26 = vor.u32 %v8123_v4, %v6962_v2  ;;  %v702_v2 = vunpack.c.l.b16 %v35_v47 }
  0xf4   :  { %4194 = vmatpush.bf16.msrb.mxu0 %v6915_v27  ;;  %v7027_v27 = vor.u32 %v8139_v8, %v7026_v6  ;;  %v7091_v39 = vor.u32 %v8155_v55, %v7090_v9  ;;  %v8231_v1 = vld [vmem:[%s12457_s1 + $0x11f4] sm:$0xf0]  ;;  %v7203_v6 = vor.u32 %v8183_v51, %v7202_v50  ;;  %v703_v8 = vunpack.c.h.b16 %v35_v47  ;;  %v7186_v51 = vld [vmem:[%s12457_s1 + $0x1050] sm:$0xf] }
  0xf5   :  { %4207 = vmatpush.bf16.msrb.mxu1 %v6979_v32  ;;  %v7018_v32 = vld [vmem:[%s12457_s1 + $0xf00] sm:$0xf]  ;;  %v7267_v9 = vor.u32 %v8199_v57, %v7266_v52  ;;  %v8179_v52 = vld [vmem:[%s12457_s1 + $0x1054] sm:$0xf0] }
  0xf6   :  { %4220 = vmatpush.bf16.msrb.mxu2 %v7043_v34  ;;  %v8137_v34 = vld [vmem:[%s12457_s1 + $0xf04] sm:$0xf0]  ;;  %v8195_v57 = vld [vmem:[%s12457_s1 + $0x10d4] sm:$0xf0] }
  0xf7   :  { %4233 = vmatpush.bf16.msrb.mxu3 %v7107_v43  ;;  %v8153_v43 = vld [vmem:[%s12457_s1 + $0xf84] sm:$0xf0] }
  0xf8   :  { %4195 = vmatpush.bf16.msrb.mxu0 %v6907_v59  ;;  %v8215_v59 = vld [vmem:[%s12457_s1 + $0x1174] sm:$0xf0]  ;;  %v7083_v4 = vor.u32 %v8153_v43, %v7082_v40  ;;  %v8229_v40 = vld [vmem:[%s12457_s1 + $0x11e4] sm:$0xf0]  ;;  %v10064_v43 = vpack.c.b16 %v703_v8, %v703_v8 }
  0xf9   :  { %4208 = vmatpush.bf16.msrb.mxu1 %v6971_v62  ;;  %v6955_v62 = vor.u32 %v8121_v24, %v6954_v21  ;;  %v7331_v55 = vor.u32 %v8215_v59, %v7330_v58  ;;  %v7395_v21 = vor.u32 %v8231_v1, %v7394_v0  ;;  %v10043_v24 = vpack.c.b16 %v700_v60, %v700_v60  ;;  %v7314_v58 = vld [vmem:[%s12457_s1 + $0x1150] sm:$0xf]  ;;  %v8211_v59 = vld [vmem:[%s12457_s1 + $0x1154] sm:$0xf0]  ;;  %v8193_v8 = vld [vmem:[%s12457_s1 + $0x10c4] sm:$0xf0] }
  0xfa   :  { %4221 = vmatpush.bf16.msrb.mxu2 %v7035_v63  ;;  %v7019_v63 = vor.u32 %v8137_v34, %v7018_v32  ;;  %v8213_v32 = vld [vmem:[%s12457_s1 + $0x1164] sm:$0xf0]  ;;  %v10054_v34 = vpack.c.b16 %v702_v2, %v702_v2  ;;  %v7378_v60 = vld [vmem:[%s12457_s1 + $0x11d0] sm:$0xf]  ;;  %v7251_v0 = vor.u32 %v8195_v57, %v7250_v54  ;;  %v7315_v1 = vor.u32 %v8211_v59, %v7314_v58  ;;  %v7178_v2 = vld [vmem:[%s12457_s1 + $0x1040] sm:$0xf] }
  0xfb   :  { %4234 = vmatpush.bf16.msrb.mxu3 %v7099_v3  ;;  %v701_v3 = vunpack.c.h.b16 %v34_v36  ;;  %v8207_v54 = vld [vmem:[%s12457_s1 + $0x1134] sm:$0xf0] }
  0xfc   :  { %4196 = vmatpush.bf16.msrb.mxu0 %v6899_v15  ;;  %v8181_v15 = vld [vmem:[%s12457_s1 + $0x1064] sm:$0xf0]  ;;  %v8223_v57 = vld [vmem:[%s12457_s1 + $0x11b4] sm:$0xf0] }
  0xfd   :  { %4209 = vmatpush.bf16.msrb.mxu1 %v6963_v26  ;;  %v8197_v26 = vld [vmem:[%s12457_s1 + $0x10e4] sm:$0xf0]  ;;  %v10056_v36 = vpack.c.b16 %v701_v3, %v701_v3  ;;  %v7195_v47 = vor.u32 %v8181_v15, %v7194_v14  ;;  %v7370_v15 = vld [vmem:[%s12457_s1 + $0x11c0] sm:$0xf] }
  0xfe   :  { %4222 = vmatpush.bf16.msrb.mxu2 %v7027_v27  ;;  %v7322_v27 = vld [vmem:[%s12457_s1 + $0x1160] sm:$0xf]  ;;  %v7259_v48 = vor.u32 %v8197_v26, %v7258_v17  ;;  %v8177_v3 = vld [vmem:[%s12457_s1 + $0x1044] sm:$0xf0] }
  0xff   :  { %4235 = vmatpush.bf16.msrb.mxu3 %v7091_v39  ;;  %v7386_v39 = vld [vmem:[%s12457_s1 + $0x11e0] sm:$0xf]  ;;  %v7323_v50 = vor.u32 %v8213_v32, %v7322_v27  ;;  %v8225_v17 = vld [vmem:[%s12457_s1 + $0x11c4] sm:$0xf0]  ;;  %v7179_v26 = vor.u32 %v8177_v3, %v7178_v2 }
 0x100   :  { %4197 = vmatpush.bf16.msrb.mxu0 %v6891_v56  ;;  %v7387_v56 = vor.u32 %v8229_v40, %v7386_v39  ;;  %v3991_v14 = vpop.f32.mrf.mxu0  ;;  %v7170_v40 = vld [vmem:[%s12457_s1 + $0x1030] sm:$0xf]  ;;  %v8189_v3 = vld [vmem:[%s12457_s1 + $0x10a4] sm:$0xf0] }
 0x101   :  { %4210 = vmatpush.bf16.msrb.mxu1 %v6955_v62  ;;  %v8227_v62 = vld [vmem:[%s12457_s1 + $0x11d4] sm:$0xf0]  ;;  %v4004_v27 = vpop.f32.mrf.mxu1 }
 0x102   :  { %4223 = vmatpush.bf16.msrb.mxu2 %v7019_v63  ;;  %v7187_v63 = vor.u32 %v8179_v52, %v7186_v51  ;;  %v8191_v51 = vld [vmem:[%s12457_s1 + $0x10b4] sm:$0xf0]  ;;  %v7298_v52 = vld [vmem:[%s12457_s1 + $0x1130] sm:$0xf] }
 0x103   :  { %4236 = vmatpush.bf16.msrb.mxu3 %v7083_v4  ;;  %4198 = vmatmul.bf16.vlgmr.msrb.gmra.mxu0 %v10043_v24  ;;  %v7242_v4 = vld [vmem:[%s12457_s1 + $0x10c0] sm:$0xf] }
 0x104   :  { %4242 = vmatpush.bf16.msra.mxu0 %v7203_v6  ;;  %4211 = vmatmul.bf16.vlgmr.msrb.gmra.mxu1 %v10056_v36  ;;  %v7379_v6 = vor.u32 %v8227_v62, %v7378_v60  ;;  %v7243_v32 = vor.u32 %v8193_v8, %v7242_v4  ;;  %v7299_v60 = vor.u32 %v8207_v54, %v7298_v52  ;;  %v7162_v62 = vld [vmem:[%s12457_s1 + $0x1020] sm:$0xf]  ;;  %v7346_v52 = vld [vmem:[%s12457_s1 + $0x1190] sm:$0xf]  ;;  %v8219_v54 = vld [vmem:[%s12457_s1 + $0x1194] sm:$0xf0] }
 0x105   :  { %4255 = vmatpush.bf16.msra.mxu1 %v7267_v9  ;;  %4224 = vmatmul.bf16.vlgmr.msrb.gmra.mxu2 %v10054_v34  ;;  %v7306_v9 = vld [vmem:[%s12457_s1 + $0x1140] sm:$0xf] }
 0x106   :  { %4268 = vmatpush.bf16.msra.mxu2 %v7331_v55  ;;  %4237 = vmatmul.bf16.vlgmr.msrb.gmra.mxu3 %v10064_v43  ;;  %v8209_v55 = vld [vmem:[%s12457_s1 + $0x1144] sm:$0xf0]  ;;  %v7290_v4 = vld [vmem:[%s12457_s1 + $0x1120] sm:$0xf] }
 0x107   :  { %4281 = vmatpush.bf16.msra.mxu3 %v7395_v21  ;;  %v3992_v21 = vadd.f32 %v3991_v14, %v9954_v61  ;;  %v7307_v39 = vor.u32 %v8209_v55, %v7306_v9  ;;  %v7371_v61 = vor.u32 %v8225_v17, %v7370_v15  ;;  %v7354_v55 = vld [vmem:[%s12457_s1 + $0x11a0] sm:$0xf]  ;;  %v8221_v14 = vld [vmem:[%s12457_s1 + $0x11a4] sm:$0xf0] }
 0x108   :  { %4243 = vmatpush.bf16.msra.mxu0 %v7195_v47  ;;  %v8175_v47 = vld [vmem:[%s12457_s1 + $0x1034] sm:$0xf0]  ;;  %v4017_v2 = vpop.f32.mrf.mxu2  ;;  %v3993_v15 = vpop.f32.mrf.mxu0 }
 0x109   :  { %4256 = vmatpush.bf16.msra.mxu1 %v7259_v48  ;;  %v7234_v48 = vld [vmem:[%s12457_s1 + $0x10b0] sm:$0xf]  ;;  %v7171_v58 = vor.u32 %v8175_v47, %v7170_v40  ;;  %v4030_v9 = vpop.f32.mrf.mxu3  ;;  %v8171_v40 = vld [vmem:[%s12457_s1 + $0x1014] sm:$0xf0] }
 0x10a   :  { %4269 = vmatpush.bf16.msra.mxu2 %v7323_v50  ;;  %v4005_v50 = vadd.f32 %v4004_v27, %v3992_v21  ;;  %v7235_v59 = vor.u32 %v8191_v51, %v7234_v48  ;;  %v4006_v21 = vpop.f32.mrf.mxu1  ;;  %v7218_v47 = vld [vmem:[%s12457_s1 + $0x1090] sm:$0xf]  ;;  %v7355_v48 = vor.u32 %v8221_v14, %v7354_v55  ;;  %v8203_v51 = vld [vmem:[%s12457_s1 + $0x1114] sm:$0xf0] }
 0x10b   :  { %4282 = vmatpush.bf16.msra.mxu3 %v7387_v56  ;;  %v7362_v56 = vld [vmem:[%s12457_s1 + $0x11b0] sm:$0xf]  ;;  %v8247_v14 = vld [vmem:[%s12457_s1 + $0x1274] sm:$0xf0] }
 0x10c   :  { %4244 = vmatpush.bf16.msra.mxu0 %v7187_v63  ;;  %v8173_v63 = vld [vmem:[%s12457_s1 + $0x1024] sm:$0xf0]  ;;  %v4018_v8 = vadd.f32 %v4017_v2, %v4005_v50  ;;  %v7282_v50 = vld [vmem:[%s12457_s1 + $0x1110] sm:$0xf]  ;;  %v36_v2 = vld [vmem:[%s12458_s0 + $0x80] sm:$0xff] }
 0x10d   :  { %4257 = vmatpush.bf16.msra.mxu1 %v7251_v0  ;;  %v7226_v0 = vld [vmem:[%s12457_s1 + $0x10a0] sm:$0xf]  ;;  %v7163_v17 = vor.u32 %v8173_v63, %v7162_v62  ;;  %v7283_v63 = vor.u32 %v8203_v51, %v7282_v50  ;;  %v7458_v55 = vld [vmem:[%s12457_s1 + $0x1270] sm:$0xf]  ;;  %v5220_v50 = vld [vmem:[%s12457_s1 + $0xf8] sm:$0xf0] }
 0x10e   :  { %4270 = vmatpush.bf16.msra.mxu2 %v7315_v1  ;;  %v7363_v1 = vor.u32 %v8223_v57, %v7362_v56  ;;  %v7227_v27 = vor.u32 %v8189_v3, %v7226_v0  ;;  %v7146_v56 = vld [vmem:[%s12457_s1 + $0x1000] sm:$0xf]  ;;  %v7347_v3 = vor.u32 %v8219_v54, %v7346_v52  ;;  %v7522_v15 = vld [vmem:[%s12457_s1 + $0x12f0] sm:$0xf]  ;;  %v705_v52 = vunpack.c.h.b16 %v36_v2 }
 0x10f   :  { %4283 = vmatpush.bf16.msra.mxu3 %v7379_v6  ;;  %v8205_v6 = vld [vmem:[%s12457_s1 + $0x1124] sm:$0xf0]  ;;  %v7274_v0 = vld [vmem:[%s12457_s1 + $0x1100] sm:$0xf] }
 0x110   :  { %4245 = vmatpush.bf16.msra.mxu0 %v7179_v26  ;;  %v10167_v26 = vadd.f32 %v4030_v9, %v4018_v8  ;;  %v37_v8 = vld [vmem:[%s12458_s0 + $0x88] sm:$0xff]  ;;  %v4019_v9 = vpop.f32.mrf.mxu2 }
 0x111   :  { %4258 = vmatpush.bf16.msra.mxu1 %v7243_v32  ;;  %v7291_v32 = vor.u32 %v8205_v6, %v7290_v4  ;;  %v7338_v4 = vld [vmem:[%s12457_s1 + $0x1180] sm:$0xf]  ;;  %v8217_v6 = vld [vmem:[%s12457_s1 + $0x1184] sm:$0xf0]  ;;  %v706_v51 = vunpack.c.l.b16 %v37_v8 }
 0x112   :  { %4271 = vmatpush.bf16.msra.mxu2 %v7307_v39  ;;  %v7154_v39 = vld [vmem:[%s12457_s1 + $0x1010] sm:$0xf]  ;;  %v7339_v54 = vor.u32 %v8217_v6, %v7338_v4  ;;  %v10269_v6 = vpack.c.b16 %v705_v52, %v705_v52 }
 0x113   :  { %4284 = vmatpush.bf16.msra.mxu3 %v7371_v61  ;;  %v8187_v61 = vld [vmem:[%s12457_s1 + $0x1094] sm:$0xf0]  ;;  %v7155_v57 = vor.u32 %v8171_v40, %v7154_v39  ;;  %v5156_v39 = vld [vmem:[%s12457_s1 + $0x78] sm:$0xf0]  ;;  %v704_v40 = vunpack.c.l.b16 %v36_v2  ;;  %v7668_v2 = vld [vmem:[%s12457_s1 + $0x64] sm:$0xf]  ;;  %v10267_v4 = vpack.c.b16 %v706_v51, %v706_v51 }
 0x114   :  { %4246 = vmatpush.bf16.msra.mxu0 %v7171_v58  ;;  %v8169_v58 = vld [vmem:[%s12457_s1 + $0x1004] sm:$0xf0]  ;;  %v7219_v62 = vor.u32 %v8187_v61, %v7218_v47  ;;  %v7686_v61 = vld [vmem:[%s12457_s1 + $0xf4] sm:$0xf]  ;;  %v5204_v51 = vld [vmem:[%s12457_s1 + $0xd8] sm:$0xf0] }
 0x115   :  { %4259 = vmatpush.bf16.msra.mxu1 %v7235_v59  ;;  %v7210_v59 = vld [vmem:[%s12457_s1 + $0x1080] sm:$0xf]  ;;  %v7147_v21 = vor.u32 %v8169_v58, %v7146_v56  ;;  %v7459_v56 = vor.u32 %v8247_v14, %v7458_v55  ;;  %v5212_v55 = vld [vmem:[%s12457_s1 + $0xe8] sm:$0xf0] }
 0x116   :  { %4272 = vmatpush.bf16.msra.mxu2 %v7299_v60  ;;  %v8185_v60 = vld [vmem:[%s12457_s1 + $0x1084] sm:$0xf0] }
 0x117   :  { %4285 = vmatpush.bf16.msra.mxu3 %v7363_v1  ;;  %v8201_v1 = vld [vmem:[%s12457_s1 + $0x1104] sm:$0xf0]  ;;  %v7211_v47 = vor.u32 %v8185_v60, %v7210_v59  ;;  %v7450_v59 = vld [vmem:[%s12457_s1 + $0x1260] sm:$0xf] }
 0x118   :  { %4247 = vmatpush.bf16.msra.mxu0 %v7163_v17  ;;  %v4032_v17 = vpop.f32.mrf.mxu3  ;;  %v8245_v60 = vld [vmem:[%s12457_s1 + $0x1264] sm:$0xf0] }
 0x119   :  { %4260 = vmatpush.bf16.msra.mxu1 %v7227_v27  ;;  %v8263_v27 = vld [vmem:[%s12457_s1 + $0x12f4] sm:$0xf0] }
 0x11a   :  { %4273 = vmatpush.bf16.msra.mxu2 %v7291_v32  ;;  %v7670_v32 = vld [vmem:[%s12457_s1 + $0x74] sm:$0xf]  ;;  %v7523_v58 = vor.u32 %v8263_v27, %v7522_v15  ;;  %v7451_v15 = vor.u32 %v8245_v60, %v7450_v59  ;;  %v7442_v27 = vld [vmem:[%s12457_s1 + $0x1250] sm:$0xf]  ;;  %v8257_v60 = vld [vmem:[%s12457_s1 + $0x12c4] sm:$0xf0] }
 0x11b   :  { %4286 = vmatpush.bf16.msra.mxu3 %v7355_v48  ;;  %v7275_v48 = vor.u32 %v8201_v1, %v7274_v0  ;;  %v5159_v9 = vor.u32 %v7670_v32, %v5156_v39  ;;  %v10256_v0 = vpack.c.b16 %v704_v40, %v704_v40  ;;  %v8261_v1 = vld [vmem:[%s12457_s1 + $0x12e4] sm:$0xf0]  ;;  %v8243_v32 = vld [vmem:[%s12457_s1 + $0x1254] sm:$0xf0]  ;;  %v7506_v39 = vld [vmem:[%s12457_s1 + $0x12d0] sm:$0xf] }
 0x11c   :  { %4248 = vmatpush.bf16.msra.mxu0 %v7155_v57  ;;  %v707_v57 = vunpack.c.h.b16 %v37_v8  ;;  %v7684_v8 = vld [vmem:[%s12457_s1 + $0xe4] sm:$0xf]  ;;  %v7443_v52 = vor.u32 %v8243_v32, %v7442_v27  ;;  %v7426_v27 = vld [vmem:[%s12457_s1 + $0x1230] sm:$0xf]  ;;  %v8239_v32 = vld [vmem:[%s12457_s1 + $0x1234] sm:$0xf0] }
 0x11d   :  { %4261 = vmatpush.bf16.msra.mxu1 %v7219_v62  ;;  %v7514_v62 = vld [vmem:[%s12457_s1 + $0x12e0] sm:$0xf]  ;;  %v5215_v40 = vor.u32 %v7684_v8, %v5212_v55 }
 0x11e   :  { %4274 = vmatpush.bf16.msra.mxu2 %v7283_v63  ;;  %v5223_v63 = vor.u32 %v7686_v61, %v5220_v50  ;;  %v10277_v14 = vpack.c.b16 %v707_v57, %v707_v57  ;;  %v7515_v17 = vor.u32 %v8261_v1, %v7514_v62  ;;  %v5140_v61 = vld [vmem:[%s12457_s1 + $0x58] sm:$0xf0]  ;;  %v7682_v50 = vld [vmem:[%s12457_s1 + $0xd4] sm:$0xf]  ;;  %v7434_v57 = vld [vmem:[%s12457_s1 + $0x1240] sm:$0xf] }
 0x11f   :  { %4287 = vmatpush.bf16.msra.mxu3 %v7347_v3  ;;  %v5148_v3 = vld [vmem:[%s12457_s1 + $0x68] sm:$0xf0]  ;;  %v5207_v59 = vor.u32 %v7682_v50, %v5204_v51  ;;  %v7664_v62 = vld [vmem:[%s12457_s1 + $0x44] sm:$0xf]  ;;  %v7678_v50 = vld [vmem:[%s12457_s1 + $0xb4] sm:$0xf] }
 0x120   :  { %4249 = vmatpush.bf16.msra.mxu0 %v7147_v21  ;;  %v5151_v21 = vor.u32 %v7668_v2, %v5148_v3  ;;  %v4043_v1 = vpop.f32.mrf.mxu0  ;;  %v7680_v2 = vld [vmem:[%s12457_s1 + $0xc4] sm:$0xf]  ;;  %v5196_v3 = vld [vmem:[%s12457_s1 + $0xc8] sm:$0xf0]  ;;  %v5188_v51 = vld [vmem:[%s12457_s1 + $0xb8] sm:$0xf0] }
 0x121   :  { %4262 = vmatpush.bf16.msra.mxu1 %v7211_v47  ;;  %v8259_v47 = vld [vmem:[%s12457_s1 + $0x12d4] sm:$0xf0]  ;;  %v4044_v8 = vadd.f32 %v4043_v1, %v10167_v26  ;;  %v5199_v26 = vor.u32 %v7680_v2, %v5196_v3  ;;  %v5116_v1 = vld [vmem:[%s12457_s1 + $0x28] sm:$0xf0] }
 0x122   :  { %4275 = vmatpush.bf16.msra.mxu2 %v7275_v48  ;;  %v7666_v48 = vld [vmem:[%s12457_s1 + $0x54] sm:$0xf] }
 0x123   :  { %4288 = vmatpush.bf16.msra.mxu3 %v7339_v54  ;;  %4250 = vmatmul.bf16.vlgmr.msra.gmra.mxu0 %v10256_v0  ;;  %v7507_v54 = vor.u32 %v8259_v47, %v7506_v39  ;;  %v7490_v39 = vld [vmem:[%s12457_s1 + $0x12b0] sm:$0xf]  ;;  %v8255_v47 = vld [vmem:[%s12457_s1 + $0x12b4] sm:$0xf0] }
 0x124   :  { %4294 = vmatpush.bf16.msrb.mxu0 %v7459_v56  ;;  %4263 = vmatmul.bf16.vlgmr.msra.gmra.mxu1 %v10269_v6  ;;  %v5143_v56 = vor.u32 %v7666_v48, %v5140_v61  ;;  %v7662_v48 = vld [vmem:[%s12457_s1 + $0x34] sm:$0xf]  ;;  %v5124_v61 = vld [vmem:[%s12457_s1 + $0x38] sm:$0xf0] }
 0x125   :  { %4307 = vmatpush.bf16.msrb.mxu1 %v7523_v58  ;;  %4276 = vmatmul.bf16.vlgmr.msra.gmra.mxu2 %v10267_v4  ;;  %v8241_v58 = vld [vmem:[%s12457_s1 + $0x1244] sm:$0xf0] }
 0x126   :  { %4320 = vmatpush.bf16.msrb.mxu2 %v5159_v9  ;;  %4289 = vmatmul.bf16.vlgmr.msra.gmra.mxu3 %v10277_v14  ;;  %v7498_v9 = vld [vmem:[%s12457_s1 + $0x12c0] sm:$0xf]  ;;  %v7435_v55 = vor.u32 %v8241_v58, %v7434_v57  ;;  %v8237_v58 = vld [vmem:[%s12457_s1 + $0x1224] sm:$0xf0] }
 0x127   :  { %4333 = vmatpush.bf16.msrb.mxu3 %v5223_v63  ;;  %v5132_v63 = vld [vmem:[%s12457_s1 + $0x48] sm:$0xf0]  ;;  %v7418_v57 = vld [vmem:[%s12457_s1 + $0x1220] sm:$0xf] }
 0x128   :  { %4295 = vmatpush.bf16.msrb.mxu0 %v7451_v15  ;;  %v4056_v15 = vpop.f32.mrf.mxu1 }
 0x129   :  { %4308 = vmatpush.bf16.msrb.mxu1 %v7515_v17  ;;  %v7499_v17 = vor.u32 %v8257_v60, %v7498_v9  ;;  %v7482_v9 = vld [vmem:[%s12457_s1 + $0x12a0] sm:$0xf]  ;;  %v4069_v60 = vpop.f32.mrf.mxu2  ;;  %v4082_v3 = vpop.f32.mrf.mxu3 }
 0x12a   :  { %4321 = vmatpush.bf16.msrb.mxu2 %v5151_v21  ;;  %v5135_v21 = vor.u32 %v7664_v62, %v5132_v63  ;;  %v8253_v62 = vld [vmem:[%s12457_s1 + $0x12a4] sm:$0xf0]  ;;  %v7660_v63 = vld [vmem:[%s12457_s1 + $0x24] sm:$0xf] }
 0x12b   :  { %4334 = vmatpush.bf16.msrb.mxu3 %v5215_v40  ;;  %v4057_v40 = vadd.f32 %v4056_v15, %v4044_v8  ;;  %v7676_v8 = vld [vmem:[%s12457_s1 + $0xa4] sm:$0xf]  ;;  %v4045_v15 = vpop.f32.mrf.mxu0 }
 0x12c   :  { %4296 = vmatpush.bf16.msrb.mxu0 %v7443_v52  ;;  %v7427_v52 = vor.u32 %v8239_v32, %v7426_v27  ;;  %v7483_v32 = vor.u32 %v8253_v62, %v7482_v9  ;;  %v7466_v9 = vld [vmem:[%s12457_s1 + $0x1280] sm:$0xf]  ;;  %v8249_v62 = vld [vmem:[%s12457_s1 + $0x1284] sm:$0xf0] }
 0x12d   :  { %4309 = vmatpush.bf16.msrb.mxu1 %v7507_v54  ;;  %v7491_v54 = vor.u32 %v8255_v47, %v7490_v39  ;;  %v4070_v2 = vadd.f32 %v4069_v60, %v4057_v40  ;;  %v5119_v39 = vor.u32 %v7660_v63, %v5116_v1  ;;  %v8235_v40 = vld [vmem:[%s12457_s1 + $0x1214] sm:$0xf0]  ;;  %v7474_v47 = vld [vmem:[%s12457_s1 + $0x1290] sm:$0xf]  ;;  %v7656_v63 = vld [vmem:[%s12457_s1 + $0x4] sm:$0xf] }
 0x12e   :  { %4322 = vmatpush.bf16.msrb.mxu2 %v5143_v56  ;;  %v5127_v56 = vor.u32 %v7662_v48, %v5124_v61  ;;  %v8251_v61 = vld [vmem:[%s12457_s1 + $0x1294] sm:$0xf0]  ;;  %v38_v1 = vld [vmem:[%s12458_s0 + $0x90] sm:$0xff] }
 0x12f   :  { %4335 = vmatpush.bf16.msrb.mxu3 %v5207_v59  ;;  %v5191_v59 = vor.u32 %v7678_v50, %v5188_v51  ;;  %v10380_v27 = vadd.f32 %v4082_v3, %v4070_v2  ;;  %v7658_v50 = vld [vmem:[%s12457_s1 + $0x14] sm:$0xf]  ;;  %v5108_v51 = vld [vmem:[%s12457_s1 + $0x18] sm:$0xf0]  ;;  %v5100_v3 = vld [vmem:[%s12457_s1 + $0x8] sm:$0xf0] }
 0x130   :  { %4297 = vmatpush.bf16.msrb.mxu0 %v7435_v55  ;;  %v5180_v55 = vld [vmem:[%s12457_s1 + $0xa8] sm:$0xf0]  ;;  %v5111_v60 = vor.u32 %v7658_v50, %v5108_v51  ;;  %v7467_v50 = vor.u32 %v8249_v62, %v7466_v9  ;;  %v5103_v51 = vor.u32 %v7656_v63, %v5100_v3 }
 0x131   :  { %4310 = vmatpush.bf16.msrb.mxu1 %v7499_v17  ;;  %v7419_v17 = vor.u32 %v8237_v58, %v7418_v57  ;;  %v5183_v48 = vor.u32 %v7676_v8, %v5180_v55  ;;  %v7402_v57 = vld [vmem:[%s12457_s1 + $0x1200] sm:$0xf]  ;;  %v8233_v58 = vld [vmem:[%s12457_s1 + $0x1204] sm:$0xf0]  ;;  %v7672_v8 = vld [vmem:[%s12457_s1 + $0x84] sm:$0xf]  ;;  %v4071_v15 = vpop.f32.mrf.mxu2 }
 0x132   :  { %4323 = vmatpush.bf16.msrb.mxu2 %v5135_v21  ;;  %v4058_v21 = vpop.f32.mrf.mxu1  ;;  %v5164_v55 = vld [vmem:[%s12457_s1 + $0x88] sm:$0xf0] }
 0x133   :  { %4336 = vmatpush.bf16.msrb.mxu3 %v5199_v26  ;;  %v7410_v26 = vld [vmem:[%s12457_s1 + $0x1210] sm:$0xf]  ;;  %v5284_v21 = vld [vmem:[%s12457_s1 + $0x178] sm:$0xf0]  ;;  %v5276_v9 = vld [vmem:[%s12457_s1 + $0x168] sm:$0xf0] }
 0x134   :  { %4298 = vmatpush.bf16.msrb.mxu0 %v7427_v52  ;;  %v7674_v52 = vld [vmem:[%s12457_s1 + $0x94] sm:$0xf]  ;;  %v5404_v3 = vld [vmem:[%s12457_s1 + $0x268] sm:$0xf0] }
 0x135   :  { %4311 = vmatpush.bf16.msrb.mxu1 %v7491_v54  ;;  %v5172_v54 = vld [vmem:[%s12457_s1 + $0x98] sm:$0xf0] }
 0x136   :  { %4324 = vmatpush.bf16.msrb.mxu2 %v5127_v56  ;;  %v7411_v56 = vor.u32 %v8235_v40, %v7410_v26  ;;  %v5175_v2 = vor.u32 %v7674_v52, %v5172_v54  ;;  %v7403_v26 = vor.u32 %v8233_v58, %v7402_v57  ;;  %v5348_v40 = vld [vmem:[%s12457_s1 + $0x1f8] sm:$0xf0]  ;;  %v7750_v52 = vld [vmem:[%s12457_s1 + $0x2f4] sm:$0xf]  ;;  %v5167_v57 = vor.u32 %v7672_v8, %v5164_v55  ;;  %v7748_v55 = vld [vmem:[%s12457_s1 + $0x2e4] sm:$0xf] }
 0x137   :  { %4337 = vmatpush.bf16.msrb.mxu3 %v5191_v59  ;;  %v7475_v59 = vor.u32 %v8251_v61, %v7474_v47  ;;  %v7734_v47 = vld [vmem:[%s12457_s1 + $0x274] sm:$0xf]  ;;  %v708_v61 = vunpack.c.l.b16 %v38_v1  ;;  %v5476_v54 = vld [vmem:[%s12457_s1 + $0x2f8] sm:$0xf0] }
 0x138   :  { %4299 = vmatpush.bf16.msrb.mxu0 %v7419_v17  ;;  %v7702_v17 = vld [vmem:[%s12457_s1 + $0x174] sm:$0xf]  ;;  %v5479_v62 = vor.u32 %v7750_v52, %v5476_v54  ;;  %v5396_v52 = vld [vmem:[%s12457_s1 + $0x258] sm:$0xf0] }
 0x139   :  { %4312 = vmatpush.bf16.msrb.mxu1 %v7483_v32  ;;  %v7718_v32 = vld [vmem:[%s12457_s1 + $0x1f4] sm:$0xf]  ;;  %v5287_v58 = vor.u32 %v7702_v17, %v5284_v21  ;;  %v10466_v63 = vpack.c.b16 %v708_v61, %v708_v61  ;;  %v5468_v17 = vld [vmem:[%s12457_s1 + $0x2e8] sm:$0xf0] }
 0x13a   :  { %4325 = vmatpush.bf16.msrb.mxu2 %v5119_v39  ;;  %v4084_v39 = vpop.f32.mrf.mxu3  ;;  %v5351_v15 = vor.u32 %v7718_v32, %v5348_v40  ;;  %v7698_v40 = vld [vmem:[%s12457_s1 + $0x154] sm:$0xf]  ;;  %v5471_v61 = vor.u32 %v7748_v55, %v5468_v17 }
 0x13b   :  { %4338 = vmatpush.bf16.msrb.mxu3 %v5183_v48  ;;  %v5412_v48 = vld [vmem:[%s12457_s1 + $0x278] sm:$0xf0]  ;;  %v7746_v54 = vld [vmem:[%s12457_s1 + $0x2d4] sm:$0xf] }
 0x13c   :  { %4300 = vmatpush.bf16.msrb.mxu0 %v7411_v56  ;;  %v709_v56 = vunpack.c.h.b16 %v38_v1  ;;  %v5415_v39 = vor.u32 %v7734_v47, %v5412_v48  ;;  %v5340_v1 = vld [vmem:[%s12457_s1 + $0x1e8] sm:$0xf0]  ;;  %v5268_v47 = vld [vmem:[%s12457_s1 + $0x158] sm:$0xf0]  ;;  %v7714_v48 = vld [vmem:[%s12457_s1 + $0x1d4] sm:$0xf] }
 0x13d   :  { %4313 = vmatpush.bf16.msrb.mxu1 %v7475_v59  ;;  %v7700_v59 = vld [vmem:[%s12457_s1 + $0x164] sm:$0xf] }
 0x13e   :  { %4326 = vmatpush.bf16.msrb.mxu2 %v5111_v60  ;;  %v7716_v60 = vld [vmem:[%s12457_s1 + $0x1e4] sm:$0xf]  ;;  %v10477_v8 = vpack.c.b16 %v709_v56, %v709_v56  ;;  %v5279_v21 = vor.u32 %v7700_v59, %v5276_v9  ;;  %v5460_v56 = vld [vmem:[%s12457_s1 + $0x2d8] sm:$0xf0]  ;;  %v5260_v59 = vld [vmem:[%s12457_s1 + $0x148] sm:$0xf0] }
 0x13f   :  { %4339 = vmatpush.bf16.msrb.mxu3 %v5175_v2  ;;  %v7732_v2 = vld [vmem:[%s12457_s1 + $0x264] sm:$0xf]  ;;  %v5343_v32 = vor.u32 %v7716_v60, %v5340_v1  ;;  %v5463_v9 = vor.u32 %v7746_v54, %v5460_v56  ;;  %v7742_v54 = vld [vmem:[%s12457_s1 + $0x2b4] sm:$0xf]  ;;  %v5444_v56 = vld [vmem:[%s12457_s1 + $0x2b8] sm:$0xf0] }
 0x140   :  { %4301 = vmatpush.bf16.msrb.mxu0 %v7403_v26  ;;  %v5407_v26 = vor.u32 %v7732_v2, %v5404_v3  ;;  %v7728_v60 = vld [vmem:[%s12457_s1 + $0x244] sm:$0xf]  ;;  %v4095_v1 = vpop.f32.mrf.mxu0  ;;  %v5452_v3 = vld [vmem:[%s12457_s1 + $0x2c8] sm:$0xf0] }
 0x141   :  { %4314 = vmatpush.bf16.msrb.mxu1 %v7467_v50  ;;  %v5332_v50 = vld [vmem:[%s12457_s1 + $0x1d8] sm:$0xf0]  ;;  %v7744_v2 = vld [vmem:[%s12457_s1 + $0x2c4] sm:$0xf]  ;;  %v4096_v55 = vadd.f32 %v4095_v1, %v10380_v27  ;;  %v5372_v1 = vld [vmem:[%s12457_s1 + $0x228] sm:$0xf0] }
 0x142   :  { %4327 = vmatpush.bf16.msrb.mxu2 %v5103_v51  ;;  %v7730_v51 = vld [vmem:[%s12457_s1 + $0x254] sm:$0xf]  ;;  %v5455_v27 = vor.u32 %v7744_v2, %v5452_v3 }
 0x143   :  { %4340 = vmatpush.bf16.msrb.mxu3 %v5167_v57  ;;  %4302 = vmatmul.bf16.vlgmr.msrb.gmra.mxu0 %v10466_v63  ;;  %v5271_v57 = vor.u32 %v7698_v40, %v5268_v47  ;;  %v7694_v40 = vld [vmem:[%s12457_s1 + $0x134] sm:$0xf]  ;;  %v5252_v47 = vld [vmem:[%s12457_s1 + $0x138] sm:$0xf0] }
 0x144   :  { %4346 = vmatpush.bf16.msra.mxu0 %v5287_v58  ;;  %4315 = vmatmul.bf16.vlgmr.msrb.gmra.mxu1 %v10477_v8  ;;  %v5335_v58 = vor.u32 %v7714_v48, %v5332_v50  ;;  %v7710_v48 = vld [vmem:[%s12457_s1 + $0x1b4] sm:$0xf]  ;;  %v5316_v50 = vld [vmem:[%s12457_s1 + $0x1b8] sm:$0xf0] }
 0x145   :  { %4359 = vmatpush.bf16.msra.mxu1 %v5351_v15  ;;  %4328 = vmatmul.bf16.vlgmr.msrb.gmra.mxu2 %v8627_v19  ;;  %v5399_v15 = vor.u32 %v7730_v51, %v5396_v52  ;;  %v7712_v19 = vld [vmem:[%s12457_s1 + $0x1c4] sm:$0xf]  ;;  %v7726_v51 = vld [vmem:[%s12457_s1 + $0x234] sm:$0xf]  ;;  %v5380_v52 = vld [vmem:[%s12457_s1 + $0x238] sm:$0xf0] }
 0x146   :  { %4372 = vmatpush.bf16.msra.mxu2 %v5415_v39  ;;  %4341 = vmatmul.bf16.vlgmr.msrb.gmra.mxu3 %v8631_v22  ;;  %v7696_v39 = vld [vmem:[%s12457_s1 + $0x144] sm:$0xf]  ;;  %v5324_v22 = vld [vmem:[%s12457_s1 + $0x1c8] sm:$0xf0] }
 0x147   :  { %4385 = vmatpush.bf16.msra.mxu3 %v5479_v62  ;;  %v5388_v62 = vld [vmem:[%s12457_s1 + $0x248] sm:$0xf0]  ;;  %v5263_v17 = vor.u32 %v7696_v39, %v5260_v59  ;;  %v7692_v39 = vld [vmem:[%s12457_s1 + $0x124] sm:$0xf] }
 0x148   :  { %4347 = vmatpush.bf16.msra.mxu0 %v5279_v21  ;;  %v4108_v21 = vpop.f32.mrf.mxu1  ;;  %v5244_v59 = vld [vmem:[%s12457_s1 + $0x128] sm:$0xf0] }
 0x149   :  { %4360 = vmatpush.bf16.msra.mxu1 %v5343_v32  ;;  %v5327_v32 = vor.u32 %v7712_v19, %v5324_v22  ;;  %v7708_v19 = vld [vmem:[%s12457_s1 + $0x1a4] sm:$0xf]  ;;  %v4121_v22 = vpop.f32.mrf.mxu2  ;;  %v4134_v3 = vpop.f32.mrf.mxu3 }
 0x14a   :  { %4373 = vmatpush.bf16.msra.mxu2 %v5407_v26  ;;  %v5391_v26 = vor.u32 %v7728_v60, %v5388_v62  ;;  %v5308_v60 = vld [vmem:[%s12457_s1 + $0x1a8] sm:$0xf0]  ;;  %v7724_v62 = vld [vmem:[%s12457_s1 + $0x224] sm:$0xf] }
 0x14b   :  { %4386 = vmatpush.bf16.msra.mxu3 %v5471_v61  ;;  %v4109_v61 = vadd.f32 %v4108_v21, %v4096_v55  ;;  %v7740_v55 = vld [vmem:[%s12457_s1 + $0x2a4] sm:$0xf]  ;;  %v4097_v21 = vpop.f32.mrf.mxu0 }
 0x14c   :  { %4348 = vmatpush.bf16.msra.mxu0 %v5271_v57  ;;  %v5255_v57 = vor.u32 %v7694_v40, %v5252_v47  ;;  %v5311_v47 = vor.u32 %v7708_v19, %v5308_v60  ;;  %v5292_v60 = vld [vmem:[%s12457_s1 + $0x188] sm:$0xf0]  ;;  %v7766_v21 = vld [vmem:[%s12457_s1 + $0x374] sm:$0xf] }
 0x14d   :  { %4361 = vmatpush.bf16.msra.mxu1 %v5335_v58  ;;  %v5319_v58 = vor.u32 %v7710_v48, %v5316_v50  ;;  %v4122_v2 = vadd.f32 %v4121_v22, %v4109_v61  ;;  %v5375_v48 = vor.u32 %v7724_v62, %v5372_v1  ;;  %v5236_v61 = vld [vmem:[%s12457_s1 + $0x118] sm:$0xf0]  ;;  %v7706_v50 = vld [vmem:[%s12457_s1 + $0x194] sm:$0xf]  ;;  %v7704_v22 = vld [vmem:[%s12457_s1 + $0x184] sm:$0xf] }
 0x14e   :  { %4374 = vmatpush.bf16.msra.mxu2 %v5399_v15  ;;  %v5383_v15 = vor.u32 %v7726_v51, %v5380_v52  ;;  %v5300_v52 = vld [vmem:[%s12457_s1 + $0x198] sm:$0xf0]  ;;  %v7720_v62 = vld [vmem:[%s12457_s1 + $0x204] sm:$0xf] }
 0x14f   :  { %4387 = vmatpush.bf16.msra.mxu3 %v5463_v9  ;;  %v5447_v9 = vor.u32 %v7742_v54, %v5444_v56  ;;  %v10586_v40 = vadd.f32 %v4134_v3, %v4122_v2  ;;  %v7722_v54 = vld [vmem:[%s12457_s1 + $0x214] sm:$0xf]  ;;  %v5364_v56 = vld [vmem:[%s12457_s1 + $0x218] sm:$0xf0]  ;;  %v5303_v19 = vor.u32 %v7706_v50, %v5300_v52  ;;  %v5356_v2 = vld [vmem:[%s12457_s1 + $0x208] sm:$0xf0] }
 0x150   :  { %4349 = vmatpush.bf16.msra.mxu0 %v5263_v17  ;;  %v5436_v17 = vld [vmem:[%s12457_s1 + $0x2a8] sm:$0xf0]  ;;  %v7736_v3 = vld [vmem:[%s12457_s1 + $0x284] sm:$0xf]  ;;  %v5668_v50 = vld [vmem:[%s12457_s1 + $0x478] sm:$0xf0]  ;;  %v5359_v52 = vor.u32 %v7720_v62, %v5356_v2 }
 0x151   :  { %4362 = vmatpush.bf16.msra.mxu1 %v5327_v32  ;;  %v5247_v32 = vor.u32 %v7692_v39, %v5244_v59  ;;  %v5439_v51 = vor.u32 %v7740_v55, %v5436_v17  ;;  %v7688_v39 = vld [vmem:[%s12457_s1 + $0x104] sm:$0xf]  ;;  %v5228_v59 = vld [vmem:[%s12457_s1 + $0x108] sm:$0xf0]  ;;  %v4123_v17 = vpop.f32.mrf.mxu2 }
 0x152   :  { %4375 = vmatpush.bf16.msra.mxu2 %v5391_v26  ;;  %v4110_v26 = vpop.f32.mrf.mxu1  ;;  %v5420_v55 = vld [vmem:[%s12457_s1 + $0x288] sm:$0xf0]  ;;  %v7796_v62 = vld [vmem:[%s12457_s1 + $0x464] sm:$0xf] }
 0x153   :  { %4388 = vmatpush.bf16.msra.mxu3 %v5455_v27  ;;  %v7690_v27 = vld [vmem:[%s12457_s1 + $0x114] sm:$0xf]  ;;  %v7812_v2 = vld [vmem:[%s12457_s1 + $0x4e4] sm:$0xf] }
 0x154   :  { %4350 = vmatpush.bf16.msra.mxu0 %v5255_v57  ;;  %v7738_v57 = vld [vmem:[%s12457_s1 + $0x294] sm:$0xf] }
 0x155   :  { %4363 = vmatpush.bf16.msra.mxu1 %v5319_v58  ;;  %v5428_v58 = vld [vmem:[%s12457_s1 + $0x298] sm:$0xf0]  ;;  %v7782_v26 = vld [vmem:[%s12457_s1 + $0x3f4] sm:$0xf] }
 0x156   :  { %4376 = vmatpush.bf16.msra.mxu2 %v5383_v15  ;;  %v5239_v15 = vor.u32 %v7690_v27, %v5236_v61  ;;  %v5431_v1 = vor.u32 %v7738_v57, %v5428_v58  ;;  %v5604_v27 = vld [vmem:[%s12457_s1 + $0x3f8] sm:$0xf0]  ;;  %v7798_v61 = vld [vmem:[%s12457_s1 + $0x474] sm:$0xf]  ;;  %v5423_v57 = vor.u32 %v7736_v3, %v5420_v55  ;;  %v5724_v3 = vld [vmem:[%s12457_s1 + $0x4e8] sm:$0xf0] }
 0x157   :  { %4389 = vmatpush.bf16.msra.mxu3 %v5447_v9  ;;  %v5367_v9 = vor.u32 %v7722_v54, %v5364_v56  ;;  %v7814_v54 = vld [vmem:[%s12457_s1 + $0x4f4] sm:$0xf]  ;;  %v5732_v56 = vld [vmem:[%s12457_s1 + $0x4f8] sm:$0xf0] }
 0x158   :  { %4351 = vmatpush.bf16.msra.mxu0 %v5247_v32  ;;  %v5540_v32 = vld [vmem:[%s12457_s1 + $0x378] sm:$0xf0] }
 0x159   :  { %4364 = vmatpush.bf16.msra.mxu1 %v5311_v47  ;;  %v4136_v47 = vpop.f32.mrf.mxu3  ;;  %v5543_v58 = vor.u32 %v7766_v21, %v5540_v32  ;;  %v7762_v32 = vld [vmem:[%s12457_s1 + $0x354] sm:$0xf] }
 0x15a   :  { %4377 = vmatpush.bf16.msra.mxu2 %v5375_v48  ;;  %v5231_v48 = vor.u32 %v7688_v39, %v5228_v59  ;;  %v5671_v39 = vor.u32 %v7798_v61, %v5668_v50  ;;  %v7764_v59 = vld [vmem:[%s12457_s1 + $0x364] sm:$0xf]  ;;  %v7778_v47 = vld [vmem:[%s12457_s1 + $0x3d4] sm:$0xf]  ;;  %v5652_v50 = vld [vmem:[%s12457_s1 + $0x458] sm:$0xf0] }
 0x15b   :  { %4390 = vmatpush.bf16.msra.mxu3 %v5439_v51  ;;  %v5295_v51 = vor.u32 %v7704_v22, %v5292_v60  ;;  %v5735_v22 = vor.u32 %v7814_v54, %v5732_v56  ;;  %v5596_v60 = vld [vmem:[%s12457_s1 + $0x3e8] sm:$0xf0]  ;;  %v7794_v61 = vld [vmem:[%s12457_s1 + $0x454] sm:$0xf] }
 0x15c   :  { %4352 = vmatpush.bf16.msra.mxu0 %v5239_v15  ;;  %v5607_v15 = vor.u32 %v7782_v26, %v5604_v27  ;;  %v5524_v26 = vld [vmem:[%s12457_s1 + $0x358] sm:$0xf0]  ;;  %v5655_v56 = vor.u32 %v7794_v61, %v5652_v50 }
 0x15d   :  { %4365 = vmatpush.bf16.msra.mxu1 %v5303_v19  ;;  %v5532_v19 = vld [vmem:[%s12457_s1 + $0x368] sm:$0xf0]  ;;  %v5588_v27 = vld [vmem:[%s12457_s1 + $0x3d8] sm:$0xf0] }
 0x15e   :  { %4378 = vmatpush.bf16.msra.mxu2 %v5367_v9  ;;  %v7780_v9 = vld [vmem:[%s12457_s1 + $0x3e4] sm:$0xf]  ;;  %v5535_v55 = vor.u32 %v7764_v59, %v5532_v19  ;;  %v5591_v54 = vor.u32 %v7778_v47, %v5588_v27  ;;  %v5636_v47 = vld [vmem:[%s12457_s1 + $0x438] sm:$0xf0] }
 0x15f   :  { %4391 = vmatpush.bf16.msra.mxu3 %v5431_v1  ;;  %v5660_v1 = vld [vmem:[%s12457_s1 + $0x468] sm:$0xf0]  ;;  %v5599_v17 = vor.u32 %v7780_v9, %v5596_v60  ;;  %v7808_v19 = vld [vmem:[%s12457_s1 + $0x4c4] sm:$0xf]  ;;  %v5700_v27 = vld [vmem:[%s12457_s1 + $0x4b8] sm:$0xf0] }
 0x160   :  { %4353 = vmatpush.bf16.msra.mxu0 %v5231_v48  ;;  %v5663_v21 = vor.u32 %v7796_v62, %v5660_v1  ;;  %v5727_v48 = vor.u32 %v7812_v2, %v5724_v3  ;;  %v4147_v59 = vpop.f32.mrf.mxu0  ;;  %v5708_v9 = vld [vmem:[%s12457_s1 + $0x4c8] sm:$0xf0]  ;;  %v7758_v3 = vld [vmem:[%s12457_s1 + $0x334] sm:$0xf] }
 0x161   :  { %4366 = vmatpush.bf16.msra.mxu1 %v5295_v51  ;;  %v7810_v51 = vld [vmem:[%s12457_s1 + $0x4d4] sm:$0xf]  ;;  %v4160_v62 = vpop.f32.mrf.mxu1 }
 0x162   :  { %4379 = vmatpush.bf16.msra.mxu2 %v5359_v52  ;;  %v5527_v52 = vor.u32 %v7762_v32, %v5524_v26  ;;  %v5572_v32 = vld [vmem:[%s12457_s1 + $0x3b8] sm:$0xf0]  ;;  %v7790_v26 = vld [vmem:[%s12457_s1 + $0x434] sm:$0xf] }
 0x163   :  { %4392 = vmatpush.bf16.msra.mxu3 %v5423_v57  ;;  %4354 = vmatmul.bf16.vlgmr.msra.gmra.mxu0 %v8625_v18  ;;  %v7760_v57 = vld [vmem:[%s12457_s1 + $0x344] sm:$0xf] }
 0x164   :  { %4398 = vmatpush.bf16.msrb.mxu0 %v5543_v58  ;;  %4367 = vmatmul.bf16.vlgmr.msra.gmra.mxu1 %v8629_v20  ;;  %v5516_v58 = vld [vmem:[%s12457_s1 + $0x348] sm:$0xf0]  ;;  %v7776_v18 = vld [vmem:[%s12457_s1 + $0x3c4] sm:$0xf] }
 0x165   :  { %4411 = vmatpush.bf16.msrb.mxu1 %v5607_v15  ;;  %4380 = vmatmul.bf16.vlgmr.msra.gmra.mxu2 %v8789_v41  ;;  %v5716_v41 = vld [vmem:[%s12457_s1 + $0x4d8] sm:$0xf0]  ;;  %v5580_v20 = vld [vmem:[%s12457_s1 + $0x3c8] sm:$0xf0]  ;;  %v7792_v15 = vld [vmem:[%s12457_s1 + $0x444] sm:$0xf]  ;;  %v5519_v60 = vor.u32 %v7760_v57, %v5516_v58 }
 0x166   :  { %4424 = vmatpush.bf16.msrb.mxu2 %v5671_v39  ;;  %4393 = vmatmul.bf16.vlgmr.msra.gmra.mxu3 %v8793_v44  ;;  %v5719_v44 = vor.u32 %v7810_v51, %v5716_v41  ;;  %v5644_v39 = vld [vmem:[%s12457_s1 + $0x448] sm:$0xf0]  ;;  %v5583_v1 = vor.u32 %v7776_v18, %v5580_v20  ;;  %v5639_v51 = vor.u32 %v7790_v26, %v5636_v47  ;;  %v7756_v41 = vld [vmem:[%s12457_s1 + $0x324] sm:$0xf]  ;;  %v7802_v26 = vld [vmem:[%s12457_s1 + $0x494] sm:$0xf] }
 0x167   :  { %4437 = vmatpush.bf16.msrb.mxu3 %v5735_v22  ;;  %v4148_v22 = vadd.f32 %v4147_v59, %v10586_v40  ;;  %v5647_v2 = vor.u32 %v7792_v15, %v5644_v39  ;;  %v5711_v40 = vor.u32 %v7808_v19, %v5708_v9  ;;  %v5564_v58 = vld [vmem:[%s12457_s1 + $0x3a8] sm:$0xf0]  ;;  %v7788_v18 = vld [vmem:[%s12457_s1 + $0x424] sm:$0xf]  ;;  %v5684_v47 = vld [vmem:[%s12457_s1 + $0x498] sm:$0xf0] }
 0x168   :  { %4399 = vmatpush.bf16.msrb.mxu0 %v5535_v55  ;;  %v5508_v55 = vld [vmem:[%s12457_s1 + $0x338] sm:$0xf0]  ;;  %v4173_v57 = vpop.f32.mrf.mxu2  ;;  %v7804_v39 = vld [vmem:[%s12457_s1 + $0x4a4] sm:$0xf]  ;;  %v5692_v59 = vld [vmem:[%s12457_s1 + $0x4a8] sm:$0xf0]  ;;  %v4149_v19 = vpop.f32.mrf.mxu0 }
 0x169   :  { %4412 = vmatpush.bf16.msrb.mxu1 %v5599_v17  ;;  %v7774_v17 = vld [vmem:[%s12457_s1 + $0x3b4] sm:$0xf]  ;;  %v5511_v61 = vor.u32 %v7758_v3, %v5508_v55  ;;  %v4186_v15 = vpop.f32.mrf.mxu3  ;;  %v5492_v3 = vld [vmem:[%s12457_s1 + $0x318] sm:$0xf0] }
 0x16a   :  { %4425 = vmatpush.bf16.msrb.mxu2 %v5663_v21  ;;  %v4161_v21 = vadd.f32 %v4160_v62, %v4148_v22  ;;  %v5575_v50 = vor.u32 %v7774_v17, %v5572_v32  ;;  %v4162_v22 = vpop.f32.mrf.mxu1  ;;  %v7770_v55 = vld [vmem:[%s12457_s1 + $0x394] sm:$0xf]  ;;  %v5695_v17 = vor.u32 %v7804_v39, %v5692_v59  ;;  %v5620_v32 = vld [vmem:[%s12457_s1 + $0x418] sm:$0xf0] }
 0x16b   :  { %4438 = vmatpush.bf16.msrb.mxu3 %v5727_v48  ;;  %v7806_v48 = vld [vmem:[%s12457_s1 + $0x4b4] sm:$0xf] }
 0x16c   :  { %4400 = vmatpush.bf16.msrb.mxu0 %v5527_v52  ;;  %v5500_v52 = vld [vmem:[%s12457_s1 + $0x328] sm:$0xf0]  ;;  %v4174_v20 = vadd.f32 %v4173_v57, %v4161_v21  ;;  %v7786_v21 = vld [vmem:[%s12457_s1 + $0x414] sm:$0xf] }
 0x16d   :  { %4413 = vmatpush.bf16.msrb.mxu1 %v5591_v54  ;;  %v7772_v54 = vld [vmem:[%s12457_s1 + $0x3a4] sm:$0xf]  ;;  %v5503_v9 = vor.u32 %v7756_v41, %v5500_v52  ;;  %v5548_v52 = vld [vmem:[%s12457_s1 + $0x388] sm:$0xf0]  ;;  %v7846_v39 = vld [vmem:[%s12457_s1 + $0x5f4] sm:$0xf] }
 0x16e   :  { %4426 = vmatpush.bf16.msrb.mxu2 %v5655_v56  ;;  %v5703_v56 = vor.u32 %v7806_v48, %v5700_v27  ;;  %v5567_v62 = vor.u32 %v7772_v54, %v5564_v58  ;;  %v7752_v27 = vld [vmem:[%s12457_s1 + $0x304] sm:$0xf]  ;;  %v5612_v57 = vld [vmem:[%s12457_s1 + $0x408] sm:$0xf0]  ;;  %v7862_v22 = vld [vmem:[%s12457_s1 + $0x674] sm:$0xf] }
 0x16f   :  { %4439 = vmatpush.bf16.msrb.mxu3 %v5719_v44  ;;  %v5628_v44 = vld [vmem:[%s12457_s1 + $0x428] sm:$0xf0]  ;;  %v7768_v41 = vld [vmem:[%s12457_s1 + $0x384] sm:$0xf] }
 0x170   :  { %4401 = vmatpush.bf16.msrb.mxu0 %v5519_v60  ;;  %v10785_v60 = vadd.f32 %v4186_v15, %v4174_v20  ;;  %v7784_v54 = vld [vmem:[%s12457_s1 + $0x404] sm:$0xf]  ;;  %v7830_v20 = vld [vmem:[%s12457_s1 + $0x574] sm:$0xf]  ;;  %v5796_v15 = vld [vmem:[%s12457_s1 + $0x578] sm:$0xf0] }
 0x171   :  { %4414 = vmatpush.bf16.msrb.mxu1 %v5583_v1  ;;  %v5631_v1 = vor.u32 %v7788_v18, %v5628_v44  ;;  %v7800_v58 = vld [vmem:[%s12457_s1 + $0x484] sm:$0xf]  ;;  %v5676_v18 = vld [vmem:[%s12457_s1 + $0x488] sm:$0xf0]  ;;  %v4175_v44 = vpop.f32.mrf.mxu2  ;;  %v4188_v59 = vpop.f32.mrf.mxu3 }
 0x172   :  { %4427 = vmatpush.bf16.msrb.mxu2 %v5647_v2  ;;  %v7754_v2 = vld [vmem:[%s12457_s1 + $0x314] sm:$0xf]  ;;  %v5908_v59 = vld [vmem:[%s12457_s1 + $0x658] sm:$0xf0] }
 0x173   :  { %4440 = vmatpush.bf16.msrb.mxu3 %v5711_v40  ;;  %v5556_v40 = vld [vmem:[%s12457_s1 + $0x398] sm:$0xf0]  ;;  %v5495_v48 = vor.u32 %v7754_v2, %v5492_v3  ;;  %v5615_v2 = vor.u32 %v7784_v54, %v5612_v57  ;;  %v7878_v3 = vld [vmem:[%s12457_s1 + $0x6f4] sm:$0xf] }
 0x174   :  { %4402 = vmatpush.bf16.msrb.mxu0 %v5511_v61  ;;  %v5484_v61 = vld [vmem:[%s12457_s1 + $0x308] sm:$0xf0]  ;;  %v7842_v44 = vld [vmem:[%s12457_s1 + $0x5d4] sm:$0xf] }
 0x175   :  { %4415 = vmatpush.bf16.msrb.mxu1 %v5575_v50  ;;  %v5559_v50 = vor.u32 %v7770_v55, %v5556_v40  ;;  %v5487_v19 = vor.u32 %v7752_v27, %v5484_v61  ;;  %v5988_v55 = vld [vmem:[%s12457_s1 + $0x6f8] sm:$0xf0]  ;;  %v5799_v40 = vor.u32 %v7830_v20, %v5796_v15  ;;  %v5852_v61 = vld [vmem:[%s12457_s1 + $0x5e8] sm:$0xf0] }
 0x176   :  { %4428 = vmatpush.bf16.msrb.mxu2 %v5639_v51  ;;  %v5623_v51 = vor.u32 %v7786_v21, %v5620_v32  ;;  %v5991_v27 = vor.u32 %v7878_v3, %v5988_v55  ;;  %v5844_v15 = vld [vmem:[%s12457_s1 + $0x5d8] sm:$0xf0]  ;;  %v7856_v3 = vld [vmem:[%s12457_s1 + $0x644] sm:$0xf]  ;;  %v5900_v55 = vld [vmem:[%s12457_s1 + $0x648] sm:$0xf0] }
 0x177   :  { %4441 = vmatpush.bf16.msrb.mxu3 %v5703_v56  ;;  %v5687_v56 = vor.u32 %v7802_v26, %v5684_v47  ;;  %v7828_v26 = vld [vmem:[%s12457_s1 + $0x564] sm:$0xf]  ;;  %v5788_v47 = vld [vmem:[%s12457_s1 + $0x568] sm:$0xf0] }
 0x178   :  { %4403 = vmatpush.bf16.msrb.mxu0 %v5503_v9  ;;  %v5860_v9 = vld [vmem:[%s12457_s1 + $0x5f8] sm:$0xf0]  ;;  %v5791_v54 = vor.u32 %v7828_v26, %v5788_v47 }
 0x179   :  { %4416 = vmatpush.bf16.msrb.mxu1 %v5567_v62  ;;  %v5924_v62 = vld [vmem:[%s12457_s1 + $0x678] sm:$0xf0]  ;;  %v5863_v21 = vor.u32 %v7846_v39, %v5860_v9  ;;  %v7858_v39 = vld [vmem:[%s12457_s1 + $0x654] sm:$0xf] }
 0x17a   :  { %4429 = vmatpush.bf16.msrb.mxu2 %v5631_v1  ;;  %v5551_v1 = vor.u32 %v7768_v41, %v5548_v52  ;;  %v5927_v32 = vor.u32 %v7862_v22, %v5924_v62  ;;  %v7876_v41 = vld [vmem:[%s12457_s1 + $0x6e4] sm:$0xf]  ;;  %v5980_v52 = vld [vmem:[%s12457_s1 + $0x6e8] sm:$0xf0]  ;;  %v5847_v22 = vor.u32 %v7842_v44, %v5844_v15  ;;  %v5911_v62 = vor.u32 %v7858_v39, %v5908_v59 }
 0x17b   :  { %4442 = vmatpush.bf16.msrb.mxu3 %v5695_v17  ;;  %v5679_v17 = vor.u32 %v7800_v58, %v5676_v18  ;;  %v7826_v58 = vld [vmem:[%s12457_s1 + $0x554] sm:$0xf]  ;;  %v5780_v18 = vld [vmem:[%s12457_s1 + $0x558] sm:$0xf0]  ;;  %v5983_v20 = vor.u32 %v7876_v41, %v5980_v52  ;;  %v7820_v15 = vld [vmem:[%s12457_s1 + $0x524] sm:$0xf] }
 0x17c   :  { %4404 = vmatpush.bf16.msrb.mxu0 %v5495_v48  ;;  %v7844_v48 = vld [vmem:[%s12457_s1 + $0x5e4] sm:$0xf]  ;;  %v5783_v9 = vor.u32 %v7826_v58, %v5780_v18  ;;  %v5828_v52 = vld [vmem:[%s12457_s1 + $0x5b8] sm:$0xf0]  ;;  %v5756_v39 = vld [vmem:[%s12457_s1 + $0x528] sm:$0xf0] }
 0x17d   :  { %4417 = vmatpush.bf16.msrb.mxu1 %v5559_v50  ;;  %v7860_v50 = vld [vmem:[%s12457_s1 + $0x664] sm:$0xf]  ;;  %v5956_v58 = vld [vmem:[%s12457_s1 + $0x6b8] sm:$0xf0] }
 0x17e   :  { %4430 = vmatpush.bf16.msrb.mxu2 %v5623_v51  ;;  %v5916_v51 = vld [vmem:[%s12457_s1 + $0x668] sm:$0xf0]  ;;  %v7836_v59 = vld [vmem:[%s12457_s1 + $0x5a4] sm:$0xf] }
 0x17f   :  { %4443 = vmatpush.bf16.msrb.mxu3 %v5687_v56  ;;  %v5855_v56 = vor.u32 %v7844_v48, %v5852_v61  ;;  %v5919_v57 = vor.u32 %v7860_v50, %v5916_v51  ;;  %v7822_v61 = vld [vmem:[%s12457_s1 + $0x534] sm:$0xf]  ;;  %v5764_v50 = vld [vmem:[%s12457_s1 + $0x538] sm:$0xf0] }
 0x180   :  { %4405 = vmatpush.bf16.msrb.mxu0 %v5487_v19  ;;  %v5972_v19 = vld [vmem:[%s12457_s1 + $0x6d8] sm:$0xf0]  ;;  %v7838_v51 = vld [vmem:[%s12457_s1 + $0x5b4] sm:$0xf]  ;;  %v5767_v18 = vor.u32 %v7822_v61, %v5764_v50 }
 0x181   :  { %4418 = vmatpush.bf16.msrb.mxu1 %v5551_v1  ;;  %v7840_v1 = vld [vmem:[%s12457_s1 + $0x5c4] sm:$0xf]  ;;  %v4212_v47 = vpop.f32.mrf.mxu1  ;;  %v5831_v44 = vor.u32 %v7838_v51, %v5828_v52  ;;  %v7850_v61 = vld [vmem:[%s12457_s1 + $0x614] sm:$0xf]  ;;  %v5876_v50 = vld [vmem:[%s12457_s1 + $0x618] sm:$0xf0] }
 0x182   :  { %4431 = vmatpush.bf16.msrb.mxu2 %v5615_v2  ;;  %v5836_v2 = vld [vmem:[%s12457_s1 + $0x5c8] sm:$0xf0]  ;;  %v7866_v51 = vld [vmem:[%s12457_s1 + $0x694] sm:$0xf]  ;;  %v7816_v52 = vld [vmem:[%s12457_s1 + $0x504] sm:$0xf] }
 0x183   :  { %4444 = vmatpush.bf16.msrb.mxu3 %v5679_v17  ;;  %4406 = vmatmul.bf16.vlgmr.msrb.gmra.mxu0 %v8781_v38  ;;  %v7874_v38 = vld [vmem:[%s12457_s1 + $0x6d4] sm:$0xf]  ;;  %v4199_v17 = vpop.f32.mrf.mxu0  ;;  %v5839_v48 = vor.u32 %v7840_v1, %v5836_v2  ;;  %v7868_v1 = vld [vmem:[%s12457_s1 + $0x6a4] sm:$0xf] }
 0x184   :  { %4450 = vmatpush.bf16.msra.mxu0 %v5799_v40  ;;  %4419 = vmatmul.bf16.vlgmr.msrb.gmra.mxu1 %v8791_v42  ;;  %v7824_v42 = vld [vmem:[%s12457_s1 + $0x544] sm:$0xf] }
 0x185   :  { %4463 = vmatpush.bf16.msra.mxu1 %v5863_v21  ;;  %4432 = vmatmul.bf16.vlgmr.msrb.gmra.mxu2 %v8982_v25  ;;  %v5772_v25 = vld [vmem:[%s12457_s1 + $0x548] sm:$0xf0]  ;;  %v7872_v40 = vld [vmem:[%s12457_s1 + $0x6c4] sm:$0xf] }
 0x186   :  { %4476 = vmatpush.bf16.msra.mxu2 %v5927_v32  ;;  %4445 = vmatmul.bf16.vlgmr.msrb.gmra.mxu3 %v8995_v30  ;;  %v5975_v30 = vor.u32 %v7874_v38, %v5972_v19  ;;  %v5964_v21 = vld [vmem:[%s12457_s1 + $0x6c8] sm:$0xf0]  ;;  %v4200_v32 = vadd.f32 %v4199_v17, %v10785_v60  ;;  %v5775_v26 = vor.u32 %v7824_v42, %v5772_v25 }
 0x187   :  { %4489 = vmatpush.bf16.msra.mxu3 %v5991_v27  ;;  %v5903_v27 = vor.u32 %v7856_v3, %v5900_v55  ;;  %v5967_v60 = vor.u32 %v7872_v40, %v5964_v21  ;;  %v5759_v3 = vor.u32 %v7820_v15, %v5756_v39  ;;  %v5868_v15 = vld [vmem:[%s12457_s1 + $0x608] sm:$0xf0]  ;;  %v7864_v39 = vld [vmem:[%s12457_s1 + $0x684] sm:$0xf] }
 0x188   :  { %4451 = vmatpush.bf16.msra.mxu0 %v5791_v54  ;;  %v4213_v41 = vadd.f32 %v4212_v47, %v4200_v32  ;;  %v7854_v54 = vld [vmem:[%s12457_s1 + $0x634] sm:$0xf]  ;;  %v4225_v19 = vpop.f32.mrf.mxu2 }
 0x189   :  { %4464 = vmatpush.bf16.msra.mxu1 %v5855_v56  ;;  %v5892_v56 = vld [vmem:[%s12457_s1 + $0x638] sm:$0xf0]  ;;  %v4238_v25 = vpop.f32.mrf.mxu3  ;;  %v4214_v55 = vpop.f32.mrf.mxu1  ;;  %v7818_v32 = vld [vmem:[%s12457_s1 + $0x514] sm:$0xf] }
 0x18a   :  { %4477 = vmatpush.bf16.msra.mxu2 %v5919_v57  ;;  %v7870_v57 = vld [vmem:[%s12457_s1 + $0x6b4] sm:$0xf]  ;;  %v4226_v42 = vadd.f32 %v4225_v19, %v4213_v41 }
 0x18b   :  { %4490 = vmatpush.bf16.msra.mxu3 %v5983_v20  ;;  %v5895_v20 = vor.u32 %v7854_v54, %v5892_v56  ;;  %v5959_v38 = vor.u32 %v7870_v57, %v5956_v58  ;;  %v4201_v2 = vpop.f32.mrf.mxu0  ;;  %v7834_v47 = vld [vmem:[%s12457_s1 + $0x594] sm:$0xf]  ;;  %v5740_v54 = vld [vmem:[%s12457_s1 + $0x508] sm:$0xf0]  ;;  %v5879_v57 = vor.u32 %v7850_v61, %v5876_v50  ;;  %v7832_v58 = vld [vmem:[%s12457_s1 + $0x584] sm:$0xf] }
 0x18c   :  { %4452 = vmatpush.bf16.msra.mxu0 %v5783_v9  ;;  %v5820_v9 = vld [vmem:[%s12457_s1 + $0x5a8] sm:$0xf0]  ;;  %v10984_v17 = vadd.f32 %v4238_v25, %v4226_v42  ;;  %v7894_v19 = vld [vmem:[%s12457_s1 + $0x774] sm:$0xf]  ;;  %v5743_v42 = vor.u32 %v7816_v52, %v5740_v54  ;;  %v6116_v25 = vld [vmem:[%s12457_s1 + $0x7f8] sm:$0xf0] }
 0x18d   :  { %4465 = vmatpush.bf16.msra.mxu1 %v5847_v22  ;;  %v7852_v22 = vld [vmem:[%s12457_s1 + $0x624] sm:$0xf]  ;;  %v5823_v40 = vor.u32 %v7836_v59, %v5820_v9  ;;  %v5932_v59 = vld [vmem:[%s12457_s1 + $0x688] sm:$0xf0]  ;;  %v6052_v9 = vld [vmem:[%s12457_s1 + $0x778] sm:$0xf0] }
 0x18e   :  { %4478 = vmatpush.bf16.msra.mxu2 %v5911_v62  ;;  %v5884_v62 = vld [vmem:[%s12457_s1 + $0x628] sm:$0xf0]  ;;  %v7942_v55 = vld [vmem:[%s12457_s1 + $0x8f4] sm:$0xf]  ;;  %v7908_v61 = vld [vmem:[%s12457_s1 + $0x7e4] sm:$0xf] }
 0x18f   :  { %4491 = vmatpush.bf16.msra.mxu3 %v5975_v30  ;;  %v5948_v30 = vld [vmem:[%s12457_s1 + $0x6a8] sm:$0xf0]  ;;  %v5887_v21 = vor.u32 %v7852_v22, %v5884_v62  ;;  %v7910_v22 = vld [vmem:[%s12457_s1 + $0x7f4] sm:$0xf]  ;;  %v7940_v52 = vld [vmem:[%s12457_s1 + $0x8e4] sm:$0xf] }
 0x190   :  { %4453 = vmatpush.bf16.msra.mxu0 %v5775_v26  ;;  %v5748_v26 = vld [vmem:[%s12457_s1 + $0x518] sm:$0xf0]  ;;  %v6236_v54 = vld [vmem:[%s12457_s1 + $0x8e8] sm:$0xf0] }
 0x191   :  { %4466 = vmatpush.bf16.msra.mxu1 %v5839_v48  ;;  %v5951_v48 = vor.u32 %v7868_v1, %v5948_v30  ;;  %v5751_v41 = vor.u32 %v7818_v32, %v5748_v26  ;;  %v4240_v62 = vpop.f32.mrf.mxu3  ;;  %v7926_v1 = vld [vmem:[%s12457_s1 + $0x874] sm:$0xf]  ;;  %v6180_v30 = vld [vmem:[%s12457_s1 + $0x878] sm:$0xf0]  ;;  %v6055_v32 = vor.u32 %v7894_v19, %v6052_v9  ;;  %v6119_v26 = vor.u32 %v7910_v22, %v6116_v25  ;;  %v6092_v25 = vld [vmem:[%s12457_s1 + $0x7c8] sm:$0xf0] }
 0x192   :  { %4479 = vmatpush.bf16.msra.mxu2 %v5903_v27  ;;  %v5812_v27 = vld [vmem:[%s12457_s1 + $0x598] sm:$0xf0] }
 0x193   :  { %4492 = vmatpush.bf16.msra.mxu3 %v5967_v60  ;;  %v5940_v60 = vld [vmem:[%s12457_s1 + $0x698] sm:$0xf0]  ;;  %v5815_v56 = vor.u32 %v7834_v47, %v5812_v27  ;;  %v6183_v47 = vor.u32 %v7926_v1, %v6180_v30  ;;  %v6044_v27 = vld [vmem:[%s12457_s1 + $0x768] sm:$0xf0]  ;;  %v7920_v1 = vld [vmem:[%s12457_s1 + $0x844] sm:$0xf] }
 0x194   :  { %4454 = vmatpush.bf16.msra.mxu0 %v5767_v18  ;;  %v5804_v18 = vld [vmem:[%s12457_s1 + $0x588] sm:$0xf0]  ;;  %v6228_v19 = vld [vmem:[%s12457_s1 + $0x8d8] sm:$0xf0] }
 0x195   :  { %4467 = vmatpush.bf16.msra.mxu1 %v5831_v44  ;;  %v7848_v44 = vld [vmem:[%s12457_s1 + $0x604] sm:$0xf]  ;;  %v5807_v2 = vor.u32 %v7832_v58, %v5804_v18  ;;  %v7890_v18 = vld [vmem:[%s12457_s1 + $0x754] sm:$0xf]  ;;  %v6156_v30 = vld [vmem:[%s12457_s1 + $0x848] sm:$0xf0] }
 0x196   :  { %4480 = vmatpush.bf16.msra.mxu2 %v5895_v20  ;;  %v5943_v20 = vor.u32 %v7866_v51, %v5940_v60  ;;  %v6108_v51 = vld [vmem:[%s12457_s1 + $0x7e8] sm:$0xf0]  ;;  %v7924_v60 = vld [vmem:[%s12457_s1 + $0x864] sm:$0xf] }
 0x197   :  { %4493 = vmatpush.bf16.msra.mxu3 %v5959_v38  ;;  %v4227_v38 = vpop.f32.mrf.mxu2 }
 0x198   :  { %4455 = vmatpush.bf16.msra.mxu0 %v5759_v3  ;;  %v5871_v3 = vor.u32 %v7848_v44, %v5868_v15  ;;  %v6036_v44 = vld [vmem:[%s12457_s1 + $0x758] sm:$0xf0]  ;;  %v6239_v15 = vor.u32 %v7940_v52, %v6236_v54  ;;  %v7934_v52 = vld [vmem:[%s12457_s1 + $0x8b4] sm:$0xf] }
 0x199   :  { %4468 = vmatpush.bf16.msra.mxu1 %v5823_v40  ;;  %v6244_v40 = vld [vmem:[%s12457_s1 + $0x8f8] sm:$0xf0]  ;;  %v6039_v9 = vor.u32 %v7890_v18, %v6036_v44  ;;  %v7884_v18 = vld [vmem:[%s12457_s1 + $0x724] sm:$0xf]  ;;  %v6012_v44 = vld [vmem:[%s12457_s1 + $0x728] sm:$0xf0] }
 0x19a   :  { %4481 = vmatpush.bf16.msra.mxu2 %v5887_v21  ;;  %v5935_v21 = vor.u32 %v7864_v39, %v5932_v59  ;;  %v6247_v50 = vor.u32 %v7942_v55, %v6244_v40  ;;  %v6100_v39 = vld [vmem:[%s12457_s1 + $0x7d8] sm:$0xf0]  ;;  %v7922_v59 = vld [vmem:[%s12457_s1 + $0x854] sm:$0xf]  ;;  %v6220_v55 = vld [vmem:[%s12457_s1 + $0x8c8] sm:$0xf0] }
 0x19b   :  { %4494 = vmatpush.bf16.msra.mxu3 %v5951_v48  ;;  %v7892_v48 = vld [vmem:[%s12457_s1 + $0x764] sm:$0xf]  ;;  %v6164_v38 = vld [vmem:[%s12457_s1 + $0x858] sm:$0xf0] }
 0x19c   :  { %4456 = vmatpush.bf16.msra.mxu0 %v5751_v41  ;;  %v6172_v41 = vld [vmem:[%s12457_s1 + $0x868] sm:$0xf0]  ;;  %v6167_v62 = vor.u32 %v7922_v59, %v6164_v38  ;;  %v6212_v54 = vld [vmem:[%s12457_s1 + $0x8b8] sm:$0xf0]  ;;  %v7916_v38 = vld [vmem:[%s12457_s1 + $0x824] sm:$0xf] }
 0x19d   :  { %4469 = vmatpush.bf16.msra.mxu1 %v5815_v56  ;;  %v6047_v56 = vor.u32 %v7892_v48, %v6044_v27  ;;  %v6175_v58 = vor.u32 %v7924_v60, %v6172_v41  ;;  %v7886_v48 = vld [vmem:[%s12457_s1 + $0x734] sm:$0xf]  ;;  %v6020_v27 = vld [vmem:[%s12457_s1 + $0x738] sm:$0xf0]  ;;  %v6076_v59 = vld [vmem:[%s12457_s1 + $0x7a8] sm:$0xf0] }
 0x19e   :  { %4482 = vmatpush.bf16.msra.mxu2 %v5879_v57  ;;  %v6111_v57 = vor.u32 %v7908_v61, %v6108_v51  ;;  %v7902_v61 = vld [vmem:[%s12457_s1 + $0x7b4] sm:$0xf]  ;;  %v6084_v51 = vld [vmem:[%s12457_s1 + $0x7b8] sm:$0xf0] }
 0x19f   :  { %4495 = vmatpush.bf16.msra.mxu3 %v5943_v20  ;;  %v7906_v20 = vld [vmem:[%s12457_s1 + $0x7d4] sm:$0xf]  ;;  %v6148_v41 = vld [vmem:[%s12457_s1 + $0x838] sm:$0xf0] }
 0x1a0   :  { %4457 = vmatpush.bf16.msra.mxu0 %v5743_v42  ;;  %v6103_v22 = vor.u32 %v7906_v20, %v6100_v39  ;;  %v7904_v42 = vld [vmem:[%s12457_s1 + $0x7c4] sm:$0xf]  ;;  %v7918_v60 = vld [vmem:[%s12457_s1 + $0x834] sm:$0xf] }
 0x1a1   :  { %4470 = vmatpush.bf16.msra.mxu1 %v5807_v2  ;;  %v4251_v2 = vpop.f32.mrf.mxu0  ;;  %v7900_v20 = vld [vmem:[%s12457_s1 + $0x7a4] sm:$0xf] }
 0x1a2   :  { %4483 = vmatpush.bf16.msra.mxu2 %v5871_v3  ;;  %v7936_v3 = vld [vmem:[%s12457_s1 + $0x8c4] sm:$0xf]  ;;  %v4252_v40 = vadd.f32 %v4251_v2, %v10984_v17  ;;  %v6004_v2 = vld [vmem:[%s12457_s1 + $0x718] sm:$0xf0] }
 0x1a3   :  { %4496 = vmatpush.bf16.msra.mxu3 %v5935_v21  ;;  %4458 = vmatmul.bf16.vlgmr.msra.gmra.mxu0 %v8993_v29  ;;  %v7938_v29 = vld [vmem:[%s12457_s1 + $0x8d4] sm:$0xf]  ;;  %v6223_v17 = vor.u32 %v7936_v3, %v6220_v55 }
 0x1a4   :  { %4502 = vmatpush.bf16.msrb.mxu0 %v6055_v32  ;;  %4471 = vmatmul.bf16.vlgmr.msra.gmra.mxu1 %v9003_v33  ;;  %v7888_v33 = vld [vmem:[%s12457_s1 + $0x744] sm:$0xf]  ;;  %v4264_v32 = vpop.f32.mrf.mxu1  ;;  %v7898_v3 = vld [vmem:[%s12457_s1 + $0x794] sm:$0xf] }
 0x1a5   :  { %4515 = vmatpush.bf16.msrb.mxu1 %v6119_v26  ;;  %4484 = vmatmul.bf16.vlgmr.msra.gmra.mxu2 %v9192_v23  ;;  %v6028_v23 = vld [vmem:[%s12457_s1 + $0x748] sm:$0xf0]  ;;  %v6095_v26 = vor.u32 %v7904_v42, %v6092_v25  ;;  %v6079_v25 = vor.u32 %v7900_v20, %v6076_v59  ;;  %v7974_v20 = vld [vmem:[%s12457_s1 + $0x9f4] sm:$0xf]  ;;  %v6372_v59 = vld [vmem:[%s12457_s1 + $0x9f8] sm:$0xf0] }
 0x1a6   :  { %4528 = vmatpush.bf16.msrb.mxu2 %v6183_v47  ;;  %4497 = vmatmul.bf16.vlgmr.msra.gmra.mxu3 %v9205_v31  ;;  %v6231_v31 = vor.u32 %v7938_v29, %v6228_v19  ;;  %v6031_v21 = vor.u32 %v7888_v33, %v6028_v23  ;;  %v6159_v47 = vor.u32 %v7920_v1, %v6156_v30  ;;  %v6140_v29 = vld [vmem:[%s12457_s1 + $0x828] sm:$0xf0]  ;;  %v7882_v30 = vld [vmem:[%s12457_s1 + $0x714] sm:$0xf] }
 0x1a7   :  { %4541 = vmatpush.bf16.msrb.mxu3 %v6247_v50  ;;  %v4265_v50 = vadd.f32 %v4264_v32, %v4252_v40  ;;  %v6015_v23 = vor.u32 %v7884_v18, %v6012_v44  ;;  %v6143_v1 = vor.u32 %v7916_v38, %v6140_v29  ;;  %v6068_v40 = vld [vmem:[%s12457_s1 + $0x798] sm:$0xf0]  ;;  %v7958_v18 = vld [vmem:[%s12457_s1 + $0x974] sm:$0xf] }
 0x1a8   :  { %4503 = vmatpush.bf16.msrb.mxu0 %v6047_v56  ;;  %v6023_v56 = vor.u32 %v7886_v48, %v6020_v27  ;;  %v4277_v39 = vpop.f32.mrf.mxu2  ;;  %v6132_v32 = vld [vmem:[%s12457_s1 + $0x818] sm:$0xf0]  ;;  %v6007_v48 = vor.u32 %v7882_v30, %v6004_v2  ;;  %v7880_v27 = vld [vmem:[%s12457_s1 + $0x704] sm:$0xf]  ;;  %v7990_v38 = vld [vmem:[%s12457_s1 + $0xa74] sm:$0xf] }
 0x1a9   :  { %4516 = vmatpush.bf16.msrb.mxu1 %v6111_v57  ;;  %v6087_v57 = vor.u32 %v7902_v61, %v6084_v51  ;;  %v4278_v19 = vadd.f32 %v4277_v39, %v4265_v50  ;;  %v4253_v33 = vpop.f32.mrf.mxu0  ;;  %v5996_v61 = vld [vmem:[%s12457_s1 + $0x708] sm:$0xf0]  ;;  %v7896_v51 = vld [vmem:[%s12457_s1 + $0x784] sm:$0xf]  ;;  %v6308_v44 = vld [vmem:[%s12457_s1 + $0x978] sm:$0xf0] }
 0x1aa   :  { %4529 = vmatpush.bf16.msrb.mxu2 %v6175_v58  ;;  %v6151_v58 = vor.u32 %v7918_v60, %v6148_v41  ;;  %v6060_v60 = vld [vmem:[%s12457_s1 + $0x788] sm:$0xf0]  ;;  %v7912_v41 = vld [vmem:[%s12457_s1 + $0x804] sm:$0xf]  ;;  %v5999_v39 = vor.u32 %v7880_v27, %v5996_v61  ;;  %v6436_v29 = vld [vmem:[%s12457_s1 + $0xa78] sm:$0xf0] }
 0x1ab   :  { %4542 = vmatpush.bf16.msrb.mxu3 %v6239_v15  ;;  %v6215_v15 = vor.u32 %v7934_v52, %v6212_v54  ;;  %v6124_v54 = vld [vmem:[%s12457_s1 + $0x808] sm:$0xf0]  ;;  %v7972_v2 = vld [vmem:[%s12457_s1 + $0x9e4] sm:$0xf]  ;;  %v7954_v61 = vld [vmem:[%s12457_s1 + $0x954] sm:$0xf] }
 0x1ac   :  { %4504 = vmatpush.bf16.msrb.mxu0 %v6039_v9  ;;  %v4290_v9 = vpop.f32.mrf.mxu3  ;;  %v4266_v42 = vpop.f32.mrf.mxu1  ;;  %v6300_v30 = vld [vmem:[%s12457_s1 + $0x968] sm:$0xf0] }
 0x1ad   :  { %4517 = vmatpush.bf16.msrb.mxu1 %v6103_v22  ;;  %v7932_v22 = vld [vmem:[%s12457_s1 + $0x8a4] sm:$0xf]  ;;  %v6375_v42 = vor.u32 %v7974_v20, %v6372_v59 }
 0x1ae   :  { %4530 = vmatpush.bf16.msrb.mxu2 %v6167_v62  ;;  %v6204_v62 = vld [vmem:[%s12457_s1 + $0x8a8] sm:$0xf0]  ;;  %v7984_v20 = vld [vmem:[%s12457_s1 + $0xa44] sm:$0xf] }
 0x1af   :  { %4543 = vmatpush.bf16.msrb.mxu3 %v6231_v31  ;;  %v11183_v31 = vadd.f32 %v4290_v9, %v4278_v19  ;;  %v6207_v55 = vor.u32 %v7932_v22, %v6204_v62  ;;  %v6063_v19 = vor.u32 %v7896_v51, %v6060_v60  ;;  %v6127_v9 = vor.u32 %v7912_v41, %v6124_v54  ;;  %v8006_v22 = vld [vmem:[%s12457_s1 + $0xaf4] sm:$0xf]  ;;  %v6500_v62 = vld [vmem:[%s12457_s1 + $0xaf8] sm:$0xf0]  ;;  %v8000_v59 = vld [vmem:[%s12457_s1 + $0xac4] sm:$0xf] }
 0x1b0   :  { %4505 = vmatpush.bf16.msrb.mxu0 %v6031_v21  ;;  %v7914_v21 = vld [vmem:[%s12457_s1 + $0x814] sm:$0xf]  ;;  %v6356_v60 = vld [vmem:[%s12457_s1 + $0x9d8] sm:$0xf0] }
 0x1b1   :  { %4518 = vmatpush.bf16.msrb.mxu1 %v6095_v26  ;;  %v7930_v26 = vld [vmem:[%s12457_s1 + $0x894] sm:$0xf]  ;;  %v6135_v50 = vor.u32 %v7914_v21, %v6132_v32  ;;  %v6428_v21 = vld [vmem:[%s12457_s1 + $0xa68] sm:$0xf0]  ;;  %v8004_v32 = vld [vmem:[%s12457_s1 + $0xae4] sm:$0xf] }
 0x1b2   :  { %4531 = vmatpush.bf16.msrb.mxu2 %v6159_v47  ;;  %v6196_v47 = vld [vmem:[%s12457_s1 + $0x898] sm:$0xf0]  ;;  %v7986_v41 = vld [vmem:[%s12457_s1 + $0xa54] sm:$0xf] }
 0x1b3   :  { %4544 = vmatpush.bf16.msrb.mxu3 %v6223_v17  ;;  %v6071_v17 = vor.u32 %v7898_v3, %v6068_v40  ;;  %v6199_v52 = vor.u32 %v7930_v26, %v6196_v47  ;;  %v6503_v3 = vor.u32 %v8006_v22, %v6500_v62  ;;  %v7988_v40 = vld [vmem:[%s12457_s1 + $0xa64] sm:$0xf]  ;;  %v6492_v26 = vld [vmem:[%s12457_s1 + $0xae8] sm:$0xf0]  ;;  %v6484_v54 = vld [vmem:[%s12457_s1 + $0xad8] sm:$0xf0] }
 0x1b4   :  { %4506 = vmatpush.bf16.msrb.mxu0 %v6023_v56  ;;  %v7928_v56 = vld [vmem:[%s12457_s1 + $0x884] sm:$0xf]  ;;  %v6431_v27 = vor.u32 %v7988_v40, %v6428_v21  ;;  %v6495_v51 = vor.u32 %v8004_v32, %v6492_v26  ;;  %v8300_v40 = vld [vmem:[%s12459_s2] sm:$0x3] }
 0x1b5   :  { %4519 = vmatpush.bf16.msrb.mxu1 %v6087_v57  ;;  %v6188_v57 = vld [vmem:[%s12457_s1 + $0x888] sm:$0xf0]  ;;  %v650_v21 = vperm.slane %v8300_v40, 1 }
 0x1b6   :  { %4532 = vmatpush.bf16.msrb.mxu2 %v6151_v58  ;;  %v4279_v58 = vpop.f32.mrf.mxu2  ;;  %v6191_v33 = vor.u32 %v7928_v56, %v6188_v57  ;;  %v6444_v40 = vld [vmem:[%s12457_s1 + $0xa88] sm:$0xf0] }
 0x1b7   :  { %4545 = vmatpush.bf16.msrb.mxu3 %v6215_v15  ;;  %v4292_v15 = vpop.f32.mrf.mxu3 }
 0x1b8   :  { %4507 = vmatpush.bf16.msrb.mxu0 %v6015_v23  ;;  %v6311_v23 = vor.u32 %v7958_v18, %v6308_v44  ;;  %v7968_v18 = vld [vmem:[%s12457_s1 + $0x9c4] sm:$0xf]  ;;  %v6348_v44 = vld [vmem:[%s12457_s1 + $0x9c8] sm:$0xf0] }
 0x1b9   :  { %4520 = vmatpush.bf16.msrb.mxu1 %v6079_v25  ;;  %v6439_v25 = vor.u32 %v7990_v38, %v6436_v29  ;;  %v6412_v15 = vld [vmem:[%s12457_s1 + $0xa48] sm:$0xf0]  ;;  %v6351_v22 = vor.u32 %v7968_v18, %v6348_v44  ;;  %v6260_v44 = vld [vmem:[%s12457_s1 + $0x918] sm:$0xf0] }
 0x1ba   :  { %4533 = vmatpush.bf16.msrb.mxu2 %v6143_v1  ;;  %v7956_v1 = vld [vmem:[%s12457_s1 + $0x964] sm:$0xf]  ;;  %v6476_v38 = vld [vmem:[%s12457_s1 + $0xac8] sm:$0xf0]  ;;  %v6415_v62 = vor.u32 %v7984_v20, %v6412_v15  ;;  %v7962_v20 = vld [vmem:[%s12457_s1 + $0x994] sm:$0xf] }
 0x1bb   :  { %4546 = vmatpush.bf16.msrb.mxu3 %v6207_v55  ;;  %v6364_v55 = vld [vmem:[%s12457_s1 + $0x9e8] sm:$0xf0]  ;;  %v6303_v47 = vor.u32 %v7956_v1, %v6300_v30  ;;  %v6340_v1 = vld [vmem:[%s12457_s1 + $0x9b8] sm:$0xf0]  ;;  %v7982_v30 = vld [vmem:[%s12457_s1 + $0xa34] sm:$0xf] }
 0x1bc   :  { %4508 = vmatpush.bf16.msrb.mxu0 %v6007_v48  ;;  %v6367_v48 = vor.u32 %v7972_v2, %v6364_v55  ;;  %v6404_v2 = vld [vmem:[%s12457_s1 + $0xa38] sm:$0xf0] }
 0x1bd   :  { %4521 = vmatpush.bf16.msrb.mxu1 %v6071_v17  ;;  %v6292_v17 = vld [vmem:[%s12457_s1 + $0x958] sm:$0xf0] }
 0x1be   :  { %4534 = vmatpush.bf16.msrb.mxu2 %v6135_v50  ;;  %v7970_v50 = vld [vmem:[%s12457_s1 + $0x9d4] sm:$0xf]  ;;  %v6295_v56 = vor.u32 %v7954_v61, %v6292_v17  ;;  %v6468_v55 = vld [vmem:[%s12457_s1 + $0xab8] sm:$0xf0]  ;;  %v7964_v61 = vld [vmem:[%s12457_s1 + $0x9a4] sm:$0xf] }
 0x1bf   :  { %4547 = vmatpush.bf16.msrb.mxu3 %v6199_v52  ;;  %v6420_v52 = vld [vmem:[%s12457_s1 + $0xa58] sm:$0xf0]  ;;  %v6359_v57 = vor.u32 %v7970_v50, %v6356_v60  ;;  %v6332_v50 = vld [vmem:[%s12457_s1 + $0x9a8] sm:$0xf0] }
 0x1c0   :  { %4509 = vmatpush.bf16.msrb.mxu0 %v5999_v39  ;;  %v6423_v58 = vor.u32 %v7986_v41, %v6420_v52  ;;  %v4303_v39 = vpop.f32.mrf.mxu0  ;;  %v6396_v60 = vld [vmem:[%s12457_s1 + $0xa28] sm:$0xf0]  ;;  %v7996_v52 = vld [vmem:[%s12457_s1 + $0xaa4] sm:$0xf] }
 0x1c1   :  { %4522 = vmatpush.bf16.msrb.mxu1 %v6063_v19  ;;  %v4304_v29 = vadd.f32 %v4303_v39, %v11183_v31  ;;  %v6479_v31 = vor.u32 %v8000_v59, %v6476_v38  ;;  %v6324_v59 = vld [vmem:[%s12457_s1 + $0x998] sm:$0xf0]  ;;  %v7978_v38 = vld [vmem:[%s12457_s1 + $0xa14] sm:$0xf] }
 0x1c2   :  { %4535 = vmatpush.bf16.msrb.mxu2 %v6127_v9  ;;  %v4316_v9 = vpop.f32.mrf.mxu1 }
 0x1c3   :  { %4548 = vmatpush.bf16.msrb.mxu3 %v6191_v33  ;;  %4510 = vmatmul.bf16.vlgmr.msrb.gmra.mxu0 %v9203_v28  ;;  %v8002_v28 = vld [vmem:[%s12457_s1 + $0xad4] sm:$0xf] }
 0x1c4   :  { %4554 = vmatpush.bf16.msra.mxu0 %v6311_v23  ;;  %4523 = vmatmul.bf16.vlgmr.msrb.gmra.mxu1 %v9213_v35  ;;  %v7952_v35 = vld [vmem:[%s12457_s1 + $0x944] sm:$0xf]  ;;  %v7950_v33 = vld [vmem:[%s12457_s1 + $0x934] sm:$0xf]  ;;  %v6276_v23 = vld [vmem:[%s12457_s1 + $0x938] sm:$0xf0] }
 0x1c5   :  { %4567 = vmatpush.bf16.msra.mxu1 %v6375_v42  ;;  %4536 = vmatmul.bf16.vlgmr.msrb.gmra.mxu2 %v9402_v37  ;;  %v6284_v37 = vld [vmem:[%s12457_s1 + $0x948] sm:$0xf0]  ;;  %v7966_v42 = vld [vmem:[%s12457_s1 + $0x9b4] sm:$0xf]  ;;  %v6279_v32 = vor.u32 %v7950_v33, %v6276_v23  ;;  %v6327_v23 = vor.u32 %v7962_v20, %v6324_v59 }
 0x1c6   :  { %4580 = vmatpush.bf16.msra.mxu2 %v6439_v25  ;;  %4549 = vmatmul.bf16.vlgmr.msrb.gmra.mxu3 %v9415_v46  ;;  %v6487_v46 = vor.u32 %v8002_v28, %v6484_v54  ;;  %v6287_v19 = vor.u32 %v7952_v35, %v6284_v37  ;;  %v11343_v25 = vadd.f32 %v4316_v9, %v4304_v29  ;;  %v6460_v28 = vld [vmem:[%s12457_s1 + $0xaa8] sm:$0xf0]  ;;  %v6388_v29 = vld [vmem:[%s12457_s1 + $0xa18] sm:$0xf0] }
 0x1c7   :  { %4593 = vmatpush.bf16.msra.mxu3 %v6503_v3  ;;  %v7998_v3 = vld [vmem:[%s12457_s1 + $0xab4] sm:$0xf]  ;;  %v6343_v26 = vor.u32 %v7966_v42, %v6340_v1  ;;  %v6335_v37 = vor.u32 %v7964_v61, %v6332_v50  ;;  %v6463_v39 = vor.u32 %v7996_v52, %v6460_v28  ;;  %v6452_v9 = vld [vmem:[%s12457_s1 + $0xa98] sm:$0xf0]  ;;  %v6252_v33 = vld [vmem:[%s12457_s1 + $0x908] sm:$0xf0]  ;;  %v6391_v42 = vor.u32 %v7978_v38, %v6388_v29 }
 0x1c8   :  { %4555 = vmatpush.bf16.msra.mxu0 %v6303_v47  ;;  %v6407_v47 = vor.u32 %v7982_v30, %v6404_v2  ;;  %v6471_v17 = vor.u32 %v7998_v3, %v6468_v55  ;;  %v4329_v41 = vpop.f32.mrf.mxu2  ;;  %v6316_v1 = vld [vmem:[%s12457_s1 + $0x988] sm:$0xf0]  ;;  %v7976_v30 = vld [vmem:[%s12457_s1 + $0xa04] sm:$0xf]  ;;  %v6628_v61 = vld [vmem:[%s12457_s1 + $0xbf8] sm:$0xf0] }
 0x1c9   :  { %4568 = vmatpush.bf16.msra.mxu1 %v6367_v48  ;;  %v7948_v48 = vld [vmem:[%s12457_s1 + $0x924] sm:$0xf]  ;;  %v4330_v54 = vadd.f32 %v4329_v41, %v650_v21  ;;  %v6380_v3 = vld [vmem:[%s12457_s1 + $0xa08] sm:$0xf0]  ;;  %v6692_v50 = vld [vmem:[%s12457_s1 + $0xc78] sm:$0xf0] }
 0x1ca   :  { %4581 = vmatpush.bf16.msra.mxu2 %v6431_v27  ;;  %v6268_v27 = vld [vmem:[%s12457_s1 + $0x928] sm:$0xf0]  ;;  %v4318_v35 = vpop.f32.mrf.mxu1  ;;  %v7992_v55 = vld [vmem:[%s12457_s1 + $0xa84] sm:$0xf]  ;;  %v8070_v41 = vld [vmem:[%s12457_s1 + $0xcf4] sm:$0xf] }
 0x1cb   :  { %4594 = vmatpush.bf16.msra.mxu3 %v6495_v51  ;;  %v7980_v51 = vld [vmem:[%s12457_s1 + $0xa24] sm:$0xf]  ;;  %v6756_v52 = vld [vmem:[%s12457_s1 + $0xcf8] sm:$0xf0]  ;;  %v6447_v28 = vor.u32 %v7992_v55, %v6444_v40  ;;  %v6556_v35 = vld [vmem:[%s12457_s1 + $0xb68] sm:$0xf0] }
 0x1cc   :  { %4556 = vmatpush.bf16.msra.mxu0 %v6295_v56  ;;  %v4342_v56 = vpop.f32.mrf.mxu3  ;;  %v6399_v18 = vor.u32 %v7980_v51, %v6396_v60  ;;  %v6383_v60 = vor.u32 %v7976_v30, %v6380_v3  ;;  %v6684_v20 = vld [vmem:[%s12457_s1 + $0xc68] sm:$0xf0]  ;;  %v8032_v55 = vld [vmem:[%s12457_s1 + $0xbc4] sm:$0xf] }
 0x1cd   :  { %4569 = vmatpush.bf16.msra.mxu1 %v6359_v57  ;;  %v4305_v57 = vpop.f32.mrf.mxu0  ;;  %v11396_v15 = vadd.f32 %v4342_v56, %v4330_v54  ;;  %v6748_v59 = vld [vmem:[%s12457_s1 + $0xce8] sm:$0xf0] }
 0x1ce   :  { %4582 = vmatpush.bf16.msra.mxu2 %v6423_v58  ;;  %v6271_v58 = vor.u32 %v7948_v48, %v6268_v27  ;;  %v6604_v40 = vld [vmem:[%s12457_s1 + $0xbc8] sm:$0xf0] }
 0x1cf   :  { %4595 = vmatpush.bf16.msra.mxu3 %v6487_v46  ;;  %v7946_v46 = vld [vmem:[%s12457_s1 + $0x914] sm:$0xf] }
 0x1d0   :  { %4557 = vmatpush.bf16.msra.mxu0 %v6287_v19  ;;  %v7994_v19 = vld [vmem:[%s12457_s1 + $0xa94] sm:$0xf]  ;;  %v4331_v21 = vpop.f32.mrf.mxu2 }
 0x1d1   :  { %4570 = vmatpush.bf16.msra.mxu1 %v6351_v22  ;;  %v6263_v22 = vor.u32 %v7946_v46, %v6260_v44  ;;  %v6455_v2 = vor.u32 %v7994_v19, %v6452_v9  ;;  %v6620_v46 = vld [vmem:[%s12457_s1 + $0xbe8] sm:$0xf0]  ;;  %v8052_v44 = vld [vmem:[%s12457_s1 + $0xc64] sm:$0xf]  ;;  %v8018_v9 = vld [vmem:[%s12457_s1 + $0xb54] sm:$0xf] }
 0x1d2   :  { %4583 = vmatpush.bf16.msra.mxu2 %v6415_v62  ;;  %v7944_v62 = vld [vmem:[%s12457_s1 + $0x904] sm:$0xf]  ;;  %v6687_v19 = vor.u32 %v8052_v44, %v6684_v20  ;;  %v6524_v20 = vld [vmem:[%s12457_s1 + $0xb28] sm:$0xf0] }
 0x1d3   :  { %4596 = vmatpush.bf16.msra.mxu3 %v6479_v31  ;;  %v7960_v31 = vld [vmem:[%s12457_s1 + $0x984] sm:$0xf]  ;;  %v6255_v27 = vor.u32 %v7944_v62, %v6252_v33  ;;  %v8034_v62 = vld [vmem:[%s12457_s1 + $0xbd4] sm:$0xf] }
 0x1d4   :  { %4558 = vmatpush.bf16.msra.mxu0 %v6279_v32  ;;  %v8022_v32 = vld [vmem:[%s12457_s1 + $0xb74] sm:$0xf]  ;;  %v4344_v48 = vpop.f32.mrf.mxu3  ;;  %v6319_v51 = vor.u32 %v7960_v31, %v6316_v1  ;;  %v6676_v31 = vld [vmem:[%s12457_s1 + $0xc58] sm:$0xf0]  ;;  %v8048_v21 = vld [vmem:[%s12457_s1 + $0xc44] sm:$0xf] }
 0x1d5   :  { %4571 = vmatpush.bf16.msra.mxu1 %v6343_v26  ;;  %v6564_v26 = vld [vmem:[%s12457_s1 + $0xb78] sm:$0xf0]  ;;  %v8012_v44 = vld [vmem:[%s12457_s1 + $0xb24] sm:$0xf] }
 0x1d6   :  { %4584 = vmatpush.bf16.msra.mxu2 %v6407_v47  ;;  %v8038_v47 = vld [vmem:[%s12457_s1 + $0xbf4] sm:$0xf]  ;;  %v6567_v54 = vor.u32 %v8022_v32, %v6564_v26  ;;  %v6740_v1 = vld [vmem:[%s12457_s1 + $0xcd8] sm:$0xf0]  ;;  %v6668_v32 = vld [vmem:[%s12457_s1 + $0xc48] sm:$0xf0] }
 0x1d7   :  { %4597 = vmatpush.bf16.msra.mxu3 %v6471_v17  ;;  %v8054_v17 = vld [vmem:[%s12457_s1 + $0xc74] sm:$0xf]  ;;  %v6631_v56 = vor.u32 %v8038_v47, %v6628_v61  ;;  %v8064_v26 = vld [vmem:[%s12457_s1 + $0xcc4] sm:$0xf]  ;;  %v6732_v47 = vld [vmem:[%s12457_s1 + $0xcc8] sm:$0xf0]  ;;  %v6607_v61 = vor.u32 %v8032_v55, %v6604_v40 }
 0x1d8   :  { %4559 = vmatpush.bf16.msra.mxu0 %v6271_v58  ;;  %v6695_v57 = vor.u32 %v8054_v17, %v6692_v50  ;;  %v8020_v58 = vld [vmem:[%s12457_s1 + $0xb64] sm:$0xf]  ;;  %v6671_v17 = vor.u32 %v8048_v21, %v6668_v32  ;;  %v8014_v50 = vld [vmem:[%s12457_s1 + $0xb34] sm:$0xf]  ;;  %v6644_v21 = vld [vmem:[%s12457_s1 + $0xc18] sm:$0xf0] }
 0x1d9   :  { %4572 = vmatpush.bf16.msra.mxu1 %v6335_v37  ;;  %v8036_v37 = vld [vmem:[%s12457_s1 + $0xbe4] sm:$0xf]  ;;  %v6559_v38 = vor.u32 %v8020_v58, %v6556_v35  ;;  %v8062_v58 = vld [vmem:[%s12457_s1 + $0xcb4] sm:$0xf] }
 0x1da   :  { %4585 = vmatpush.bf16.msra.mxu2 %v6399_v18  ;;  %v6759_v18 = vor.u32 %v8070_v41, %v6756_v52  ;;  %v6623_v29 = vor.u32 %v8036_v37, %v6620_v46  ;;  %v8042_v40 = vld [vmem:[%s12457_s1 + $0xc14] sm:$0xf] }
 0x1db   :  { %4598 = vmatpush.bf16.msra.mxu3 %v6463_v39  ;;  %v8068_v39 = vld [vmem:[%s12457_s1 + $0xce4] sm:$0xf]  ;;  %v8058_v32 = vld [vmem:[%s12457_s1 + $0xc94] sm:$0xf] }
 0x1dc   :  { %4560 = vmatpush.bf16.msra.mxu0 %v6263_v22  ;;  %v6548_v22 = vld [vmem:[%s12457_s1 + $0xb58] sm:$0xf0]  ;;  %v6751_v33 = vor.u32 %v8068_v39, %v6748_v59  ;;  %v8028_v39 = vld [vmem:[%s12457_s1 + $0xba4] sm:$0xf] }
 0x1dd   :  { %4573 = vmatpush.bf16.msra.mxu1 %v6327_v23  ;;  %v6612_v23 = vld [vmem:[%s12457_s1 + $0xbd8] sm:$0xf0]  ;;  %v6551_v30 = vor.u32 %v8018_v9, %v6548_v22  ;;  %v6652_v9 = vld [vmem:[%s12457_s1 + $0xc28] sm:$0xf0] }
 0x1de   :  { %4586 = vmatpush.bf16.msra.mxu2 %v6391_v42  ;;  %v8050_v42 = vld [vmem:[%s12457_s1 + $0xc54] sm:$0xf] }
 0x1df   :  { %4599 = vmatpush.bf16.msra.mxu3 %v6455_v2  ;;  %v6615_v2 = vor.u32 %v8034_v62, %v6612_v23  ;;  %v6679_v3 = vor.u32 %v8050_v42, %v6676_v31  ;;  %v6716_v23 = vld [vmem:[%s12457_s1 + $0xca8] sm:$0xf0]  ;;  %v6527_v42 = vor.u32 %v8012_v44, %v6524_v20  ;;  %v6948_v44 = vld [vmem:[%s12457_s1 + $0xe78] sm:$0xf0] }
 0x1e0   :  { %4561 = vmatpush.bf16.msra.mxu0 %v6255_v27  ;;  %v4355_v27 = vpop.f32.mrf.mxu0 }
 0x1e1   :  { %4574 = vmatpush.bf16.msra.mxu1 %v6319_v51  ;;  %v6532_v51 = vld [vmem:[%s12457_s1 + $0xb38] sm:$0xf0]  ;;  %v4356_v41 = vadd.f32 %v4355_v27, %v11396_v15  ;;  %v4368_v52 = vpop.f32.mrf.mxu1  ;;  %v6508_v27 = vld [vmem:[%s12457_s1 + $0xb08] sm:$0xf0] }
 0x1e2   :  { %4587 = vmatpush.bf16.msra.mxu2 %v6383_v60  ;;  %v8030_v60 = vld [vmem:[%s12457_s1 + $0xbb4] sm:$0xf]  ;;  %v6724_v15 = vld [vmem:[%s12457_s1 + $0xcb8] sm:$0xf0]  ;;  %v6535_v37 = vor.u32 %v8014_v50, %v6532_v51  ;;  %v8024_v50 = vld [vmem:[%s12457_s1 + $0xb84] sm:$0xf] }
 0x1e3   :  { %4600 = vmatpush.bf16.msra.mxu3 %v6447_v28  ;;  %4562 = vmatmul.bf16.vlgmr.msra.gmra.mxu0 %v9413_v45  ;;  %v8066_v45 = vld [vmem:[%s12457_s1 + $0xcd4] sm:$0xf]  ;;  %v6735_v28 = vor.u32 %v8064_v26, %v6732_v47  ;;  %v4369_v35 = vadd.f32 %v4368_v52, %v4356_v41  ;;  %v6708_v26 = vld [vmem:[%s12457_s1 + $0xc98] sm:$0xf0]  ;;  %v6572_v51 = vld [vmem:[%s12457_s1 + $0xb88] sm:$0xf0] }
 0x1e4   :  { %4606 = vmatpush.bf16.msrb.mxu0 %v6567_v54  ;;  %4575 = vmatmul.bf16.vlgmr.msra.gmra.mxu1 %v9423_v49  ;;  %v8016_v49 = vld [vmem:[%s12457_s1 + $0xb44] sm:$0xf]  ;;  %v6596_v54 = vld [vmem:[%s12457_s1 + $0xbb8] sm:$0xf0]  ;;  %v6711_v52 = vor.u32 %v8058_v32, %v6708_v26  ;;  %v6575_v20 = vor.u32 %v8024_v50, %v6572_v51 }
 0x1e5   :  { %4619 = vmatpush.bf16.msrb.mxu1 %v6631_v56  ;;  %4588 = vmatmul.bf16.vlgmr.msra.gmra.mxu2 %v9617_v7  ;;  %v6540_v7 = vld [vmem:[%s12457_s1 + $0xb48] sm:$0xf0]  ;;  %v8046_v56 = vld [vmem:[%s12457_s1 + $0xc34] sm:$0xf]  ;;  %v6868_v26 = vld [vmem:[%s12457_s1 + $0xdd8] sm:$0xf0] }
 0x1e6   :  { %4632 = vmatpush.bf16.msrb.mxu2 %v6695_v57  ;;  %4601 = vmatmul.bf16.vlgmr.msra.gmra.mxu3 %v9630_v12  ;;  %v6743_v12 = vor.u32 %v8066_v45, %v6740_v1  ;;  %v6543_v48 = vor.u32 %v8016_v49, %v6540_v7  ;;  %v6660_v57 = vld [vmem:[%s12457_s1 + $0xc38] sm:$0xf0]  ;;  %v8026_v49 = vld [vmem:[%s12457_s1 + $0xb94] sm:$0xf]  ;;  %v8096_v51 = vld [vmem:[%s12457_s1 + $0xdc4] sm:$0xf] }
 0x1e7   :  { %4645 = vmatpush.bf16.msrb.mxu3 %v6759_v18  ;;  %v6599_v18 = vor.u32 %v8030_v60, %v6596_v54  ;;  %v6663_v46 = vor.u32 %v8046_v56, %v6660_v57  ;;  %v8040_v60 = vld [vmem:[%s12457_s1 + $0xc04] sm:$0xf]  ;;  %v6700_v56 = vld [vmem:[%s12457_s1 + $0xc88] sm:$0xf0] }
 0x1e8   :  { %4607 = vmatpush.bf16.msrb.mxu0 %v6559_v38  ;;  %v4381_v59 = vpop.f32.mrf.mxu2  ;;  %v6727_v38 = vor.u32 %v8062_v58, %v6724_v15  ;;  %v4357_v45 = vpop.f32.mrf.mxu0  ;;  %v8056_v54 = vld [vmem:[%s12457_s1 + $0xc84] sm:$0xf]  ;;  %v8086_v58 = vld [vmem:[%s12457_s1 + $0xd74] sm:$0xf]  ;;  %v6820_v15 = vld [vmem:[%s12457_s1 + $0xd78] sm:$0xf0] }
 0x1e9   :  { %4620 = vmatpush.bf16.msrb.mxu1 %v6623_v29  ;;  %v6588_v29 = vld [vmem:[%s12457_s1 + $0xba8] sm:$0xf0]  ;;  %v4382_v22 = vadd.f32 %v4381_v59, %v4369_v35  ;;  %v4394_v62 = vpop.f32.mrf.mxu3  ;;  %v4370_v7 = vpop.f32.mrf.mxu1  ;;  %v8102_v35 = vld [vmem:[%s12457_s1 + $0xdf4] sm:$0xf] }
 0x1ea   :  { %4633 = vmatpush.bf16.msrb.mxu2 %v6687_v19  ;;  %v8044_v19 = vld [vmem:[%s12457_s1 + $0xc24] sm:$0xf]  ;;  %v6591_v1 = vor.u32 %v8028_v39, %v6588_v29  ;;  %v8134_v59 = vld [vmem:[%s12457_s1 + $0xef4] sm:$0xf]  ;;  %v6703_v29 = vor.u32 %v8056_v54, %v6700_v56  ;;  %v6876_v45 = vld [vmem:[%s12457_s1 + $0xde8] sm:$0xf0] }
 0x1eb   :  { %4646 = vmatpush.bf16.msrb.mxu3 %v6751_v33  ;;  %v8060_v33 = vld [vmem:[%s12457_s1 + $0xca4] sm:$0xf]  ;;  %v11586_v31 = vadd.f32 %v4394_v62, %v4382_v22  ;;  %v6988_v56 = vld [vmem:[%s12457_s1 + $0xec8] sm:$0xf0] }
 0x1ec   :  { %4608 = vmatpush.bf16.msrb.mxu0 %v6551_v30  ;;  %v6655_v30 = vor.u32 %v8044_v19, %v6652_v9  ;;  %v6719_v55 = vor.u32 %v8060_v33, %v6716_v23  ;;  %v6823_v19 = vor.u32 %v8086_v58, %v6820_v15  ;;  %v8084_v62 = vld [vmem:[%s12457_s1 + $0xd64] sm:$0xf]  ;;  %v6812_v33 = vld [vmem:[%s12457_s1 + $0xd68] sm:$0xf0] }
 0x1ed   :  { %4621 = vmatpush.bf16.msrb.mxu1 %v6615_v2  ;;  %v8010_v2 = vld [vmem:[%s12457_s1 + $0xb14] sm:$0xf]  ;;  %v8100_v23 = vld [vmem:[%s12457_s1 + $0xde4] sm:$0xf] }
 0x1ee   :  { %4634 = vmatpush.bf16.msrb.mxu2 %v6679_v3  ;;  %v6516_v3 = vld [vmem:[%s12457_s1 + $0xb18] sm:$0xf0]  ;;  %v6879_v7 = vor.u32 %v8100_v23, %v6876_v45  ;;  %v8128_v54 = vld [vmem:[%s12457_s1 + $0xec4] sm:$0xf]  ;;  %v6780_v23 = vld [vmem:[%s12457_s1 + $0xd28] sm:$0xf0] }
 0x1ef   :  { %4647 = vmatpush.bf16.msrb.mxu3 %v6743_v12  ;;  %v6580_v12 = vld [vmem:[%s12457_s1 + $0xb98] sm:$0xf0]  ;;  %v6519_v47 = vor.u32 %v8010_v2, %v6516_v3  ;;  %v8132_v2 = vld [vmem:[%s12457_s1 + $0xee4] sm:$0xf]  ;;  %v7004_v3 = vld [vmem:[%s12457_s1 + $0xee8] sm:$0xf0] }
 0x1f0   :  { %4609 = vmatpush.bf16.msrb.mxu0 %v6543_v48  ;;  %v8008_v48 = vld [vmem:[%s12457_s1 + $0xb04] sm:$0xf]  ;;  %v4383_v41 = vpop.f32.mrf.mxu2  ;;  %v7007_v32 = vor.u32 %v8132_v2, %v7004_v3  ;;  %v6908_v3 = vld [vmem:[%s12457_s1 + $0xe28] sm:$0xf0] }
 0x1f1   :  { %4622 = vmatpush.bf16.msrb.mxu1 %v6607_v61  ;;  %v6583_v61 = vor.u32 %v8026_v49, %v6580_v12  ;;  %v4396_v57 = vpop.f32.mrf.mxu3  ;;  %v6815_v49 = vor.u32 %v8084_v62, %v6812_v33  ;;  %v8082_v12 = vld [vmem:[%s12457_s1 + $0xd54] sm:$0xf]  ;;  %v8112_v41 = vld [vmem:[%s12457_s1 + $0xe44] sm:$0xf] }
 0x1f2   :  { %4635 = vmatpush.bf16.msrb.mxu2 %v6671_v17  ;;  %v6647_v17 = vor.u32 %v8042_v40, %v6644_v21  ;;  %v6804_v40 = vld [vmem:[%s12457_s1 + $0xd58] sm:$0xf0]  ;;  %v8098_v21 = vld [vmem:[%s12457_s1 + $0xdd4] sm:$0xf]  ;;  %v8076_v33 = vld [vmem:[%s12457_s1 + $0xd24] sm:$0xf] }
 0x1f3   :  { %4648 = vmatpush.bf16.msrb.mxu3 %v6735_v28  ;;  %v6636_v28 = vld [vmem:[%s12457_s1 + $0xc08] sm:$0xf0]  ;;  %v8108_v2 = vld [vmem:[%s12457_s1 + $0xe24] sm:$0xf] }
 0x1f4   :  { %4610 = vmatpush.bf16.msrb.mxu0 %v6535_v37  ;;  %v6511_v37 = vor.u32 %v8008_v48, %v6508_v27  ;;  %v6639_v39 = vor.u32 %v8040_v60, %v6636_v28  ;;  %v6932_v48 = vld [vmem:[%s12457_s1 + $0xe58] sm:$0xf0]  ;;  %v6860_v60 = vld [vmem:[%s12457_s1 + $0xdc8] sm:$0xf0] }
 0x1f5   :  { %4623 = vmatpush.bf16.msrb.mxu1 %v6599_v18  ;;  %v6884_v18 = vld [vmem:[%s12457_s1 + $0xdf8] sm:$0xf0] }
 0x1f6   :  { %4636 = vmatpush.bf16.msrb.mxu2 %v6663_v46  ;;  %v8118_v46 = vld [vmem:[%s12457_s1 + $0xe74] sm:$0xf]  ;;  %v6887_v9 = vor.u32 %v8102_v35, %v6884_v18  ;;  %v6996_v27 = vld [vmem:[%s12457_s1 + $0xed8] sm:$0xf0]  ;;  %v6863_v35 = vor.u32 %v8096_v51, %v6860_v60 }
 0x1f7   :  { %4649 = vmatpush.bf16.msrb.mxu3 %v6727_v38  ;;  %v7012_v38 = vld [vmem:[%s12457_s1 + $0xef8] sm:$0xf0]  ;;  %v6951_v22 = vor.u32 %v8118_v46, %v6948_v44  ;;  %v8078_v18 = vld [vmem:[%s12457_s1 + $0xd34] sm:$0xf] }
 0x1f8   :  { %4611 = vmatpush.bf16.msrb.mxu0 %v6527_v42  ;;  %v7015_v42 = vor.u32 %v8134_v59, %v7012_v38  ;;  %v6788_v46 = vld [vmem:[%s12457_s1 + $0xd38] sm:$0xf0]  ;;  %v8094_v44 = vld [vmem:[%s12457_s1 + $0xdb4] sm:$0xf] }
 0x1f9   :  { %4624 = vmatpush.bf16.msrb.mxu1 %v6591_v1  ;;  %v8116_v1 = vld [vmem:[%s12457_s1 + $0xe64] sm:$0xf]  ;;  %v8110_v59 = vld [vmem:[%s12457_s1 + $0xe34] sm:$0xf]  ;;  %v6916_v38 = vld [vmem:[%s12457_s1 + $0xe38] sm:$0xf0] }
 0x1fa   :  { %4637 = vmatpush.bf16.msrb.mxu2 %v6655_v30  ;;  %v6940_v30 = vld [vmem:[%s12457_s1 + $0xe68] sm:$0xf0]  ;;  %v6919_v62 = vor.u32 %v8110_v59, %v6916_v38  ;;  %v8122_v51 = vld [vmem:[%s12457_s1 + $0xe94] sm:$0xf]  ;;  %v7140_v38 = vld [vmem:[%s12457_s1 + $0xff8] sm:$0xf0] }
 0x1fb   :  { %4650 = vmatpush.bf16.msrb.mxu3 %v6719_v55  ;;  %v6943_v55 = vor.u32 %v8116_v1, %v6940_v30  ;;  %v6844_v30 = vld [vmem:[%s12457_s1 + $0xda8] sm:$0xf0] }
 0x1fc   :  { %4612 = vmatpush.bf16.msrb.mxu0 %v6519_v47  ;;  %v8114_v47 = vld [vmem:[%s12457_s1 + $0xe54] sm:$0xf] }
 0x1fd   :  { %4625 = vmatpush.bf16.msrb.mxu1 %v6583_v61  ;;  %v6807_v61 = vor.u32 %v8082_v12, %v6804_v40  ;;  %v6935_v50 = vor.u32 %v8114_v47, %v6932_v48  ;;  %v6972_v12 = vld [vmem:[%s12457_s1 + $0xea8] sm:$0xf0]  ;;  %v6911_v48 = vor.u32 %v8108_v2, %v6908_v3  ;;  %v8164_v3 = vld [vmem:[%s12457_s1 + $0xfe4] sm:$0xf] }
 0x1fe   :  { %4638 = vmatpush.bf16.msrb.mxu2 %v6647_v17  ;;  %v6871_v17 = vor.u32 %v8098_v21, %v6868_v26  ;;  %v6783_v21 = vor.u32 %v8076_v33, %v6780_v23  ;;  %v7268_v33 = vld [vmem:[%s12457_s1 + $0x10f8] sm:$0xf0]  ;;  %v7068_v2 = vld [vmem:[%s12457_s1 + $0xf68] sm:$0xf0] }
 0x1ff   :  { %4651 = vmatpush.bf16.msrb.mxu3 %v6711_v52  ;;  %v6924_v52 = vld [vmem:[%s12457_s1 + $0xe48] sm:$0xf0] }
 0x200   :  { %4613 = vmatpush.bf16.msrb.mxu0 %v6511_v37  ;;  %v4407_v28 = vpop.f32.mrf.mxu0  ;;  %v6927_v37 = vor.u32 %v8112_v41, %v6924_v52  ;;  %v8072_v41 = vld [vmem:[%s12457_s1 + $0xd04] sm:$0xf]  ;;  %v6764_v52 = vld [vmem:[%s12457_s1 + $0xd08] sm:$0xf0] }
 0x201   :  { %4626 = vmatpush.bf16.msrb.mxu1 %v6575_v20  ;;  %v4408_v57 = vadd.f32 %v4407_v28, %v11586_v31  ;;  %v4420_v15 = vpop.f32.mrf.mxu1  ;;  %v6991_v31 = vor.u32 %v8128_v54, %v6988_v56  ;;  %v8088_v56 = vld [vmem:[%s12457_s1 + $0xd84] sm:$0xf]  ;;  %v6767_v59 = vor.u32 %v8072_v41, %v6764_v52 }
 0x202   :  { %4639 = vmatpush.bf16.msrb.mxu2 %v6639_v39  ;;  %v6852_v39 = vld [vmem:[%s12457_s1 + $0xdb8] sm:$0xf0]  ;;  %v8160_v52 = vld [vmem:[%s12457_s1 + $0xfc4] sm:$0xf] }
 0x203   :  { %4652 = vmatpush.bf16.msrb.mxu3 %v6703_v29  ;;  %4614 = vmatmul.bf16.vlgmr.msrb.gmra.mxu0 %v9628_v11  ;;  %v8130_v11 = vld [vmem:[%s12457_s1 + $0xed4] sm:$0xf]  ;;  %v4421_v20 = vadd.f32 %v4420_v15, %v4408_v57  ;;  %v6828_v57 = vld [vmem:[%s12457_s1 + $0xd88] sm:$0xf0] }
 0x204   :  { %4658 = vmatpush.bf16.msra.mxu0 %v6823_v19  ;;  %4627 = vmatmul.bf16.vlgmr.msrb.gmra.mxu1 %v9638_v16  ;;  %v8080_v16 = vld [vmem:[%s12457_s1 + $0xd44] sm:$0xf]  ;;  %v8126_v29 = vld [vmem:[%s12457_s1 + $0xeb4] sm:$0xf]  ;;  %v6980_v19 = vld [vmem:[%s12457_s1 + $0xeb8] sm:$0xf0] }
 0x205   :  { %4671 = vmatpush.bf16.msra.mxu1 %v6887_v9  ;;  %4640 = vmatmul.bf16.vlgmr.msrb.gmra.mxu2 %v9830_v5  ;;  %v6796_v5 = vld [vmem:[%s12457_s1 + $0xd48] sm:$0xf0]  ;;  %v6791_v9 = vor.u32 %v8078_v18, %v6788_v46  ;;  %v6983_v45 = vor.u32 %v8126_v29, %v6980_v19  ;;  %v8182_v29 = vld [vmem:[%s12457_s1 + $0x1074] sm:$0xf]  ;;  %v7204_v19 = vld [vmem:[%s12457_s1 + $0x1078] sm:$0xf0] }
 0x206   :  { %4684 = vmatpush.bf16.msra.mxu2 %v6951_v22  ;;  %4653 = vmatmul.bf16.vlgmr.msrb.gmra.mxu3 %v9843_v13  ;;  %v6999_v13 = vor.u32 %v8130_v11, %v6996_v27  ;;  %v6799_v58 = vor.u32 %v8080_v16, %v6796_v5  ;;  %v6855_v22 = vor.u32 %v8094_v44, %v6852_v39  ;;  %v8074_v11 = vld [vmem:[%s12457_s1 + $0xd14] sm:$0xf]  ;;  %v6772_v27 = vld [vmem:[%s12457_s1 + $0xd18] sm:$0xf0]  ;;  %v6956_v18 = vld [vmem:[%s12457_s1 + $0xe88] sm:$0xf0] }
 0x207   :  { %4697 = vmatpush.bf16.msra.mxu3 %v7015_v42  ;;  %v8092_v42 = vld [vmem:[%s12457_s1 + $0xda4] sm:$0xf]  ;;  %v8106_v16 = vld [vmem:[%s12457_s1 + $0xe14] sm:$0xf]  ;;  %v6900_v5 = vld [vmem:[%s12457_s1 + $0xe18] sm:$0xf0]  ;;  %v6775_v60 = vor.u32 %v8074_v11, %v6772_v27 }
 0x208   :  { %4659 = vmatpush.bf16.msra.mxu0 %v6815_v49  ;;  %v4433_v1 = vpop.f32.mrf.mxu2  ;;  %v4409_v40 = vpop.f32.mrf.mxu0  ;;  %v6847_v47 = vor.u32 %v8092_v42, %v6844_v30  ;;  %v6903_v54 = vor.u32 %v8106_v16, %v6900_v5  ;;  %v8150_v44 = vld [vmem:[%s12457_s1 + $0xf74] sm:$0xf]  ;;  %v8148_v30 = vld [vmem:[%s12457_s1 + $0xf64] sm:$0xf]  ;;  %v7060_v27 = vld [vmem:[%s12457_s1 + $0xf58] sm:$0xf0] }
 0x209   :  { %4672 = vmatpush.bf16.msra.mxu1 %v6879_v7  ;;  %v4434_v49 = vadd.f32 %v4433_v1, %v4421_v20  ;;  %v4446_v7 = vpop.f32.mrf.mxu3  ;;  %v8166_v20 = vld [vmem:[%s12457_s1 + $0xff4] sm:$0xf]  ;;  %v7207_v1 = vor.u32 %v8182_v29, %v7204_v19  ;;  %v8196_v40 = vld [vmem:[%s12457_s1 + $0x10e4] sm:$0xf]  ;;  %v7188_v5 = vld [vmem:[%s12457_s1 + $0x1058] sm:$0xf0] }
 0x20a   :  { %4685 = vmatpush.bf16.msra.mxu2 %v6943_v55  ;;  %v8124_v55 = vld [vmem:[%s12457_s1 + $0xea4] sm:$0xf]  ;;  %v8146_v11 = vld [vmem:[%s12457_s1 + $0xf54] sm:$0xf]  ;;  %v7172_v19 = vld [vmem:[%s12457_s1 + $0x1038] sm:$0xf0] }
 0x20b   :  { %4698 = vmatpush.bf16.msra.mxu3 %v7007_v32  ;;  %v4422_v32 = vpop.f32.mrf.mxu1  ;;  %v11785_v26 = vadd.f32 %v4446_v7, %v4434_v49  ;;  %v7132_v7 = vld [vmem:[%s12457_s1 + $0xfe8] sm:$0xf0]  ;;  %v8178_v16 = vld [vmem:[%s12457_s1 + $0x1054] sm:$0xf] }
 0x20c   :  { %4660 = vmatpush.bf16.msra.mxu0 %v6807_v61  ;;  %v8090_v61 = vld [vmem:[%s12457_s1 + $0xd94] sm:$0xf]  ;;  %v7071_v32 = vor.u32 %v8148_v30, %v7068_v2  ;;  %v7191_v41 = vor.u32 %v8178_v16, %v7188_v5 }
 0x20d   :  { %4673 = vmatpush.bf16.msra.mxu1 %v6871_v17  ;;  %v6975_v17 = vor.u32 %v8124_v55, %v6972_v12  ;;  %v8180_v55 = vld [vmem:[%s12457_s1 + $0x1064] sm:$0xf]  ;;  %v7196_v12 = vld [vmem:[%s12457_s1 + $0x1068] sm:$0xf0]  ;;  %v8174_v29 = vld [vmem:[%s12457_s1 + $0x1034] sm:$0xf] }
 0x20e   :  { %4686 = vmatpush.bf16.msra.mxu2 %v6935_v50  ;;  %v6836_v50 = vld [vmem:[%s12457_s1 + $0xd98] sm:$0xf0]  ;;  %v8154_v16 = vld [vmem:[%s12457_s1 + $0xf94] sm:$0xf] }
 0x20f   :  { %4699 = vmatpush.bf16.msra.mxu3 %v6999_v13  ;;  %v6964_v13 = vld [vmem:[%s12457_s1 + $0xe98] sm:$0xf0]  ;;  %v6839_v28 = vor.u32 %v8090_v61, %v6836_v50  ;;  %v8162_v61 = vld [vmem:[%s12457_s1 + $0xfd4] sm:$0xf] }
 0x210   :  { %4661 = vmatpush.bf16.msra.mxu0 %v6799_v58  ;;  %v8104_v58 = vld [vmem:[%s12457_s1 + $0xe04] sm:$0xf]  ;;  %v6967_v15 = vor.u32 %v8122_v51, %v6964_v13  ;;  %v4435_v46 = vpop.f32.mrf.mxu2  ;;  %v7124_v50 = vld [vmem:[%s12457_s1 + $0xfd8] sm:$0xf0]  ;;  %v7063_v13 = vor.u32 %v8146_v11, %v7060_v27 }
 0x211   :  { %4674 = vmatpush.bf16.msra.mxu1 %v6863_v35  ;;  %v6892_v35 = vld [vmem:[%s12457_s1 + $0xe08] sm:$0xf0]  ;;  %v4448_v39 = vpop.f32.mrf.mxu3  ;;  %v7252_v51 = vld [vmem:[%s12457_s1 + $0x10d8] sm:$0xf0] }
 0x212   :  { %4687 = vmatpush.bf16.msra.mxu2 %v6927_v37  ;;  %v8120_v37 = vld [vmem:[%s12457_s1 + $0xe84] sm:$0xf]  ;;  %v8158_v39 = vld [vmem:[%s12457_s1 + $0xfb4] sm:$0xf] }
 0x213   :  { %4700 = vmatpush.bf16.msra.mxu3 %v6991_v31  ;;  %v7076_v31 = vld [vmem:[%s12457_s1 + $0xf78] sm:$0xf0]  ;;  %v6959_v23 = vor.u32 %v8120_v37, %v6956_v18 }
 0x214   :  { %4662 = vmatpush.bf16.msra.mxu0 %v6791_v9  ;;  %v6831_v9 = vor.u32 %v8088_v56, %v6828_v57  ;;  %v7079_v42 = vor.u32 %v8150_v44, %v7076_v31  ;;  %v7180_v56 = vld [vmem:[%s12457_s1 + $0x1048] sm:$0xf0]  ;;  %v8142_v31 = vld [vmem:[%s12457_s1 + $0xf34] sm:$0xf] }
 0x215   :  { %4675 = vmatpush.bf16.msra.mxu1 %v6855_v22  ;;  %v6895_v22 = vor.u32 %v8104_v58, %v6892_v35  ;;  %v8192_v58 = vld [vmem:[%s12457_s1 + $0x10c4] sm:$0xf] }
 0x216   :  { %4688 = vmatpush.bf16.msra.mxu2 %v6919_v62  ;;  %v8198_v62 = vld [vmem:[%s12457_s1 + $0x10f4] sm:$0xf] }
 0x217   :  { %4701 = vmatpush.bf16.msra.mxu3 %v6983_v45  ;;  %v7143_v45 = vor.u32 %v8166_v20, %v7140_v38  ;;  %v7271_v49 = vor.u32 %v8198_v62, %v7268_v33  ;;  %v7044_v20 = vld [vmem:[%s12457_s1 + $0xf38] sm:$0xf0] }
 0x218   :  { %4663 = vmatpush.bf16.msra.mxu0 %v6783_v21  ;;  %v7260_v21 = vld [vmem:[%s12457_s1 + $0x10e8] sm:$0xf0]  ;;  %v7108_v38 = vld [vmem:[%s12457_s1 + $0xfb8] sm:$0xf0]  ;;  %v7047_v62 = vor.u32 %v8142_v31, %v7044_v20  ;;  %v8230_v31 = vld [vmem:[%s12457_s1 + $0x11f4] sm:$0xf] }
 0x219   :  { %4676 = vmatpush.bf16.msra.mxu1 %v6847_v47  ;;  %v7135_v47 = vor.u32 %v8164_v3, %v7132_v7  ;;  %v7111_v33 = vor.u32 %v8158_v39, %v7108_v38  ;;  %v7100_v3 = vld [vmem:[%s12457_s1 + $0xfa8] sm:$0xf0]  ;;  %v7460_v38 = vld [vmem:[%s12457_s1 + $0x1278] sm:$0xf0] }
 0x21a   :  { %4689 = vmatpush.bf16.msra.mxu2 %v6911_v48  ;;  %v7199_v48 = vor.u32 %v8180_v55, %v7196_v12  ;;  %v7164_v7 = vld [vmem:[%s12457_s1 + $0x1028] sm:$0xf0] }
 0x21b   :  { %4702 = vmatpush.bf16.msra.mxu3 %v6975_v17  ;;  %v7263_v17 = vor.u32 %v8196_v40, %v7260_v21  ;;  %v8188_v40 = vld [vmem:[%s12457_s1 + $0x10a4] sm:$0xf]  ;;  %v7228_v21 = vld [vmem:[%s12457_s1 + $0x10a8] sm:$0xf0] }
 0x21c   :  { %4664 = vmatpush.bf16.msra.mxu0 %v6775_v60  ;;  %v7127_v60 = vor.u32 %v8162_v61, %v7124_v50  ;;  %v7028_v50 = vld [vmem:[%s12457_s1 + $0xf18] sm:$0xf0]  ;;  %v7231_v5 = vor.u32 %v8188_v40, %v7228_v21 }
 0x21d   :  { %4677 = vmatpush.bf16.msra.mxu1 %v6839_v28  ;;  %v7116_v28 = vld [vmem:[%s12457_s1 + $0xfc8] sm:$0xf0] }
 0x21e   :  { %4690 = vmatpush.bf16.msra.mxu2 %v6903_v54  ;;  %v8176_v54 = vld [vmem:[%s12457_s1 + $0x1044] sm:$0xf]  ;;  %v7119_v46 = vor.u32 %v8160_v52, %v7116_v28  ;;  %v7020_v52 = vld [vmem:[%s12457_s1 + $0xf08] sm:$0xf0] }
 0x21f   :  { %4703 = vmatpush.bf16.msra.mxu3 %v6967_v15  ;;  %v7244_v15 = vld [vmem:[%s12457_s1 + $0x10c8] sm:$0xf0]  ;;  %v7183_v44 = vor.u32 %v8176_v54, %v7180_v56  ;;  %v8152_v54 = vld [vmem:[%s12457_s1 + $0xf84] sm:$0xf] }
 0x220   :  { %4665 = vmatpush.bf16.msra.mxu0 %v6767_v59  ;;  %v4459_v57 = vpop.f32.mrf.mxu0  ;;  %v7084_v56 = vld [vmem:[%s12457_s1 + $0xf88] sm:$0xf0] }
 0x221   :  { %4678 = vmatpush.bf16.msra.mxu1 %v6831_v9  ;;  %v4460_v35 = vadd.f32 %v4459_v57, %v11785_v26  ;;  %v4472_v18 = vpop.f32.mrf.mxu1  ;;  %v7247_v26 = vor.u32 %v8192_v58, %v7244_v15  ;;  %v8190_v9 = vld [vmem:[%s12457_s1 + $0x10b4] sm:$0xf]  ;;  %v8168_v57 = vld [vmem:[%s12457_s1 + $0x1004] sm:$0xf]  ;;  %v7148_v15 = vld [vmem:[%s12457_s1 + $0x1008] sm:$0xf0] }
 0x222   :  { %4691 = vmatpush.bf16.msra.mxu2 %v6895_v22  ;;  %v7236_v22 = vld [vmem:[%s12457_s1 + $0x10b8] sm:$0xf0] }
 0x223   :  { %4704 = vmatpush.bf16.msra.mxu3 %v6959_v23  ;;  %4666 = vmatmul.bf16.vlgmr.msra.gmra.mxu0 %v9841_v10  ;;  %v8194_v10 = vld [vmem:[%s12457_s1 + $0x10d4] sm:$0xf]  ;;  %v4473_v59 = vadd.f32 %v4472_v18, %v4460_v35  ;;  %v7175_v23 = vor.u32 %v8174_v29, %v7172_v19  ;;  %v7239_v30 = vor.u32 %v8190_v9, %v7236_v22  ;;  %v8184_v35 = vld [vmem:[%s12457_s1 + $0x1084] sm:$0xf]  ;;  %v7524_v22 = vld [vmem:[%s12457_s1 + $0x12f8] sm:$0xf0] }
 0x224   :  { %4710 = vmatpush.bf16.msrb.mxu0 %v7079_v42  ;;  %4679 = vmatmul.bf16.vlgmr.msra.gmra.mxu1 %v9851_v53  ;;  %v8144_v53 = vld [vmem:[%s12457_s1 + $0xf44] sm:$0xf]  ;;  %v7087_v29 = vor.u32 %v8152_v54, %v7084_v56  ;;  %v7151_v19 = vor.u32 %v8168_v57, %v7148_v15  ;;  %v8262_v9 = vld [vmem:[%s12457_s1 + $0x12f4] sm:$0xf] }
 0x225   :  { %4723 = vmatpush.bf16.msrb.mxu1 %v7143_v45  ;;  %4692 = vmatmul.bf16.vlgmr.msra.gmra.mxu2 %v10043_v24  ;;  %v7052_v24 = vld [vmem:[%s12457_s1 + $0xf48] sm:$0xf0]  ;;  %v8140_v42 = vld [vmem:[%s12457_s1 + $0xf24] sm:$0xf] }
 0x226   :  { %4736 = vmatpush.bf16.msrb.mxu2 %v7207_v1  ;;  %4705 = vmatmul.bf16.vlgmr.msra.gmra.mxu3 %v10056_v36  ;;  %v7255_v36 = vor.u32 %v8194_v10, %v7252_v51  ;;  %v7055_v37 = vor.u32 %v8144_v53, %v7052_v24  ;;  %v7036_v45 = vld [vmem:[%s12457_s1 + $0xf28] sm:$0xf0]  ;;  %v8156_v1 = vld [vmem:[%s12457_s1 + $0xfa4] sm:$0xf]  ;;  %v7092_v10 = vld [vmem:[%s12457_s1 + $0xf98] sm:$0xf0] }
 0x227   :  { %4749 = vmatpush.bf16.msrb.mxu3 %v7271_v49  ;;  %v8172_v49 = vld [vmem:[%s12457_s1 + $0x1024] sm:$0xf]  ;;  %v7103_v27 = vor.u32 %v8156_v1, %v7100_v3  ;;  %v8170_v51 = vld [vmem:[%s12457_s1 + $0x1014] sm:$0xf]  ;;  %v7324_v1 = vld [vmem:[%s12457_s1 + $0x1168] sm:$0xf0] }
 0x228   :  { %4711 = vmatpush.bf16.msrb.mxu0 %v7071_v32  ;;  %v4485_v2 = vpop.f32.mrf.mxu2  ;;  %v4461_v32 = vpop.f32.mrf.mxu0  ;;  %v7167_v61 = vor.u32 %v8172_v49, %v7164_v7  ;;  %v8136_v24 = vld [vmem:[%s12457_s1 + $0xf04] sm:$0xf]  ;;  %v7388_v3 = vld [vmem:[%s12457_s1 + $0x11e8] sm:$0xf0] }
 0x229   :  { %4724 = vmatpush.bf16.msrb.mxu1 %v7135_v47  ;;  %v4486_v55 = vadd.f32 %v4485_v2, %v4473_v59  ;;  %v4498_v12 = vpop.f32.mrf.mxu3  ;;  %v7039_v47 = vor.u32 %v8140_v42, %v7036_v45  ;;  %v7023_v39 = vor.u32 %v8136_v24, %v7020_v52  ;;  %v8246_v59 = vld [vmem:[%s12457_s1 + $0x1274] sm:$0xf]  ;;  %v8212_v45 = vld [vmem:[%s12457_s1 + $0x1164] sm:$0xf]  ;;  %v7527_v2 = vor.u32 %v8262_v9, %v7524_v22  ;;  %v7452_v7 = vld [vmem:[%s12457_s1 + $0x1268] sm:$0xf0] }
 0x22a   :  { %4737 = vmatpush.bf16.msrb.mxu2 %v7199_v48  ;;  %v4474_v48 = vpop.f32.mrf.mxu1  ;;  %v7463_v42 = vor.u32 %v8246_v59, %v7460_v38  ;;  %v8244_v49 = vld [vmem:[%s12457_s1 + $0x1264] sm:$0xf]  ;;  %v7327_v40 = vor.u32 %v8212_v45, %v7324_v1  ;;  %v7436_v24 = vld [vmem:[%s12457_s1 + $0x1248] sm:$0xf0] }
 0x22b   :  { %4750 = vmatpush.bf16.msrb.mxu3 %v7263_v17  ;;  %v11984_v11 = vadd.f32 %v4498_v12, %v4486_v55  ;;  %v8138_v17 = vld [vmem:[%s12457_s1 + $0xf14] sm:$0xf]  ;;  %v8260_v55 = vld [vmem:[%s12457_s1 + $0x12e4] sm:$0xf]  ;;  %v7516_v12 = vld [vmem:[%s12457_s1 + $0x12e8] sm:$0xf0]  ;;  %v7455_v32 = vor.u32 %v8244_v49, %v7452_v7 }
 0x22c   :  { %4712 = vmatpush.bf16.msrb.mxu0 %v7063_v13  ;;  %v7156_v13 = vld [vmem:[%s12457_s1 + $0x1018] sm:$0xf0]  ;;  %v7031_v53 = vor.u32 %v8138_v17, %v7028_v50  ;;  %v8242_v50 = vld [vmem:[%s12457_s1 + $0x1254] sm:$0xf]  ;;  %v7292_v9 = vld [vmem:[%s12457_s1 + $0x1128] sm:$0xf0] }
 0x22d   :  { %4725 = vmatpush.bf16.msrb.mxu1 %v7127_v60  ;;  %v8186_v60 = vld [vmem:[%s12457_s1 + $0x1094] sm:$0xf]  ;;  %v7159_v28 = vor.u32 %v8170_v51, %v7156_v13  ;;  %v7316_v48 = vld [vmem:[%s12457_s1 + $0x1158] sm:$0xf0]  ;;  %v8220_v22 = vld [vmem:[%s12457_s1 + $0x11a4] sm:$0xf] }
 0x22e   :  { %4738 = vmatpush.bf16.msrb.mxu2 %v7191_v41  ;;  %v7220_v41 = vld [vmem:[%s12457_s1 + $0x1098] sm:$0xf0]  ;;  %v7420_v45 = vld [vmem:[%s12457_s1 + $0x1228] sm:$0xf0] }
 0x22f   :  { %4751 = vmatpush.bf16.msrb.mxu3 %v7255_v36  ;;  %v7095_v36 = vor.u32 %v8154_v16, %v7092_v10  ;;  %v7223_v58 = vor.u32 %v8186_v60, %v7220_v41  ;;  %v7380_v17 = vld [vmem:[%s12457_s1 + $0x11d8] sm:$0xf0]  ;;  %v8224_v60 = vld [vmem:[%s12457_s1 + $0x11c4] sm:$0xf]  ;;  %v7372_v41 = vld [vmem:[%s12457_s1 + $0x11c8] sm:$0xf0] }
 0x230   :  { %4713 = vmatpush.bf16.msrb.mxu0 %v7055_v37  ;;  %v7212_v37 = vld [vmem:[%s12457_s1 + $0x1088] sm:$0xf0]  ;;  %v4487_v18 = vpop.f32.mrf.mxu2  ;;  %v7444_v16 = vld [vmem:[%s12457_s1 + $0x1258] sm:$0xf0] }
 0x231   :  { %4726 = vmatpush.bf16.msrb.mxu1 %v7119_v46  ;;  %v8214_v46 = vld [vmem:[%s12457_s1 + $0x1174] sm:$0xf]  ;;  %v4500_v20 = vpop.f32.mrf.mxu3  ;;  %v7447_v13 = vor.u32 %v8242_v50, %v7444_v16  ;;  %v7412_v50 = vld [vmem:[%s12457_s1 + $0x1218] sm:$0xf0] }
 0x232   :  { %4739 = vmatpush.bf16.msrb.mxu2 %v7183_v44  ;;  %v7332_v44 = vld [vmem:[%s12457_s1 + $0x1178] sm:$0xf0]  ;;  %v8222_v18 = vld [vmem:[%s12457_s1 + $0x11b4] sm:$0xf] }
 0x233   :  { %4752 = vmatpush.bf16.msrb.mxu3 %v7247_v26  ;;  %v7396_v26 = vld [vmem:[%s12457_s1 + $0x11f8] sm:$0xf0]  ;;  %v8250_v16 = vld [vmem:[%s12457_s1 + $0x1294] sm:$0xf] }
 0x234   :  { %4714 = vmatpush.bf16.msrb.mxu0 %v7047_v62  ;;  %v7215_v62 = vor.u32 %v8184_v35, %v7212_v37  ;;  %v8206_v35 = vld [vmem:[%s12457_s1 + $0x1134] sm:$0xf]  ;;  %v7300_v37 = vld [vmem:[%s12457_s1 + $0x1138] sm:$0xf0] }
 0x235   :  { %4727 = vmatpush.bf16.msrb.mxu1 %v7111_v33  ;;  %v7335_v33 = vor.u32 %v8214_v46, %v7332_v44  ;;  %v7364_v44 = vld [vmem:[%s12457_s1 + $0x11b8] sm:$0xf0]  ;;  %v7303_v59 = vor.u32 %v8206_v35, %v7300_v37 }
 0x236   :  { %4740 = vmatpush.bf16.msrb.mxu2 %v7175_v23  ;;  %v7399_v23 = vor.u32 %v8230_v31, %v7396_v26  ;;  %v8238_v31 = vld [vmem:[%s12457_s1 + $0x1234] sm:$0xf]  ;;  %v7428_v20 = vld [vmem:[%s12457_s1 + $0x1238] sm:$0xf0]  ;;  %v7367_v38 = vor.u32 %v8222_v18, %v7364_v44  ;;  %v7578_v44 = vld [vmem:[%s12460_s3 + $0x60] sm:$0xf] }
 0x237   :  { %4753 = vmatpush.bf16.msrb.mxu3 %v7239_v30  ;;  %v8228_v30 = vld [vmem:[%s12457_s1 + $0x11e4] sm:$0xf]  ;;  %v7492_v26 = vld [vmem:[%s12457_s1 + $0x12b8] sm:$0xf0] }
 0x238   :  { %4715 = vmatpush.bf16.msrb.mxu0 %v7039_v47  ;;  %v7391_v21 = vor.u32 %v8228_v30, %v7388_v3  ;;  %v8210_v47 = vld [vmem:[%s12457_s1 + $0x1154] sm:$0xf]  ;;  %v7484_v3 = vld [vmem:[%s12457_s1 + $0x12a8] sm:$0xf0] }
 0x239   :  { %4728 = vmatpush.bf16.msrb.mxu1 %v7103_v27  ;;  %v8226_v27 = vld [vmem:[%s12457_s1 + $0x11d4] sm:$0xf]  ;;  %v7319_v10 = vor.u32 %v8210_v47, %v7316_v48  ;;  %v7284_v47 = vld [vmem:[%s12457_s1 + $0x1118] sm:$0xf0] }
 0x23a   :  { %4741 = vmatpush.bf16.msrb.mxu2 %v7167_v61  ;;  %v7519_v61 = vor.u32 %v8260_v55, %v7516_v12  ;;  %v7383_v51 = vor.u32 %v8226_v27, %v7380_v17  ;;  %v8218_v48 = vld [vmem:[%s12457_s1 + $0x1194] sm:$0xf] }
 0x23b   :  { %4754 = vmatpush.bf16.msrb.mxu3 %v7231_v5  ;;  %v7508_v5 = vld [vmem:[%s12457_s1 + $0x12d8] sm:$0xf0]  ;;  %v8234_v17 = vld [vmem:[%s12457_s1 + $0x1214] sm:$0xf] }
 0x23c   :  { %4716 = vmatpush.bf16.msrb.mxu0 %v7031_v53  ;;  %v8240_v53 = vld [vmem:[%s12457_s1 + $0x1244] sm:$0xf] }
 0x23d   :  { %4729 = vmatpush.bf16.msrb.mxu1 %v7095_v36  ;;  %v8256_v36 = vld [vmem:[%s12457_s1 + $0x12c4] sm:$0xf]  ;;  %v7439_v15 = vor.u32 %v8240_v53, %v7436_v24  ;;  %v7404_v53 = vld [vmem:[%s12457_s1 + $0x1208] sm:$0xf0] }
 0x23e   :  { %4742 = vmatpush.bf16.msrb.mxu2 %v7159_v28  ;;  %v7500_v28 = vld [vmem:[%s12457_s1 + $0x12c8] sm:$0xf0]  ;;  %v8248_v24 = vld [vmem:[%s12457_s1 + $0x1284] sm:$0xf] }
 0x23f   :  { %4755 = vmatpush.bf16.msrb.mxu3 %v7223_v58  ;;  %v7375_v58 = vor.u32 %v8224_v60, %v7372_v41  ;;  %v7340_v60 = vld [vmem:[%s12457_s1 + $0x1188] sm:$0xf0]  ;;  %v8232_v41 = vld [vmem:[%s12457_s1 + $0x1204] sm:$0xf] }
 0x240   :  { %4717 = vmatpush.bf16.msrb.mxu0 %v7023_v39  ;;  %v4511_v52 = vpop.f32.mrf.mxu0  ;;  %v8254_v39 = vld [vmem:[%s12457_s1 + $0x12b4] sm:$0xf]  ;;  %v7407_v37 = vor.u32 %v8232_v41, %v7404_v53  ;;  %v8265_v41 = vld [vmem:[%s12460_s3 + $0x4] sm:$0xf0]  ;;  %v8264_v53 = vld [vmem:[%s12460_s3 + $0x4] sm:$0xf] }
 0x241   :  { %4730 = vmatpush.bf16.msrb.mxu1 %v7087_v29  ;;  %v4512_v54 = vadd.f32 %v4511_v52, %v11984_v11  ;;  %v4524_v57 = vpop.f32.mrf.mxu1  ;;  %v7503_v11 = vor.u32 %v8256_v36, %v7500_v28  ;;  %v7431_v29 = vor.u32 %v8238_v31, %v7428_v20  ;;  %v7468_v36 = vld [vmem:[%s12457_s1 + $0x1288] sm:$0xf0]  ;;  %v7586_v28 = vld [vmem:[%s12460_s3 + $0x70] sm:$0xf]  ;;  %v8277_v31 = vld [vmem:[%s12460_s3 + $0x64] sm:$0xf0] }
 0x242   :  { %4743 = vmatpush.bf16.msrb.mxu2 %v7151_v19  ;;  %v8204_v19 = vld [vmem:[%s12457_s1 + $0x1124] sm:$0xf]  ;;  %v7471_v18 = vor.u32 %v8248_v24, %v7468_v36  ;;  %v7532_v24 = vld [vmem:[%s12460_s3 + $0x8] sm:$0xf0] }
 0x243   :  { %4756 = vmatpush.bf16.msrb.mxu3 %v7215_v62  ;;  %4718 = vmatmul.bf16.vlgmr.msrb.gmra.mxu0 %v10054_v34  ;;  %v8258_v34 = vld [vmem:[%s12457_s1 + $0x12d4] sm:$0xf]  ;;  %v4525_v46 = vadd.f32 %v4524_v57, %v4512_v54  ;;  %v7495_v62 = vor.u32 %v8254_v39, %v7492_v26  ;;  %v7295_v7 = vor.u32 %v8204_v19, %v7292_v9  ;;  %v8279_v54 = vld [vmem:[%s12460_s3 + $0x74] sm:$0xf0]  ;;  %v8276_v20 = vld [vmem:[%s12460_s3 + $0x64] sm:$0xf] }
 0x244   :  { %4762 = vmatpush.bf16.msra.mxu0 %v7335_v33  ;;  %4731 = vmatmul.bf16.vlgmr.msrb.gmra.mxu1 %v10064_v43  ;;  %v8208_v43 = vld [vmem:[%s12457_s1 + $0x1144] sm:$0xf]  ;;  %v7580_v39 = vld [vmem:[%s12460_s3 + $0x68] sm:$0xf0]  ;;  %v7579_v26 = vor.u32 %v8277_v31, %v7578_v44  ;;  %v8274_v19 = vld [vmem:[%s12460_s3 + $0x54] sm:$0xf] }
 0x245   :  { %4775 = vmatpush.bf16.msra.mxu1 %v7399_v23  ;;  %4744 = vmatmul.bf16.vlgmr.msrb.gmra.mxu2 %v10256_v0  ;;  %v7308_v0 = vld [vmem:[%s12457_s1 + $0x1148] sm:$0xf0] }
 0x246   :  { %4788 = vmatpush.bf16.msra.mxu2 %v7463_v42  ;;  %4757 = vmatmul.bf16.vlgmr.msrb.gmra.mxu3 %v10269_v6  ;;  %v7511_v6 = vor.u32 %v8258_v34, %v7508_v5  ;;  %v7311_v56 = vor.u32 %v8208_v43, %v7308_v0  ;;  %v7356_v23 = vld [vmem:[%s12457_s1 + $0x11a8] sm:$0xf0]  ;;  %v8236_v42 = vld [vmem:[%s12457_s1 + $0x1224] sm:$0xf]  ;;  %v7476_v34 = vld [vmem:[%s12457_s1 + $0x1298] sm:$0xf0] }
 0x247   :  { %4801 = vmatpush.bf16.msra.mxu3 %v7527_v2  ;;  %v8252_v2 = vld [vmem:[%s12457_s1 + $0x12a4] sm:$0xf]  ;;  %v7276_v43 = vld [vmem:[%s12457_s1 + $0x1108] sm:$0xf0] }
 0x248   :  { %4763 = vmatpush.bf16.msra.mxu0 %v7327_v40  ;;  %v4537_v33 = vpop.f32.mrf.mxu2  ;;  %v4513_v49 = vpop.f32.mrf.mxu0  ;;  %v7359_v40 = vor.u32 %v8220_v22, %v7356_v23  ;;  %v7487_v27 = vor.u32 %v8252_v2, %v7484_v3  ;;  %v8216_v0 = vld [vmem:[%s12457_s1 + $0x1184] sm:$0xf]  ;;  %v8271_v2 = vld [vmem:[%s12460_s3 + $0x34] sm:$0xf0] }
 0x249   :  { %4776 = vmatpush.bf16.msra.mxu1 %v7391_v21  ;;  %v4538_v1 = vadd.f32 %v4537_v33, %v4525_v46  ;;  %v4550_v30 = vpop.f32.mrf.mxu3  ;;  %v4526_v55 = vpop.f32.mrf.mxu1  ;;  %v7423_v21 = vor.u32 %v8236_v42, %v7420_v45  ;;  %v7343_v35 = vor.u32 %v8216_v0, %v7340_v60  ;;  %v8270_v49 = vld [vmem:[%s12460_s3 + $0x34] sm:$0xf] }
 0x24a   :  { %4789 = vmatpush.bf16.msra.mxu2 %v7455_v32  ;;  %v8202_v32 = vld [vmem:[%s12457_s1 + $0x1114] sm:$0xf] }
 0x24b   :  { %4802 = vmatpush.bf16.msra.mxu3 %v7519_v61  ;;  %v12183_v12 = vadd.f32 %v4550_v30, %v4538_v1  ;;  %v7348_v61 = vld [vmem:[%s12457_s1 + $0x1198] sm:$0xf0]  ;;  %v7287_v5 = vor.u32 %v8202_v32, %v7284_v47  ;;  %v7554_v30 = vld [vmem:[%s12460_s3 + $0x30] sm:$0xf]  ;;  %v8268_v47 = vld [vmem:[%s12460_s3 + $0x24] sm:$0xf] }
 0x24c   :  { %4764 = vmatpush.bf16.msra.mxu0 %v7319_v10  ;;  %v8200_v10 = vld [vmem:[%s12457_s1 + $0x1104] sm:$0xf]  ;;  %v7555_v55 = vor.u32 %v8271_v2, %v7554_v30 }
 0x24d   :  { %4777 = vmatpush.bf16.msra.mxu1 %v7383_v51  ;;  %v7351_v51 = vor.u32 %v8218_v48, %v7348_v61  ;;  %v7279_v57 = vor.u32 %v8200_v10, %v7276_v43  ;;  %v7548_v48 = vld [vmem:[%s12460_s3 + $0x28] sm:$0xf0]  ;;  %v7538_v10 = vld [vmem:[%s12460_s3 + $0x10] sm:$0xf]  ;;  %v7540_v43 = vld [vmem:[%s12460_s3 + $0x18] sm:$0xf0] }
 0x24e   :  { %4790 = vmatpush.bf16.msra.mxu2 %v7447_v13  ;;  %v7415_v13 = vor.u32 %v8234_v17, %v7412_v50 }
 0x24f   :  { %4803 = vmatpush.bf16.msra.mxu3 %v7511_v6  ;;  %v7479_v6 = vor.u32 %v8250_v16, %v7476_v34 }
 0x250   :  { %4765 = vmatpush.bf16.msra.mxu0 %v7311_v56  ;;  %v4539_v52 = vpop.f32.mrf.mxu2 }
 0x251   :  { %4778 = vmatpush.bf16.msra.mxu1 %v7375_v58  ;;  %v4552_v56 = vpop.f32.mrf.mxu3  ;;  %v8278_v58 = vld [vmem:[%s12460_s3 + $0x74] sm:$0xf] }
 0x252   :  { %4791 = vmatpush.bf16.msra.mxu2 %v7439_v15  ;;  %v7588_v15 = vld [vmem:[%s12460_s3 + $0x78] sm:$0xf0]  ;;  %v7535_v56 = vor.u32 %v8264_v53, %v7532_v24  ;;  %v7612_v24 = vld [vmem:[%s12460_s3 + $0xa8] sm:$0xf0] }
 0x253   :  { %4804 = vmatpush.bf16.msra.mxu3 %v7503_v11  ;;  %v7587_v11 = vor.u32 %v8279_v54, %v7586_v28  ;;  %v7591_v46 = vor.u32 %v8278_v58, %v7588_v15  ;;  %v4814_v54 = vmul.f32 %v11343_v25, %v11343_v25 }
 0x254   :  { %4766 = vmatpush.bf16.msra.mxu0 %v7303_v59  ;;  %v7583_v59 = vor.u32 %v8276_v20, %v7580_v39 }
 0x255   :  { %4779 = vmatpush.bf16.msra.mxu1 %v7367_v38  ;;  %v7570_v38 = vld [vmem:[%s12460_s3 + $0x50] sm:$0xf] }
 0x256   :  { %4792 = vmatpush.bf16.msra.mxu2 %v7431_v29  ;;  %v8275_v29 = vld [vmem:[%s12460_s3 + $0x54] sm:$0xf0] }
 0x257   :  { %4805 = vmatpush.bf16.msra.mxu3 %v7495_v62  ;;  %v7571_v9 = vor.u32 %v8275_v29, %v7570_v38  ;;  %v8272_v62 = vld [vmem:[%s12460_s3 + $0x44] sm:$0xf] }
 0x258   :  { %4767 = vmatpush.bf16.msra.mxu0 %v7295_v7  ;;  %v7556_v7 = vld [vmem:[%s12460_s3 + $0x38] sm:$0xf0] }
 0x259   :  { %4780 = vmatpush.bf16.msra.mxu1 %v7359_v40  ;;  %v7546_v40 = vld [vmem:[%s12460_s3 + $0x20] sm:$0xf] }
 0x25a   :  { %4793 = vmatpush.bf16.msra.mxu2 %v7423_v21  ;;  %v8269_v21 = vld [vmem:[%s12460_s3 + $0x24] sm:$0xf0] }
 0x25b   :  { %4806 = vmatpush.bf16.msra.mxu3 %v7487_v27  ;;  %v7547_v50 = vor.u32 %v8269_v21, %v7546_v40  ;;  %v7636_v40 = vld [vmem:[%s12460_s3 + $0xd8] sm:$0xf0] }
 0x25c   :  { %4768 = vmatpush.bf16.msra.mxu0 %v7287_v5  ;;  %v7551_v5 = vor.u32 %v8268_v47, %v7548_v48  ;;  %v7626_v47 = vld [vmem:[%s12460_s3 + $0xc0] sm:$0xf]  ;;  %v8289_v48 = vld [vmem:[%s12460_s3 + $0xc4] sm:$0xf0] }
 0x25d   :  { %4781 = vmatpush.bf16.msra.mxu1 %v7351_v51  ;;  %v8267_v51 = vld [vmem:[%s12460_s3 + $0x14] sm:$0xf0] }
 0x25e   :  { %4794 = vmatpush.bf16.msra.mxu2 %v7415_v13  ;;  %v8266_v13 = vld [vmem:[%s12460_s3 + $0x14] sm:$0xf]  ;;  %v7539_v0 = vor.u32 %v8267_v51, %v7538_v10  ;;  %v7620_v51 = vld [vmem:[%s12460_s3 + $0xb8] sm:$0xf0] }
 0x25f   :  { %4807 = vmatpush.bf16.msra.mxu3 %v7479_v6  ;;  %v7543_v60 = vor.u32 %v8266_v13, %v7540_v43  ;;  %v7530_v6 = vld [vmem:[%s12460_s3] sm:$0xf] }
 0x260   :  { %4769 = vmatpush.bf16.msra.mxu0 %v7279_v57  ;;  %v4563_v33 = vpop.f32.mrf.mxu0  ;;  %v7531_v28 = vor.u32 %v8265_v41, %v7530_v6  ;;  %v4816_v57 = vpack.c.bf16 %v4814_v54, %v4814_v54  ;;  %v8284_v6 = vld [vmem:[%s12460_s3 + $0xa4] sm:$0xf]  ;;  %v8282_v54 = vld [vmem:[%s12460_s3 + $0x94] sm:$0xf] }
 0x261   :  { %4782 = vmatpush.bf16.msra.mxu1 %v7343_v35  ;;  %v4564_v23 = vadd.f32 %v4563_v33, %v12183_v12  ;;  %v4576_v45 = vpop.f32.mrf.mxu1  ;;  %v7559_v12 = vor.u32 %v8270_v49, %v7556_v7  ;;  %v7642_v33 = vld [vmem:[%s12460_s3 + $0xe0] sm:$0xf]  ;;  %v8291_v49 = vld [vmem:[%s12460_s3 + $0xd4] sm:$0xf0]  ;;  %v8290_v7 = vld [vmem:[%s12460_s3 + $0xd4] sm:$0xf] }
 0x262   :  { %4795 = vmatpush.bf16.msra.mxu2 %v7407_v37 }
 0x263   :  { %4808 = vmatpush.bf16.msra.mxu3 %v7471_v18  ;;  %4770 = vmatmul.bf16.vlgmr.msra.gmra.mxu0 %v10267_v4  ;;  %v7572_v4 = vld [vmem:[%s12460_s3 + $0x58] sm:$0xf0]  ;;  %v4577_v3 = vadd.f32 %v4576_v45, %v4564_v23  ;;  %v8293_v23 = vld [vmem:[%s12460_s3 + $0xe4] sm:$0xf0]  ;;  %v8292_v45 = vld [vmem:[%s12460_s3 + $0xe4] sm:$0xf] }
 0x264   :  { %5016 = vmatpush.bf16.msrb.mxu0 %v7587_v11  ;;  %4783 = vmatmul.bf16.vlgmr.msra.gmra.mxu1 %v10277_v14  ;;  %v7575_v22 = vor.u32 %v8274_v19, %v7572_v4  ;;  %v7562_v14 = vld [vmem:[%s12460_s3 + $0x40] sm:$0xf]  ;;  %v7643_v30 = vor.u32 %v8293_v23, %v7642_v33 }
 0x265   :  { %4796 = vmatmul.bf16.vlgmr.msra.gmra.mxu2 %v10466_v63  ;;  %v8273_v63 = vld [vmem:[%s12460_s3 + $0x44] sm:$0xf0] }
 0x266   :  { %5042 = vmatpush.bf16.msrb.mxu2 %v7591_v46  ;;  %4809 = vmatmul.bf16.vlgmr.msra.gmra.mxu3 %v10477_v8  ;;  %v7564_v8 = vld [vmem:[%s12460_s3 + $0x48] sm:$0xf0]  ;;  %v7563_v42 = vor.u32 %v8273_v63, %v7562_v14  ;;  %v8294_v14 = vld [vmem:[%s12460_s3 + $0xf4] sm:$0xf] }
 0x267   :  { %v7567_v1 = vor.u32 %v8272_v62, %v7564_v8  ;;  %v7652_v8 = vld [vmem:[%s12460_s3 + $0xf8] sm:$0xf0] }
 0x268   :  { %5017 = vmatpush.bf16.msrb.mxu0 %v7579_v26  ;;  %v4589_v32 = vpop.f32.mrf.mxu2  ;;  %v4565_v17 = vpop.f32.mrf.mxu0 }
 0x269   :  { %v4590_v27 = vadd.f32 %v4589_v32, %v4577_v3  ;;  %v4602_v61 = vpop.f32.mrf.mxu3  ;;  %v4578_v16 = vpop.f32.mrf.mxu1  ;;  %v7634_v3 = vld [vmem:[%s12460_s3 + $0xd0] sm:$0xf]  ;;  %v7639_v32 = vor.u32 %v8290_v7, %v7636_v40  ;;  %v7627_v17 = vor.u32 %v8289_v48, %v7626_v47  ;;  %v4850_v48 = vld [vmem:[%s12461_s4] sm:$0x3] }
 0x26a   :  { %5043 = vmatpush.bf16.msrb.mxu2 %v7583_v59  ;;  %v7618_v16 = vld [vmem:[%s12460_s3 + $0xb0] sm:$0xf] }
 0x26b   :  { %v4603_v34 = vadd.f32 %v4602_v61, %v4590_v27  ;;  %v8288_v27 = vld [vmem:[%s12460_s3 + $0xc4] sm:$0xf]  ;;  %v7628_v61 = vld [vmem:[%s12460_s3 + $0xc8] sm:$0xf0] }
 0x26c   :  { %5018 = vmatpush.bf16.msrb.mxu0 %v7571_v9  ;;  %v7650_v9 = vld [vmem:[%s12460_s3 + $0xf0] sm:$0xf] }
 0x26e   :  { %5044 = vmatpush.bf16.msrb.mxu2 %v7575_v22  ;;  %v8295_v22 = vld [vmem:[%s12460_s3 + $0xf4] sm:$0xf0] }
 0x26f   :  { %v7651_v62 = vor.u32 %v8295_v22, %v7650_v9 }
 0x270   :  { %5019 = vmatpush.bf16.msrb.mxu0 %v7563_v42  ;;  %v4591_v52 = vpop.f32.mrf.mxu2  ;;  %v7655_v42 = vor.u32 %v8294_v14, %v7652_v8 }
 0x271   :  { %v4604_v36 = vpop.f32.mrf.mxu3  ;;  %5029 = vmatpush.bf16.msrb.mxu1 %v7651_v62  ;;  %v7615_v52 = vor.u32 %v8284_v6, %v7612_v24 }
 0x272   :  { %5045 = vmatpush.bf16.msrb.mxu2 %v7567_v1  ;;  %v7644_v1 = vld [vmem:[%s12460_s3 + $0xe8] sm:$0xf0]  ;;  %5055 = vmatpush.bf16.msrb.mxu3 %v7655_v42  ;;  %v7602_v36 = vld [vmem:[%s12460_s3 + $0x90] sm:$0xf] }
 0x273   :  { %v7647_v2 = vor.u32 %v8292_v45, %v7644_v1 }
 0x274   :  { %5020 = vmatpush.bf16.msrb.mxu0 %v7555_v55 }
 0x275   :  { %5030 = vmatpush.bf16.msrb.mxu1 %v7643_v30 }
 0x276   :  { %5046 = vmatpush.bf16.msrb.mxu2 %v7559_v12  ;;  %v7635_v12 = vor.u32 %v8291_v49, %v7634_v3  ;;  %5056 = vmatpush.bf16.msrb.mxu3 %v7647_v2 }
 0x278   :  { %5021 = vmatpush.bf16.msrb.mxu0 %v7547_v50  ;;  %v7631_v50 = vor.u32 %v8288_v27, %v7628_v61  ;;  %v4852_v27 = vperm.slane %v4850_v48, 0 }
 0x279   :  { %5031 = vmatpush.bf16.msrb.mxu1 %v7635_v12 }
 0x27a   :  { %5047 = vmatpush.bf16.msrb.mxu2 %v7551_v5  ;;  %5057 = vmatpush.bf16.msrb.mxu3 %v7639_v32  ;;  %v8286_v5 = vld [vmem:[%s12460_s3 + $0xb4] sm:$0xf] }
 0x27b   :  { %v7623_v13 = vor.u32 %v8286_v5, %v7620_v51 }
 0x27c   :  { %5022 = vmatpush.bf16.msrb.mxu0 %v7539_v0  ;;  %v7610_v0 = vld [vmem:[%s12460_s3 + $0xa0] sm:$0xf] }
 0x27d   :  { %5032 = vmatpush.bf16.msrb.mxu1 %v7627_v17 }
 0x27e   :  { %5048 = vmatpush.bf16.msrb.mxu2 %v7543_v60  ;;  %5058 = vmatpush.bf16.msrb.mxu3 %v7631_v50  ;;  %v8285_v60 = vld [vmem:[%s12460_s3 + $0xa4] sm:$0xf0]  ;;  %v4853_v50 = vperm.slane %v4850_v48, 1 }
 0x27f   :  { %v7611_v53 = vor.u32 %v8285_v60, %v7610_v0 }
 0x280   :  { %5023 = vmatpush.bf16.msrb.mxu0 %v7531_v28  ;;  %v4615_v58 = vpop.f32.mrf.mxu0  ;;  %v8283_v28 = vld [vmem:[%s12460_s3 + $0x94] sm:$0xf0] }
 0x281   :  { %v4616_v15 = vadd.f32 %v4615_v58, %v4603_v34  ;;  %v4628_v35 = vpop.f32.mrf.mxu1  ;;  %v8287_v34 = vld [vmem:[%s12460_s3 + $0xb4] sm:$0xf0] }
 0x282   :  { %5049 = vmatpush.bf16.msrb.mxu2 %v7535_v56  ;;  %v7619_v10 = vor.u32 %v8287_v34, %v7618_v16  ;;  %5059 = vmatpush.bf16.msrb.mxu3 %v7623_v13  ;;  %v7603_v56 = vor.u32 %v8283_v28, %v7602_v36 }
 0x283   :  { %5024 = vmatmul.bf16.vlgmr.msrb.gmra.mxu0 %v4816_v57  ;;  %v4629_v37 = vadd.f32 %v4628_v35, %v4616_v15 }
 0x284   :  { %5033 = vmatpush.bf16.msrb.mxu1 %v7619_v10 }
 0x285   :  { %5050 = vmatmul.bf16.vlgmr.msrb.gmra.mxu2 %v4816_v57  ;;  %v7604_v57 = vld [vmem:[%s12460_s3 + $0x98] sm:$0xf0] }
 0x286   :  { %5060 = vmatpush.bf16.msrb.mxu3 %v7615_v52  ;;  %v7607_v58 = vor.u32 %v8282_v54, %v7604_v57 }
 0x288   :  { %v4641_v18 = vpop.f32.mrf.mxu2  ;;  %v4617_v44 = vpop.f32.mrf.mxu0  ;;  %5034 = vmatpush.bf16.msrb.mxu1 %v7611_v53 }
 0x289   :  { %v4642_v11 = vadd.f32 %v4641_v18, %v4629_v37  ;;  %v4654_v46 = vpop.f32.mrf.mxu3  ;;  %v4630_v31 = vpop.f32.mrf.mxu1  ;;  %v8280_v44 = vld [vmem:[%s12460_s3 + $0x84] sm:$0xf] }
 0x28a   :  { %5061 = vmatpush.bf16.msrb.mxu3 %v7607_v58 }
 0x28b   :  { %v12336_v20 = vadd.f32 %v4654_v46, %v4642_v11  ;;  %v7594_v11 = vld [vmem:[%s12460_s3 + $0x80] sm:$0xf]  ;;  %v8281_v46 = vld [vmem:[%s12460_s3 + $0x84] sm:$0xf0] }
 0x28c   :  { %5035 = vmatpush.bf16.msrb.mxu1 %v7603_v56 }
 0x290   :  { %v4643_v39 = vpop.f32.mrf.mxu2 }
 0x291   :  { %v4656_v26 = vpop.f32.mrf.mxu3  ;;  %v7595_v39 = vor.u32 %v8281_v46, %v7594_v11 }
 0x293   :  { %5036 = vmatpush.bf16.msrb.mxu1 %v7595_v39 }
 0x2a0   :  { %v12338_v59 = vpop.f32.mrf.mxu0 }
 0x2a1   :  { %v12340_v38 = vpop.f32.mrf.mxu1  ;;  %v4668_v15 = vadd.f32 %v12338_v59, %v12336_v20  ;;  %v7596_v20 = vld [vmem:[%s12460_s3 + $0x88] sm:$0xf0] }
 0x2a2   :  { %v7599_v26 = vor.u32 %v8280_v44, %v7596_v20 }
 0x2a3   :  { %v4681_v59 = vadd.f32 %v12340_v38, %v4668_v15 }
 0x2a4   :  { %5062 = vmatpush.bf16.msrb.mxu3 %v7599_v26 }
 0x2a8   :  { %v12342_v29 = vpop.f32.mrf.mxu2  ;;  %v4669_v4 = vpop.f32.mrf.mxu0 }
 0x2a9   :  { %v12344_v19 = vpop.f32.mrf.mxu3  ;;  %v4682_v63 = vpop.f32.mrf.mxu1  ;;  %v4694_v4 = vadd.f32 %v12342_v29, %v4681_v59 }
 0x2ab   :  { %v4707_v14 = vadd.f32 %v12344_v19, %v4694_v4 }
 0x2b0   :  { %v4695_v55 = vpop.f32.mrf.mxu2 }
 0x2b1   :  { %v4708_v21 = vpop.f32.mrf.mxu3 }
 0x2c0   :  { %v4719_v43 = vpop.f32.mrf.mxu0 }
 0x2c1   :  { %v4732_v41 = vpop.f32.mrf.mxu1  ;;  %v4720_v63 = vadd.f32 %v4719_v43, %v4707_v14 }
 0x2c3   :  { %v4733_v62 = vadd.f32 %v4732_v41, %v4720_v63 }
 0x2c8   :  { %v4745_v35 = vpop.f32.mrf.mxu2  ;;  %v4721_v18 = vpop.f32.mrf.mxu0 }
 0x2c9   :  { %v4758_v37 = vpop.f32.mrf.mxu3  ;;  %v4734_v31 = vpop.f32.mrf.mxu1  ;;  %v4746_v8 = vadd.f32 %v4745_v35, %v4733_v62 }
 0x2cb   :  { %v4759_v33 = vadd.f32 %v4758_v37, %v4746_v8 }
 0x2d0   :  { %v4747_v9 = vpop.f32.mrf.mxu2 }
 0x2d1   :  { %v4760_v22 = vpop.f32.mrf.mxu3 }
 0x2e0   :  { %v4771_v23 = vpop.f32.mrf.mxu0 }
 0x2e1   :  { %v4784_v42 = vpop.f32.mrf.mxu1  ;;  %v4772_v45 = vadd.f32 %v4771_v23, %v4759_v33 }
 0x2e3   :  { %v4785_v1 = vadd.f32 %v4784_v42, %v4772_v45 }
 0x2e8   :  { %v4797_v30 = vpop.f32.mrf.mxu2  ;;  %v4773_v38 = vpop.f32.mrf.mxu0 }
 0x2e9   :  { %v4798_v2 = vadd.f32 %v4797_v30, %v4785_v1  ;;  %v4810_v3 = vpop.f32.mrf.mxu3  ;;  %v4786_v49 = vpop.f32.mrf.mxu1 }
 0x2eb   :  { %v4811_v7 = vadd.f32 %v4810_v3, %v4798_v2 }
 0x2ed   :  { %v4815_v55 = vmul.f32 %v4811_v7, %v4811_v7 }
 0x2ef   :  { %v4817_v29 = vpack.c.bf16 %v4815_v55, %v4815_v55 }
 0x2f0   :  { %v4799_v12 = vpop.f32.mrf.mxu2 }
 0x2f1   :  { %v4812_v40 = vpop.f32.mrf.mxu3  ;;  %5037 = vmatmul.bf16.vlgmr.msrb.gmra.mxu1 %v4817_v29  ;;  %5063 = vmatmul.bf16.vlgmr.msrb.gmra.mxu3 %v4817_v29 }
 0x300   :  { %v5025_v19 = vpop.f32.mrf.mxu0 }
 0x301   :  { %v5026_v61 = vadd.f32 %v5025_v19, %v4852_v27 }
 0x308   :  { %v5051_v21 = vpop.f32.mrf.mxu2  ;;  %v5027_v32 = vpop.f32.mrf.mxu0 }
 0x309   :  { %v5052_v34 = vadd.f32 %v5051_v21, %v4853_v50 }
 0x310   :  { %v5053_v47 = vpop.f32.mrf.mxu2 }
 0x36e   :  { %v5038_v17 = vpop.f32.mrf.mxu1 }
 0x36f   :  { %v5039_v16 = vadd.f32 %v5038_v17, %v5026_v61 }
 0x371   :  { %8296 = vrsqrt.f32 %v5039_v16  ;;  %vm5074_vm1 = vweird.f32 %v5039_v16 }
 0x374   :  { %v5064_v5 = vpop.f32.mrf.mxu3 }
 0x375   :  { %v5065_v10 = vadd.f32 %v5064_v5, %v5052_v34 }
 0x376   :  { %v5040_v51 = vpop.f32.mrf.mxu1 }
 0x377   :  { %v8297_v13 = vpop.eup %8296  ;;  %8298 = vrsqrt.f32 %v5065_v10  ;;  %vm5084_vm4 = vweird.f32 %v5065_v10 }
 0x378   :  { %v5069_v43 = vmul.f32 %v8297_v13, %v5039_v16  ;;  %vm5075_vm0 = vweird.f32 %v8297_v13 }
 0x379   :  { %vm5076_vm2 = vmor %vm5074_vm1, %vm5075_vm0 }
 0x37a   :  { %v5070_v0 = vmul.f32 %v8297_v13, %v5069_v43 }
 0x37c   :  { %v5071_v60 = vmul.f32 0.5, %v5070_v0  ;;  %v5066_v6 = vpop.f32.mrf.mxu3 }
 0x37d   :  { %v8299_v41 = vpop.eup %8298 }
 0x37e   :  { %v5072_v53 = vsub.f32 1.5, %v5071_v60  ;;  %v5079_v24 = vmul.f32 %v8299_v41, %v5065_v10  ;;  %vm5085_vm3 = vweird.f32 %v8299_v41 }
 0x37f   :  { %vm5086_vm5 = vmor %vm5084_vm4, %vm5085_vm3 }
 0x380   :  { %v5073_v52 = vmul.f32 %v8297_v13, %v5072_v53  ;;  %v5080_v36 = vmul.f32 %v8299_v41, %v5079_v24 }
 0x382   :  { %v5077_v28 = vsel %vm5076_vm2, %v8297_v13, %v5073_v52  ;;  %v5081_v54 = vmul.f32 0.5, %v5080_v36 }
 0x383   :  { %v5088_v56 = vmul.f32 %v5077_v28, %v11343_v25 }
 0x384   :  { %v5082_v57 = vsub.f32 1.5, %v5081_v54 }
 0x385   :  { %5090 = vst [vmem:[%s12462_s5] sm:$0xff] %v5088_v56 }
 0x386   :  { %v5083_v58 = vmul.f32 %v8299_v41, %v5082_v57 }
 0x388   :  { %v5087_v15 = vsel %vm5086_vm5, %v8299_v41, %v5083_v58 }
 0x389   :  { %v5089_v35 = vmul.f32 %v5087_v15, %v4811_v7 }
 0x38b   :  { %5091 = vst [vmem:[%s12462_s5 + $0x8] sm:$0xff] %v5089_v35 }

</bundles_post_ra>
